<compile_context>
chip_gen: v7x
topology: tpu7x:2x2x1
jax: 0.10.0
libtpu: 0.0.40
codegen_flags: <defaults>
</compile_context>

<pallas_src>
import functools
import math

import jax
import jax.numpy as jnp
from jax.experimental import pallas as pl
from jax.experimental.pallas import tpu as pltpu


def _gnn_kernel(minprob, maxprob,
                x_ref, adj_ref, unif_ref,
                wr1_ref, wo1_ref, b1_ref,
                wr2_ref, wo2_ref, b2_ref,
                wr3_ref, wo3_ref, b3_ref,
                wfc_ref, bfc_ref,
                u_ref, p_ref):
    x = x_ref[...]                        # (BB, N, Fin) f32
    adj = adj_ref[...]                    # (BB, N, N)   f32
    BB, N, _ = x.shape
    H = wr1_ref.shape[1]

    # Row-normalize the adjacency once: (adj @ h) / deg == (adj / deg) @ h.
    # The reciprocal goes to the EUP (approx); the divide becomes a multiply.
    deg = jnp.maximum(jnp.sum(adj, axis=-1, keepdims=True), 1.0)   # (BB, N, 1)
    adj_n = adj * pl.reciprocal(deg, approx=True)                  # (BB, N, N)

    def sage_sigmoid(h, wr_ref, wo_ref, b_ref, keep_bf16):
        """DenseSAGEConv(normalize=False) + sigmoid on one batch tile."""
        F = h.shape[-1]
        # ---- aggregation: agg = adj_n @ h --------------------------------
        if N <= 32:
            # Tiny graphs: a batched (N,N)x(N,F) einsum degenerates into BB
            # under-filled K=N MXU pushes; do the same FLOPs on the VPU with
            # a statically unrolled j-loop.
            hf = h.astype(jnp.float32)
            agg = adj_n[:, :, 0:1] * hf[:, 0:1, :]
            for j in range(1, N):
                agg = agg + adj_n[:, :, j:j + 1] * hf[:, j:j + 1, :]
        else:
            agg = jnp.einsum('bij,bjf->bif',
                             adj_n.astype(jnp.bfloat16),
                             h.astype(jnp.bfloat16),
                             preferred_element_type=jnp.float32)
        # ---- lin_rel(agg) + lin_root(h) + rel bias (two bf16 MXU matmuls,
        #      no (BB,N,2F) concat copy; f32 accumulation) ------------------
        agg_flat = agg.reshape(BB * N, F).astype(jnp.bfloat16)
        h_flat = h.astype(jnp.bfloat16).reshape(BB * N, F)
        out = (jnp.dot(agg_flat, wr_ref[...], preferred_element_type=jnp.float32)
               + jnp.dot(h_flat, wo_ref[...], preferred_element_type=jnp.float32)
               + b_ref[...])                                       # (BB*N, H)
        act = jax.nn.sigmoid(out)                                  # f32
        if keep_bf16:
            act = act.astype(jnp.bfloat16)      # halve inter-layer traffic
        return act.reshape(BB, N, H)

    h = sage_sigmoid(x, wr1_ref, wo1_ref, b1_ref, keep_bf16=True)
    h = sage_sigmoid(h, wr2_ref, wo2_ref, b2_ref, keep_bf16=True)
    h = sage_sigmoid(h, wr3_ref, wo3_ref, b3_ref, keep_bf16=False)  # f32 head

    # fc1 head (output width 1): VPU multiply + lane reduction; scalar bias
    # read from SMEM.
    wfc = wfc_ref[...].reshape(1, 1, H)                            # f32
    logits = jnp.sum(h * wfc, axis=-1) + bfc_ref[0, 0]             # (BB, N)
    p = jax.nn.sigmoid(logits) * (maxprob - minprob) + minprob     # (BB, N)
    u = (unif_ref[...] < p).astype(jnp.float32)                    # Bernoulli(p)

    p_ref[...] = p
    u_ref[...] = u


def _ceil_to(v, m):
    return ((v + m - 1) // m) * m


def _pick_tile_and_vmem(B, N, Fin, H):
    """Derive the batch tile BB and an explicit VMEM limit.

    Accounts for lane padding (last dims < 128 pad to 128 lanes in VMEM) and
    BlockSpec double-buffering of every input/output block, plus the in-kernel
    intermediates (adj_n, per-layer activations / aggregation temps).
    """
    sub_n = _ceil_to(N, 8)
    lanes_n = _ceil_to(N, 128)
    lanes_f = _ceil_to(Fin, 128)
    lanes_h = _ceil_to(H, 128)
    per_b = (2 * sub_n * lanes_f * 4          # x block (f32, double-buffered)
             + 2 * sub_n * lanes_n * 4        # adj block (f32, double-buffered)
             + 6 * lanes_n * 4                # unif, u, p blocks (dbl-buffered)
             + sub_n * lanes_n * 4            # adj_n
             + 2 * sub_n * lanes_f * 4        # first-layer aggregation temps
             + 6 * sub_n * lanes_h * 4)       # per-layer activations / temps
    budget = 24 * 1024 * 1024                 # per-tile compute budget
    bb = max(8, (budget // per_b) // 8 * 8)
    bb = min(bb, 512)                         # diminishing returns past ~512 rows
    b_pad8 = _ceil_to(max(B, 1), 8)
    if b_pad8 >= 16:
        # Keep >= 2 grid steps so pipelining hides the adj/feature DMA and the
        # "parallel" batch axis can shard across v7x's two TensorCores.
        bb = min(bb, _ceil_to((b_pad8 + 1) // 2, 8))
    bb = max(8, min(bb, b_pad8))
    bp = _ceil_to(max(B, 1), bb)
    vmem_limit = int(min(48 * 1024 * 1024,
                         max(32 * 1024 * 1024, per_b * bb + 8 * 1024 * 1024)))
    return bb, bp, vmem_limit


def gnn_forward(hs_list, batch_adj, params, *, conv_len, fc_len,
                minprob, maxprob, rng_key):
    # ---- glue: concatenate conv / fc hidden states exactly as torch does ----
    conv_hs = jnp.concatenate([hs_list[i] for i in range(conv_len + 1)], axis=1)
    fc_hs = jnp.concatenate(
        [hs_list[i] for i in range(conv_len + 1, conv_len + fc_len + 1)], axis=1)
    fc_hs = jnp.broadcast_to(fc_hs[:, :, None],
                             (fc_hs.shape[0], fc_hs.shape[1], 64))
    hs0 = jnp.concatenate([conv_hs, fc_hs], axis=1).astype(jnp.float32)  # (B,N,64)

    B, N, Fin = hs0.shape
    H = params["wrel1"].shape[1]
    adj = batch_adj.astype(jnp.float32)

    # Weights in bf16 for the MXU (accumulation, biases, sigmoid stay f32).
    wr1 = params["wrel1"].astype(jnp.bfloat16)
    wo1 = params["wroot1"].astype(jnp.bfloat16)
    wr2 = params["wrel2"].astype(jnp.bfloat16)
    wo2 = params["wroot2"].astype(jnp.bfloat16)
    wr3 = params["wrel3"].astype(jnp.bfloat16)
    wo3 = params["wroot3"].astype(jnp.bfloat16)
    b1 = params["brel1"].astype(jnp.float32)
    b2 = params["brel2"].astype(jnp.float32)
    b3 = params["brel3"].astype(jnp.float32)
    wfc = params["wfc"].reshape(1, H).astype(jnp.float32)          # (1, H)
    bfc = params["bfc"].reshape(1, 1).astype(jnp.float32)          # (1, 1) scalar

    # Batch tile / padding / explicit VMEM limit.
    BB, Bp, vmem_limit = _pick_tile_and_vmem(B, N, Fin, H)

    # Uniform randoms for the Bernoulli draw.
    unif = jax.random.uniform(rng_key, (B, N), dtype=jnp.float32)
    if Bp != B:
        pad = Bp - B
        hs0 = jnp.pad(hs0, ((0, pad), (0, 0), (0, 0)))
        adj = jnp.pad(adj, ((0, pad), (0, 0), (0, 0)))
        unif = jnp.pad(unif, ((0, pad), (0, 0)), constant_values=0.5)

    bm3 = lambda b: (b, 0, 0)
    bm2 = lambda b: (b, 0)
    pm = lambda b: (0, 0)

    kernel = functools.partial(_gnn_kernel, float(minprob), float(maxprob))

    u2, p2 = pl.pallas_call(
        kernel,
        out_shape=(jax.ShapeDtypeStruct((Bp, N), jnp.float32),
                   jax.ShapeDtypeStruct((Bp, N), jnp.float32)),
        grid_spec=pltpu.PrefetchScalarGridSpec(
            num_scalar_prefetch=0,
            grid=(Bp // BB,),
            in_specs=[
                pl.BlockSpec((BB, N, Fin), bm3),     # node features
                pl.BlockSpec((BB, N, N), bm3),       # adjacency
                pl.BlockSpec((BB, N), bm2),          # uniforms
                pl.BlockSpec((Fin, H), pm),          # conv1 W_rel (bf16)
                pl.BlockSpec((Fin, H), pm),          # conv1 W_root (bf16)
                pl.BlockSpec((1, H), pm),            # conv1 rel bias
                pl.BlockSpec((H, H), pm),            # conv2 W_rel
                pl.BlockSpec((H, H), pm),            # conv2 W_root
                pl.BlockSpec((1, H), pm),            # conv2 rel bias
                pl.BlockSpec((H, H), pm),            # conv3 W_rel
                pl.BlockSpec((H, H), pm),            # conv3 W_root
                pl.BlockSpec((1, H), pm),            # conv3 rel bias
                pl.BlockSpec((1, H), pm),            # fc1 W row (f32)
                pl.BlockSpec(memory_space=pltpu.MemorySpace.SMEM),  # fc1 bias
            ],
            out_specs=[
                pl.BlockSpec((BB, N), bm2),          # u
                pl.BlockSpec((BB, N), bm2),          # p
            ],
        ),
        compiler_params=pltpu.CompilerParams(
            dimension_semantics=("parallel",),
            vmem_limit_bytes=vmem_limit),
    )(hs0, adj, unif, wr1, wo1, b1, wr2, wo2, b2, wr3, wo3, b3, wfc, bfc)

    u = u2[:B].reshape(B, N, 1)
    p = p2[:B].reshape(B, N, 1)
    return u, p


def init_params(key, hidden_size):
    """Deterministic parameter init (torch-Linear-style uniform bounds)."""
    def lin(k, fan_in, fan_out):
        bound = 1.0 / (fan_in ** 0.5)
        return jax.random.uniform(k, (fan_in, fan_out), jnp.float32, -bound, bound)

    ks = jax.random.split(key, 12)
    H = hidden_size
    Fin = 8 * 8
    params = {
        "wrel1": lin(ks[0], Fin, H),
        "brel1": lin(ks[1], Fin, H)[:1, :],          # (1, H)
        "wroot1": lin(ks[2], Fin, H),
        "wrel2": lin(ks[3], H, H),
        "brel2": lin(ks[4], H, H)[:1, :],
        "wroot2": lin(ks[5], H, H),
        "wrel3": lin(ks[6], H, H),
        "brel3": lin(ks[7], H, H)[:1, :],
        "wroot3": lin(ks[8], H, H),
        "wfc": lin(ks[9], H, 1),
        "bfc": lin(ks[10], H, 1)[:1, :],             # (1, 1)
    }
    return params


if __name__ == "__main__":
    key = jax.random.PRNGKey(0)
    B = 2
    hidden_size = 32
    conv_len, fc_len = 2, 1
    minprob, maxprob = 0.1, 0.9

    k_hs = jax.random.split(key, 8)
    # conv hidden states: (B, n_i, 64) each; fc hidden state: (B, m)
    hs_list = [jax.random.normal(k_hs[i], (B, 4, 64), dtype=jnp.float32)
               for i in range(conv_len + 1)]
    hs_list.append(jax.random.normal(k_hs[3], (B, 4), dtype=jnp.float32))
    adj_nodes = (conv_len + 1) * 4 + 4               # N = 16

    adj_raw = jax.random.uniform(k_hs[4], (B, adj_nodes, adj_nodes))
    batch_adj = (adj_raw > 0.5).astype(jnp.float32)
    batch_adj = jnp.maximum(batch_adj, jnp.transpose(batch_adj, (0, 2, 1)))

    params = init_params(jax.random.PRNGKey(1), hidden_size)

    u, p = gnn_forward(hs_list, batch_adj, params,
                       conv_len=conv_len, fc_len=fc_len,
                       minprob=minprob, maxprob=maxprob,
                       rng_key=jax.random.PRNGKey(42))
    jax.block_until_ready((u, p))

    assert u.shape == (B, adj_nodes, 1) and p.shape == (B, adj_nodes, 1)
    assert bool(jnp.all((p >= minprob - 1e-5) & (p <= maxprob + 1e-5)))
    assert bool(jnp.all((u == 0.0) | (u == 1.0)))
    print("KERNEL_OK")
</pallas_src>

<mosaic_0001>
module attributes {stable_mosaic.version = 11 : i64} {
  func.func @_gnn_kernel(%arg0: i32, %arg1: memref<8x16x64xf32, #tpu.memory_space<vmem>>, %arg2: memref<8x16x16xf32, #tpu.memory_space<vmem>>, %arg3: memref<8x16xf32, #tpu.memory_space<vmem>>, %arg4: memref<64x32xbf16, #tpu.memory_space<vmem>>, %arg5: memref<64x32xbf16, #tpu.memory_space<vmem>>, %arg6: memref<1x32xf32, #tpu.memory_space<vmem>>, %arg7: memref<32x32xbf16, #tpu.memory_space<vmem>>, %arg8: memref<32x32xbf16, #tpu.memory_space<vmem>>, %arg9: memref<1x32xf32, #tpu.memory_space<vmem>>, %arg10: memref<32x32xbf16, #tpu.memory_space<vmem>>, %arg11: memref<32x32xbf16, #tpu.memory_space<vmem>>, %arg12: memref<1x32xf32, #tpu.memory_space<vmem>>, %arg13: memref<1x32xf32, #tpu.memory_space<vmem>>, %arg14: memref<1x1xf32, #tpu.memory_space<smem>>, %arg15: memref<8x16xf32, #tpu.memory_space<vmem>>, %arg16: memref<8x16xf32, #tpu.memory_space<vmem>>) attributes {dimension_semantics = [#tpu.dimension_semantics<parallel>], iteration_bounds = array<i64: 1>, scalar_prefetch = 0 : i64, scratch_operands = 0 : i64, tpu.core_type = #tpu.core_type<tc>, window_params = [{transform_indices = @transform_0, window_bounds = array<i64: 8, 16, 64>}, {transform_indices = @transform_1, window_bounds = array<i64: 8, 16, 16>}, {transform_indices = @transform_2, window_bounds = array<i64: 8, 16>}, {pipeline_mode = #tpu.pipeline_mode<synchronous>, transform_indices = @transform_3, window_bounds = array<i64: 64, 32>}, {pipeline_mode = #tpu.pipeline_mode<synchronous>, transform_indices = @transform_4, window_bounds = array<i64: 64, 32>}, {pipeline_mode = #tpu.pipeline_mode<synchronous>, transform_indices = @transform_5, window_bounds = array<i64: 1, 32>}, {pipeline_mode = #tpu.pipeline_mode<synchronous>, transform_indices = @transform_6, window_bounds = array<i64: 32, 32>}, {pipeline_mode = #tpu.pipeline_mode<synchronous>, transform_indices = @transform_7, window_bounds = array<i64: 32, 32>}, {pipeline_mode = #tpu.pipeline_mode<synchronous>, transform_indices = @transform_8, window_bounds = array<i64: 1, 32>}, {pipeline_mode = #tpu.pipeline_mode<synchronous>, transform_indices = @transform_9, window_bounds = array<i64: 32, 32>}, {pipeline_mode = #tpu.pipeline_mode<synchronous>, transform_indices = @transform_10, window_bounds = array<i64: 32, 32>}, {pipeline_mode = #tpu.pipeline_mode<synchronous>, transform_indices = @transform_11, window_bounds = array<i64: 1, 32>}, {pipeline_mode = #tpu.pipeline_mode<synchronous>, transform_indices = @transform_12, window_bounds = array<i64: 1, 32>}, {transform_indices = @transform_13, window_bounds = array<i64: 1, 1>}, {transform_indices = @transform_14, window_bounds = array<i64: 8, 16>}, {transform_indices = @transform_15, window_bounds = array<i64: 8, 16>}]} {
    %c0 = arith.constant 0 : index
    %c0_0 = arith.constant 0 : index
    %c0_1 = arith.constant 0 : index
    %0 = vector.load %arg1[%c0, %c0_0, %c0_1] : memref<8x16x64xf32, #tpu.memory_space<vmem>>, vector<8x16x64xf32>
    %c0_2 = arith.constant 0 : index
    %c0_3 = arith.constant 0 : index
    %c0_4 = arith.constant 0 : index
    %1 = vector.load %arg2[%c0_2, %c0_3, %c0_4] : memref<8x16x16xf32, #tpu.memory_space<vmem>>, vector<8x16x16xf32>
    %cst = arith.constant dense<0.000000e+00> : vector<8x16xf32>
    %2 = vector.multi_reduction <add>, %1, %cst [2] : vector<8x16x16xf32> to vector<8x16xf32>
    %3 = vector.shape_cast %2 : vector<8x16xf32> to vector<8x16x1xf32>
    %cst_5 = arith.constant 1.000000e+00 : f32
    %4 = vector.broadcast %cst_5 : f32 to vector<8x16x1xf32>
    %5 = arith.maximumf %3, %4 : vector<8x16x1xf32>
    %6 = tpu.reciprocal %5 {approx = true} : vector<8x16x1xf32> -> vector<8x16x1xf32>
    %7 = vector.broadcast %6 : vector<8x16x1xf32> to vector<8x16x16xf32>
    %8 = arith.mulf %1, %7 : vector<8x16x16xf32>
    %9 = vector.extract_strided_slice %8 {offsets = [0, 0, 0], sizes = [8, 16, 1], strides = [1, 1, 1]} : vector<8x16x16xf32> to vector<8x16x1xf32>
    %10 = vector.extract_strided_slice %0 {offsets = [0, 0, 0], sizes = [8, 1, 64], strides = [1, 1, 1]} : vector<8x16x64xf32> to vector<8x1x64xf32>
    %11 = vector.broadcast %9 : vector<8x16x1xf32> to vector<8x16x64xf32>
    %12 = vector.broadcast %10 : vector<8x1x64xf32> to vector<8x16x64xf32>
    %13 = arith.mulf %11, %12 : vector<8x16x64xf32>
    %14 = vector.extract_strided_slice %8 {offsets = [0, 0, 1], sizes = [8, 16, 1], strides = [1, 1, 1]} : vector<8x16x16xf32> to vector<8x16x1xf32>
    %15 = vector.extract_strided_slice %0 {offsets = [0, 1, 0], sizes = [8, 1, 64], strides = [1, 1, 1]} : vector<8x16x64xf32> to vector<8x1x64xf32>
    %16 = vector.broadcast %14 : vector<8x16x1xf32> to vector<8x16x64xf32>
    %17 = vector.broadcast %15 : vector<8x1x64xf32> to vector<8x16x64xf32>
    %18 = arith.mulf %16, %17 : vector<8x16x64xf32>
    %19 = arith.addf %13, %18 : vector<8x16x64xf32>
    %20 = vector.extract_strided_slice %8 {offsets = [0, 0, 2], sizes = [8, 16, 1], strides = [1, 1, 1]} : vector<8x16x16xf32> to vector<8x16x1xf32>
    %21 = vector.extract_strided_slice %0 {offsets = [0, 2, 0], sizes = [8, 1, 64], strides = [1, 1, 1]} : vector<8x16x64xf32> to vector<8x1x64xf32>
    %22 = vector.broadcast %20 : vector<8x16x1xf32> to vector<8x16x64xf32>
    %23 = vector.broadcast %21 : vector<8x1x64xf32> to vector<8x16x64xf32>
    %24 = arith.mulf %22, %23 : vector<8x16x64xf32>
    %25 = arith.addf %19, %24 : vector<8x16x64xf32>
    %26 = vector.extract_strided_slice %8 {offsets = [0, 0, 3], sizes = [8, 16, 1], strides = [1, 1, 1]} : vector<8x16x16xf32> to vector<8x16x1xf32>
    %27 = vector.extract_strided_slice %0 {offsets = [0, 3, 0], sizes = [8, 1, 64], strides = [1, 1, 1]} : vector<8x16x64xf32> to vector<8x1x64xf32>
    %28 = vector.broadcast %26 : vector<8x16x1xf32> to vector<8x16x64xf32>
    %29 = vector.broadcast %27 : vector<8x1x64xf32> to vector<8x16x64xf32>
    %30 = arith.mulf %28, %29 : vector<8x16x64xf32>
    %31 = arith.addf %25, %30 : vector<8x16x64xf32>
    %32 = vector.extract_strided_slice %8 {offsets = [0, 0, 4], sizes = [8, 16, 1], strides = [1, 1, 1]} : vector<8x16x16xf32> to vector<8x16x1xf32>
    %33 = vector.extract_strided_slice %0 {offsets = [0, 4, 0], sizes = [8, 1, 64], strides = [1, 1, 1]} : vector<8x16x64xf32> to vector<8x1x64xf32>
    %34 = vector.broadcast %32 : vector<8x16x1xf32> to vector<8x16x64xf32>
    %35 = vector.broadcast %33 : vector<8x1x64xf32> to vector<8x16x64xf32>
    %36 = arith.mulf %34, %35 : vector<8x16x64xf32>
    %37 = arith.addf %31, %36 : vector<8x16x64xf32>
    %38 = vector.extract_strided_slice %8 {offsets = [0, 0, 5], sizes = [8, 16, 1], strides = [1, 1, 1]} : vector<8x16x16xf32> to vector<8x16x1xf32>
    %39 = vector.extract_strided_slice %0 {offsets = [0, 5, 0], sizes = [8, 1, 64], strides = [1, 1, 1]} : vector<8x16x64xf32> to vector<8x1x64xf32>
    %40 = vector.broadcast %38 : vector<8x16x1xf32> to vector<8x16x64xf32>
    %41 = vector.broadcast %39 : vector<8x1x64xf32> to vector<8x16x64xf32>
    %42 = arith.mulf %40, %41 : vector<8x16x64xf32>
    %43 = arith.addf %37, %42 : vector<8x16x64xf32>
    %44 = vector.extract_strided_slice %8 {offsets = [0, 0, 6], sizes = [8, 16, 1], strides = [1, 1, 1]} : vector<8x16x16xf32> to vector<8x16x1xf32>
    %45 = vector.extract_strided_slice %0 {offsets = [0, 6, 0], sizes = [8, 1, 64], strides = [1, 1, 1]} : vector<8x16x64xf32> to vector<8x1x64xf32>
    %46 = vector.broadcast %44 : vector<8x16x1xf32> to vector<8x16x64xf32>
    %47 = vector.broadcast %45 : vector<8x1x64xf32> to vector<8x16x64xf32>
    %48 = arith.mulf %46, %47 : vector<8x16x64xf32>
    %49 = arith.addf %43, %48 : vector<8x16x64xf32>
    %50 = vector.extract_strided_slice %8 {offsets = [0, 0, 7], sizes = [8, 16, 1], strides = [1, 1, 1]} : vector<8x16x16xf32> to vector<8x16x1xf32>
    %51 = vector.extract_strided_slice %0 {offsets = [0, 7, 0], sizes = [8, 1, 64], strides = [1, 1, 1]} : vector<8x16x64xf32> to vector<8x1x64xf32>
    %52 = vector.broadcast %50 : vector<8x16x1xf32> to vector<8x16x64xf32>
    %53 = vector.broadcast %51 : vector<8x1x64xf32> to vector<8x16x64xf32>
    %54 = arith.mulf %52, %53 : vector<8x16x64xf32>
    %55 = arith.addf %49, %54 : vector<8x16x64xf32>
    %56 = vector.extract_strided_slice %8 {offsets = [0, 0, 8], sizes = [8, 16, 1], strides = [1, 1, 1]} : vector<8x16x16xf32> to vector<8x16x1xf32>
    %57 = vector.extract_strided_slice %0 {offsets = [0, 8, 0], sizes = [8, 1, 64], strides = [1, 1, 1]} : vector<8x16x64xf32> to vector<8x1x64xf32>
    %58 = vector.broadcast %56 : vector<8x16x1xf32> to vector<8x16x64xf32>
    %59 = vector.broadcast %57 : vector<8x1x64xf32> to vector<8x16x64xf32>
    %60 = arith.mulf %58, %59 : vector<8x16x64xf32>
    %61 = arith.addf %55, %60 : vector<8x16x64xf32>
    %62 = vector.extract_strided_slice %8 {offsets = [0, 0, 9], sizes = [8, 16, 1], strides = [1, 1, 1]} : vector<8x16x16xf32> to vector<8x16x1xf32>
    %63 = vector.extract_strided_slice %0 {offsets = [0, 9, 0], sizes = [8, 1, 64], strides = [1, 1, 1]} : vector<8x16x64xf32> to vector<8x1x64xf32>
    %64 = vector.broadcast %62 : vector<8x16x1xf32> to vector<8x16x64xf32>
    %65 = vector.broadcast %63 : vector<8x1x64xf32> to vector<8x16x64xf32>
    %66 = arith.mulf %64, %65 : vector<8x16x64xf32>
    %67 = arith.addf %61, %66 : vector<8x16x64xf32>
    %68 = vector.extract_strided_slice %8 {offsets = [0, 0, 10], sizes = [8, 16, 1], strides = [1, 1, 1]} : vector<8x16x16xf32> to vector<8x16x1xf32>
    %69 = vector.extract_strided_slice %0 {offsets = [0, 10, 0], sizes = [8, 1, 64], strides = [1, 1, 1]} : vector<8x16x64xf32> to vector<8x1x64xf32>
    %70 = vector.broadcast %68 : vector<8x16x1xf32> to vector<8x16x64xf32>
    %71 = vector.broadcast %69 : vector<8x1x64xf32> to vector<8x16x64xf32>
    %72 = arith.mulf %70, %71 : vector<8x16x64xf32>
    %73 = arith.addf %67, %72 : vector<8x16x64xf32>
    %74 = vector.extract_strided_slice %8 {offsets = [0, 0, 11], sizes = [8, 16, 1], strides = [1, 1, 1]} : vector<8x16x16xf32> to vector<8x16x1xf32>
    %75 = vector.extract_strided_slice %0 {offsets = [0, 11, 0], sizes = [8, 1, 64], strides = [1, 1, 1]} : vector<8x16x64xf32> to vector<8x1x64xf32>
    %76 = vector.broadcast %74 : vector<8x16x1xf32> to vector<8x16x64xf32>
    %77 = vector.broadcast %75 : vector<8x1x64xf32> to vector<8x16x64xf32>
    %78 = arith.mulf %76, %77 : vector<8x16x64xf32>
    %79 = arith.addf %73, %78 : vector<8x16x64xf32>
    %80 = vector.extract_strided_slice %8 {offsets = [0, 0, 12], sizes = [8, 16, 1], strides = [1, 1, 1]} : vector<8x16x16xf32> to vector<8x16x1xf32>
    %81 = vector.extract_strided_slice %0 {offsets = [0, 12, 0], sizes = [8, 1, 64], strides = [1, 1, 1]} : vector<8x16x64xf32> to vector<8x1x64xf32>
    %82 = vector.broadcast %80 : vector<8x16x1xf32> to vector<8x16x64xf32>
    %83 = vector.broadcast %81 : vector<8x1x64xf32> to vector<8x16x64xf32>
    %84 = arith.mulf %82, %83 : vector<8x16x64xf32>
    %85 = arith.addf %79, %84 : vector<8x16x64xf32>
    %86 = vector.extract_strided_slice %8 {offsets = [0, 0, 13], sizes = [8, 16, 1], strides = [1, 1, 1]} : vector<8x16x16xf32> to vector<8x16x1xf32>
    %87 = vector.extract_strided_slice %0 {offsets = [0, 13, 0], sizes = [8, 1, 64], strides = [1, 1, 1]} : vector<8x16x64xf32> to vector<8x1x64xf32>
    %88 = vector.broadcast %86 : vector<8x16x1xf32> to vector<8x16x64xf32>
    %89 = vector.broadcast %87 : vector<8x1x64xf32> to vector<8x16x64xf32>
    %90 = arith.mulf %88, %89 : vector<8x16x64xf32>
    %91 = arith.addf %85, %90 : vector<8x16x64xf32>
    %92 = vector.extract_strided_slice %8 {offsets = [0, 0, 14], sizes = [8, 16, 1], strides = [1, 1, 1]} : vector<8x16x16xf32> to vector<8x16x1xf32>
    %93 = vector.extract_strided_slice %0 {offsets = [0, 14, 0], sizes = [8, 1, 64], strides = [1, 1, 1]} : vector<8x16x64xf32> to vector<8x1x64xf32>
    %94 = vector.broadcast %92 : vector<8x16x1xf32> to vector<8x16x64xf32>
    %95 = vector.broadcast %93 : vector<8x1x64xf32> to vector<8x16x64xf32>
    %96 = arith.mulf %94, %95 : vector<8x16x64xf32>
    %97 = arith.addf %91, %96 : vector<8x16x64xf32>
    %98 = vector.extract_strided_slice %8 {offsets = [0, 0, 15], sizes = [8, 16, 1], strides = [1, 1, 1]} : vector<8x16x16xf32> to vector<8x16x1xf32>
    %99 = vector.extract_strided_slice %0 {offsets = [0, 15, 0], sizes = [8, 1, 64], strides = [1, 1, 1]} : vector<8x16x64xf32> to vector<8x1x64xf32>
    %100 = vector.broadcast %98 : vector<8x16x1xf32> to vector<8x16x64xf32>
    %101 = vector.broadcast %99 : vector<8x1x64xf32> to vector<8x16x64xf32>
    %102 = arith.mulf %100, %101 : vector<8x16x64xf32>
    %103 = arith.addf %97, %102 : vector<8x16x64xf32>
    %104 = vector.shape_cast %103 : vector<8x16x64xf32> to vector<128x64xf32>
    %105 = arith.truncf %104 : vector<128x64xf32> to vector<128x64xbf16>
    %106 = arith.truncf %0 : vector<8x16x64xf32> to vector<8x16x64xbf16>
    %107 = vector.shape_cast %106 : vector<8x16x64xbf16> to vector<128x64xbf16>
    %c0_6 = arith.constant 0 : index
    %c0_7 = arith.constant 0 : index
    %108 = vector.load %arg4[%c0_6, %c0_7] : memref<64x32xbf16, #tpu.memory_space<vmem>>, vector<64x32xbf16>
    %cst_8 = arith.constant dense<0.000000e+00> : vector<128x32xf32>
    %109 = tpu.matmul %105, %108, %cst_8 {dimension_numbers = #tpu.dot_dimension_numbers<[1], [0], [0], [1], [0, 0, 1, 1], [], []>} : vector<128x64xbf16>, vector<64x32xbf16>, vector<128x32xf32> -> vector<128x32xf32>
    %c0_9 = arith.constant 0 : index
    %c0_10 = arith.constant 0 : index
    %110 = vector.load %arg5[%c0_9, %c0_10] : memref<64x32xbf16, #tpu.memory_space<vmem>>, vector<64x32xbf16>
    %cst_11 = arith.constant dense<0.000000e+00> : vector<128x32xf32>
    %111 = tpu.matmul %107, %110, %cst_11 {dimension_numbers = #tpu.dot_dimension_numbers<[1], [0], [0], [1], [0, 0, 1, 1], [], []>} : vector<128x64xbf16>, vector<64x32xbf16>, vector<128x32xf32> -> vector<128x32xf32>
    %112 = arith.addf %109, %111 : vector<128x32xf32>
    %c0_12 = arith.constant 0 : index
    %c0_13 = arith.constant 0 : index
    %113 = vector.load %arg6[%c0_12, %c0_13] : memref<1x32xf32, #tpu.memory_space<vmem>>, vector<1x32xf32>
    %114 = vector.broadcast %113 : vector<1x32xf32> to vector<128x32xf32>
    %115 = arith.addf %112, %114 : vector<128x32xf32>
    %116 = arith.negf %115 : vector<128x32xf32>
    %117 = math.exp %116 : vector<128x32xf32>
    %cst_14 = arith.constant 1.000000e+00 : f32
    %118 = vector.broadcast %cst_14 : f32 to vector<128x32xf32>
    %119 = arith.addf %118, %117 : vector<128x32xf32>
    %120 = arith.divf %118, %119 : vector<128x32xf32>
    %121 = arith.truncf %120 : vector<128x32xf32> to vector<128x32xbf16>
    %122 = vector.shape_cast %121 : vector<128x32xbf16> to vector<8x16x32xbf16>
    %123 = arith.extf %122 : vector<8x16x32xbf16> to vector<8x16x32xf32>
    %124 = vector.extract_strided_slice %8 {offsets = [0, 0, 0], sizes = [8, 16, 1], strides = [1, 1, 1]} : vector<8x16x16xf32> to vector<8x16x1xf32>
    %125 = vector.extract_strided_slice %123 {offsets = [0, 0, 0], sizes = [8, 1, 32], strides = [1, 1, 1]} : vector<8x16x32xf32> to vector<8x1x32xf32>
    %126 = vector.broadcast %124 : vector<8x16x1xf32> to vector<8x16x32xf32>
    %127 = vector.broadcast %125 : vector<8x1x32xf32> to vector<8x16x32xf32>
    %128 = arith.mulf %126, %127 : vector<8x16x32xf32>
    %129 = vector.extract_strided_slice %8 {offsets = [0, 0, 1], sizes = [8, 16, 1], strides = [1, 1, 1]} : vector<8x16x16xf32> to vector<8x16x1xf32>
    %130 = vector.extract_strided_slice %123 {offsets = [0, 1, 0], sizes = [8, 1, 32], strides = [1, 1, 1]} : vector<8x16x32xf32> to vector<8x1x32xf32>
    %131 = vector.broadcast %129 : vector<8x16x1xf32> to vector<8x16x32xf32>
    %132 = vector.broadcast %130 : vector<8x1x32xf32> to vector<8x16x32xf32>
    %133 = arith.mulf %131, %132 : vector<8x16x32xf32>
    %134 = arith.addf %128, %133 : vector<8x16x32xf32>
    %135 = vector.extract_strided_slice %8 {offsets = [0, 0, 2], sizes = [8, 16, 1], strides = [1, 1, 1]} : vector<8x16x16xf32> to vector<8x16x1xf32>
    %136 = vector.extract_strided_slice %123 {offsets = [0, 2, 0], sizes = [8, 1, 32], strides = [1, 1, 1]} : vector<8x16x32xf32> to vector<8x1x32xf32>
    %137 = vector.broadcast %135 : vector<8x16x1xf32> to vector<8x16x32xf32>
    %138 = vector.broadcast %136 : vector<8x1x32xf32> to vector<8x16x32xf32>
    %139 = arith.mulf %137, %138 : vector<8x16x32xf32>
    %140 = arith.addf %134, %139 : vector<8x16x32xf32>
    %141 = vector.extract_strided_slice %8 {offsets = [0, 0, 3], sizes = [8, 16, 1], strides = [1, 1, 1]} : vector<8x16x16xf32> to vector<8x16x1xf32>
    %142 = vector.extract_strided_slice %123 {offsets = [0, 3, 0], sizes = [8, 1, 32], strides = [1, 1, 1]} : vector<8x16x32xf32> to vector<8x1x32xf32>
    %143 = vector.broadcast %141 : vector<8x16x1xf32> to vector<8x16x32xf32>
    %144 = vector.broadcast %142 : vector<8x1x32xf32> to vector<8x16x32xf32>
    %145 = arith.mulf %143, %144 : vector<8x16x32xf32>
    %146 = arith.addf %140, %145 : vector<8x16x32xf32>
    %147 = vector.extract_strided_slice %8 {offsets = [0, 0, 4], sizes = [8, 16, 1], strides = [1, 1, 1]} : vector<8x16x16xf32> to vector<8x16x1xf32>
    %148 = vector.extract_strided_slice %123 {offsets = [0, 4, 0], sizes = [8, 1, 32], strides = [1, 1, 1]} : vector<8x16x32xf32> to vector<8x1x32xf32>
    %149 = vector.broadcast %147 : vector<8x16x1xf32> to vector<8x16x32xf32>
    %150 = vector.broadcast %148 : vector<8x1x32xf32> to vector<8x16x32xf32>
    %151 = arith.mulf %149, %150 : vector<8x16x32xf32>
    %152 = arith.addf %146, %151 : vector<8x16x32xf32>
    %153 = vector.extract_strided_slice %8 {offsets = [0, 0, 5], sizes = [8, 16, 1], strides = [1, 1, 1]} : vector<8x16x16xf32> to vector<8x16x1xf32>
    %154 = vector.extract_strided_slice %123 {offsets = [0, 5, 0], sizes = [8, 1, 32], strides = [1, 1, 1]} : vector<8x16x32xf32> to vector<8x1x32xf32>
    %155 = vector.broadcast %153 : vector<8x16x1xf32> to vector<8x16x32xf32>
    %156 = vector.broadcast %154 : vector<8x1x32xf32> to vector<8x16x32xf32>
    %157 = arith.mulf %155, %156 : vector<8x16x32xf32>
    %158 = arith.addf %152, %157 : vector<8x16x32xf32>
    %159 = vector.extract_strided_slice %8 {offsets = [0, 0, 6], sizes = [8, 16, 1], strides = [1, 1, 1]} : vector<8x16x16xf32> to vector<8x16x1xf32>
    %160 = vector.extract_strided_slice %123 {offsets = [0, 6, 0], sizes = [8, 1, 32], strides = [1, 1, 1]} : vector<8x16x32xf32> to vector<8x1x32xf32>
    %161 = vector.broadcast %159 : vector<8x16x1xf32> to vector<8x16x32xf32>
    %162 = vector.broadcast %160 : vector<8x1x32xf32> to vector<8x16x32xf32>
    %163 = arith.mulf %161, %162 : vector<8x16x32xf32>
    %164 = arith.addf %158, %163 : vector<8x16x32xf32>
    %165 = vector.extract_strided_slice %8 {offsets = [0, 0, 7], sizes = [8, 16, 1], strides = [1, 1, 1]} : vector<8x16x16xf32> to vector<8x16x1xf32>
    %166 = vector.extract_strided_slice %123 {offsets = [0, 7, 0], sizes = [8, 1, 32], strides = [1, 1, 1]} : vector<8x16x32xf32> to vector<8x1x32xf32>
    %167 = vector.broadcast %165 : vector<8x16x1xf32> to vector<8x16x32xf32>
    %168 = vector.broadcast %166 : vector<8x1x32xf32> to vector<8x16x32xf32>
    %169 = arith.mulf %167, %168 : vector<8x16x32xf32>
    %170 = arith.addf %164, %169 : vector<8x16x32xf32>
    %171 = vector.extract_strided_slice %8 {offsets = [0, 0, 8], sizes = [8, 16, 1], strides = [1, 1, 1]} : vector<8x16x16xf32> to vector<8x16x1xf32>
    %172 = vector.extract_strided_slice %123 {offsets = [0, 8, 0], sizes = [8, 1, 32], strides = [1, 1, 1]} : vector<8x16x32xf32> to vector<8x1x32xf32>
    %173 = vector.broadcast %171 : vector<8x16x1xf32> to vector<8x16x32xf32>
    %174 = vector.broadcast %172 : vector<8x1x32xf32> to vector<8x16x32xf32>
    %175 = arith.mulf %173, %174 : vector<8x16x32xf32>
    %176 = arith.addf %170, %175 : vector<8x16x32xf32>
    %177 = vector.extract_strided_slice %8 {offsets = [0, 0, 9], sizes = [8, 16, 1], strides = [1, 1, 1]} : vector<8x16x16xf32> to vector<8x16x1xf32>
    %178 = vector.extract_strided_slice %123 {offsets = [0, 9, 0], sizes = [8, 1, 32], strides = [1, 1, 1]} : vector<8x16x32xf32> to vector<8x1x32xf32>
    %179 = vector.broadcast %177 : vector<8x16x1xf32> to vector<8x16x32xf32>
    %180 = vector.broadcast %178 : vector<8x1x32xf32> to vector<8x16x32xf32>
    %181 = arith.mulf %179, %180 : vector<8x16x32xf32>
    %182 = arith.addf %176, %181 : vector<8x16x32xf32>
    %183 = vector.extract_strided_slice %8 {offsets = [0, 0, 10], sizes = [8, 16, 1], strides = [1, 1, 1]} : vector<8x16x16xf32> to vector<8x16x1xf32>
    %184 = vector.extract_strided_slice %123 {offsets = [0, 10, 0], sizes = [8, 1, 32], strides = [1, 1, 1]} : vector<8x16x32xf32> to vector<8x1x32xf32>
    %185 = vector.broadcast %183 : vector<8x16x1xf32> to vector<8x16x32xf32>
    %186 = vector.broadcast %184 : vector<8x1x32xf32> to vector<8x16x32xf32>
    %187 = arith.mulf %185, %186 : vector<8x16x32xf32>
    %188 = arith.addf %182, %187 : vector<8x16x32xf32>
    %189 = vector.extract_strided_slice %8 {offsets = [0, 0, 11], sizes = [8, 16, 1], strides = [1, 1, 1]} : vector<8x16x16xf32> to vector<8x16x1xf32>
    %190 = vector.extract_strided_slice %123 {offsets = [0, 11, 0], sizes = [8, 1, 32], strides = [1, 1, 1]} : vector<8x16x32xf32> to vector<8x1x32xf32>
    %191 = vector.broadcast %189 : vector<8x16x1xf32> to vector<8x16x32xf32>
    %192 = vector.broadcast %190 : vector<8x1x32xf32> to vector<8x16x32xf32>
    %193 = arith.mulf %191, %192 : vector<8x16x32xf32>
    %194 = arith.addf %188, %193 : vector<8x16x32xf32>
    %195 = vector.extract_strided_slice %8 {offsets = [0, 0, 12], sizes = [8, 16, 1], strides = [1, 1, 1]} : vector<8x16x16xf32> to vector<8x16x1xf32>
    %196 = vector.extract_strided_slice %123 {offsets = [0, 12, 0], sizes = [8, 1, 32], strides = [1, 1, 1]} : vector<8x16x32xf32> to vector<8x1x32xf32>
    %197 = vector.broadcast %195 : vector<8x16x1xf32> to vector<8x16x32xf32>
    %198 = vector.broadcast %196 : vector<8x1x32xf32> to vector<8x16x32xf32>
    %199 = arith.mulf %197, %198 : vector<8x16x32xf32>
    %200 = arith.addf %194, %199 : vector<8x16x32xf32>
    %201 = vector.extract_strided_slice %8 {offsets = [0, 0, 13], sizes = [8, 16, 1], strides = [1, 1, 1]} : vector<8x16x16xf32> to vector<8x16x1xf32>
    %202 = vector.extract_strided_slice %123 {offsets = [0, 13, 0], sizes = [8, 1, 32], strides = [1, 1, 1]} : vector<8x16x32xf32> to vector<8x1x32xf32>
    %203 = vector.broadcast %201 : vector<8x16x1xf32> to vector<8x16x32xf32>
    %204 = vector.broadcast %202 : vector<8x1x32xf32> to vector<8x16x32xf32>
    %205 = arith.mulf %203, %204 : vector<8x16x32xf32>
    %206 = arith.addf %200, %205 : vector<8x16x32xf32>
    %207 = vector.extract_strided_slice %8 {offsets = [0, 0, 14], sizes = [8, 16, 1], strides = [1, 1, 1]} : vector<8x16x16xf32> to vector<8x16x1xf32>
    %208 = vector.extract_strided_slice %123 {offsets = [0, 14, 0], sizes = [8, 1, 32], strides = [1, 1, 1]} : vector<8x16x32xf32> to vector<8x1x32xf32>
    %209 = vector.broadcast %207 : vector<8x16x1xf32> to vector<8x16x32xf32>
    %210 = vector.broadcast %208 : vector<8x1x32xf32> to vector<8x16x32xf32>
    %211 = arith.mulf %209, %210 : vector<8x16x32xf32>
    %212 = arith.addf %206, %211 : vector<8x16x32xf32>
    %213 = vector.extract_strided_slice %8 {offsets = [0, 0, 15], sizes = [8, 16, 1], strides = [1, 1, 1]} : vector<8x16x16xf32> to vector<8x16x1xf32>
    %214 = vector.extract_strided_slice %123 {offsets = [0, 15, 0], sizes = [8, 1, 32], strides = [1, 1, 1]} : vector<8x16x32xf32> to vector<8x1x32xf32>
    %215 = vector.broadcast %213 : vector<8x16x1xf32> to vector<8x16x32xf32>
    %216 = vector.broadcast %214 : vector<8x1x32xf32> to vector<8x16x32xf32>
    %217 = arith.mulf %215, %216 : vector<8x16x32xf32>
    %218 = arith.addf %212, %217 : vector<8x16x32xf32>
    %219 = vector.shape_cast %218 : vector<8x16x32xf32> to vector<128x32xf32>
    %220 = arith.truncf %219 : vector<128x32xf32> to vector<128x32xbf16>
    %221 = vector.shape_cast %122 : vector<8x16x32xbf16> to vector<128x32xbf16>
    %c0_15 = arith.constant 0 : index
    %c0_16 = arith.constant 0 : index
    %222 = vector.load %arg7[%c0_15, %c0_16] : memref<32x32xbf16, #tpu.memory_space<vmem>>, vector<32x32xbf16>
    %cst_17 = arith.constant dense<0.000000e+00> : vector<128x32xf32>
    %223 = tpu.matmul %220, %222, %cst_17 {dimension_numbers = #tpu.dot_dimension_numbers<[1], [0], [0], [1], [0, 0, 1, 1], [], []>} : vector<128x32xbf16>, vector<32x32xbf16>, vector<128x32xf32> -> vector<128x32xf32>
    %c0_18 = arith.constant 0 : index
    %c0_19 = arith.constant 0 : index
    %224 = vector.load %arg8[%c0_18, %c0_19] : memref<32x32xbf16, #tpu.memory_space<vmem>>, vector<32x32xbf16>
    %cst_20 = arith.constant dense<0.000000e+00> : vector<128x32xf32>
    %225 = tpu.matmul %221, %224, %cst_20 {dimension_numbers = #tpu.dot_dimension_numbers<[1], [0], [0], [1], [0, 0, 1, 1], [], []>} : vector<128x32xbf16>, vector<32x32xbf16>, vector<128x32xf32> -> vector<128x32xf32>
    %226 = arith.addf %223, %225 : vector<128x32xf32>
    %c0_21 = arith.constant 0 : index
    %c0_22 = arith.constant 0 : index
    %227 = vector.load %arg9[%c0_21, %c0_22] : memref<1x32xf32, #tpu.memory_space<vmem>>, vector<1x32xf32>
    %228 = vector.broadcast %227 : vector<1x32xf32> to vector<128x32xf32>
    %229 = arith.addf %226, %228 : vector<128x32xf32>
    %230 = arith.negf %229 : vector<128x32xf32>
    %231 = math.exp %230 : vector<128x32xf32>
    %cst_23 = arith.constant 1.000000e+00 : f32
    %232 = vector.broadcast %cst_23 : f32 to vector<128x32xf32>
    %233 = arith.addf %232, %231 : vector<128x32xf32>
    %234 = arith.divf %232, %233 : vector<128x32xf32>
    %235 = arith.truncf %234 : vector<128x32xf32> to vector<128x32xbf16>
    %236 = vector.shape_cast %235 : vector<128x32xbf16> to vector<8x16x32xbf16>
    %237 = arith.extf %236 : vector<8x16x32xbf16> to vector<8x16x32xf32>
    %238 = vector.extract_strided_slice %8 {offsets = [0, 0, 0], sizes = [8, 16, 1], strides = [1, 1, 1]} : vector<8x16x16xf32> to vector<8x16x1xf32>
    %239 = vector.extract_strided_slice %237 {offsets = [0, 0, 0], sizes = [8, 1, 32], strides = [1, 1, 1]} : vector<8x16x32xf32> to vector<8x1x32xf32>
    %240 = vector.broadcast %238 : vector<8x16x1xf32> to vector<8x16x32xf32>
    %241 = vector.broadcast %239 : vector<8x1x32xf32> to vector<8x16x32xf32>
    %242 = arith.mulf %240, %241 : vector<8x16x32xf32>
    %243 = vector.extract_strided_slice %8 {offsets = [0, 0, 1], sizes = [8, 16, 1], strides = [1, 1, 1]} : vector<8x16x16xf32> to vector<8x16x1xf32>
    %244 = vector.extract_strided_slice %237 {offsets = [0, 1, 0], sizes = [8, 1, 32], strides = [1, 1, 1]} : vector<8x16x32xf32> to vector<8x1x32xf32>
    %245 = vector.broadcast %243 : vector<8x16x1xf32> to vector<8x16x32xf32>
    %246 = vector.broadcast %244 : vector<8x1x32xf32> to vector<8x16x32xf32>
    %247 = arith.mulf %245, %246 : vector<8x16x32xf32>
    %248 = arith.addf %242, %247 : vector<8x16x32xf32>
    %249 = vector.extract_strided_slice %8 {offsets = [0, 0, 2], sizes = [8, 16, 1], strides = [1, 1, 1]} : vector<8x16x16xf32> to vector<8x16x1xf32>
    %250 = vector.extract_strided_slice %237 {offsets = [0, 2, 0], sizes = [8, 1, 32], strides = [1, 1, 1]} : vector<8x16x32xf32> to vector<8x1x32xf32>
    %251 = vector.broadcast %249 : vector<8x16x1xf32> to vector<8x16x32xf32>
    %252 = vector.broadcast %250 : vector<8x1x32xf32> to vector<8x16x32xf32>
    %253 = arith.mulf %251, %252 : vector<8x16x32xf32>
    %254 = arith.addf %248, %253 : vector<8x16x32xf32>
    %255 = vector.extract_strided_slice %8 {offsets = [0, 0, 3], sizes = [8, 16, 1], strides = [1, 1, 1]} : vector<8x16x16xf32> to vector<8x16x1xf32>
    %256 = vector.extract_strided_slice %237 {offsets = [0, 3, 0], sizes = [8, 1, 32], strides = [1, 1, 1]} : vector<8x16x32xf32> to vector<8x1x32xf32>
    %257 = vector.broadcast %255 : vector<8x16x1xf32> to vector<8x16x32xf32>
    %258 = vector.broadcast %256 : vector<8x1x32xf32> to vector<8x16x32xf32>
    %259 = arith.mulf %257, %258 : vector<8x16x32xf32>
    %260 = arith.addf %254, %259 : vector<8x16x32xf32>
    %261 = vector.extract_strided_slice %8 {offsets = [0, 0, 4], sizes = [8, 16, 1], strides = [1, 1, 1]} : vector<8x16x16xf32> to vector<8x16x1xf32>
    %262 = vector.extract_strided_slice %237 {offsets = [0, 4, 0], sizes = [8, 1, 32], strides = [1, 1, 1]} : vector<8x16x32xf32> to vector<8x1x32xf32>
    %263 = vector.broadcast %261 : vector<8x16x1xf32> to vector<8x16x32xf32>
    %264 = vector.broadcast %262 : vector<8x1x32xf32> to vector<8x16x32xf32>
    %265 = arith.mulf %263, %264 : vector<8x16x32xf32>
    %266 = arith.addf %260, %265 : vector<8x16x32xf32>
    %267 = vector.extract_strided_slice %8 {offsets = [0, 0, 5], sizes = [8, 16, 1], strides = [1, 1, 1]} : vector<8x16x16xf32> to vector<8x16x1xf32>
    %268 = vector.extract_strided_slice %237 {offsets = [0, 5, 0], sizes = [8, 1, 32], strides = [1, 1, 1]} : vector<8x16x32xf32> to vector<8x1x32xf32>
    %269 = vector.broadcast %267 : vector<8x16x1xf32> to vector<8x16x32xf32>
    %270 = vector.broadcast %268 : vector<8x1x32xf32> to vector<8x16x32xf32>
    %271 = arith.mulf %269, %270 : vector<8x16x32xf32>
    %272 = arith.addf %266, %271 : vector<8x16x32xf32>
    %273 = vector.extract_strided_slice %8 {offsets = [0, 0, 6], sizes = [8, 16, 1], strides = [1, 1, 1]} : vector<8x16x16xf32> to vector<8x16x1xf32>
    %274 = vector.extract_strided_slice %237 {offsets = [0, 6, 0], sizes = [8, 1, 32], strides = [1, 1, 1]} : vector<8x16x32xf32> to vector<8x1x32xf32>
    %275 = vector.broadcast %273 : vector<8x16x1xf32> to vector<8x16x32xf32>
    %276 = vector.broadcast %274 : vector<8x1x32xf32> to vector<8x16x32xf32>
    %277 = arith.mulf %275, %276 : vector<8x16x32xf32>
    %278 = arith.addf %272, %277 : vector<8x16x32xf32>
    %279 = vector.extract_strided_slice %8 {offsets = [0, 0, 7], sizes = [8, 16, 1], strides = [1, 1, 1]} : vector<8x16x16xf32> to vector<8x16x1xf32>
    %280 = vector.extract_strided_slice %237 {offsets = [0, 7, 0], sizes = [8, 1, 32], strides = [1, 1, 1]} : vector<8x16x32xf32> to vector<8x1x32xf32>
    %281 = vector.broadcast %279 : vector<8x16x1xf32> to vector<8x16x32xf32>
    %282 = vector.broadcast %280 : vector<8x1x32xf32> to vector<8x16x32xf32>
    %283 = arith.mulf %281, %282 : vector<8x16x32xf32>
    %284 = arith.addf %278, %283 : vector<8x16x32xf32>
    %285 = vector.extract_strided_slice %8 {offsets = [0, 0, 8], sizes = [8, 16, 1], strides = [1, 1, 1]} : vector<8x16x16xf32> to vector<8x16x1xf32>
    %286 = vector.extract_strided_slice %237 {offsets = [0, 8, 0], sizes = [8, 1, 32], strides = [1, 1, 1]} : vector<8x16x32xf32> to vector<8x1x32xf32>
    %287 = vector.broadcast %285 : vector<8x16x1xf32> to vector<8x16x32xf32>
    %288 = vector.broadcast %286 : vector<8x1x32xf32> to vector<8x16x32xf32>
    %289 = arith.mulf %287, %288 : vector<8x16x32xf32>
    %290 = arith.addf %284, %289 : vector<8x16x32xf32>
    %291 = vector.extract_strided_slice %8 {offsets = [0, 0, 9], sizes = [8, 16, 1], strides = [1, 1, 1]} : vector<8x16x16xf32> to vector<8x16x1xf32>
    %292 = vector.extract_strided_slice %237 {offsets = [0, 9, 0], sizes = [8, 1, 32], strides = [1, 1, 1]} : vector<8x16x32xf32> to vector<8x1x32xf32>
    %293 = vector.broadcast %291 : vector<8x16x1xf32> to vector<8x16x32xf32>
    %294 = vector.broadcast %292 : vector<8x1x32xf32> to vector<8x16x32xf32>
    %295 = arith.mulf %293, %294 : vector<8x16x32xf32>
    %296 = arith.addf %290, %295 : vector<8x16x32xf32>
    %297 = vector.extract_strided_slice %8 {offsets = [0, 0, 10], sizes = [8, 16, 1], strides = [1, 1, 1]} : vector<8x16x16xf32> to vector<8x16x1xf32>
    %298 = vector.extract_strided_slice %237 {offsets = [0, 10, 0], sizes = [8, 1, 32], strides = [1, 1, 1]} : vector<8x16x32xf32> to vector<8x1x32xf32>
    %299 = vector.broadcast %297 : vector<8x16x1xf32> to vector<8x16x32xf32>
    %300 = vector.broadcast %298 : vector<8x1x32xf32> to vector<8x16x32xf32>
    %301 = arith.mulf %299, %300 : vector<8x16x32xf32>
    %302 = arith.addf %296, %301 : vector<8x16x32xf32>
    %303 = vector.extract_strided_slice %8 {offsets = [0, 0, 11], sizes = [8, 16, 1], strides = [1, 1, 1]} : vector<8x16x16xf32> to vector<8x16x1xf32>
    %304 = vector.extract_strided_slice %237 {offsets = [0, 11, 0], sizes = [8, 1, 32], strides = [1, 1, 1]} : vector<8x16x32xf32> to vector<8x1x32xf32>
    %305 = vector.broadcast %303 : vector<8x16x1xf32> to vector<8x16x32xf32>
    %306 = vector.broadcast %304 : vector<8x1x32xf32> to vector<8x16x32xf32>
    %307 = arith.mulf %305, %306 : vector<8x16x32xf32>
    %308 = arith.addf %302, %307 : vector<8x16x32xf32>
    %309 = vector.extract_strided_slice %8 {offsets = [0, 0, 12], sizes = [8, 16, 1], strides = [1, 1, 1]} : vector<8x16x16xf32> to vector<8x16x1xf32>
    %310 = vector.extract_strided_slice %237 {offsets = [0, 12, 0], sizes = [8, 1, 32], strides = [1, 1, 1]} : vector<8x16x32xf32> to vector<8x1x32xf32>
    %311 = vector.broadcast %309 : vector<8x16x1xf32> to vector<8x16x32xf32>
    %312 = vector.broadcast %310 : vector<8x1x32xf32> to vector<8x16x32xf32>
    %313 = arith.mulf %311, %312 : vector<8x16x32xf32>
    %314 = arith.addf %308, %313 : vector<8x16x32xf32>
    %315 = vector.extract_strided_slice %8 {offsets = [0, 0, 13], sizes = [8, 16, 1], strides = [1, 1, 1]} : vector<8x16x16xf32> to vector<8x16x1xf32>
    %316 = vector.extract_strided_slice %237 {offsets = [0, 13, 0], sizes = [8, 1, 32], strides = [1, 1, 1]} : vector<8x16x32xf32> to vector<8x1x32xf32>
    %317 = vector.broadcast %315 : vector<8x16x1xf32> to vector<8x16x32xf32>
    %318 = vector.broadcast %316 : vector<8x1x32xf32> to vector<8x16x32xf32>
    %319 = arith.mulf %317, %318 : vector<8x16x32xf32>
    %320 = arith.addf %314, %319 : vector<8x16x32xf32>
    %321 = vector.extract_strided_slice %8 {offsets = [0, 0, 14], sizes = [8, 16, 1], strides = [1, 1, 1]} : vector<8x16x16xf32> to vector<8x16x1xf32>
    %322 = vector.extract_strided_slice %237 {offsets = [0, 14, 0], sizes = [8, 1, 32], strides = [1, 1, 1]} : vector<8x16x32xf32> to vector<8x1x32xf32>
    %323 = vector.broadcast %321 : vector<8x16x1xf32> to vector<8x16x32xf32>
    %324 = vector.broadcast %322 : vector<8x1x32xf32> to vector<8x16x32xf32>
    %325 = arith.mulf %323, %324 : vector<8x16x32xf32>
    %326 = arith.addf %320, %325 : vector<8x16x32xf32>
    %327 = vector.extract_strided_slice %8 {offsets = [0, 0, 15], sizes = [8, 16, 1], strides = [1, 1, 1]} : vector<8x16x16xf32> to vector<8x16x1xf32>
    %328 = vector.extract_strided_slice %237 {offsets = [0, 15, 0], sizes = [8, 1, 32], strides = [1, 1, 1]} : vector<8x16x32xf32> to vector<8x1x32xf32>
    %329 = vector.broadcast %327 : vector<8x16x1xf32> to vector<8x16x32xf32>
    %330 = vector.broadcast %328 : vector<8x1x32xf32> to vector<8x16x32xf32>
    %331 = arith.mulf %329, %330 : vector<8x16x32xf32>
    %332 = arith.addf %326, %331 : vector<8x16x32xf32>
    %333 = vector.shape_cast %332 : vector<8x16x32xf32> to vector<128x32xf32>
    %334 = arith.truncf %333 : vector<128x32xf32> to vector<128x32xbf16>
    %335 = vector.shape_cast %236 : vector<8x16x32xbf16> to vector<128x32xbf16>
    %c0_24 = arith.constant 0 : index
    %c0_25 = arith.constant 0 : index
    %336 = vector.load %arg10[%c0_24, %c0_25] : memref<32x32xbf16, #tpu.memory_space<vmem>>, vector<32x32xbf16>
    %cst_26 = arith.constant dense<0.000000e+00> : vector<128x32xf32>
    %337 = tpu.matmul %334, %336, %cst_26 {dimension_numbers = #tpu.dot_dimension_numbers<[1], [0], [0], [1], [0, 0, 1, 1], [], []>} : vector<128x32xbf16>, vector<32x32xbf16>, vector<128x32xf32> -> vector<128x32xf32>
    %c0_27 = arith.constant 0 : index
    %c0_28 = arith.constant 0 : index
    %338 = vector.load %arg11[%c0_27, %c0_28] : memref<32x32xbf16, #tpu.memory_space<vmem>>, vector<32x32xbf16>
    %cst_29 = arith.constant dense<0.000000e+00> : vector<128x32xf32>
    %339 = tpu.matmul %335, %338, %cst_29 {dimension_numbers = #tpu.dot_dimension_numbers<[1], [0], [0], [1], [0, 0, 1, 1], [], []>} : vector<128x32xbf16>, vector<32x32xbf16>, vector<128x32xf32> -> vector<128x32xf32>
    %340 = arith.addf %337, %339 : vector<128x32xf32>
    %c0_30 = arith.constant 0 : index
    %c0_31 = arith.constant 0 : index
    %341 = vector.load %arg12[%c0_30, %c0_31] : memref<1x32xf32, #tpu.memory_space<vmem>>, vector<1x32xf32>
    %342 = vector.broadcast %341 : vector<1x32xf32> to vector<128x32xf32>
    %343 = arith.addf %340, %342 : vector<128x32xf32>
    %344 = arith.negf %343 : vector<128x32xf32>
    %345 = math.exp %344 : vector<128x32xf32>
    %cst_32 = arith.constant 1.000000e+00 : f32
    %346 = vector.broadcast %cst_32 : f32 to vector<128x32xf32>
    %347 = arith.addf %346, %345 : vector<128x32xf32>
    %348 = arith.divf %346, %347 : vector<128x32xf32>
    %349 = vector.shape_cast %348 : vector<128x32xf32> to vector<8x16x32xf32>
    %c0_33 = arith.constant 0 : index
    %c0_34 = arith.constant 0 : index
    %350 = vector.load %arg13[%c0_33, %c0_34] : memref<1x32xf32, #tpu.memory_space<vmem>>, vector<1x32xf32>
    %351 = vector.shape_cast %350 : vector<1x32xf32> to vector<1x1x32xf32>
    %352 = vector.broadcast %351 : vector<1x1x32xf32> to vector<8x16x32xf32>
    %353 = arith.mulf %349, %352 : vector<8x16x32xf32>
    %cst_35 = arith.constant dense<0.000000e+00> : vector<8x16xf32>
    %354 = vector.multi_reduction <add>, %353, %cst_35 [2] : vector<8x16x32xf32> to vector<8x16xf32>
    %c0_36 = arith.constant 0 : index
    %c0_37 = arith.constant 0 : index
    %355 = memref.load %arg14[%c0_36, %c0_37] : memref<1x1xf32, #tpu.memory_space<smem>>
    %356 = vector.broadcast %355 : f32 to vector<8x16xf32>
    %357 = arith.addf %354, %356 : vector<8x16xf32>
    %358 = arith.negf %357 : vector<8x16xf32>
    %359 = math.exp %358 : vector<8x16xf32>
    %cst_38 = arith.constant 1.000000e+00 : f32
    %360 = vector.broadcast %cst_38 : f32 to vector<8x16xf32>
    %361 = arith.addf %360, %359 : vector<8x16xf32>
    %362 = arith.divf %360, %361 : vector<8x16xf32>
    %cst_39 = arith.constant 8.000000e-01 : f32
    %363 = vector.broadcast %cst_39 : f32 to vector<8x16xf32>
    %364 = arith.mulf %362, %363 : vector<8x16xf32>
    %cst_40 = arith.constant 1.000000e-01 : f32
    %365 = vector.broadcast %cst_40 : f32 to vector<8x16xf32>
    %366 = arith.addf %364, %365 : vector<8x16xf32>
    %c0_41 = arith.constant 0 : index
    %c0_42 = arith.constant 0 : index
    %367 = vector.load %arg3[%c0_41, %c0_42] : memref<8x16xf32, #tpu.memory_space<vmem>>, vector<8x16xf32>
    %368 = arith.cmpf olt, %367, %366 : vector<8x16xf32>
    %369 = arith.extui %368 : vector<8x16xi1> to vector<8x16xi32>
    %370 = arith.sitofp %369 : vector<8x16xi32> to vector<8x16xf32>
    %c0_43 = arith.constant 0 : index
    %c0_44 = arith.constant 0 : index
    %371 = vector.load %arg16[%c0_43, %c0_44] : memref<8x16xf32, #tpu.memory_space<vmem>>, vector<8x16xf32>
    tpu.vector_store %arg16[%c0_43, %c0_44], %366 {strides = array<i32>} : memref<8x16xf32, #tpu.memory_space<vmem>>, vector<8x16xf32>,
    %c0_45 = arith.constant 0 : index
    %c0_46 = arith.constant 0 : index
    %372 = vector.load %arg15[%c0_45, %c0_46] : memref<8x16xf32, #tpu.memory_space<vmem>>, vector<8x16xf32>
    tpu.vector_store %arg15[%c0_45, %c0_46], %370 {strides = array<i32>} : memref<8x16xf32, #tpu.memory_space<vmem>>, vector<8x16xf32>,
    return
  }
  func.func @transform_0(%arg0: i32) -> (i32, i32, i32) {
    %c0_i32 = arith.constant 0 : i32
    %c0_i32_0 = arith.constant 0 : i32
    %c0_i32_1 = arith.constant 0 : i32
    return %arg0, %c0_i32, %c0_i32_0 : i32, i32, i32
  }
  func.func @transform_1(%arg0: i32) -> (i32, i32, i32) {
    %c0_i32 = arith.constant 0 : i32
    %c0_i32_0 = arith.constant 0 : i32
    %c0_i32_1 = arith.constant 0 : i32
    return %arg0, %c0_i32, %c0_i32_0 : i32, i32, i32
  }
  func.func @transform_2(%arg0: i32) -> (i32, i32) {
    %c0_i32 = arith.constant 0 : i32
    %c0_i32_0 = arith.constant 0 : i32
    return %arg0, %c0_i32 : i32, i32
  }
  func.func @transform_3(%arg0: i32) -> (i32, i32) {
    %c0_i32 = arith.constant 0 : i32
    %c0_i32_0 = arith.constant 0 : i32
    %c0_i32_1 = arith.constant 0 : i32
    return %c0_i32, %c0_i32_0 : i32, i32
  }
  func.func @transform_4(%arg0: i32) -> (i32, i32) {
    %c0_i32 = arith.constant 0 : i32
    %c0_i32_0 = arith.constant 0 : i32
    %c0_i32_1 = arith.constant 0 : i32
    return %c0_i32, %c0_i32_0 : i32, i32
  }
  func.func @transform_5(%arg0: i32) -> (i32, i32) {
    %c0_i32 = arith.constant 0 : i32
    %c0_i32_0 = arith.constant 0 : i32
    %c0_i32_1 = arith.constant 0 : i32
    return %c0_i32, %c0_i32_0 : i32, i32
  }
  func.func @transform_6(%arg0: i32) -> (i32, i32) {
    %c0_i32 = arith.constant 0 : i32
    %c0_i32_0 = arith.constant 0 : i32
    %c0_i32_1 = arith.constant 0 : i32
    return %c0_i32, %c0_i32_0 : i32, i32
  }
  func.func @transform_7(%arg0: i32) -> (i32, i32) {
    %c0_i32 = arith.constant 0 : i32
    %c0_i32_0 = arith.constant 0 : i32
    %c0_i32_1 = arith.constant 0 : i32
    return %c0_i32, %c0_i32_0 : i32, i32
  }
  func.func @transform_8(%arg0: i32) -> (i32, i32) {
    %c0_i32 = arith.constant 0 : i32
    %c0_i32_0 = arith.constant 0 : i32
    %c0_i32_1 = arith.constant 0 : i32
    return %c0_i32, %c0_i32_0 : i32, i32
  }
  func.func @transform_9(%arg0: i32) -> (i32, i32) {
    %c0_i32 = arith.constant 0 : i32
    %c0_i32_0 = arith.constant 0 : i32
    %c0_i32_1 = arith.constant 0 : i32
    return %c0_i32, %c0_i32_0 : i32, i32
  }
  func.func @transform_10(%arg0: i32) -> (i32, i32) {
    %c0_i32 = arith.constant 0 : i32
    %c0_i32_0 = arith.constant 0 : i32
    %c0_i32_1 = arith.constant 0 : i32
    return %c0_i32, %c0_i32_0 : i32, i32
  }
  func.func @transform_11(%arg0: i32) -> (i32, i32) {
    %c0_i32 = arith.constant 0 : i32
    %c0_i32_0 = arith.constant 0 : i32
    %c0_i32_1 = arith.constant 0 : i32
    return %c0_i32, %c0_i32_0 : i32, i32
  }
  func.func @transform_12(%arg0: i32) -> (i32, i32) {
    %c0_i32 = arith.constant 0 : i32
    %c0_i32_0 = arith.constant 0 : i32
    %c0_i32_1 = arith.constant 0 : i32
    return %c0_i32, %c0_i32_0 : i32, i32
  }
  func.func @transform_13(%arg0: i32) -> (i32, i32) {
    %c0_i32 = arith.constant 0 : i32
    %c0_i32_0 = arith.constant 0 : i32
    %c0_i32_1 = arith.constant 0 : i32
    return %c0_i32, %c0_i32_0 : i32, i32
  }
  func.func @transform_14(%arg0: i32) -> (i32, i32) {
    %c0_i32 = arith.constant 0 : i32
    %c0_i32_0 = arith.constant 0 : i32
    return %arg0, %c0_i32 : i32, i32
  }
  func.func @transform_15(%arg0: i32) -> (i32, i32) {
    %c0_i32 = arith.constant 0 : i32
    %c0_i32_0 = arith.constant 0 : i32
    return %arg0, %c0_i32 : i32, i32
  }
}

</mosaic_0001>

<bundles_post_ra>
// kernel: tpu_custom_call.1
= control target key start
LH: loop header
LB: loop body
LE: loop exit
PB: predicated region body
PF: predicated region fallthrough
CT: control target
= control target key end

     0   :  { %22 = vsyncpa [#allocation4], 0  ;;  %s10402_s0 = inlined_call_operand.hbm [shape: f32[8,16,64], index: 0, kind: input, shape index: {}]   ;;  %s10403_s1 = inlined_call_operand.hbm [shape: f32[8,16,16], index: 1, kind: input, shape index: {}]   ;;  %s10404_s2 = inlined_call_operand.vmem [shape: f32[8,16], index: 2, kind: input, shape index: {}]   ;;  %s10405_s3 = inlined_call_operand.vmem [shape: bf16[64,32], index: 3, kind: input, shape index: {}]   ;;  %s10406_s4 = inlined_call_operand.vmem [shape: bf16[64,32], index: 4, kind: input, shape index: {}]   ;;  %s10407_s5 = inlined_call_operand.vmem [shape: f32[1,32], index: 5, kind: input, shape index: {}]   ;;  %s10408_s6 = inlined_call_operand.vmem [shape: bf16[32,32], index: 6, kind: input, shape index: {}]   ;;  %s10409_s7 = inlined_call_operand.vmem [shape: bf16[32,32], index: 7, kind: input, shape index: {}]   ;;  %s10410_s8 = inlined_call_operand.vmem [shape: f32[1,32], index: 8, kind: input, shape index: {}]   ;;  %s10411_s9 = inlined_call_operand.vmem [shape: bf16[32,32], index: 9, kind: input, shape index: {}]   ;;  %s10412_s10 = inlined_call_operand.vmem [shape: bf16[32,32], index: 10, kind: input, shape index: {}]   ;;  %s10413_s11 = inlined_call_operand.vmem [shape: f32[1,32], index: 11, kind: input, shape index: {}]   ;;  %s10414_s12 = inlined_call_operand.vmem [shape: f32[1,32], index: 12, kind: input, shape index: {}]   ;;  %s10415_s13 = inlined_call_operand.<no memory space> [shape: f32[1,1], index: 13, kind: input, shape index: {}]   ;;  %s10416_s14 = inlined_call_operand.hbm [shape: f32[8,16], index: 14, kind: output, shape index: {0}]   ;;  %s10417_s15 = inlined_call_operand.hbm [shape: f32[8,16], index: 15, kind: output, shape index: {1}]  }
   0x1   :  { %23 = vsyncpa [#allocation7], 0 }
   0x2   :  { %24 = vsyncpa [#allocation5], 0 }
   0x3   :  { %25 = vsyncpa [#allocation10], 0  ;;  %s6877_s18 = smov [#allocation3]   ;;  %s6781_s22 = scalar_lea.hbm %s10402_s0, 2048 }
   0x4   :  { %s31_s19 = sshll.u32 %s6877_s18, 4  ;;  %p6782_p0 = scmp.ne.s32.totalorder %s10402_s0, %s6781_s22  ;;  %s32_s19 = int_to_ptr.vmem [resolvable:$true] %s31_s19 }
   0x5   :  { %p6785_p1 = scmp.lt.u32.totalorder %s6781_s22, %s10402_s0 }
   0x7   :  { %p6787_p2 = pnand %p6785_p1, %p6782_p0 }
   0x9   :  { %6790 = shalt.err (!%p6787_p2)
}
   0xa   :  { %s6791_s27 = scalar_lea.vmem %s32_s19, 2048  ;;  %p6796_p4 = scmp.lt.s32.totalorder %s32_s19, %s32_s19 }
   0xb   :  { %p6792_p3 = scmp.ne.s32.totalorder %s32_s19, %s6791_s27  ;;  %p6797_p5 = scmp.lt.s32.totalorder %s6791_s27, %s6791_s27 }
   0xd   :  { %p6798_p6 = por %p6797_p5, %p6796_p4 }
   0xf   :  { %p6799_p7 = pnand %p6798_p6, %p6792_p3 }
  0x11   :  { %6802 = shalt.err (!%p6799_p7)
}
  0x12   :  { %s6878_s28 = smov 128   ;;  %s6879_s29 = smov 8  }
  0x13   :  { %37 = dma.hbm_to_vmem [thread:$0]  %s10402_s0, 2048, %s32_s19, [#allocation4], %s6878_s28, %s6878_s28, %s6879_s29  }
  0x14   :  { %s6880_s17 = smov [#allocation6]   ;;  %s6803_s22 = scalar_lea.hbm %s10403_s1, 2048 }
  0x15   :  { %s43_s18 = sshll.u32 %s6880_s17, 4  ;;  %p6804_p8 = scmp.ne.s32.totalorder %s10403_s1, %s6803_s22  ;;  %s44_s18 = int_to_ptr.vmem [resolvable:$true] %s43_s18 }
  0x16   :  { %p6807_p9 = scmp.lt.u32.totalorder %s6803_s22, %s10403_s1 }
  0x18   :  { %p6809_p10 = pnand %p6807_p9, %p6804_p8 }
  0x1a   :  { %6812 = shalt.err (!%p6809_p10)
}
  0x1b   :  { %s6813_s27 = scalar_lea.vmem %s44_s18, 2048  ;;  %p6818_p12 = scmp.lt.s32.totalorder %s44_s18, %s44_s18 }
  0x1c   :  { %p6814_p11 = scmp.ne.s32.totalorder %s44_s18, %s6813_s27  ;;  %p6819_p13 = scmp.lt.s32.totalorder %s6813_s27, %s6813_s27 }
  0x1e   :  { %p6820_p0 = por %p6819_p13, %p6818_p12 }
  0x20   :  { %p6821_p1 = pnand %p6820_p0, %p6814_p11 }
  0x22   :  { %6824 = shalt.err (!%p6821_p1)
}
  0x23   :  { %49 = dma.hbm_to_vmem [thread:$0]  %s10403_s1, 2048, %s44_s18, [#allocation7], %s6878_s28, %s6878_s28, %s6879_s29  }
  0x24   :  { %6869 = dma.done.wait [#allocation4], 2048  }
  0x25   :  { %6870 = vsyncadd [#allocation4], 4294965248 }
  0x26   :  { %6871 = dma.done.wait [#allocation7], 2048  }
  0x27   :  { %6872 = vsyncadd [#allocation7], 4294965248  ;;  %vm113_vm0 = vcmask 130048   ;;  %v7004_v0 = vld [vmem:[#allocation6] sm:$0xff]  ;;  %v7006_v1 = vld [vmem:[#allocation6 + $0x8] sm:$0xff]  ;;  %v10426_v32 = vmov 0  }
  0x28   :  { %v7008_v2 = vld [vmem:[#allocation6 + $0x10] sm:$0xff]  ;;  %v114_v3 = vsel %vm113_vm0, %v7004_v0, 0.0  ;;  %v7014_v5 = vld [vmem:[#allocation6 + $0x18] sm:$0xff]  ;;  %v7016_v6 = vld [vmem:[#allocation6 + $0x20] sm:$0xff]  ;;  %v117_v10 = vsel %vm113_vm0, %v7006_v1, 0.0  ;;  %6323 = vset.pattern.permute.xlu0 %v10426_v32  ;;  %6324 = vset.pattern.permute.xlu1 %v10426_v32  ;;  %v10443_v55 = vmov 2  }
  0x29   :  { %v120_v4 = vsel %vm113_vm0, %v7008_v2, 0.0  ;;  %115 = vadd.xlane.f32.xlu0 %v114_v3  ;;  %v7018_v7 = vld [vmem:[#allocation6 + $0x30] sm:$0xff]  ;;  %v7020_v8 = vld [vmem:[#allocation6 + $0x28] sm:$0xff]  ;;  %v7022_v9 = vld [vmem:[#allocation6 + $0x38] sm:$0xff]  ;;  %v123_v11 = vsel %vm113_vm0, %v7014_v5, 0.0  ;;  %v126_v14 = vsel %vm113_vm0, %v7016_v6, 0.0 }
  0x2a   :  { %121 = vadd.xlane.f32.xlu1 %v120_v4  ;;  %v7028_v12 = vld [vmem:[#allocation6 + $0x40] sm:$0xff]  ;;  %v7030_v13 = vld [vmem:[#allocation6 + $0x48] sm:$0xff]  ;;  %v132_v15 = vsel %vm113_vm0, %v7018_v7, 0.0  ;;  %v129_v16 = vsel %vm113_vm0, %v7020_v8, 0.0  ;;  %v135_v17 = vsel %vm113_vm0, %v7022_v9, 0.0  ;;  %v7044_v20 = vld [vmem:[#allocation6 + $0x58] sm:$0xff] }
  0x2b   :  { %v138_v18 = vsel %vm113_vm0, %v7028_v12, 0.0  ;;  %v141_v19 = vsel %vm113_vm0, %v7030_v13, 0.0  ;;  %v7046_v21 = vld [vmem:[#allocation6 + $0x50] sm:$0xff]  ;;  %v147_v22 = vsel %vm113_vm0, %v7044_v20, 0.0  ;;  %v7052_v24 = vld [vmem:[#allocation6 + $0x60] sm:$0xff]  ;;  %v7054_v25 = vld [vmem:[#allocation6 + $0x68] sm:$0xff] }
  0x2c   :  { %v144_v23 = vsel %vm113_vm0, %v7046_v21, 0.0  ;;  %v150_v26 = vsel %vm113_vm0, %v7052_v24, 0.0  ;;  %v153_v27 = vsel %vm113_vm0, %v7054_v25, 0.0  ;;  %v7060_v28 = vld [vmem:[#allocation6 + $0x78] sm:$0xff]  ;;  %v7062_v29 = vld [vmem:[#allocation6 + $0x70] sm:$0xff]  ;;  %vm2314_vm1 = vcmask 523264  }
  0x2d   :  { %118 = vadd.xlane.f32.xlu0 %v117_v10  ;;  %v159_v30 = vsel %vm113_vm0, %v7060_v28, 0.0  ;;  %v156_v31 = vsel %vm113_vm0, %v7062_v29, 0.0  ;;  %vm3760_vm2 = vcmask 261120   ;;  %vm5812_vm3 = vcmask 130112   ;;  %s6898_s29 = smov [#allocation8]  }
  0x2e   :  { %124 = vadd.xlane.f32.xlu1 %v123_v11  ;;  %vm5877_vm4 = vcmask 1041409   ;;  %vm5879_vm5 = vcmask 1042434   ;;  %vm5881_vm6 = vcmask 1043459   ;;  %vm5883_vm7 = vcmask 1044484   ;;  %s5903_s30 = sshll.u32 %s6898_s29, 4  ;;  %s10369_s30 = int_to_ptr.vmem [resolvable:$true] %s5903_s30 }
  0x2f   :  { %vm5885_vm8 = vcmask 1045509   ;;  %vm5887_vm9 = vcmask 1046534   ;;  %vm5889_vm10 = vcmask 1047559  }
  0x31   :  { %127 = vadd.xlane.f32.xlu0 %v126_v14 }
  0x32   :  { %130 = vadd.xlane.f32.xlu1 %v129_v16 }
  0x35   :  { %133 = vadd.xlane.f32.xlu0 %v132_v15 }
  0x36   :  { %136 = vadd.xlane.f32.xlu1 %v135_v17 }
  0x39   :  { %139 = vadd.xlane.f32.xlu0 %v138_v18 }
  0x3a   :  { %142 = vadd.xlane.f32.xlu1 %v141_v19 }
  0x3d   :  { %145 = vadd.xlane.f32.xlu0 %v144_v23 }
  0x3e   :  { %148 = vadd.xlane.f32.xlu1 %v147_v22 }
  0x41   :  { %151 = vadd.xlane.f32.xlu0 %v150_v26  ;;  %v10434_v26 = vmov 3  }
  0x42   :  { %154 = vadd.xlane.f32.xlu1 %v153_v27 }
  0x45   :  { %157 = vadd.xlane.f32.xlu0 %v156_v31 }
  0x46   :  { %160 = vadd.xlane.f32.xlu1 %v159_v30 }
  0xb6   :  { %v116_v33 = vpop.xlane.xlu0 %115 }
  0xb7   :  { %v122_v34 = vpop.xlane.xlu1 %121  ;;  %v162_v35 = vmax.f32 %v116_v33, 1.0 }
  0xb8   :  { %v164_v36 = vmax.f32 %v122_v34, 1.0 }
  0xb9   :  { %6482 = vrcp.f32 %v162_v35 }
  0xba   :  { %v119_v37 = vpop.xlane.xlu0 %118  ;;  %6484 = vrcp.f32 %v164_v36 }
  0xbb   :  { %v125_v38 = vpop.xlane.xlu1 %124  ;;  %v163_v39 = vmax.f32 %v119_v37, 1.0 }
  0xbc   :  { %v165_v40 = vmax.f32 %v125_v38, 1.0 }
  0xbd   :  { %6486 = vrcp.f32 %v163_v39 }
  0xbe   :  { %6488 = vrcp.f32 %v165_v40  ;;  %v128_v41 = vpop.xlane.xlu0 %127  ;;  %v10436_v40 = vmov 6  }
  0xbf   :  { %v166_v42 = vmax.f32 %v128_v41, 1.0  ;;  %v7070_v43 = vpop.xlane.xlu1 %130 }
  0xc1   :  { %6490 = vrcp.f32 %v166_v42 }
  0xc2   :  { %v134_v44 = vpop.xlane.xlu0 %133 }
  0xc3   :  { %v6483_v45 = vpop.eup %6482  ;;  %v168_v46 = vmax.f32 %v134_v44, 1.0  ;;  %v137_v48 = vpop.xlane.xlu1 %136 }
  0xc4   :  { %v7073_v47 = vmul.f32 %v6483_v45, %v7004_v0  ;;  %v6485_v49 = vpop.eup %6484  ;;  %v169_v53 = vmax.f32 %v137_v48, 1.0  ;;  %v10422_v0 = vmov 1  }
  0xc5   :  { %6492 = vrcp.f32 %v168_v46  ;;  %v7080_v54 = vmul.f32 %v6485_v49, %v7008_v2 }
  0xc6   :  { %212 = vperm.xlu0 %6323, %v7073_v47   ;;  %v140_v56 = vpop.xlane.xlu0 %139  ;;  %6494 = vrcp.f32 %v169_v53 }
  0xc7   :  { %v6487_v50 = vpop.eup %6486  ;;  %v170_v59 = vmax.f32 %v140_v56, 1.0  ;;  %v143_v60 = vpop.xlane.xlu1 %142 }
  0xc8   :  { %v6489_v51 = vpop.eup %6488  ;;  %v7077_v52 = vmul.f32 %v6487_v50, %v7006_v1  ;;  %v171_v63 = vmax.f32 %v143_v60, 1.0 }
  0xc9   :  { %v7085_v57 = vmul.f32 %v6489_v51, %v7014_v5  ;;  %6496 = vrcp.f32 %v170_v59 }
  0xca   :  { %6326 = vset.pattern.permute.xlu0 %v10443_v55  ;;  %217 = vperm.xlu1 %6324, %v7077_v52   ;;  %v7095_v1 = vpop.xlane.xlu0 %145  ;;  %6498 = vrcp.f32 %v171_v63 }
  0xcb   :  { %467 = vperm.xlu0 %6326, %v7073_v47   ;;  %v6491_v58 = vpop.eup %6490  ;;  %v149_v3 = vpop.xlane.xlu1 %148  ;;  %v172_v38 = vmax.f32 %v7095_v1, 1.0 }
  0xcc   :  { %v7091_v61 = vmul.f32 %v6491_v58, %v7016_v6  ;;  %v173_v5 = vmax.f32 %v149_v3, 1.0  ;;  %v10428_v58 = vmov 8  }
  0xce   :  { %222 = vperm.xlu1 %6324, %v7080_v54   ;;  %v152_v11 = vpop.xlane.xlu0 %151  ;;  %6500 = vrcp.f32 %v173_v5 }
  0xcf   :  { %479 = vperm.xlu0 %6326, %v7085_v57   ;;  %v6493_v62 = vpop.eup %6492  ;;  %v7103_v6 = vpop.xlane.xlu1 %154  ;;  %v174_v14 = vmax.f32 %v152_v11, 1.0 }
  0xd0   :  { %v7098_v2 = vmul.f32 %v6493_v62, %v7018_v7  ;;  %v6495_v4 = vpop.eup %6494  ;;  %v175_v35 = vmax.f32 %v7103_v6, 1.0 }
  0xd1   :  { %v7106_v10 = vmul.f32 %v6495_v4, %v7022_v9  ;;  %6502 = vrcp.f32 %v174_v14 }
  0xd2   :  { %227 = vperm.xlu1 %6324, %v7085_v57   ;;  %v158_v27 = vpop.xlane.xlu0 %157 }
  0xd3   :  { %6331 = vset.pattern.permute.xlu0 %v10422_v0  ;;  %v6497_v7 = vpop.eup %6496  ;;  %v161_v16 = vpop.xlane.xlu1 %160  ;;  %v176_v30 = vmax.f32 %v158_v27, 1.0 }
  0xd4   :  { %355 = vperm.xlu0 %6331, %v7091_v61   ;;  %v7113_v15 = vmul.f32 %v6497_v7, %v7028_v12  ;;  %v6499_v9 = vpop.eup %6498  ;;  %v177_v17 = vmax.f32 %v161_v16, 1.0  ;;  %v10418_v7 = vmov 15  }
  0xd5   :  { %v7119_v18 = vmul.f32 %v6499_v9, %v7030_v13 }
  0xd6   :  { %232 = vperm.xlu1 %6324, %v7091_v61   ;;  %6504 = vrcp.f32 %v177_v17 }
  0xd8   :  { %363 = vperm.xlu0 %6331, %v7098_v2   ;;  %v6501_v19 = vpop.eup %6500 }
  0xd9   :  { %v7126_v12 = vmul.f32 %v6501_v19, %v7044_v20 }
  0xda   :  { %6325 = vset.pattern.permute.xlu1 %v10422_v0 }
  0xdb   :  { %339 = vperm.xlu1 %6325, %v7073_v47   ;;  %v6503_v22 = vpop.eup %6502 }
  0xdc   :  { %6340 = vset.pattern.permute.xlu0 %v10443_v55  ;;  %v7133_v13 = vmul.f32 %v6503_v22, %v7052_v24  ;;  %v167_v24 = vmax.f32 %v7070_v43, 1.0  ;;  %v10432_v43 = vmov 7  }
  0xdd   :  { %495 = vperm.xlu0 %6340, %v7106_v10  }
  0xde   :  { %6506 = vrcp.f32 %v167_v24 }
  0xdf   :  { %343 = vperm.xlu1 %6325, %v7077_v52   ;;  %6508 = vrcp.f32 %v176_v30 }
  0xe0   :  { %v6505_v23 = vpop.eup %6504  ;;  %6510 = vrcp.f32 %v175_v35 }
  0xe1   :  { %6350 = vset.pattern.permute.xlu0 %v10426_v32  ;;  %v7139_v20 = vmul.f32 %v6505_v23, %v7060_v28  ;;  %v10430_v28 = vmov 4   ;;  %6512 = vrcp.f32 %v172_v38  ;;  %v10424_v23 = vmov 9  }
  0xe2   :  { %252 = vperm.xlu0 %6350, %v7113_v15  }
  0xe3   :  { %347 = vperm.xlu1 %6325, %v7080_v54   ;;  %10835 = vst [vmem:[#allocation15_spill] sm:$0xff] %v7139_v20 }
  0xe6   :  { %6353 = vset.pattern.permute.xlu0 %v10422_v0 }
  0xe7   :  { %351 = vperm.xlu1 %6325, %v7085_v57   ;;  %375 = vperm.xlu0 %6353, %v7119_v18  }
  0xe8   :  { %v6507_v31 = vpop.eup %6506 }
  0xe9   :  { %v6509_v33 = vpop.eup %6508  ;;  %v7157_v34 = vmul.f32 %v6507_v31, %v7020_v8  ;;  %v10420_v8 = vmov 5  }
  0xea   :  { %v7161_v36 = vmul.f32 %v6509_v33, %v7062_v29  ;;  %v6511_v29 = vpop.eup %6510 }
  0xeb   :  { %6327 = vset.pattern.permute.xlu1 %v10443_v55  ;;  %6357 = vset.pattern.permute.xlu0 %v10426_v32  ;;  %v7175_v37 = vmul.f32 %v6511_v29, %v7054_v25  ;;  %v6513_v25 = vpop.eup %6512 }
  0xec   :  { %471 = vperm.xlu1 %6327, %v7077_v52   ;;  %267 = vperm.xlu0 %6357, %v7126_v12   ;;  %v7196_v39 = vmul.f32 %v6513_v25, %v7046_v21 }
  0xed   :  { %10836 = vst [vmem:[#allocation16_spill] sm:$0xff] %v7175_v37 }
  0xf0   :  { %475 = vperm.xlu1 %6327, %v7080_v54   ;;  %6380 = vset.pattern.permute.xlu0 %v10422_v0 }
  0xf1   :  { %387 = vperm.xlu0 %6380, %v7133_v13  }
  0xf4   :  { %6328 = vset.pattern.permute.xlu1 %v10434_v26 }
  0xf5   :  { %595 = vperm.xlu1 %6328, %v7073_v47   ;;  %6386 = vset.pattern.permute.xlu0 %v10426_v32 }
  0xf6   :  { %287 = vperm.xlu0 %6386, %v7139_v20  }
  0xf9   :  { %603 = vperm.xlu1 %6328, %v7080_v54  }
  0xfa   :  { %6391 = vset.pattern.permute.xlu0 %v10443_v55 }
  0xfb   :  { %515 = vperm.xlu0 %6391, %v7133_v13  }
  0xfd   :  { %607 = vperm.xlu1 %6328, %v7085_v57  }
  0xff   :  { %527 = vperm.xlu0 %6391, %v7139_v20  }
 0x101   :  { %6329 = vset.pattern.permute.xlu1 %v10430_v28 }
 0x102   :  { %727 = vperm.xlu1 %6329, %v7077_v52  }
 0x103   :  { %6397 = vset.pattern.permute.xlu0 %v10434_v26 }
 0x104   :  { %599 = vperm.xlu0 %6397, %v7077_v52  }
 0x106   :  { %731 = vperm.xlu1 %6329, %v7080_v54  }
 0x108   :  { %611 = vperm.xlu0 %6397, %v7091_v61  }
 0x10a   :  { %6330 = vset.pattern.permute.xlu1 %v10426_v32 }
 0x10b   :  { %237 = vperm.xlu1 %6330, %v7157_v34  }
 0x10c   :  { %651 = vperm.xlu0 %6397, %v7161_v36  }
 0x10f   :  { %6332 = vset.pattern.permute.xlu1 %v10422_v0 }
 0x110   :  { %359 = vperm.xlu1 %6332, %v7157_v34   ;;  %6405 = vset.pattern.permute.xlu0 %v10430_v28 }
 0x111   :  { %723 = vperm.xlu0 %6405, %v7073_v47  }
 0x114   :  { %6333 = vset.pattern.permute.xlu1 %v10420_v8 }
 0x115   :  { %851 = vperm.xlu1 %6333, %v7073_v47   ;;  %735 = vperm.xlu0 %6405, %v7085_v57  }
 0x119   :  { %6334 = vset.pattern.permute.xlu1 %v10426_v32  ;;  %739 = vperm.xlu0 %6405, %v7091_v61  }
 0x11a   :  { %242 = vperm.xlu1 %6334, %v7098_v2  }
 0x11d   :  { %775 = vperm.xlu0 %6405, %v7175_v37  }
 0x11e   :  { %247 = vperm.xlu1 %6334, %v7106_v10  }
 0x121   :  { %783 = vperm.xlu0 %6405, %v7139_v20  }
 0x122   :  { %6335 = vset.pattern.permute.xlu1 %v10422_v0 }
 0x123   :  { %367 = vperm.xlu1 %6335, %v7106_v10  }
 0x125   :  { %6414 = vset.pattern.permute.xlu0 %v10420_v8 }
 0x126   :  { %855 = vperm.xlu0 %6414, %v7077_v52  }
 0x127   :  { %6336 = vset.pattern.permute.xlu1 %v10420_v8 }
 0x128   :  { %859 = vperm.xlu1 %6336, %v7080_v54  }
 0x12a   :  { %863 = vperm.xlu0 %6414, %v7085_v57  }
 0x12c   :  { %6337 = vset.pattern.permute.xlu1 %v10443_v55 }
 0x12d   :  { %483 = vperm.xlu1 %6337, %v7091_v61  }
 0x12e   :  { %875 = vperm.xlu0 %6414, %v7098_v2  }
 0x131   :  { %487 = vperm.xlu1 %6337, %v7157_v34  }
 0x132   :  { %887 = vperm.xlu0 %6414, %v7119_v18  }
 0x135   :  { %6338 = vset.pattern.permute.xlu1 %v10436_v40 }
 0x136   :  { %983 = vperm.xlu1 %6338, %v7077_v52   ;;  %891 = vperm.xlu0 %6414, %v7196_v39  }
 0x13a   :  { %6339 = vset.pattern.permute.xlu1 %v10443_v55  ;;  %903 = vperm.xlu0 %6414, %v7175_v37  }
 0x13b   :  { %491 = vperm.xlu1 %6339, %v7098_v2  }
 0x13e   :  { %911 = vperm.xlu0 %6414, %v7139_v20  }
 0x13f   :  { %6341 = vset.pattern.permute.xlu1 %v10436_v40 }
 0x140   :  { %987 = vperm.xlu1 %6341, %v7080_v54  }
 0x142   :  { %6421 = vset.pattern.permute.xlu0 %v10436_v40 }
 0x143   :  { %979 = vperm.xlu0 %6421, %v7073_v47  }
 0x144   :  { %991 = vperm.xlu1 %6341, %v7085_v57  }
 0x145   :  { %v7217_v41 = vpop.permute.xlu0 %212 }
 0x146   :  { %10838 = vst [vmem:[#allocation18_spill] sm:$0xff] %v7217_v41 }
 0x147   :  { %995 = vperm.xlu0 %6421, %v7091_v61  }
 0x148   :  { %6342 = vset.pattern.permute.xlu1 %v10434_v26 }
 0x149   :  { %v7213_v21 = vpop.permute.xlu1 %217  ;;  %615 = vperm.xlu1 %6342, %v7157_v34  }
 0x14a   :  { %10837 = vst [vmem:[#allocation17_spill] sm:$0xff] %v7213_v21  ;;  %v7227_v45 = vpop.permute.xlu0 %467 }
 0x14b   :  { %1003 = vperm.xlu0 %6421, %v7098_v2   ;;  %10841 = vst [vmem:[#allocation21_spill] sm:$0xff] %v7227_v45 }
 0x14d   :  { %v7219_v42 = vpop.permute.xlu1 %222  ;;  %6343 = vset.pattern.permute.xlu1 %v10432_v43 }
 0x14e   :  { %10839 = vst [vmem:[#allocation19_spill] sm:$0xff] %v7219_v42  ;;  %1107 = vperm.xlu1 %6343, %v7073_v47   ;;  %v7233_v48 = vpop.permute.xlu0 %479  ;;  %v7682_v42 = vld [vmem:[#allocation3 + $0x20] sm:$0xff] }
 0x14f   :  { %1015 = vperm.xlu0 %6421, %v7119_v18   ;;  %10843 = vst [vmem:[#allocation23_spill] sm:$0xff] %v7233_v48  ;;  %10981 = vst [vmem:[#allocation145_spill] sm:$0xff] %v7682_v42 }
 0x151   :  { %v7224_v44 = vpop.permute.xlu1 %227 }
 0x152   :  { %10840 = vst [vmem:[#allocation20_spill] sm:$0xff] %v7224_v44  ;;  %6344 = vset.pattern.permute.xlu1 %v10434_v26  ;;  %v7689_v44 = vld [vmem:[#allocation3 + $0x30] sm:$0xff] }
 0x153   :  { %619 = vperm.xlu1 %6344, %v7098_v2   ;;  %1031 = vperm.xlu0 %6421, %v7175_v37   ;;  %v7243_v50 = vpop.permute.xlu0 %355  ;;  %10984 = vst [vmem:[#allocation148_spill] sm:$0xff] %v7689_v44 }
 0x154   :  { %10845 = vst [vmem:[#allocation25_spill] sm:$0xff] %v7243_v50 }
 0x155   :  { %v7231_v46 = vpop.permute.xlu1 %232 }
 0x156   :  { %10842 = vst [vmem:[#allocation22_spill] sm:$0xff] %v7231_v46 }
 0x157   :  { %623 = vperm.xlu1 %6344, %v7106_v10   ;;  %1039 = vperm.xlu0 %6421, %v7139_v20   ;;  %v7249_v53 = vpop.permute.xlu0 %363 }
 0x158   :  { %10847 = vst [vmem:[#allocation27_spill] sm:$0xff] %v7249_v53 }
 0x15a   :  { %v7237_v49 = vpop.permute.xlu1 %339 }
 0x15b   :  { %10844 = vst [vmem:[#allocation24_spill] sm:$0xff] %v7237_v49  ;;  %6345 = vset.pattern.permute.xlu1 %v10432_v43  ;;  %6428 = vset.pattern.permute.xlu0 %v10432_v43  ;;  %v10440_v43 = vmov 10  }
 0x15c   :  { %1119 = vperm.xlu1 %6345, %v7085_v57   ;;  %1111 = vperm.xlu0 %6428, %v7077_v52   ;;  %v7259_v60 = vpop.permute.xlu0 %495 }
 0x15d   :  { %10850 = vst [vmem:[#allocation30_spill] sm:$0xff] %v7259_v60 }
 0x15e   :  { %v7245_v51 = vpop.permute.xlu1 %343 }
 0x15f   :  { %10846 = vst [vmem:[#allocation26_spill] sm:$0xff] %v7245_v51 }
 0x160   :  { %6346 = vset.pattern.permute.xlu1 %v10430_v28  ;;  %1115 = vperm.xlu0 %6428, %v7080_v54  }
 0x161   :  { %743 = vperm.xlu1 %6346, %v7157_v34   ;;  %v7267_v63 = vpop.permute.xlu0 %252 }
 0x162   :  { %v7252_v56 = vpop.permute.xlu1 %347  ;;  %10852 = vst [vmem:[#allocation32_spill] sm:$0xff] %v7267_v63 }
 0x163   :  { %10848 = vst [vmem:[#allocation28_spill] sm:$0xff] %v7252_v56 }
 0x164   :  { %1123 = vperm.xlu0 %6428, %v7091_v61  }
 0x165   :  { %6347 = vset.pattern.permute.xlu1 %v10428_v58 }
 0x166   :  { %v7256_v59 = vpop.permute.xlu1 %351  ;;  %1235 = vperm.xlu1 %6347, %v7073_v47   ;;  %v7273_v3 = vpop.permute.xlu0 %375 }
 0x167   :  { %10849 = vst [vmem:[#allocation29_spill] sm:$0xff] %v7256_v59  ;;  %10854 = vst [vmem:[#allocation34_spill] sm:$0xff] %v7273_v3  ;;  %v10892_v3 = vmov 3  }
 0x168   :  { %1131 = vperm.xlu0 %6428, %v7098_v2  }
 0x16a   :  { %6348 = vset.pattern.permute.xlu1 %v10430_v28 }
 0x16b   :  { %v7263_v62 = vpop.permute.xlu1 %471  ;;  %747 = vperm.xlu1 %6348, %v7098_v2   ;;  %v7284_v6 = vpop.permute.xlu0 %267 }
 0x16c   :  { %10851 = vst [vmem:[#allocation31_spill] sm:$0xff] %v7263_v62  ;;  %1139 = vperm.xlu0 %6428, %v7113_v15   ;;  %10857 = vst [vmem:[#allocation37_spill] sm:$0xff] %v7284_v6 }
 0x16f   :  { %v7269_v1 = vpop.permute.xlu1 %475  ;;  %751 = vperm.xlu1 %6348, %v7106_v10  }
 0x170   :  { %10853 = vst [vmem:[#allocation33_spill] sm:$0xff] %v7269_v1  ;;  %1151 = vperm.xlu0 %6428, %v7126_v12   ;;  %v7293_v14 = vpop.permute.xlu0 %387 }
 0x171   :  { %10859 = vst [vmem:[#allocation39_spill] sm:$0xff] %v7293_v14  ;;  %v10453_v14 = vmov 11  }
 0x173   :  { %6349 = vset.pattern.permute.xlu1 %v10428_v58 }
 0x174   :  { %v7276_v4 = vpop.permute.xlu1 %595  ;;  %1247 = vperm.xlu1 %6349, %v7085_v57   ;;  %1159 = vperm.xlu0 %6428, %v7175_v37  }
 0x175   :  { %10855 = vst [vmem:[#allocation35_spill] sm:$0xff] %v7276_v4  ;;  %v7300_v9 = vpop.permute.xlu0 %287 }
 0x176   :  { %10861 = vst [vmem:[#allocation41_spill] sm:$0xff] %v7300_v9  ;;  %v10889_v9 = vmov 10  }
 0x178   :  { %v7280_v5 = vpop.permute.xlu1 %603  ;;  %6351 = vset.pattern.permute.xlu1 %v10426_v32  ;;  %1167 = vperm.xlu0 %6428, %v7139_v20  }
 0x179   :  { %10856 = vst [vmem:[#allocation36_spill] sm:$0xff] %v7280_v5  ;;  %257 = vperm.xlu1 %6351, %v7119_v18  }
 0x17a   :  { %v7310_v22 = vpop.permute.xlu0 %515 }
 0x17b   :  { %10864 = vst [vmem:[#allocation44_spill] sm:$0xff] %v7310_v22  ;;  %v10886_v22 = vmov 6  }
 0x17c   :  { %v7287_v11 = vpop.permute.xlu1 %607  ;;  %6435 = vset.pattern.permute.xlu0 %v10418_v7 }
 0x17d   :  { %10858 = vst [vmem:[#allocation38_spill] sm:$0xff] %v7287_v11  ;;  %6352 = vset.pattern.permute.xlu1 %v10422_v0  ;;  %2139 = vperm.xlu0 %6435, %v7080_v54   ;;  %v10966_v11 = vmov 14  }
 0x17e   :  { %371 = vperm.xlu1 %6352, %v7113_v15   ;;  %v7318_v24 = vpop.permute.xlu0 %527 }
 0x17f   :  { %10866 = vst [vmem:[#allocation46_spill] sm:$0xff] %v7318_v24 }
 0x181   :  { %v7295_v16 = vpop.permute.xlu1 %727  ;;  %2147 = vperm.xlu0 %6435, %v7091_v61  }
 0x182   :  { %10860 = vst [vmem:[#allocation40_spill] sm:$0xff] %v7295_v16  ;;  %6354 = vset.pattern.permute.xlu1 %v10420_v8 }
 0x183   :  { %867 = vperm.xlu1 %6354, %v7091_v61   ;;  %v7327_v31 = vpop.permute.xlu0 %599 }
 0x184   :  { %10868 = vst [vmem:[#allocation48_spill] sm:$0xff] %v7327_v31 }
 0x185   :  { %v7302_v17 = vpop.permute.xlu1 %731  ;;  %2155 = vperm.xlu0 %6435, %v7098_v2  }
 0x186   :  { %10862 = vst [vmem:[#allocation42_spill] sm:$0xff] %v7302_v17 }
 0x187   :  { %871 = vperm.xlu1 %6354, %v7157_v34   ;;  %v7333_v35 = vpop.permute.xlu0 %611 }
 0x188   :  { %10870 = vst [vmem:[#allocation50_spill] sm:$0xff] %v7333_v35 }
 0x189   :  { %6437 = vset.pattern.permute.xlu0 %v10428_v58 }
 0x18a   :  { %v7307_v19 = vpop.permute.xlu1 %237  ;;  %1239 = vperm.xlu0 %6437, %v7077_v52  }
 0x18b   :  { %10863 = vst [vmem:[#allocation43_spill] sm:$0xff] %v7307_v19  ;;  %6355 = vset.pattern.permute.xlu1 %v10424_v23  ;;  %v7343_v25 = vpop.permute.xlu0 %651 }
 0x18c   :  { %1367 = vperm.xlu1 %6355, %v7077_v52   ;;  %10873 = vst [vmem:[#allocation53_spill] sm:$0xff] %v7343_v25 }
 0x18e   :  { %1243 = vperm.xlu0 %6437, %v7080_v54  }
 0x18f   :  { %v7315_v27 = vpop.permute.xlu1 %359 }
 0x190   :  { %10865 = vst [vmem:[#allocation45_spill] sm:$0xff] %v7315_v27  ;;  %6356 = vset.pattern.permute.xlu1 %v10426_v32 }
 0x191   :  { %262 = vperm.xlu1 %6356, %v7196_v39  }
 0x192   :  { %1251 = vperm.xlu0 %6437, %v7091_v61  }
 0x194   :  { %v7322_v30 = vpop.permute.xlu1 %851 }
 0x195   :  { %10867 = vst [vmem:[#allocation47_spill] sm:$0xff] %v7322_v30  ;;  %6358 = vset.pattern.permute.xlu1 %v10422_v0 }
 0x196   :  { %379 = vperm.xlu1 %6358, %v7196_v39   ;;  %1259 = vperm.xlu0 %6437, %v7098_v2  }
 0x199   :  { %v7329_v33 = vpop.permute.xlu1 %242 }
 0x19a   :  { %10869 = vst [vmem:[#allocation49_spill] sm:$0xff] %v7329_v33  ;;  %383 = vperm.xlu1 %6358, %v7126_v12   ;;  %1287 = vperm.xlu0 %6437, %v7175_v37   ;;  %v10899_v33 = vmov 11  }
 0x19d   :  { %v7335_v29 = vpop.permute.xlu1 %247 }
 0x19e   :  { %10871 = vst [vmem:[#allocation51_spill] sm:$0xff] %v7335_v29  ;;  %6359 = vset.pattern.permute.xlu1 %v10420_v8  ;;  %1291 = vperm.xlu0 %6437, %v7161_v36   ;;  %v7352_v8 = vpop.permute.xlu0 %723  ;;  %v10896_v29 = vmov 7  }
 0x19f   :  { %879 = vperm.xlu1 %6359, %v7106_v10   ;;  %10875 = vst [vmem:[#allocation55_spill] sm:$0xff] %v7352_v8 }
 0x1a2   :  { %v7340_v38 = vpop.permute.xlu1 %367  ;;  %6441 = vset.pattern.permute.xlu0 %v10424_v23 }
 0x1a3   :  { %10872 = vst [vmem:[#allocation52_spill] sm:$0xff] %v7340_v38  ;;  %6360 = vset.pattern.permute.xlu1 %v10424_v23  ;;  %1363 = vperm.xlu0 %6441, %v7073_v47   ;;  %v7359_v23 = vpop.permute.xlu0 %735 }
 0x1a4   :  { %1371 = vperm.xlu1 %6360, %v7080_v54   ;;  %10877 = vst [vmem:[#allocation57_spill] sm:$0xff] %v7359_v23 }
 0x1a7   :  { %v7348_v7 = vpop.permute.xlu1 %859  ;;  %1375 = vperm.xlu0 %6441, %v7085_v57   ;;  %v7367_v58 = vpop.permute.xlu0 %739 }
 0x1a8   :  { %10874 = vst [vmem:[#allocation54_spill] sm:$0xff] %v7348_v7  ;;  %6361 = vset.pattern.permute.xlu1 %v10443_v55  ;;  %10879 = vst [vmem:[#allocation59_spill] sm:$0xff] %v7367_v58  ;;  %v10914_v58 = vmov 8  }
 0x1a9   :  { %499 = vperm.xlu1 %6361, %v7113_v15  }
 0x1ab   :  { %1391 = vperm.xlu0 %6441, %v7106_v10  }
 0x1ac   :  { %v7356_v0 = vpop.permute.xlu1 %483 }
 0x1ad   :  { %10876 = vst [vmem:[#allocation56_spill] sm:$0xff] %v7356_v0  ;;  %503 = vperm.xlu1 %6361, %v7119_v18  }
 0x1af   :  { %1415 = vperm.xlu0 %6441, %v7175_v37  }
 0x1b0   :  { %v7362_v32 = vpop.permute.xlu1 %487 }
 0x1b1   :  { %10878 = vst [vmem:[#allocation58_spill] sm:$0xff] %v7362_v32  ;;  %6362 = vset.pattern.permute.xlu1 %v10436_v40  ;;  %v7377_v40 = vpop.permute.xlu0 %775  ;;  %v10480_v32 = vmov 13  }
 0x1b2   :  { %999 = vperm.xlu1 %6362, %v7157_v34   ;;  %10882 = vst [vmem:[#allocation62_spill] sm:$0xff] %v7377_v40 }
 0x1b3   :  { %1419 = vperm.xlu0 %6441, %v7161_v36  }
 0x1b5   :  { %v7369_v28 = vpop.permute.xlu1 %983  ;;  %v7386_v24 = vpop.permute.xlu0 %783 }
 0x1b6   :  { %10880 = vst [vmem:[#allocation60_spill] sm:$0xff] %v7369_v28  ;;  %6363 = vset.pattern.permute.xlu1 %v10440_v43  ;;  %10884 = vst [vmem:[#allocation64_spill] sm:$0xff] %v7386_v24 }
 0x1b7   :  { %1491 = vperm.xlu1 %6363, %v7073_v47   ;;  %6446 = vset.pattern.permute.xlu0 %v10440_v43 }
 0x1b8   :  { %1495 = vperm.xlu0 %6446, %v7077_v52  }
 0x1ba   :  { %v7375_v26 = vpop.permute.xlu1 %491 }
 0x1bb   :  { %10881 = vst [vmem:[#allocation61_spill] sm:$0xff] %v7375_v26  ;;  %6364 = vset.pattern.permute.xlu1 %v10443_v55  ;;  %v7393_v55 = vpop.permute.xlu0 %855 }
 0x1bc   :  { %507 = vperm.xlu1 %6364, %v7196_v39   ;;  %1503 = vperm.xlu0 %6446, %v7085_v57   ;;  %10887 = vst [vmem:[#allocation66_spill] sm:$0xff] %v7393_v55 }
 0x1bf   :  { %v7382_v25 = vpop.permute.xlu1 %987  ;;  %v7401_v24 = vpop.permute.xlu0 %863 }
 0x1c0   :  { %10883 = vst [vmem:[#allocation63_spill] sm:$0xff] %v7382_v25  ;;  %511 = vperm.xlu1 %6364, %v7126_v12   ;;  %1515 = vperm.xlu0 %6446, %v7098_v2   ;;  %10890 = vst [vmem:[#allocation68_spill] sm:$0xff] %v7401_v24  ;;  %v10942_v25 = vmov 13  }
 0x1c3   :  { %v7388_v43 = vpop.permute.xlu1 %991  ;;  %v7411_v60 = vpop.permute.xlu0 %875 }
 0x1c4   :  { %10885 = vst [vmem:[#allocation65_spill] sm:$0xff] %v7388_v43  ;;  %6365 = vset.pattern.permute.xlu1 %v10886_v22  ;;  %1543 = vperm.xlu0 %6446, %v7175_v37   ;;  %10894 = vst [vmem:[#allocation71_spill] sm:$0xff] %v7411_v60  ;;  %v10938_v43 = vmov 9  }
 0x1c5   :  { %1007 = vperm.xlu1 %6365, %v7106_v10  }
 0x1c7   :  { %v7419_v38 = vpop.permute.xlu0 %887 }
 0x1c8   :  { %v7395_v40 = vpop.permute.xlu1 %615  ;;  %1547 = vperm.xlu0 %6446, %v7161_v36   ;;  %10897 = vst [vmem:[#allocation73_spill] sm:$0xff] %v7419_v38 }
 0x1c9   :  { %10888 = vst [vmem:[#allocation67_spill] sm:$0xff] %v7395_v40  ;;  %6366 = vset.pattern.permute.xlu1 %v10889_v9  ;;  %v10909_v40 = vmov 4  }
 0x1ca   :  { %1499 = vperm.xlu1 %6366, %v7080_v54  }
 0x1cb   :  { %v7427_v60 = vpop.permute.xlu0 %891 }
 0x1cc   :  { %6451 = vset.pattern.permute.xlu0 %v10453_v14  ;;  %10900 = vst [vmem:[#allocation75_spill] sm:$0xff] %v7427_v60 }
 0x1cd   :  { %v7403_v6 = vpop.permute.xlu1 %1107  ;;  %1623 = vperm.xlu0 %6451, %v7077_v52  }
 0x1ce   :  { %10891 = vst [vmem:[#allocation69_spill] sm:$0xff] %v7403_v6  ;;  %6367 = vset.pattern.permute.xlu1 %v10892_v3 }
 0x1cf   :  { %627 = vperm.xlu1 %6367, %v7113_v15   ;;  %v7435_v38 = vpop.permute.xlu0 %903 }
 0x1d0   :  { %10902 = vst [vmem:[#allocation77_spill] sm:$0xff] %v7435_v38 }
 0x1d1   :  { %1631 = vperm.xlu0 %6451, %v7085_v57  }
 0x1d2   :  { %v7409_v63 = vpop.permute.xlu1 %619 }
 0x1d3   :  { %10893 = vst [vmem:[#allocation70_spill] sm:$0xff] %v7409_v63  ;;  %631 = vperm.xlu1 %6367, %v7119_v18  }
 0x1d5   :  { %1639 = vperm.xlu0 %6451, %v7157_v34  }
 0x1d6   :  { %v7415_v14 = vpop.permute.xlu1 %623 }
 0x1d7   :  { %10895 = vst [vmem:[#allocation72_spill] sm:$0xff] %v7415_v14  ;;  %6368 = vset.pattern.permute.xlu1 %v10896_v29  ;;  %v10466_v14 = vmov 12  }
 0x1d8   :  { %1127 = vperm.xlu1 %6368, %v7157_v34  }
 0x1d9   :  { %1671 = vperm.xlu0 %6451, %v7175_v37  }
 0x1db   :  { %v7422_v26 = vpop.permute.xlu1 %1119 }
 0x1dc   :  { %10898 = vst [vmem:[#allocation74_spill] sm:$0xff] %v7422_v26  ;;  %6369 = vset.pattern.permute.xlu1 %v10899_v33 }
 0x1dd   :  { %1619 = vperm.xlu1 %6369, %v7073_v47   ;;  %1675 = vperm.xlu0 %6451, %v7161_v36  }
 0x1e0   :  { %v7429_v63 = vpop.permute.xlu1 %743 }
 0x1e1   :  { %10901 = vst [vmem:[#allocation76_spill] sm:$0xff] %v7429_v63  ;;  %6370 = vset.pattern.permute.xlu1 %v10892_v3  ;;  %6456 = vset.pattern.permute.xlu0 %v10466_v14  ;;  %v7445_v63 = vpop.permute.xlu0 %911 }
 0x1e2   :  { %635 = vperm.xlu1 %6370, %v7196_v39   ;;  %1751 = vperm.xlu0 %6456, %v7077_v52   ;;  %10905 = vst [vmem:[#allocation80_spill] sm:$0xff] %v7445_v63 }
 0x1e5   :  { %v7437_v53 = vpop.permute.xlu1 %1235  ;;  %v7453_v38 = vpop.permute.xlu0 %979 }
 0x1e6   :  { %10903 = vst [vmem:[#allocation78_spill] sm:$0xff] %v7437_v53  ;;  %639 = vperm.xlu1 %6370, %v7126_v12   ;;  %1759 = vperm.xlu0 %6456, %v7085_v57   ;;  %10907 = vst [vmem:[#allocation82_spill] sm:$0xff] %v7453_v38 }
 0x1e9   :  { %v7461_v63 = vpop.permute.xlu0 %995 }
 0x1ea   :  { %v7441_v60 = vpop.permute.xlu1 %747  ;;  %6371 = vset.pattern.permute.xlu1 %v10896_v29  ;;  %1763 = vperm.xlu0 %6456, %v7091_v61   ;;  %10910 = vst [vmem:[#allocation84_spill] sm:$0xff] %v7461_v63 }
 0x1eb   :  { %10904 = vst [vmem:[#allocation79_spill] sm:$0xff] %v7441_v60  ;;  %1135 = vperm.xlu1 %6371, %v7106_v10  }
 0x1ed   :  { %v7468_v19 = vpop.permute.xlu0 %1003 }
 0x1ee   :  { %v7448_v14 = vpop.permute.xlu1 %751  ;;  %1771 = vperm.xlu0 %6456, %v7098_v2   ;;  %10912 = vst [vmem:[#allocation86_spill] sm:$0xff] %v7468_v19 }
 0x1ef   :  { %10906 = vst [vmem:[#allocation81_spill] sm:$0xff] %v7448_v14  ;;  %6372 = vset.pattern.permute.xlu1 %v10899_v33 }
 0x1f0   :  { %1627 = vperm.xlu1 %6372, %v7080_v54  }
 0x1f1   :  { %v7478_v35 = vpop.permute.xlu0 %1015 }
 0x1f2   :  { %1787 = vperm.xlu0 %6456, %v7196_v39   ;;  %10917 = vst [vmem:[#allocation89_spill] sm:$0xff] %v7478_v35 }
 0x1f3   :  { %v7456_v60 = vpop.permute.xlu1 %1247 }
 0x1f4   :  { %10908 = vst [vmem:[#allocation83_spill] sm:$0xff] %v7456_v60  ;;  %6373 = vset.pattern.permute.xlu1 %v10909_v40  ;;  %v10931_v60 = vmov 1  }
 0x1f5   :  { %755 = vperm.xlu1 %6373, %v7113_v15  }
 0x1f6   :  { %1799 = vperm.xlu0 %6456, %v7175_v37  }
 0x1f8   :  { %v7463_v14 = vpop.permute.xlu1 %257 }
 0x1f9   :  { %10911 = vst [vmem:[#allocation85_spill] sm:$0xff] %v7463_v14  ;;  %759 = vperm.xlu1 %6373, %v7119_v18   ;;  %v10916_v14 = vmov 12  }
 0x1fa   :  { %6460 = vset.pattern.permute.xlu0 %v10480_v32 }
 0x1fb   :  { %1875 = vperm.xlu0 %6460, %v7073_v47  }
 0x1fd   :  { %v7470_v27 = vpop.permute.xlu1 %371  ;;  %6374 = vset.pattern.permute.xlu1 %v10914_v58 }
 0x1fe   :  { %10913 = vst [vmem:[#allocation87_spill] sm:$0xff] %v7470_v27  ;;  %1255 = vperm.xlu1 %6374, %v7157_v34   ;;  %v7487_v27 = vpop.permute.xlu0 %1031 }
 0x1ff   :  { %1891 = vperm.xlu0 %6460, %v7091_v61   ;;  %10919 = vst [vmem:[#allocation91_spill] sm:$0xff] %v7487_v27 }
 0x202   :  { %v7475_v63 = vpop.permute.xlu1 %867  ;;  %6375 = vset.pattern.permute.xlu1 %v10916_v14  ;;  %v7493_v35 = vpop.permute.xlu0 %1039 }
 0x203   :  { %10915 = vst [vmem:[#allocation88_spill] sm:$0xff] %v7475_v63  ;;  %1747 = vperm.xlu1 %6375, %v7073_v47   ;;  %1899 = vperm.xlu0 %6460, %v7098_v2   ;;  %10921 = vst [vmem:[#allocation93_spill] sm:$0xff] %v7493_v35  ;;  %v10492_v63 = vmov 14  }
 0x206   :  { %v7482_v32 = vpop.permute.xlu1 %871  ;;  %v7502_v27 = vpop.permute.xlu0 %1111 }
 0x207   :  { %10918 = vst [vmem:[#allocation90_spill] sm:$0xff] %v7482_v32  ;;  %6376 = vset.pattern.permute.xlu1 %v10909_v40  ;;  %1915 = vperm.xlu0 %6460, %v7196_v39   ;;  %10923 = vst [vmem:[#allocation95_spill] sm:$0xff] %v7502_v27 }
 0x208   :  { %763 = vperm.xlu1 %6376, %v7196_v39  }
 0x20a   :  { %v7512_v50 = vpop.permute.xlu0 %1115 }
 0x20b   :  { %v7489_v19 = vpop.permute.xlu1 %1367  ;;  %1923 = vperm.xlu0 %6460, %v7133_v13   ;;  %10927 = vst [vmem:[#allocation98_spill] sm:$0xff] %v7512_v50  ;;  %v10934_v50 = vmov 5  }
 0x20c   :  { %10920 = vst [vmem:[#allocation92_spill] sm:$0xff] %v7489_v19  ;;  %767 = vperm.xlu1 %6376, %v7126_v12  }
 0x20f   :  { %1935 = vperm.xlu0 %6460, %v7139_v20  }
 0x210   :  { %6377 = vset.pattern.permute.xlu1 %v10914_v58  ;;  %v7497_v32 = vpop.permute.xlu1 %262 }
 0x211   :  { %10922 = vst [vmem:[#allocation94_spill] sm:$0xff] %v7497_v32  ;;  %1263 = vperm.xlu1 %6377, %v7106_v10   ;;  %v10926_v32 = vmov 0  }
 0x213   :  { %6462 = vset.pattern.permute.xlu0 %v10492_v63 }
 0x214   :  { %2003 = vperm.xlu0 %6462, %v7073_v47  }
 0x215   :  { %6378 = vset.pattern.permute.xlu1 %v10916_v14  ;;  %v7505_v0 = vpop.permute.xlu1 %379 }
 0x216   :  { %10924 = vst [vmem:[#allocation96_spill] sm:$0xff] %v7505_v0  ;;  %1755 = vperm.xlu1 %6378, %v7080_v54   ;;  %v7520_v0 = vpop.permute.xlu0 %1123 }
 0x217   :  { %10929 = vst [vmem:[#allocation100_spill] sm:$0xff] %v7520_v0  ;;  %v10936_v0 = vmov 15  }
 0x218   :  { %2015 = vperm.xlu0 %6462, %v7085_v57  }
 0x219   :  { %v7509_v35 = vpop.permute.xlu1 %383 }
 0x21a   :  { %10925 = vst [vmem:[#allocation97_spill] sm:$0xff] %v7509_v35  ;;  %6379 = vset.pattern.permute.xlu1 %v10926_v32  ;;  %v7527_v35 = vpop.permute.xlu0 %1131 }
 0x21b   :  { %272 = vperm.xlu1 %6379, %v7133_v13   ;;  %10932 = vst [vmem:[#allocation102_spill] sm:$0xff] %v7527_v35 }
 0x21c   :  { %2019 = vperm.xlu0 %6462, %v7091_v61  }
 0x21e   :  { %v7516_v63 = vpop.permute.xlu1 %879 }
 0x21f   :  { %10928 = vst [vmem:[#allocation99_spill] sm:$0xff] %v7516_v63  ;;  %277 = vperm.xlu1 %6379, %v7175_v37  }
 0x220   :  { %2027 = vperm.xlu0 %6462, %v7098_v2  }
 0x223   :  { %v7522_v46 = vpop.permute.xlu1 %1371  ;;  %6381 = vset.pattern.permute.xlu1 %v10931_v60 }
 0x224   :  { %10930 = vst [vmem:[#allocation101_spill] sm:$0xff] %v7522_v46  ;;  %391 = vperm.xlu1 %6381, %v7175_v37   ;;  %2043 = vperm.xlu0 %6462, %v7196_v39   ;;  %v7537_v46 = vpop.permute.xlu0 %1139 }
 0x225   :  { %10937 = vst [vmem:[#allocation105_spill] sm:$0xff] %v7537_v46 }
 0x228   :  { %v7529_v26 = vpop.permute.xlu1 %499  ;;  %6382 = vset.pattern.permute.xlu1 %v10934_v50  ;;  %2055 = vperm.xlu0 %6462, %v7175_v37  }
 0x229   :  { %10933 = vst [vmem:[#allocation103_spill] sm:$0xff] %v7529_v26  ;;  %883 = vperm.xlu1 %6382, %v7113_v15   ;;  %v7546_v26 = vpop.permute.xlu0 %1151 }
 0x22a   :  { %10940 = vst [vmem:[#allocation107_spill] sm:$0xff] %v7546_v26 }
 0x22c   :  { %v7534_v63 = vpop.permute.xlu1 %503  ;;  %6464 = vset.pattern.permute.xlu0 %v10936_v0 }
 0x22d   :  { %10935 = vst [vmem:[#allocation104_spill] sm:$0xff] %v7534_v63  ;;  %6383 = vset.pattern.permute.xlu1 %v10938_v43  ;;  %2171 = vperm.xlu0 %6464, %v7196_v39   ;;  %v7553_v46 = vpop.permute.xlu0 %1159 }
 0x22e   :  { %1379 = vperm.xlu1 %6383, %v7091_v61   ;;  %10943 = vst [vmem:[#allocation109_spill] sm:$0xff] %v7553_v46 }
 0x231   :  { %v7542_v35 = vpop.permute.xlu1 %999  ;;  %2179 = vperm.xlu0 %6464, %v7133_v13  }
 0x232   :  { %10939 = vst [vmem:[#allocation106_spill] sm:$0xff] %v7542_v35  ;;  %1383 = vperm.xlu1 %6383, %v7157_v34   ;;  %v7559_v35 = vpop.permute.xlu0 %1167 }
 0x233   :  { %10945 = vst [vmem:[#allocation111_spill] sm:$0xff] %v7559_v35 }
 0x235   :  { %2191 = vperm.xlu0 %6464, %v7139_v20  }
 0x236   :  { %v7549_v63 = vpop.permute.xlu1 %1491  ;;  %6384 = vset.pattern.permute.xlu1 %v10942_v25  ;;  %v7567_v23 = vpop.permute.xlu0 %2139 }
 0x237   :  { %10941 = vst [vmem:[#allocation108_spill] sm:$0xff] %v7549_v63  ;;  %1879 = vperm.xlu1 %6384, %v7077_v52   ;;  %10948 = vst [vmem:[#allocation114_spill] sm:$0xff] %v7567_v23 }
 0x23b   :  { %v7555_v24 = vpop.permute.xlu1 %507  ;;  %6385 = vset.pattern.permute.xlu1 %v10926_v32  ;;  %v7574_v32 = vpop.permute.xlu0 %2147 }
 0x23c   :  { %10944 = vst [vmem:[#allocation110_spill] sm:$0xff] %v7555_v24  ;;  %282 = vperm.xlu1 %6385, %v7161_v36   ;;  %10950 = vst [vmem:[#allocation116_spill] sm:$0xff] %v7574_v32 }
 0x23f   :  { %v7561_v7 = vpop.permute.xlu1 %511 }
 0x240   :  { %10946 = vst [vmem:[#allocation112_spill] sm:$0xff] %v7561_v7  ;;  %6387 = vset.pattern.permute.xlu1 %v10931_v60  ;;  %v7580_v60 = vpop.permute.xlu0 %2155 }
 0x241   :  { %395 = vperm.xlu1 %6387, %v7161_v36   ;;  %10952 = vst [vmem:[#allocation118_spill] sm:$0xff] %v7580_v60 }
 0x244   :  { %v7565_v26 = vpop.permute.xlu1 %1007  ;;  %v7586_v35 = vpop.permute.xlu0 %1239 }
 0x245   :  { %10947 = vst [vmem:[#allocation113_spill] sm:$0xff] %v7565_v26  ;;  %399 = vperm.xlu1 %6387, %v7139_v20   ;;  %10954 = vst [vmem:[#allocation120_spill] sm:$0xff] %v7586_v35 }
 0x248   :  { %v7594_v23 = vpop.permute.xlu0 %1243 }
 0x249   :  { %v7570_v46 = vpop.permute.xlu1 %1499  ;;  %6388 = vset.pattern.permute.xlu1 %v10934_v50  ;;  %10958 = vst [vmem:[#allocation123_spill] sm:$0xff] %v7594_v23 }
 0x24a   :  { %10949 = vst [vmem:[#allocation115_spill] sm:$0xff] %v7570_v46  ;;  %895 = vperm.xlu1 %6388, %v7126_v12  }
 0x24e   :  { %v7576_v24 = vpop.permute.xlu1 %627  ;;  %6389 = vset.pattern.permute.xlu1 %v10938_v43 }
 0x24f   :  { %10951 = vst [vmem:[#allocation117_spill] sm:$0xff] %v7576_v24  ;;  %1387 = vperm.xlu1 %6389, %v7098_v2   ;;  %v10957_v24 = vmov 2  }
 0x252   :  { %v7582_v7 = vpop.permute.xlu1 %631 }
 0x253   :  { %10953 = vst [vmem:[#allocation119_spill] sm:$0xff] %v7582_v7  ;;  %6390 = vset.pattern.permute.xlu1 %v10942_v25  ;;  %v7601_v7 = vpop.permute.xlu0 %1251 }
 0x254   :  { %1883 = vperm.xlu1 %6390, %v7080_v54   ;;  %10960 = vst [vmem:[#allocation125_spill] sm:$0xff] %v7601_v7 }
 0x257   :  { %v7588_v26 = vpop.permute.xlu1 %1127 }
 0x258   :  { %10955 = vst [vmem:[#allocation121_spill] sm:$0xff] %v7588_v26  ;;  %1887 = vperm.xlu1 %6390, %v7085_v57   ;;  %v7607_v26 = vpop.permute.xlu0 %1259 }
 0x259   :  { %10962 = vst [vmem:[#allocation127_spill] sm:$0xff] %v7607_v26 }
 0x25c   :  { %v7591_v32 = vpop.permute.xlu1 %1619  ;;  %6392 = vset.pattern.permute.xlu1 %v10957_v24  ;;  %v7612_v23 = vpop.permute.xlu0 %1287 }
 0x25d   :  { %10956 = vst [vmem:[#allocation122_spill] sm:$0xff] %v7591_v32  ;;  %519 = vperm.xlu1 %6392, %v7175_v37   ;;  %10964 = vst [vmem:[#allocation129_spill] sm:$0xff] %v7612_v23 }
 0x261   :  { %v7597_v60 = vpop.permute.xlu1 %635  ;;  %6393 = vset.pattern.permute.xlu1 %v10886_v22 }
 0x262   :  { %10959 = vst [vmem:[#allocation124_spill] sm:$0xff] %v7597_v60  ;;  %1011 = vperm.xlu1 %6393, %v7113_v15  }
 0x265   :  { %v7603_v46 = vpop.permute.xlu1 %639 }
 0x266   :  { %10961 = vst [vmem:[#allocation126_spill] sm:$0xff] %v7603_v46  ;;  %6394 = vset.pattern.permute.xlu1 %v10889_v9  ;;  %v7621_v46 = vpop.permute.xlu0 %1291 }
 0x267   :  { %1507 = vperm.xlu1 %6394, %v7091_v61   ;;  %10968 = vst [vmem:[#allocation132_spill] sm:$0xff] %v7621_v46 }
 0x26a   :  { %v7609_v17 = vpop.permute.xlu1 %1135  ;;  %v7628_v23 = vpop.permute.xlu0 %1363 }
 0x26b   :  { %10963 = vst [vmem:[#allocation128_spill] sm:$0xff] %v7609_v17  ;;  %1511 = vperm.xlu1 %6394, %v7157_v34   ;;  %10970 = vst [vmem:[#allocation134_spill] sm:$0xff] %v7628_v23 }
 0x26f   :  { %v7614_v60 = vpop.permute.xlu1 %1627  ;;  %6395 = vset.pattern.permute.xlu1 %v10966_v11 }
 0x270   :  { %10965 = vst [vmem:[#allocation130_spill] sm:$0xff] %v7614_v60  ;;  %2007 = vperm.xlu1 %6395, %v7077_v52  }
 0x274   :  { %v7618_v7 = vpop.permute.xlu1 %755  ;;  %6396 = vset.pattern.permute.xlu1 %v10957_v24  ;;  %v6466_v24 = vld [vmem:[%s10406_s4] sm:$0xff]  }
 0x275   :  { %10967 = vst [vmem:[#allocation131_spill] sm:$0xff] %v7618_v7  ;;  %523 = vperm.xlu1 %6396, %v7161_v36   ;;  %v7636_v7 = vpop.permute.xlu0 %1375  ;;  %6124 = vmatprep.subr.bf16.mxu0 %v6466_v24 }
 0x276   :  { %10972 = vst [vmem:[#allocation136_spill] sm:$0xff] %v7636_v7  ;;  %6125 = vmatpush3.bf16.msra.mxu0 %v6466_v24  ;;  %v6468_v7 = vld [vmem:[%s10406_s4 + $0x10] sm:$0xff]  }
 0x278   :  { %v7624_v26 = vpop.permute.xlu1 %759 }
 0x279   :  { %10969 = vst [vmem:[#allocation133_spill] sm:$0xff] %v7624_v26  ;;  %6398 = vset.pattern.permute.xlu1 %v10886_v22  ;;  %v6467_v26 = vld [vmem:[%s10406_s4 + $0x8] sm:$0xff]  }
 0x27a   :  { %1019 = vperm.xlu1 %6398, %v7196_v39   ;;  %6126 = vmatprep.subr.bf16.mxu0 %v6467_v26 }
 0x27b   :  { %6127 = vmatpush3.bf16.msra.mxu0 %v6467_v26  ;;  %v6469_v26 = vld [vmem:[%s10406_s4 + $0x18] sm:$0xff]  }
 0x27c   :  { %6128 = vmatprep.subr.bf16.mxu0 %v6468_v7 }
 0x27d   :  { %v7630_v17 = vpop.permute.xlu1 %1255 }
 0x27e   :  { %10971 = vst [vmem:[#allocation135_spill] sm:$0xff] %v7630_v17  ;;  %1023 = vperm.xlu1 %6398, %v7126_v12   ;;  %v7645_v17 = vpop.permute.xlu0 %1391 }
 0x27f   :  { %10974 = vst [vmem:[#allocation138_spill] sm:$0xff] %v7645_v17  ;;  %6129 = vmatpush3.bf16.msra.mxu0 %v6468_v7  ;;  %v7660_v17 = vld [vmem:[#allocation3] sm:$0xff]  ;;  %v7669_v7 = vld [vmem:[#allocation3 + $0x18] sm:$0xff] }
 0x280   :  { %6130 = vmatprep.subr.bf16.mxu0 %v6469_v26  ;;  %10978 = vst [vmem:[#allocation142_spill] sm:$0xff] %v7669_v7 }
 0x282   :  { %v7638_v46 = vpop.permute.xlu1 %1747  ;;  %6399 = vset.pattern.permute.xlu1 %v10889_v9  ;;  %v7664_v5 = vpop.permute.xlu0 %1415 }
 0x283   :  { %10973 = vst [vmem:[#allocation137_spill] sm:$0xff] %v7638_v46  ;;  %1519 = vperm.xlu1 %6399, %v7106_v10   ;;  %10977 = vst [vmem:[#allocation141_spill] sm:$0xff] %v7664_v5  ;;  %6131 = vmatpush3.bf16.msra.mxu0 %v6469_v26  ;;  %v7684_v26 = vld [vmem:[#allocation3 + $0x28] sm:$0xff]  ;;  %v92_v46 = vld [vmem:[#allocation3 + $0x58] sm:$0xff] }
 0x284   :  { %10982 = vst [vmem:[#allocation146_spill] sm:$0xff] %v7684_v26 }
 0x286   :  { %v7680_v5 = vpop.permute.xlu0 %1419 }
 0x287   :  { %v7647_v60 = vpop.permute.xlu1 %763  ;;  %6400 = vset.pattern.permute.xlu1 %v10966_v11  ;;  %10980 = vst [vmem:[#allocation144_spill] sm:$0xff] %v7680_v5  ;;  %v91_v11 = vld [vmem:[#allocation3 + $0x50] sm:$0xff] }
 0x288   :  { %10975 = vst [vmem:[#allocation139_spill] sm:$0xff] %v7647_v60  ;;  %2011 = vperm.xlu1 %6400, %v7080_v54   ;;  %v7662_v60 = vld [vmem:[#allocation3 + $0x8] sm:$0xff]  ;;  %v7667_v54 = vld [vmem:[#allocation3 + $0x10] sm:$0xff] }
 0x289   :  { %v2267_v48 = vpack.c.bf16 %v7669_v7, %v7667_v54  ;;  %v7691_v7 = vld [vmem:[#allocation3 + $0x38] sm:$0xff] }
 0x28a   :  { %10985 = vst [vmem:[#allocation149_spill] sm:$0xff] %v7691_v7  ;;  %v7699_v5 = vpop.permute.xlu0 %1495 }
 0x28b   :  { %v7654_v24 = vpop.permute.xlu1 %767  ;;  %10986 = vst [vmem:[#allocation150_spill] sm:$0xff] %v7699_v5 }
 0x28c   :  { %10976 = vst [vmem:[#allocation140_spill] sm:$0xff] %v7654_v24  ;;  %6401 = vset.pattern.permute.xlu1 %v10892_v3  ;;  %v2266_v24 = vpack.c.bf16 %v7662_v60, %v7660_v17 }
 0x28d   :  { %643 = vperm.xlu1 %6401, %v7133_v13  }
 0x28e   :  { %6132 = vmatprep.mubr.msk.bf16.mxu0 %vm2314_vm1, %v2266_v24  ;;  %v2268_v24 = vpack.c.bf16 %v7684_v26, %v7682_v42 }
 0x28f   :  { %6133 = vmatmul.mubr.msk.bf16.vlgmr.msra.gmra.mrb[0].mxu0 %vm2314_vm1, %v2267_v48  ;;  %v2269_v48 = vpack.c.bf16 %v7691_v7, %v7689_v44  ;;  %v7708_v7 = vpop.permute.xlu0 %1503 }
 0x290   :  { %v7675_v1 = vpop.permute.xlu1 %1263  ;;  %6136 = vmatprep.mubr.msk.bf16.mxu0 %vm2314_vm1, %v2268_v24  ;;  %10989 = vst [vmem:[#allocation153_spill] sm:$0xff] %v7708_v7  ;;  %v2271_v24 = vpack.c.bf16 %v92_v46, %v91_v11 }
 0x291   :  { %10979 = vst [vmem:[#allocation143_spill] sm:$0xff] %v7675_v1  ;;  %647 = vperm.xlu1 %6401, %v7175_v37   ;;  %v89_v1 = vld [vmem:[#allocation3 + $0x40] sm:$0xff] }
 0x293   :  { %v7717_v44 = vpop.permute.xlu0 %1515 }
 0x294   :  { %10991 = vst [vmem:[#allocation155_spill] sm:$0xff] %v7717_v44  ;;  %v10593_v44 = vlaneseq }
 0x295   :  { %v7686_v56 = vpop.permute.xlu1 %1755  ;;  %6402 = vset.pattern.permute.xlu1 %v10896_v29 }
 0x296   :  { %10983 = vst [vmem:[#allocation147_spill] sm:$0xff] %v7686_v56  ;;  %1143 = vperm.xlu1 %6402, %v7119_v18   ;;  %v90_v56 = vld [vmem:[#allocation3 + $0x48] sm:$0xff] }
 0x297   :  { %6137 = vmatmul.mubr.msk.bf16.gmra.mrb[4].mxu0 %vm2314_vm1, %v2269_v48  ;;  %v2270_v42 = vpack.c.bf16 %v90_v56, %v89_v1  ;;  %v95_v56 = vld [vmem:[#allocation3 + $0x70] sm:$0xff]  ;;  %v96_v1 = vld [vmem:[#allocation3 + $0x78] sm:$0xff] }
 0x298   :  { %v2273_v7 = vpack.c.bf16 %v96_v1, %v95_v56 }
 0x299   :  { %6140 = vmatprep.mubr.msk.bf16.mxu0 %vm2314_vm1, %v2270_v42 }
 0x29a   :  { %v7702_v37 = vpop.permute.xlu1 %272  ;;  %6403 = vset.pattern.permute.xlu1 %v10899_v33 }
 0x29b   :  { %10987 = vst [vmem:[#allocation151_spill] sm:$0xff] %v7702_v37  ;;  %1635 = vperm.xlu1 %6403, %v7091_v61   ;;  %v93_v61 = vld [vmem:[#allocation3 + $0x60] sm:$0xff]  ;;  %v94_v37 = vld [vmem:[#allocation3 + $0x68] sm:$0xff] }
 0x29e   :  { %v7706_v26 = vpop.permute.xlu1 %277 }
 0x29f   :  { %10988 = vst [vmem:[#allocation152_spill] sm:$0xff] %v7706_v26  ;;  %6404 = vset.pattern.permute.xlu1 %v10936_v0  ;;  %6141 = vmatmul.mubr.msk.bf16.gmra.mrb[8].mxu0 %vm2314_vm1, %v2271_v24  ;;  %v2272_v26 = vpack.c.bf16 %v94_v37, %v93_v61  ;;  %v6470_v37 = vld [vmem:[%s10405_s3] sm:$0xff]   ;;  %v6473_v24 = vld [vmem:[%s10405_s3 + $0x18] sm:$0xff]  }
 0x2a0   :  { %2131 = vperm.xlu1 %6404, %v7073_v47   ;;  %v7725_v47 = vpop.permute.xlu0 %1543  ;;  %6148 = vmatprep.subr.bf16.mxu0 %v6470_v37 }
 0x2a1   :  { %6144 = vmatprep.mubr.msk.bf16.mxu0 %vm2314_vm1, %v2272_v26  ;;  %10993 = vst [vmem:[#allocation157_spill] sm:$0xff] %v7725_v47  ;;  %6149 = vmatpush3.bf16.msra.mxu0 %v6470_v37  ;;  %v6472_v26 = vld [vmem:[%s10405_s3 + $0x10] sm:$0xff]  }
 0x2a3   :  { %v7714_v48 = vpop.permute.xlu1 %391 }
 0x2a4   :  { %10990 = vst [vmem:[#allocation154_spill] sm:$0xff] %v7714_v48  ;;  %2135 = vperm.xlu1 %6404, %v7077_v52   ;;  %v7734_v42 = vpop.permute.xlu0 %1547 }
 0x2a5   :  { %10995 = vst [vmem:[#allocation159_spill] sm:$0xff] %v7734_v42 }
 0x2a7   :  { %6145 = vmatmul.mubr.msk.bf16.gmra.mrb[12].mxu0 %vm2314_vm1, %v2273_v7 }
 0x2a8   :  { %v7719_v59 = vpop.permute.xlu1 %883  ;;  %6406 = vset.pattern.permute.xlu1 %v10892_v3  ;;  %v6471_v3 = vld [vmem:[%s10405_s3 + $0x8] sm:$0xff]   ;;  %v7745_v7 = vpop.permute.xlu0 %1623 }
 0x2a9   :  { %10992 = vst [vmem:[#allocation156_spill] sm:$0xff] %v7719_v59  ;;  %655 = vperm.xlu1 %6406, %v7139_v20   ;;  %6150 = vmatprep.subr.bf16.mxu0 %v6471_v3  ;;  %10998 = vst [vmem:[#allocation162_spill] sm:$0xff] %v7745_v7 }
 0x2aa   :  { %6151 = vmatpush3.bf16.msra.mxu0 %v6471_v3 }
 0x2ab   :  { %6152 = vmatprep.subr.bf16.mxu0 %v6472_v26 }
 0x2ac   :  { %v7758_v61 = vpop.permute.xlu0 %1631 }
 0x2ad   :  { %v7727_v52 = vpop.permute.xlu1 %1379  ;;  %6407 = vset.pattern.permute.xlu1 %v10896_v29  ;;  %11000 = vst [vmem:[#allocation164_spill] sm:$0xff] %v7758_v61 }
 0x2ae   :  { %10994 = vst [vmem:[#allocation158_spill] sm:$0xff] %v7727_v52  ;;  %1147 = vperm.xlu1 %6407, %v7196_v39   ;;  %6153 = vmatpush3.bf16.msra.mxu0 %v6472_v26 }
 0x2af   :  { %6154 = vmatprep.subr.bf16.mxu0 %v6473_v24 }
 0x2b0   :  { %v7764_v1 = vpop.permute.xlu0 %1639 }
 0x2b1   :  { %v7736_v46 = vpop.permute.xlu1 %1383  ;;  %11002 = vst [vmem:[#allocation166_spill] sm:$0xff] %v7764_v1 }
 0x2b2   :  { %10996 = vst [vmem:[#allocation160_spill] sm:$0xff] %v7736_v46  ;;  %6408 = vset.pattern.permute.xlu1 %v10899_v33  ;;  %6155 = vmatpush3.bf16.msra.mxu0 %v6473_v24 }
 0x2b3   :  { %1643 = vperm.xlu1 %6408, %v7098_v2  }
 0x2b6   :  { %v7743_v11 = vpop.permute.xlu1 %1879 }
 0x2b7   :  { %10997 = vst [vmem:[#allocation161_spill] sm:$0xff] %v7743_v11  ;;  %1647 = vperm.xlu1 %6408, %v7106_v10  }
 0x2bb   :  { %6409 = vset.pattern.permute.xlu1 %v10936_v0  ;;  %v7752_v2 = vpop.permute.xlu1 %282 }
 0x2bc   :  { %10999 = vst [vmem:[#allocation163_spill] sm:$0xff] %v7752_v2  ;;  %2143 = vperm.xlu1 %6409, %v7085_v57   ;;  %v7770_v57 = vpop.permute.xlu0 %1671 }
 0x2bd   :  { %11004 = vst [vmem:[#allocation168_spill] sm:$0xff] %v7770_v57 }
 0x2c0   :  { %6410 = vset.pattern.permute.xlu1 %v10909_v40  ;;  %v7761_v56 = vpop.permute.xlu1 %395  ;;  %v7778_v24 = vpop.permute.xlu0 %1675 }
 0x2c1   :  { %11001 = vst [vmem:[#allocation165_spill] sm:$0xff] %v7761_v56  ;;  %771 = vperm.xlu1 %6410, %v7133_v13   ;;  %11007 = vst [vmem:[#allocation171_spill] sm:$0xff] %v7778_v24 }
 0x2c4   :  { %v7766_v37 = vpop.permute.xlu1 %399  ;;  %v7785_v56 = vpop.permute.xlu0 %1751 }
 0x2c5   :  { %11003 = vst [vmem:[#allocation167_spill] sm:$0xff] %v7766_v37  ;;  %6411 = vset.pattern.permute.xlu1 %v10914_v58  ;;  %11009 = vst [vmem:[#allocation173_spill] sm:$0xff] %v7785_v56 }
 0x2c6   :  { %1267 = vperm.xlu1 %6411, %v7113_v15  }
 0x2c9   :  { %v7772_v3 = vpop.permute.xlu1 %895 }
 0x2ca   :  { %11005 = vst [vmem:[#allocation169_spill] sm:$0xff] %v7772_v3  ;;  %1271 = vperm.xlu1 %6411, %v7119_v18   ;;  %v7791_v3 = vpop.permute.xlu0 %1759 }
 0x2cb   :  { %11011 = vst [vmem:[#allocation175_spill] sm:$0xff] %v7791_v3 }
 0x2ce   :  { %6412 = vset.pattern.permute.xlu1 %v10916_v14  ;;  %v7776_v26 = vpop.permute.xlu1 %1387  ;;  %v7796_v24 = vpop.permute.xlu0 %1763 }
 0x2cf   :  { %11006 = vst [vmem:[#allocation170_spill] sm:$0xff] %v7776_v26  ;;  %1767 = vperm.xlu1 %6412, %v7157_v34   ;;  %11013 = vst [vmem:[#allocation177_spill] sm:$0xff] %v7796_v24  ;;  %v7824_v26 = vshrl.u32 %v10593_v44, 7 }
 0x2d1   :  { %11022 = vst [vmem:[#allocation186_spill] sm:$0xff] %v7824_v26  ;;  %v7836_v24 = vsub.s32 1, %v7824_v26 }
 0x2d2   :  { %v7805_v47 = vpop.permute.xlu0 %1771 }
 0x2d3   :  { %6413 = vset.pattern.permute.xlu1 %v10909_v40  ;;  %v7782_v2 = vpop.permute.xlu1 %1883  ;;  %11016 = vst [vmem:[#allocation180_spill] sm:$0xff] %v7805_v47  ;;  %11026 = vst [vmem:[#allocation190_spill] sm:$0xff] %v7836_v24  ;;  %v405_v44 = vrot.slane %v7660_v17, %v7836_v24 }
 0x2d4   :  { %11008 = vst [vmem:[#allocation172_spill] sm:$0xff] %v7782_v2  ;;  %779 = vperm.xlu1 %6413, %v7161_v36  }
 0x2d5   :  { %v435_v52 = vmul.f32 %v405_v44, %v7245_v51 }
 0x2d7   :  { %v7787_v57 = vpop.permute.xlu1 %1887 }
 0x2d8   :  { %11010 = vst [vmem:[#allocation174_spill] sm:$0xff] %v7787_v57  ;;  %6415 = vset.pattern.permute.xlu1 %v10914_v58  ;;  %v7876_v57 = vsub.s32 6, %v7824_v26 }
 0x2d9   :  { %1275 = vperm.xlu1 %6415, %v7196_v39  }
 0x2dc   :  { %v7793_v59 = vpop.permute.xlu1 %519 }
 0x2dd   :  { %11012 = vst [vmem:[#allocation176_spill] sm:$0xff] %v7793_v59  ;;  %1279 = vperm.xlu1 %6415, %v7126_v12   ;;  %v7812_v59 = vpop.permute.xlu0 %1787 }
 0x2de   :  { %11018 = vst [vmem:[#allocation182_spill] sm:$0xff] %v7812_v59 }
 0x2e1   :  { %6416 = vset.pattern.permute.xlu1 %v10916_v14  ;;  %v7799_v40 = vpop.permute.xlu1 %1011  ;;  %v7863_v14 = vsub.s32 4, %v7824_v26 }
 0x2e2   :  { %11014 = vst [vmem:[#allocation178_spill] sm:$0xff] %v7799_v40  ;;  %1775 = vperm.xlu1 %6416, %v7106_v10   ;;  %v7817_v40 = vpop.permute.xlu0 %1799 }
 0x2e3   :  { %11020 = vst [vmem:[#allocation184_spill] sm:$0xff] %v7817_v40  ;;  %v7833_v40 = vsub.s32 0, %v7824_v26  ;;  %v789_v2 = vrot.slane %v7660_v17, %v7863_v14 }
 0x2e5   :  { %11025 = vst [vmem:[#allocation189_spill] sm:$0xff] %v7833_v40  ;;  %v293_v46 = vrot.slane %v7660_v17, %v7833_v40 }
 0x2e6   :  { %6417 = vset.pattern.permute.xlu1 %v10934_v50  ;;  %v7803_v42 = vpop.permute.xlu1 %1507  ;;  %v7826_v1 = vpop.permute.xlu0 %1875 }
 0x2e7   :  { %11015 = vst [vmem:[#allocation179_spill] sm:$0xff] %v7803_v42  ;;  %899 = vperm.xlu1 %6417, %v7133_v13   ;;  %11023 = vst [vmem:[#allocation187_spill] sm:$0xff] %v7826_v1  ;;  %v434_v42 = vmul.f32 %v405_v44, %v7237_v49  ;;  %v323_v58 = vmul.f32 %v293_v46, %v7213_v21  ;;  %v7870_v49 = vsub.s32 5, %v7824_v26 }
 0x2ea   :  { %v7808_v37 = vpop.permute.xlu1 %1511 }
 0x2eb   :  { %11017 = vst [vmem:[#allocation181_spill] sm:$0xff] %v7808_v37  ;;  %6418 = vset.pattern.permute.xlu1 %v10938_v43  ;;  %v7841_v37 = vsub.s32 2, %v7824_v26 }
 0x2ec   :  { %1395 = vperm.xlu1 %6418, %v7113_v15  }
 0x2ed   :  { %11028 = vst [vmem:[#allocation192_spill] sm:$0xff] %v7841_v37 }
 0x2ef   :  { %v7814_v48 = vpop.permute.xlu1 %2007 }
 0x2f0   :  { %11019 = vst [vmem:[#allocation183_spill] sm:$0xff] %v7814_v48  ;;  %1399 = vperm.xlu1 %6418, %v7119_v18  }
 0x2f4   :  { %6419 = vset.pattern.permute.xlu1 %v10942_v25  ;;  %v7820_v47 = vpop.permute.xlu1 %523 }
 0x2f5   :  { %11021 = vst [vmem:[#allocation185_spill] sm:$0xff] %v7820_v47  ;;  %1895 = vperm.xlu1 %6419, %v7157_v34  }
 0x2f9   :  { %6420 = vset.pattern.permute.xlu1 %v10934_v50  ;;  %v7829_v59 = vpop.permute.xlu1 %1019  ;;  %v7847_v50 = vsub.s32 3, %v7824_v26 }
 0x2fa   :  { %11024 = vst [vmem:[#allocation188_spill] sm:$0xff] %v7829_v59  ;;  %907 = vperm.xlu1 %6420, %v7161_v36   ;;  %v7849_v59 = vpop.permute.xlu0 %1891 }
 0x2fb   :  { %11029 = vst [vmem:[#allocation193_spill] sm:$0xff] %v7847_v50  ;;  %11030 = vst [vmem:[#allocation194_spill] sm:$0xff] %v7849_v59  ;;  %v322_v59 = vmul.f32 %v293_v46, %v7217_v41  ;;  %v7881_v41 = vsub.s32 7, %v7824_v26  ;;  %v1045_v26 = vrot.slane %v7660_v17, %v7876_v57 }
 0x2fd   :  { %v7838_v47 = vpop.permute.xlu1 %1023  ;;  %v450_v51 = vadd.f32 %v434_v42, %v322_v59  ;;  %v917_v59 = vrot.slane %v7660_v17, %v7870_v49 }
 0x2fe   :  { %11027 = vst [vmem:[#allocation191_spill] sm:$0xff] %v7838_v47  ;;  %6422 = vset.pattern.permute.xlu1 %v10938_v43  ;;  %v533_v47 = vrot.slane %v7660_v17, %v7841_v37  ;;  %v661_v43 = vrot.slane %v7660_v17, %v7847_v50  ;;  %v7872_v44 = vpop.permute.xlu0 %1899 }
 0x2ff   :  { %1403 = vperm.xlu1 %6422, %v7196_v39   ;;  %11032 = vst [vmem:[#allocation196_spill] sm:$0xff] %v7872_v44  ;;  %v1173_v44 = vrot.slane %v7660_v17, %v7881_v41 }
 0x300   :  { %v563_v0 = vmul.f32 %v533_v47, %v7263_v62  ;;  %v691_v33 = vmul.f32 %v661_v43, %v7327_v31  ;;  %v562_v62 = vmul.f32 %v533_v47, %v7227_v45  ;;  %v818_v31 = vmul.f32 %v789_v2, %v7352_v8 }
 0x301   :  { %v947_v47 = vmul.f32 %v917_v59, %v7393_v55  ;;  %v1557_v8 = vrot.slane %v7662_v60, %v7841_v37 }
 0x302   :  { %v7858_v20 = vpop.permute.xlu1 %1519 }
 0x303   :  { %11031 = vst [vmem:[#allocation195_spill] sm:$0xff] %v7858_v20  ;;  %1407 = vperm.xlu1 %6422, %v7126_v12   ;;  %v451_v20 = vadd.f32 %v435_v52, %v323_v58  ;;  %v690_v58 = vmul.f32 %v661_v43, %v7276_v4  ;;  %v578_v52 = vadd.f32 %v562_v62, %v450_v51 }
 0x304   :  { %v946_v43 = vmul.f32 %v917_v59, %v7322_v30  ;;  %v1301_v51 = vrot.slane %v7662_v60, %v7833_v40  ;;  %v1202_v30 = vmul.f32 %v1173_v44, %v7403_v6  ;;  %v1203_v59 = vmul.f32 %v1173_v44, %v7502_v27 }
 0x305   :  { %v579_v21 = vadd.f32 %v563_v0, %v451_v20  ;;  %v706_v0 = vadd.f32 %v690_v58, %v578_v52  ;;  %v819_v20 = vmul.f32 %v789_v2, %v7295_v16  ;;  %v1074_v58 = vmul.f32 %v1045_v26, %v7453_v38 }
 0x306   :  { %v1429_v16 = vrot.slane %v7662_v60, %v7836_v24 }
 0x307   :  { %6423 = vset.pattern.permute.xlu1 %v10942_v25  ;;  %v7884_v46 = vpop.permute.xlu1 %2011  ;;  %v707_v42 = vadd.f32 %v691_v33, %v579_v21  ;;  %v7896_v25 = vpop.permute.xlu0 %1915  ;;  %v834_v62 = vadd.f32 %v818_v31, %v706_v0  ;;  %v1075_v33 = vmul.f32 %v1045_v26, %v7369_v28  ;;  %v1330_v0 = vmul.f32 %v1301_v51, %v7437_v53 }
 0x308   :  { %11033 = vst [vmem:[#allocation197_spill] sm:$0xff] %v7884_v46  ;;  %1903 = vperm.xlu1 %6423, %v7106_v10   ;;  %11034 = vst [vmem:[#allocation198_spill] sm:$0xff] %v7896_v25  ;;  %v1941_v28 = vrot.slane %v7662_v60, %v7870_v49 }
 0x309   :  { %v835_v17 = vadd.f32 %v819_v20, %v707_v42  ;;  %v962_v2 = vadd.f32 %v946_v43, %v834_v62  ;;  %v1331_v20 = vmul.f32 %v1301_v51, %v7586_v35  ;;  %v1685_v62 = vrot.slane %v7662_v60, %v7847_v50  ;;  %v11045_v35 = vld [vmem:[#allocation28_spill] sm:$0xff] }
 0x30a   :  { %v409_v51 = vrot.slane %v7667_v54, %v7836_v24 }
 0x30b   :  { %v963_v52 = vadd.f32 %v947_v47, %v835_v17  ;;  %v7917_v31 = vpop.permute.xlu0 %1923  ;;  %v1090_v26 = vadd.f32 %v1074_v58, %v962_v2  ;;  %v1458_v47 = vmul.f32 %v1429_v16, %v7628_v23  ;;  %v1586_v58 = vmul.f32 %v1557_v8, %v7549_v63 }
 0x30c   :  { %6424 = vset.pattern.permute.xlu1 %v10886_v22  ;;  %v7902_v21 = vpop.permute.xlu1 %643  ;;  %11037 = vst [vmem:[#allocation201_spill] sm:$0xff] %v7917_v31  ;;  %v436_v53 = vmul.f32 %v409_v51, %v11045_v35  ;;  %v921_v35 = vrot.slane %v7667_v54, %v7870_v49 }
 0x30d   :  { %11035 = vst [vmem:[#allocation199_spill] sm:$0xff] %v7902_v21  ;;  %1027 = vperm.xlu1 %6424, %v7133_v13   ;;  %v1091_v42 = vadd.f32 %v1075_v33, %v963_v52  ;;  %v1218_v44 = vadd.f32 %v1202_v30, %v1090_v26  ;;  %v1459_v33 = vmul.f32 %v1429_v16, %v7489_v19  ;;  %v11044_v19 = vld [vmem:[#allocation20_spill] sm:$0xff] }
 0x30e   :  { %v1587_v52 = vmul.f32 %v1557_v8, %v7699_v5  ;;  %v297_v16 = vrot.slane %v7667_v54, %v7833_v40  ;;  %v537_v26 = vrot.slane %v7667_v54, %v7841_v37  ;;  %v1715_v8 = vmul.f32 %v1685_v62, %v7745_v7  ;;  %v11047_v7 = vld [vmem:[#allocation33_spill] sm:$0xff] }
 0x30f   :  { %v1219_v43 = vadd.f32 %v1203_v59, %v1091_v42  ;;  %v1346_v6 = vadd.f32 %v1330_v0, %v1218_v44  ;;  %v7933_v30 = vpop.permute.xlu0 %1935  ;;  %v1714_v59 = vmul.f32 %v1685_v62, %v7591_v32  ;;  %v1813_v42 = vrot.slane %v7662_v60, %v7863_v14  ;;  %v11040_v0 = vld [vmem:[#allocation29_spill] sm:$0xff] }
 0x310   :  { %v7911_v55 = vpop.permute.xlu1 %647  ;;  %11039 = vst [vmem:[#allocation203_spill] sm:$0xff] %v7933_v30  ;;  %v665_v44 = vrot.slane %v7667_v54, %v7847_v50  ;;  %v11042_v5 = vmov 14   ;;  %v325_v23 = vmul.f32 %v297_v16, %v11044_v19  ;;  %v11111_v30 = vld [vmem:[#allocation50_spill] sm:$0xff] }
 0x311   :  { %11036 = vst [vmem:[#allocation200_spill] sm:$0xff] %v7911_v55  ;;  %6425 = vset.pattern.permute.xlu1 %v10889_v9  ;;  %v1347_v27 = vadd.f32 %v1331_v20, %v1219_v43  ;;  %v1474_v2 = vadd.f32 %v1458_v47, %v1346_v6  ;;  %v437_v20 = vmul.f32 %v409_v51, %v11040_v0  ;;  %v11041_v47 = vld [vmem:[#allocation137_spill] sm:$0xff] }
 0x312   :  { %1523 = vperm.xlu1 %6425, %v7113_v15   ;;  %v1842_v32 = vmul.f32 %v1813_v42, %v11041_v47  ;;  %v793_v0 = vrot.slane %v7667_v54, %v7863_v14  ;;  %v564_v51 = vmul.f32 %v537_v26, %v11047_v7 }
 0x313   :  { %v1475_v43 = vadd.f32 %v1459_v33, %v1347_v27  ;;  %v1602_v6 = vadd.f32 %v1586_v58, %v1474_v2  ;;  %v1843_v33 = vmul.f32 %v1813_v42, %v7785_v56  ;;  %v2069_v58 = vrot.slane %v7662_v60, %v7876_v57  ;;  %v11046_v2 = vld [vmem:[#allocation19_spill] sm:$0xff]  ;;  %v7965_v38 = vpop.permute.xlu0 %2003  ;;  %v11050_v56 = vld [vmem:[#allocation36_spill] sm:$0xff] }
 0x314   :  { %v324_v47 = vmul.f32 %v297_v16, %v11046_v2  ;;  %v453_v19 = vadd.f32 %v437_v20, %v325_v23  ;;  %11048 = vst [vmem:[#allocation205_spill] sm:$0xff] %v7965_v38  ;;  %v11049_v42 = vld [vmem:[#allocation23_spill] sm:$0xff]  ;;  %v692_v16 = vmul.f32 %v665_v44, %v11050_v56  ;;  %v11051_v23 = vld [vmem:[#allocation38_spill] sm:$0xff] }
 0x315   :  { %v7926_v17 = vpop.permute.xlu1 %1143  ;;  %v1603_v27 = vadd.f32 %v1587_v52, %v1475_v43  ;;  %v1730_v62 = vadd.f32 %v1714_v59, %v1602_v6  ;;  %v1971_v52 = vmul.f32 %v1941_v28, %v7743_v11  ;;  %v2197_v59 = vrot.slane %v7662_v60, %v7881_v41 }
 0x316   :  { %11038 = vst [vmem:[#allocation202_spill] sm:$0xff] %v7926_v17  ;;  %1527 = vperm.xlu1 %6425, %v7119_v18   ;;  %v565_v43 = vmul.f32 %v537_v26, %v11049_v42  ;;  %v452_v6 = vadd.f32 %v436_v53, %v324_v47  ;;  %v693_v20 = vmul.f32 %v665_v44, %v11051_v23  ;;  %v11053_v53 = vld [vmem:[#allocation42_spill] sm:$0xff]  ;;  %v11134_v17 = vld [vmem:[#allocation79_spill] sm:$0xff] }
 0x317   :  { %v1731_v4 = vadd.f32 %v1715_v8, %v1603_v27  ;;  %v1858_v45 = vadd.f32 %v1842_v32, %v1730_v62  ;;  %v1970_v8 = vmul.f32 %v1941_v28, %v7826_v1  ;;  %v2098_v32 = vmul.f32 %v2069_v58, %v7965_v38  ;;  %v11054_v62 = vld [vmem:[#allocation57_spill] sm:$0xff]  ;;  %v11055_v42 = vld [vmem:[#allocation54_spill] sm:$0xff] }
 0x318   :  { %v2099_v27 = vmul.f32 %v2069_v58, %v7814_v48  ;;  %v580_v60 = vadd.f32 %v564_v51, %v452_v6  ;;  %v581_v26 = vadd.f32 %v565_v43, %v453_v19  ;;  %v820_v47 = vmul.f32 %v793_v0, %v11053_v53  ;;  %v11057_v19 = vld [vmem:[#allocation68_spill] sm:$0xff] }
 0x319   :  { %v1859_v2 = vadd.f32 %v1843_v33, %v1731_v4  ;;  %v1049_v44 = vrot.slane %v7667_v54, %v7876_v57  ;;  %v1986_v23 = vadd.f32 %v1970_v8, %v1858_v45  ;;  %v948_v38 = vmul.f32 %v921_v35, %v11055_v42 }
 0x31a   :  { %6426 = vset.pattern.permute.xlu1 %v11042_v5  ;;  %v7949_v63 = vpop.permute.xlu1 %1635  ;;  %v708_v28 = vadd.f32 %v692_v16, %v580_v60  ;;  %v709_v33 = vadd.f32 %v693_v20, %v581_v26  ;;  %v1177_v58 = vrot.slane %v7667_v54, %v7881_v41  ;;  %v949_v43 = vmul.f32 %v921_v35, %v11057_v19  ;;  %v11060_v54 = vld [vmem:[#allocation65_spill] sm:$0xff] }
 0x31b   :  { %11043 = vst [vmem:[#allocation204_spill] sm:$0xff] %v7949_v63  ;;  %2023 = vperm.xlu1 %6426, %v7157_v34   ;;  %v1987_v56 = vadd.f32 %v1971_v52, %v1859_v2  ;;  %v2114_v6 = vadd.f32 %v2098_v32, %v1986_v23  ;;  %v11059_v52 = vld [vmem:[#allocation142_spill] sm:$0xff]  ;;  %v1077_v8 = vmul.f32 %v1049_v44, %v11060_v54 }
 0x31c   :  { %v836_v45 = vadd.f32 %v820_v47, %v708_v28  ;;  %v1305_v16 = vrot.slane %v11059_v52, %v7833_v40  ;;  %v11061_v23 = vld [vmem:[#allocation98_spill] sm:$0xff] }
 0x31d   :  { %v2115_v53 = vadd.f32 %v2099_v27, %v1987_v56  ;;  %v1204_v56 = vmul.f32 %v1177_v58, %v11061_v23  ;;  %v11062_v27 = vld [vmem:[#allocation74_spill] sm:$0xff] }
 0x31e   :  { %v964_v35 = vadd.f32 %v948_v38, %v836_v45  ;;  %v1205_v47 = vmul.f32 %v1177_v58, %v11062_v27  ;;  %v1561_v38 = vrot.slane %v11059_v52, %v7841_v37  ;;  %v1689_v45 = vrot.slane %v11059_v52, %v7847_v50  ;;  %v11108_v27 = vld [vmem:[#allocation56_spill] sm:$0xff] }
 0x31f   :  { %6427 = vset.pattern.permute.xlu1 %v10886_v22  ;;  %v7974_v7 = vpop.permute.xlu1 %2131  ;;  %v821_v22 = vmul.f32 %v793_v0, %v11054_v62  ;;  %v11058_v0 = vld [vmem:[#allocation63_spill] sm:$0xff] }
 0x320   :  { %11052 = vst [vmem:[#allocation206_spill] sm:$0xff] %v7974_v7  ;;  %1035 = vperm.xlu1 %6427, %v7161_v36   ;;  %v2226_v4 = vmul.f32 %v2197_v59, %v7974_v7  ;;  %v1076_v2 = vmul.f32 %v1049_v44, %v11058_v0 }
 0x321   :  { %v837_v20 = vadd.f32 %v821_v22, %v709_v33  ;;  %v11065_v22 = vld [vmem:[#allocation83_spill] sm:$0xff] }
 0x322   :  { %v2242_v60 = vadd.f32 %v2226_v4, %v2114_v6  ;;  %v1092_v19 = vadd.f32 %v1076_v2, %v964_v35  ;;  %v11066_v4 = vld [vmem:[#allocation101_spill] sm:$0xff] }
 0x323   :  { %v7988_v51 = vpop.permute.xlu1 %2135  ;;  %v965_v32 = vadd.f32 %v949_v43, %v837_v20  ;;  %v11067_v43 = vld [vmem:[#allocation136_spill] sm:$0xff] }
 0x324   :  { %11056 = vst [vmem:[#allocation207_spill] sm:$0xff] %v7988_v51  ;;  %v2227_v48 = vmul.f32 %v2197_v59, %v7988_v51  ;;  %6429 = vset.pattern.permute.xlu1 %v10889_v9  ;;  %v1433_v59 = vrot.slane %v11059_v52, %v7836_v24  ;;  %v11064_v51 = vld [vmem:[#allocation123_spill] sm:$0xff] }
 0x325   :  { %1531 = vperm.xlu1 %6429, %v7196_v39   ;;  %v1332_v42 = vmul.f32 %v1305_v16, %v11064_v51  ;;  %v1093_v44 = vadd.f32 %v1077_v8, %v965_v32  ;;  %v11069_v8 = vld [vmem:[#allocation153_spill] sm:$0xff]  ;;  %v11071_v32 = vld [vmem:[#allocation130_spill] sm:$0xff] }
 0x326   :  { %v2243_v26 = vadd.f32 %v2227_v48, %v2115_v53  ;;  %v1333_v48 = vmul.f32 %v1305_v16, %v11065_v22  ;;  %v1220_v53 = vadd.f32 %v1204_v56, %v1092_v19  ;;  %v1460_v33 = vmul.f32 %v1433_v59, %v11066_v4  ;;  %v11107_v22 = vld [vmem:[#allocation25_spill] sm:$0xff] }
 0x327   :  { %v1221_v58 = vadd.f32 %v1205_v47, %v1093_v44  ;;  %v1461_v6 = vmul.f32 %v1433_v59, %v11067_v43  ;;  %v1817_v19 = vrot.slane %v11059_v52, %v7863_v14  ;;  %v1717_v59 = vmul.f32 %v1689_v45, %v7758_v61  ;;  %v11075_v61 = vld [vmem:[#allocation174_spill] sm:$0xff] }
 0x328   :  { %v8002_v28 = vpop.permute.xlu1 %655  ;;  %v2258_v0 = vpack.c.bf16 %v2243_v26, %v2242_v60  ;;  %v1348_v2 = vadd.f32 %v1332_v42, %v1220_v53  ;;  %v1589_v60 = vmul.f32 %v1561_v38, %v11069_v8  ;;  %v11070_v26 = vld [vmem:[#allocation115_spill] sm:$0xff]  ;;  %v1716_v42 = vmul.f32 %v1689_v45, %v11071_v32  ;;  %v11106_v43 = vld [vmem:[#allocation22_spill] sm:$0xff] }
 0x329   :  { %11063 = vst [vmem:[#allocation142_spill] sm:$0xff] %v8002_v28  ;;  %1535 = vperm.xlu1 %6429, %v7126_v12   ;;  %v1349_v16 = vadd.f32 %v1333_v48, %v1221_v58  ;;  %v1588_v35 = vmul.f32 %v1561_v38, %v11070_v26  ;;  %v1945_v47 = vrot.slane %v11059_v52, %v7870_v49  ;;  %v11072_v58 = vld [vmem:[#allocation147_spill] sm:$0xff] }
 0x32a   :  { %6156 = vmatprep.mubr.msk.bf16.mxu0 %vm2314_vm1, %v2258_v0  ;;  %v1476_v0 = vadd.f32 %v1460_v33, %v1348_v2  ;;  %v1845_v53 = vmul.f32 %v1817_v19, %v7791_v3  ;;  %v1844_v38 = vmul.f32 %v1817_v19, %v11072_v58  ;;  %v2073_v33 = vrot.slane %v11059_v52, %v7876_v57  ;;  %v11074_v2 = vld [vmem:[#allocation172_spill] sm:$0xff]  ;;  %v8039_v3 = vpop.permute.xlu0 %2015 }
 0x32b   :  { %v1477_v56 = vadd.f32 %v1461_v6, %v1349_v16  ;;  %v1972_v16 = vmul.f32 %v1945_v47, %v11074_v2  ;;  %11077 = vst [vmem:[#allocation211_spill] sm:$0xff] %v8039_v3  ;;  %v11078_v58 = vmov 11   ;;  %v2201_v32 = vrot.slane %v11059_v52, %v7881_v41 }
 0x32c   :  { %v1604_v48 = vadd.f32 %v1588_v35, %v1476_v0  ;;  %v11081_v52 = vmov 15  }
 0x32d   :  { %6430 = vset.pattern.permute.xlu1 %v11042_v5  ;;  %v8015_v20 = vpop.permute.xlu1 %1147  ;;  %v1605_v44 = vadd.f32 %v1589_v60, %v1477_v56  ;;  %v1973_v60 = vmul.f32 %v1945_v47, %v11075_v61  ;;  %v2100_v56 = vmul.f32 %v2073_v33, %v7884_v46 }
 0x32e   :  { %11068 = vst [vmem:[#allocation208_spill] sm:$0xff] %v8015_v20  ;;  %2031 = vperm.xlu1 %6430, %v7106_v10   ;;  %v1732_v45 = vadd.f32 %v1716_v42, %v1604_v48  ;;  %v2101_v42 = vmul.f32 %v2073_v33, %v8039_v3  ;;  %v11080_v48 = vld [vmem:[#allocation114_spill] sm:$0xff] }
 0x32f   :  { %v1733_v6 = vadd.f32 %v1717_v59, %v1605_v44 }
 0x330   :  { %v1860_v0 = vadd.f32 %v1844_v38, %v1732_v45 }
 0x331   :  { %v1861_v35 = vadd.f32 %v1845_v53, %v1733_v6  ;;  %v2228_v53 = vmul.f32 %v2201_v32, %v11080_v48 }
 0x332   :  { %6431 = vset.pattern.permute.xlu1 %v10896_v29  ;;  %v8029_v8 = vpop.permute.xlu1 %1643  ;;  %v1988_v26 = vadd.f32 %v1972_v16, %v1860_v0 }
 0x333   :  { %11073 = vst [vmem:[#allocation209_spill] sm:$0xff] %v8029_v8  ;;  %1155 = vperm.xlu1 %6431, %v7133_v13   ;;  %v1989_v59 = vadd.f32 %v1973_v60, %v1861_v35  ;;  %v11090_v60 = vmov 12  }
 0x334   :  { %v2116_v47 = vadd.f32 %v2100_v56, %v1988_v26 }
 0x335   :  { %v2117_v38 = vadd.f32 %v2101_v42, %v1989_v59  ;;  %v11096_v59 = vmov 9  }
 0x336   :  { %v8037_v19 = vpop.permute.xlu1 %1647  ;;  %v2244_v45 = vadd.f32 %v2228_v53, %v2116_v47  ;;  %v11098_v47 = vmov 13  }
 0x337   :  { %11076 = vst [vmem:[#allocation210_spill] sm:$0xff] %v8037_v19  ;;  %6432 = vset.pattern.permute.xlu1 %v11078_v58 }
 0x338   :  { %1651 = vperm.xlu1 %6432, %v7113_v15  }
 0x33b   :  { %v8046_v44 = vpop.permute.xlu1 %2143 }
 0x33c   :  { %11079 = vst [vmem:[#allocation212_spill] sm:$0xff] %v8046_v44  ;;  %v2229_v6 = vmul.f32 %v2201_v32, %v8046_v44  ;;  %1655 = vperm.xlu1 %6432, %v7119_v18  }
 0x33e   :  { %v2245_v46 = vadd.f32 %v2229_v6, %v2117_v38 }
 0x340   :  { %v2259_v61 = vpack.c.bf16 %v2245_v46, %v2244_v45  ;;  %6433 = vset.pattern.permute.xlu1 %v11081_v52  ;;  %v8052_v16 = vpop.permute.xlu1 %771 }
 0x341   :  { %11082 = vst [vmem:[#allocation213_spill] sm:$0xff] %v8052_v16  ;;  %2151 = vperm.xlu1 %6433, %v7157_v34  }
 0x342   :  { %6157 = vmatmul.mubr.msk.bf16.vlgmr.msra.gmra.mrb[0].mxu0 %vm2314_vm1, %v2259_v61 }
 0x345   :  { %6434 = vset.pattern.permute.xlu1 %v10896_v29  ;;  %v8057_v26 = vpop.permute.xlu1 %1267  ;;  %v11087_v29 = vmov 8  }
 0x346   :  { %11083 = vst [vmem:[#allocation214_spill] sm:$0xff] %v8057_v26  ;;  %1163 = vperm.xlu1 %6434, %v7161_v36   ;;  %v11132_v26 = vld [vmem:[#allocation106_spill] sm:$0xff] }
 0x349   :  { %v8060_v32 = vpop.permute.xlu1 %1271 }
 0x34a   :  { %11084 = vst [vmem:[#allocation215_spill] sm:$0xff] %v8060_v32  ;;  %6436 = vset.pattern.permute.xlu1 %v11078_v58  ;;  %v11130_v32 = vld [vmem:[#allocation125_spill] sm:$0xff] }
 0x34b   :  { %1659 = vperm.xlu1 %6436, %v7196_v39  }
 0x34e   :  { %v8064_v46 = vpop.permute.xlu1 %1767 }
 0x34f   :  { %11085 = vst [vmem:[#allocation216_spill] sm:$0xff] %v8064_v46  ;;  %1663 = vperm.xlu1 %6436, %v7126_v12  }
 0x353   :  { %6438 = vset.pattern.permute.xlu1 %v11081_v52  ;;  %v8068_v34 = vpop.permute.xlu1 %779 }
 0x354   :  { %11086 = vst [vmem:[#allocation217_spill] sm:$0xff] %v8068_v34  ;;  %2159 = vperm.xlu1 %6438, %v7106_v10   ;;  %v11093_v10 = vld [vmem:[#allocation15_spill] sm:$0xff]  ;;  %v11129_v34 = vld [vmem:[#allocation90_spill] sm:$0xff] }
 0x358   :  { %6439 = vset.pattern.permute.xlu1 %v11087_v29  ;;  %v8072_v61 = vpop.permute.xlu1 %1275 }
 0x359   :  { %11088 = vst [vmem:[#allocation218_spill] sm:$0xff] %v8072_v61  ;;  %1283 = vperm.xlu1 %6439, %v7133_v13  }
 0x35c   :  { %v8075_v33 = vpop.permute.xlu1 %1279 }
 0x35d   :  { %11089 = vst [vmem:[#allocation219_spill] sm:$0xff] %v8075_v33  ;;  %6440 = vset.pattern.permute.xlu1 %v11090_v60 }
 0x35e   :  { %1779 = vperm.xlu1 %6440, %v7113_v15  }
 0x361   :  { %v8079_v39 = vpop.permute.xlu1 %1775 }
 0x362   :  { %11091 = vst [vmem:[#allocation220_spill] sm:$0xff] %v8079_v39  ;;  %1783 = vperm.xlu1 %6440, %v7119_v18  }
 0x366   :  { %6442 = vset.pattern.permute.xlu1 %v11087_v29  ;;  %v8083_v35 = vpop.permute.xlu1 %899 }
 0x367   :  { %11092 = vst [vmem:[#allocation221_spill] sm:$0xff] %v8083_v35  ;;  %1295 = vperm.xlu1 %6442, %v11093_v10  }
 0x36b   :  { %6443 = vset.pattern.permute.xlu1 %v11090_v60  ;;  %v8087_v0 = vpop.permute.xlu1 %1395 }
 0x36c   :  { %11094 = vst [vmem:[#allocation15_spill] sm:$0xff] %v8087_v0  ;;  %1791 = vperm.xlu1 %6443, %v7126_v12  }
 0x36f   :  { %v8090_v56 = vpop.permute.xlu1 %1399 }
 0x370   :  { %11095 = vst [vmem:[#allocation222_spill] sm:$0xff] %v8090_v56  ;;  %6444 = vset.pattern.permute.xlu1 %v11096_v59 }
 0x371   :  { %1411 = vperm.xlu1 %6444, %v7133_v13  }
 0x374   :  { %v8094_v42 = vpop.permute.xlu1 %1895 }
 0x375   :  { %11097 = vst [vmem:[#allocation223_spill] sm:$0xff] %v8094_v42  ;;  %6445 = vset.pattern.permute.xlu1 %v11098_v47 }
 0x376   :  { %1907 = vperm.xlu1 %6445, %v7113_v15  }
 0x379   :  { %v8098_v53 = vpop.permute.xlu1 %907 }
 0x37a   :  { %11099 = vst [vmem:[#allocation224_spill] sm:$0xff] %v8098_v53  ;;  %1911 = vperm.xlu1 %6445, %v7119_v18  }
 0x37e   :  { %6447 = vset.pattern.permute.xlu1 %v11096_v59  ;;  %v8102_v38 = vpop.permute.xlu1 %1403  ;;  %v11104_v59 = vld [vmem:[#allocation145_spill] sm:$0xff] }
 0x37f   :  { %11100 = vst [vmem:[#allocation225_spill] sm:$0xff] %v8102_v38  ;;  %1423 = vperm.xlu1 %6447, %v11093_v10   ;;  %v301_v44 = vrot.slane %v11104_v59, %v7833_v40  ;;  %v413_v48 = vrot.slane %v11104_v59, %v7836_v24  ;;  %v541_v3 = vrot.slane %v11104_v59, %v7841_v37 }
 0x380   :  { %v669_v7 = vrot.slane %v11104_v59, %v7847_v50 }
 0x381   :  { %v326_v4 = vmul.f32 %v301_v44, %v11106_v43  ;;  %v438_v51 = vmul.f32 %v413_v48, %v11107_v22  ;;  %v566_v23 = vmul.f32 %v541_v3, %v11108_v27  ;;  %v797_v22 = vrot.slane %v11104_v59, %v7863_v14  ;;  %v11113_v43 = vld [vmem:[#allocation88_spill] sm:$0xff] }
 0x382   :  { %v8105_v6 = vpop.permute.xlu1 %1407  ;;  %v694_v31 = vmul.f32 %v669_v7, %v11111_v30  ;;  %v925_v27 = vrot.slane %v11104_v59, %v7870_v49  ;;  %v1053_v30 = vrot.slane %v11104_v59, %v7876_v57 }
 0x383   :  { %11101 = vst [vmem:[#allocation226_spill] sm:$0xff] %v8105_v6  ;;  %6448 = vset.pattern.permute.xlu1 %v11098_v47  ;;  %v454_v62 = vadd.f32 %v438_v51, %v326_v4  ;;  %v11112_v51 = vld [vmem:[#allocation59_spill] sm:$0xff] }
 0x384   :  { %1919 = vperm.xlu1 %6448, %v7126_v12   ;;  %v822_v4 = vmul.f32 %v797_v22, %v11112_v51  ;;  %v950_v25 = vmul.f32 %v925_v27, %v11113_v43  ;;  %v11118_v51 = vld [vmem:[#allocation58_spill] sm:$0xff]  ;;  %v1079_v16 = vmul.f32 %v1053_v30, %v11132_v26 }
 0x385   :  { %v582_v11 = vadd.f32 %v566_v23, %v454_v62  ;;  %v11115_v23 = vld [vmem:[#allocation45_spill] sm:$0xff] }
 0x387   :  { %v8109_v45 = vpop.permute.xlu1 %1903 }
 0x388   :  { %11102 = vst [vmem:[#allocation227_spill] sm:$0xff] %v8109_v45  ;;  %6449 = vset.pattern.permute.xlu1 %v10889_v9 }
 0x389   :  { %1539 = vperm.xlu1 %6449, %v7133_v13  }
 0x38c   :  { %v8113_v29 = vpop.permute.xlu1 %1027 }
 0x38d   :  { %11103 = vst [vmem:[#allocation228_spill] sm:$0xff] %v8113_v29  ;;  %6450 = vset.pattern.permute.xlu1 %v11042_v5  ;;  %v439_v29 = vmul.f32 %v413_v48, %v11115_v23  ;;  %v11119_v23 = vld [vmem:[#allocation67_spill] sm:$0xff] }
 0x38e   :  { %2035 = vperm.xlu1 %6450, %v7113_v15   ;;  %v695_v53 = vmul.f32 %v669_v7, %v11119_v23 }
 0x391   :  { %v8123_v2 = vpop.permute.xlu1 %1523 }
 0x392   :  { %11105 = vst [vmem:[#allocation145_spill] sm:$0xff] %v8123_v2  ;;  %2039 = vperm.xlu1 %6450, %v7119_v18   ;;  %v11116_v2 = vld [vmem:[#allocation148_spill] sm:$0xff] }
 0x393   :  { %v417_v6 = vrot.slane %v11116_v2, %v7836_v24  ;;  %v305_v43 = vrot.slane %v11116_v2, %v7833_v40 }
 0x395   :  { %v8129_v54 = vpop.permute.xlu1 %1527 }
 0x396   :  { %11109 = vst [vmem:[#allocation229_spill] sm:$0xff] %v8129_v54  ;;  %6452 = vset.pattern.permute.xlu1 %v10889_v9  ;;  %v710_v9 = vadd.f32 %v694_v31, %v582_v11  ;;  %v11117_v11 = vld [vmem:[#allocation43_spill] sm:$0xff] }
 0x397   :  { %1551 = vperm.xlu1 %6452, %v11093_v10   ;;  %v327_v31 = vmul.f32 %v301_v44, %v11117_v11  ;;  %v1181_v44 = vrot.slane %v11104_v59, %v7881_v41  ;;  %v11122_v11 = vld [vmem:[#allocation146_spill] sm:$0xff] }
 0x398   :  { %v838_v54 = vadd.f32 %v822_v4, %v710_v9  ;;  %v8164_v9 = vrot.slane %v11116_v2, %v7841_v37  ;;  %v11121_v4 = vld [vmem:[#allocation84_spill] sm:$0xff]  ;;  %v1309_v35 = vrot.slane %v11122_v11, %v7833_v40  ;;  %v1437_v59 = vrot.slane %v11122_v11, %v7836_v24 }
 0x399   :  { %v455_v48 = vadd.f32 %v439_v29, %v327_v31  ;;  %v1078_v0 = vmul.f32 %v1053_v30, %v11121_v4  ;;  %v8176_v31 = vrot.slane %v11116_v2, %v7847_v50  ;;  %v11125_v4 = vld [vmem:[#allocation76_spill] sm:$0xff]  ;;  %v929_v30 = vrot.slane %v11116_v2, %v7870_v49 }
 0x39a   :  { %v8135_v1 = vpop.permute.xlu1 %2023  ;;  %v966_v38 = vadd.f32 %v950_v25, %v838_v54  ;;  %v11123_v25 = vld [vmem:[#allocation27_spill] sm:$0xff]  ;;  %v11124_v54 = vld [vmem:[#allocation49_spill] sm:$0xff]  ;;  %v823_v23 = vmul.f32 %v797_v22, %v11125_v4  ;;  %v1334_v22 = vmul.f32 %v1309_v35, %v11130_v32  ;;  %v11131_v4 = vld [vmem:[#allocation70_spill] sm:$0xff]  ;;  %v1693_v32 = vrot.slane %v11122_v11, %v7847_v50 }
 0x39b   :  { %11110 = vst [vmem:[#allocation230_spill] sm:$0xff] %v8135_v1  ;;  %6453 = vset.pattern.permute.xlu1 %v11042_v5  ;;  %v328_v7 = vmul.f32 %v305_v43, %v11124_v54 }
 0x39c   :  { %2047 = vperm.xlu1 %6453, %v7126_v12  }
 0x39f   :  { %v8146_v62 = vpop.permute.xlu1 %1035 }
 0x3a0   :  { %11114 = vst [vmem:[#allocation231_spill] sm:$0xff] %v8146_v62  ;;  %6454 = vset.pattern.permute.xlu1 %v11078_v58  ;;  %v567_v62 = vmul.f32 %v541_v3, %v11118_v51  ;;  %v440_v3 = vmul.f32 %v417_v6, %v11123_v25  ;;  %v1094_v51 = vadd.f32 %v1078_v0, %v966_v38 }
 0x3a1   :  { %1667 = vperm.xlu1 %6454, %v7133_v13   ;;  %v8186_v25 = vrot.slane %v11116_v2, %v7863_v14  ;;  %v1565_v0 = vrot.slane %v11122_v11, %v7841_v37 }
 0x3a2   :  { %v583_v29 = vadd.f32 %v567_v62, %v455_v48  ;;  %v11128_v48 = vld [vmem:[#allocation100_spill] sm:$0xff]  ;;  %v456_v38 = vadd.f32 %v440_v3, %v328_v7  ;;  %v11135_v7 = vld [vmem:[#allocation121_spill] sm:$0xff] }
 0x3a3   :  { %v1206_v54 = vmul.f32 %v1181_v44, %v11128_v48  ;;  %v1207_v21 = vmul.f32 %v1181_v44, %v11135_v7  ;;  %v11203_v7 = vld [vmem:[#allocation64_spill] sm:$0xff] }
 0x3a4   :  { %v8160_v56 = vpop.permute.xlu1 %1531  ;;  %v711_v61 = vadd.f32 %v695_v53, %v583_v29 }
 0x3a5   :  { %11120 = vst [vmem:[#allocation148_spill] sm:$0xff] %v8160_v56  ;;  %6455 = vset.pattern.permute.xlu1 %v11081_v52  ;;  %v11126_v56 = vld [vmem:[#allocation61_spill] sm:$0xff]  ;;  %v1222_v29 = vadd.f32 %v1206_v54, %v1094_v51  ;;  %v11138_v51 = vld [vmem:[#allocation135_spill] sm:$0xff] }
 0x3a6   :  { %2163 = vperm.xlu1 %6455, %v7113_v15   ;;  %v568_v33 = vmul.f32 %v8164_v9, %v11126_v56  ;;  %v951_v15 = vmul.f32 %v925_v27, %v11129_v34  ;;  %v696_v56 = vmul.f32 %v8176_v31, %v11131_v4  ;;  %v839_v53 = vadd.f32 %v823_v23, %v711_v61  ;;  %v11136_v4 = vld [vmem:[#allocation179_spill] sm:$0xff] }
 0x3a7   :  { %v824_v27 = vmul.f32 %v8186_v25, %v11134_v17  ;;  %v1350_v3 = vadd.f32 %v1334_v22, %v1222_v29  ;;  %v1590_v28 = vmul.f32 %v1565_v0, %v11136_v4  ;;  %v1335_v23 = vmul.f32 %v1309_v35, %v11138_v51  ;;  %v11140_v17 = vld [vmem:[#allocation160_spill] sm:$0xff]  ;;  %v8457_v51 = vld [vmem:[#allocation3 + $0x68] sm:$0xff] }
 0x3a8   :  { %v8188_v62 = vpop.permute.xlu1 %1535  ;;  %v584_v48 = vadd.f32 %v568_v33, %v456_v38  ;;  %v967_v34 = vadd.f32 %v951_v15, %v839_v53  ;;  %v1718_v38 = vmul.f32 %v1693_v32, %v7949_v63  ;;  %v11139_v15 = vld [vmem:[#allocation52_spill] sm:$0xff]  ;;  %v1821_v29 = vrot.slane %v11122_v11, %v7863_v14  ;;  %v11144_v63 = vld [vmem:[#allocation181_spill] sm:$0xff] }
 0x3a9   :  { %11127 = vst [vmem:[#allocation146_spill] sm:$0xff] %v8188_v62  ;;  %v11133_v62 = vld [vmem:[#allocation158_spill] sm:$0xff]  ;;  %v441_v44 = vmul.f32 %v417_v6, %v11139_v15  ;;  %v1463_v4 = vmul.f32 %v1437_v59, %v11140_v17  ;;  %v1591_v6 = vmul.f32 %v1565_v0, %v11144_v63  ;;  %v1185_v0 = vrot.slane %v11116_v2, %v7881_v41  ;;  %v11199_v63 = vld [vmem:[#allocation53_spill] sm:$0xff] }
 0x3aa   :  { %2167 = vperm.xlu1 %6455, %v7119_v18   ;;  %v1462_v20 = vmul.f32 %v1437_v59, %v11133_v62  ;;  %v712_v61 = vadd.f32 %v696_v56, %v584_v48  ;;  %v1095_v33 = vadd.f32 %v1079_v16, %v967_v34  ;;  %v11141_v48 = vld [vmem:[#allocation51_spill] sm:$0xff]  ;;  %v11147_v15 = vld [vmem:[#allocation86_spill] sm:$0xff] }
 0x3ab   :  { %v11142_v16 = vld [vmem:[#allocation71_spill] sm:$0xff]  ;;  %v11201_v62 = vld [vmem:[#allocation62_spill] sm:$0xff] }
 0x3ac   :  { %v1478_v54 = vadd.f32 %v1462_v20, %v1350_v3  ;;  %v840_v22 = vadd.f32 %v824_v27, %v712_v61  ;;  %v1223_v53 = vadd.f32 %v1207_v21, %v1095_v33  ;;  %v952_v34 = vmul.f32 %v929_v30, %v11142_v16 }
 0x3ad   :  { %v8206_v18 = vpop.permute.xlu1 %2031  ;;  %v1057_v20 = vrot.slane %v11116_v2, %v7876_v57  ;;  %v2077_v2 = vrot.slane %v11122_v11, %v7876_v57 }
 0x3ae   :  { %11137 = vst [vmem:[#allocation232_spill] sm:$0xff] %v8206_v18  ;;  %6457 = vset.pattern.permute.xlu1 %v11078_v58  ;;  %v1606_v56 = vadd.f32 %v1590_v28, %v1478_v54  ;;  %v329_v58 = vmul.f32 %v305_v43, %v11141_v48  ;;  %v1351_v3 = vadd.f32 %v1335_v23, %v1223_v53  ;;  %v11145_v28 = vld [vmem:[#allocation177_spill] sm:$0xff]  ;;  %v11146_v54 = vld [vmem:[#allocation30_spill] sm:$0xff] }
 0x3af   :  { %1679 = vperm.xlu1 %6457, %v11093_v10   ;;  %v968_v61 = vadd.f32 %v952_v34, %v840_v22  ;;  %v1846_v59 = vmul.f32 %v1821_v29, %v11145_v28  ;;  %v1949_v43 = vrot.slane %v11122_v11, %v7870_v49  ;;  %v569_v16 = vmul.f32 %v8164_v9, %v11146_v54  ;;  %v11151_v9 = vld [vmem:[#allocation166_spill] sm:$0xff] }
 0x3b0   :  { %v1734_v27 = vadd.f32 %v1718_v38, %v1606_v56  ;;  %v457_v21 = vadd.f32 %v441_v44, %v329_v58  ;;  %v1479_v33 = vadd.f32 %v1463_v4, %v1351_v3  ;;  %v1080_v23 = vmul.f32 %v1057_v20, %v11147_v15  ;;  %v11148_v38 = vld [vmem:[#allocation149_spill] sm:$0xff]  ;;  %v11150_v58 = vld [vmem:[#allocation72_spill] sm:$0xff]  ;;  %v11152_v15 = vld [vmem:[#allocation194_spill] sm:$0xff] }
 0x3b1   :  { %v1313_v44 = vrot.slane %v11148_v38, %v7833_v40  ;;  %v697_v34 = vmul.f32 %v8176_v31, %v11150_v58  ;;  %v1719_v3 = vmul.f32 %v1693_v32, %v11151_v9  ;;  %v1974_v54 = vmul.f32 %v1949_v43, %v11152_v15  ;;  %v11155_v31 = vld [vmem:[#allocation127_spill] sm:$0xff]  ;;  %v8254_v32 = vpop.permute.xlu0 %2019 }
 0x3b2   :  { %v8222_v35 = vpop.permute.xlu1 %1155  ;;  %v1607_v22 = vadd.f32 %v1591_v6, %v1479_v33  ;;  %v1862_v53 = vadd.f32 %v1846_v59, %v1734_v27  ;;  %v585_v56 = vadd.f32 %v569_v16, %v457_v21  ;;  %v1096_v4 = vadd.f32 %v1080_v23, %v968_v61  ;;  %v11153_v6 = vld [vmem:[#allocation102_spill] sm:$0xff]  ;;  %v11154_v16 = vld [vmem:[#allocation81_spill] sm:$0xff]  ;;  %11156 = vst [vmem:[#allocation234_spill] sm:$0xff] %v8254_v32 }
 0x3b3   :  { %11143 = vst [vmem:[#allocation233_spill] sm:$0xff] %v8222_v35  ;;  %6458 = vset.pattern.permute.xlu1 %v11081_v52  ;;  %v1847_v28 = vmul.f32 %v1821_v29, %v8064_v46  ;;  %v1208_v27 = vmul.f32 %v1185_v0, %v11153_v6  ;;  %v825_v21 = vmul.f32 %v8186_v25, %v11154_v16  ;;  %v11158_v46 = vld [vmem:[#allocation99_spill] sm:$0xff]  ;;  %v11159_v16 = vld [vmem:[#allocation170_spill] sm:$0xff] }
 0x3b4   :  { %2175 = vperm.xlu1 %6458, %v7126_v12   ;;  %v1336_v61 = vmul.f32 %v1313_v44, %v11155_v31  ;;  %v1990_v59 = vadd.f32 %v1974_v54, %v1862_v53  ;;  %v1735_v33 = vadd.f32 %v1719_v3, %v1607_v22  ;;  %v1975_v23 = vmul.f32 %v1949_v43, %v8094_v42  ;;  %v11160_v3 = vld [vmem:[#allocation113_spill] sm:$0xff] }
 0x3b5   :  { %v2205_v29 = vrot.slane %v11122_v11, %v7881_v41  ;;  %v713_v6 = vadd.f32 %v697_v34, %v585_v56  ;;  %v1224_v15 = vadd.f32 %v1208_v27, %v1096_v4  ;;  %v953_v25 = vmul.f32 %v929_v30, %v11158_v46  ;;  %v11161_v27 = vld [vmem:[#allocation128_spill] sm:$0xff] }
 0x3b6   :  { %v1569_v9 = vrot.slane %v11148_v38, %v7841_v37  ;;  %v2102_v48 = vmul.f32 %v2077_v2, %v8254_v32  ;;  %v1863_v54 = vadd.f32 %v1847_v28, %v1735_v33  ;;  %v2103_v22 = vmul.f32 %v2077_v2, %v8135_v1  ;;  %v11163_v33 = vld [vmem:[#allocation116_spill] sm:$0xff] }
 0x3b7   :  { %v8237_v12 = vpop.permute.xlu1 %1651  ;;  %v841_v43 = vadd.f32 %v825_v21, %v713_v6  ;;  %v1352_v53 = vadd.f32 %v1336_v61, %v1224_v15  ;;  %v1081_v11 = vmul.f32 %v1057_v20, %v11160_v3  ;;  %v1697_v56 = vrot.slane %v11148_v38, %v7847_v50  ;;  %v11164_v15 = vld [vmem:[#allocation155_spill] sm:$0xff] }
 0x3b8   :  { %11149 = vst [vmem:[#allocation149_spill] sm:$0xff] %v8237_v12  ;;  %6459 = vset.pattern.permute.xlu1 %v11090_v60  ;;  %v1441_v60 = vrot.slane %v11148_v38, %v7836_v24  ;;  %v1991_v30 = vadd.f32 %v1975_v23, %v1863_v54  ;;  %v2118_v34 = vadd.f32 %v2102_v48, %v1990_v59  ;;  %v11165_v21 = vld [vmem:[#allocation143_spill] sm:$0xff] }
 0x3b9   :  { %1795 = vperm.xlu1 %6459, %v7133_v13   ;;  %v969_v4 = vadd.f32 %v953_v25, %v841_v43  ;;  %v2230_v2 = vmul.f32 %v2205_v29, %v11163_v33  ;;  %v1592_v20 = vmul.f32 %v1569_v9, %v11164_v15  ;;  %v1337_v38 = vmul.f32 %v1313_v44, %v11165_v21  ;;  %v11168_v44 = vld [vmem:[#allocation138_spill] sm:$0xff]  ;;  %v11196_v33 = vld [vmem:[#allocation44_spill] sm:$0xff] }
 0x3ba   :  { %v1464_v31 = vmul.f32 %v1441_v60, %v11159_v16  ;;  %v1209_v16 = vmul.f32 %v1185_v0, %v11161_v27  ;;  %v2119_v28 = vadd.f32 %v2103_v22, %v1991_v30  ;;  %v1720_v48 = vmul.f32 %v1697_v56, %v8029_v8  ;;  %v11191_v8 = vld [vmem:[#allocation39_spill] sm:$0xff]  ;;  %v11198_v27 = vld [vmem:[#allocation46_spill] sm:$0xff] }
 0x3bb   :  { %v8257_v58 = vpop.permute.xlu1 %1655  ;;  %v1097_v6 = vadd.f32 %v1081_v11, %v969_v4  ;;  %v2246_v59 = vadd.f32 %v2230_v2, %v2118_v34  ;;  %v1465_v11 = vmul.f32 %v1441_v60, %v11168_v44  ;;  %v11170_v34 = vld [vmem:[#allocation195_spill] sm:$0xff] }
 0x3bc   :  { %11157 = vst [vmem:[#allocation235_spill] sm:$0xff] %v8257_v58  ;;  %v1480_v46 = vadd.f32 %v1464_v31, %v1352_v53  ;;  %v6770_v31 = vld [vmem:[#allocation3 + $0x38] sm:$0xff]  ;;  %v1593_v4 = vmul.f32 %v1569_v9, %v11170_v34 }
 0x3bd   :  { %1803 = vperm.xlu1 %6459, %v7161_v36   ;;  %v1225_v0 = vadd.f32 %v1209_v16, %v1097_v6  ;;  %v1825_v23 = vrot.slane %v6770_v31, %v7863_v14  ;;  %v11167_v53 = vld [vmem:[#allocation16_spill] sm:$0xff]  ;;  %v1953_v16 = vrot.slane %v6770_v31, %v7870_v49 }
 0x3be   :  { %v1608_v25 = vadd.f32 %v1592_v20, %v1480_v46  ;;  %v11172_v20 = vld [vmem:[#allocation196_spill] sm:$0xff] }
 0x3bf   :  { %v1353_v22 = vadd.f32 %v1337_v38, %v1225_v0  ;;  %v1976_v6 = vmul.f32 %v1953_v16, %v11172_v20  ;;  %v2081_v38 = vrot.slane %v6770_v31, %v7876_v57  ;;  %v1849_v60 = vmul.f32 %v1825_v23, %v8079_v39  ;;  %v11189_v20 = vld [vmem:[#allocation37_spill] sm:$0xff] }
 0x3c0   :  { %v8272_v42 = vpop.permute.xlu1 %2151  ;;  %v1736_v43 = vadd.f32 %v1720_v48, %v1608_v25  ;;  %v1977_v9 = vmul.f32 %v1953_v16, %v8109_v45 }
 0x3c1   :  { %11162 = vst [vmem:[#allocation236_spill] sm:$0xff] %v8272_v42  ;;  %v2231_v1 = vmul.f32 %v2205_v29, %v8272_v42  ;;  %1807 = vperm.xlu1 %6459, %v11093_v10   ;;  %v1481_v46 = vadd.f32 %v1465_v11, %v1353_v22  ;;  %v2105_v22 = vmul.f32 %v2081_v38, %v8206_v18  ;;  %v11195_v42 = vld [vmem:[#allocation41_spill] sm:$0xff] }
 0x3c3   :  { %v2247_v61 = vadd.f32 %v2231_v1, %v2119_v28  ;;  %v11169_v1 = vld [vmem:[#allocation180_spill] sm:$0xff]  ;;  %v1609_v48 = vadd.f32 %v1593_v4, %v1481_v46  ;;  %v11176_v4 = vld [vmem:[#allocation118_spill] sm:$0xff] }
 0x3c4   :  { %v1848_v30 = vmul.f32 %v1825_v23, %v11169_v1 }
 0x3c5   :  { %6461 = vset.pattern.permute.xlu1 %v11098_v47  ;;  %v8282_v54 = vpop.permute.xlu1 %1163  ;;  %v2260_v29 = vpack.c.bf16 %v2247_v61, %v2246_v59  ;;  %v1721_v47 = vmul.f32 %v1697_v56, %v8037_v19  ;;  %v8297_v61 = vpop.permute.xlu0 %2027  ;;  %v6476_v19 = vld [vmem:[%s10409_s7] sm:$0xff]  }
 0x3c6   :  { %11166 = vst [vmem:[#allocation237_spill] sm:$0xff] %v8282_v54  ;;  %1927 = vperm.xlu1 %6461, %v11167_v53   ;;  %v1864_v28 = vadd.f32 %v1848_v30, %v1736_v43  ;;  %11173 = vst [vmem:[#allocation238_spill] sm:$0xff] %v8297_v61  ;;  %v2104_v25 = vmul.f32 %v2081_v38, %v8297_v61  ;;  %v2209_v43 = vrot.slane %v6770_v31, %v7881_v41  ;;  %v6475_v38 = vld [vmem:[%s10408_s6 + $0x8] sm:$0xff]  }
 0x3c7   :  { %6160 = vmatprep.mubr.msk.bf16.mxu0 %vm2314_vm1, %v2260_v29  ;;  %v1737_v0 = vadd.f32 %v1721_v47, %v1609_v48  ;;  %v11188_v61 = vld [vmem:[#allocation34_spill] sm:$0xff]  ;;  %6172 = vmatprep.subr.bf16.mxu0 %v6476_v19 }
 0x3c8   :  { %v1992_v59 = vadd.f32 %v1976_v6, %v1864_v28  ;;  %6173 = vmatpush3.bf16.msra.mxu0 %v6476_v19 }
 0x3c9   :  { %v1865_v29 = vadd.f32 %v1849_v60, %v1737_v0 }
 0x3ca   :  { %1931 = vperm.xlu1 %6461, %v7161_v36   ;;  %v8292_v2 = vpop.permute.xlu1 %1659  ;;  %v2120_v11 = vadd.f32 %v2104_v25, %v1992_v59  ;;  %v8331_v59 = vld [vmem:[#allocation3 + $0x40] sm:$0xff] }
 0x3cb   :  { %11171 = vst [vmem:[#allocation16_spill] sm:$0xff] %v8292_v2  ;;  %v1993_v23 = vadd.f32 %v1977_v9, %v1865_v29  ;;  %v8335_v0 = vrot.slane %v8331_v59, %v7833_v40  ;;  %v8341_v9 = vld [vmem:[#allocation3 + $0x50] sm:$0xff] }
 0x3cd   :  { %v2121_v16 = vadd.f32 %v2105_v22, %v1993_v23  ;;  %v8350_v22 = vld [vmem:[#allocation3 + $0x70] sm:$0xff] }
 0x3ce   :  { %6463 = vset.pattern.permute.xlu1 %v11042_v5  ;;  %v8301_v56 = vpop.permute.xlu1 %1663  ;;  %v2232_v5 = vmul.f32 %v2209_v43, %v11176_v4  ;;  %v11187_v4 = vld [vmem:[#allocation32_spill] sm:$0xff]  ;;  %v8408_v1 = vrot.slane %v8350_v22, %v7876_v57  ;;  %v8445_v32 = vrot.slane %v8350_v22, %v7881_v41 }
 0x3cf   :  { %11174 = vst [vmem:[#allocation239_spill] sm:$0xff] %v8301_v56  ;;  %2051 = vperm.xlu1 %6463, %v7133_v13   ;;  %v6474_v13 = vld [vmem:[%s10408_s6] sm:$0xff]   ;;  %v8396_v18 = vmul.f32 %v8335_v0, %v11187_v4  ;;  %v6477_v4 = vld [vmem:[%s10409_s7 + $0x8] sm:$0xff]  }
 0x3d0   :  { %v2248_v47 = vadd.f32 %v2232_v5, %v2120_v11  ;;  %6192 = vmatprep.subr.bf16.mxu1 %v6474_v13  ;;  %v8359_v11 = vrot.slane %v8350_v22, %v7841_v37  ;;  %11190 = vst [vmem:[#allocation251_spill] sm:$0xff] %v8408_v1  ;;  %6174 = vmatprep.subr.bf16.mxu0 %v6477_v4  ;;  %v11210_v56 = vld [vmem:[#allocation77_spill] sm:$0xff] }
 0x3d1   :  { %6193 = vmatpush3.bf16.msra.mxu1 %v6474_v13  ;;  %v8374_v13 = vrot.slane %v8331_v59, %v7870_v49  ;;  %6175 = vmatpush3.bf16.msra.mxu0 %v6477_v4  ;;  %v11224_v4 = vld [vmem:[#allocation87_spill] sm:$0xff] }
 0x3d2   :  { %6194 = vmatprep.subr.bf16.mxu1 %v6475_v38  ;;  %v8441_v3 = vmul.f32 %v8359_v11, %v11198_v27  ;;  %v8461_v27 = vrot.slane %v8457_v51, %v7833_v40 }
 0x3d3   :  { %2059 = vperm.xlu1 %6463, %v7161_v36   ;;  %v8308_v30 = vpop.permute.xlu1 %2159 }
 0x3d4   :  { %11175 = vst [vmem:[#allocation240_spill] sm:$0xff] %v8308_v30  ;;  %v2233_v46 = vmul.f32 %v2209_v43, %v8308_v30  ;;  %v8354_v43 = vrot.slane %v8350_v22, %v7833_v40  ;;  %11202 = vst [vmem:[#allocation257_spill] sm:$0xff] %v8461_v27 }
 0x3d5   :  { %6195 = vmatpush3.bf16.msra.mxu1 %v6475_v38  ;;  %v8389_v38 = vrot.slane %v8331_v59, %v7876_v57 }
 0x3d6   :  { %v2249_v28 = vadd.f32 %v2233_v46, %v2121_v16  ;;  %v8363_v16 = vrot.slane %v8350_v22, %v7847_v50  ;;  %v8370_v46 = vrot.slane %v8350_v22, %v7863_v14  ;;  %v8434_v21 = vmul.f32 %v8354_v43, %v11195_v42 }
 0x3d7   :  { %2063 = vperm.xlu1 %6463, %v11093_v10  }
 0x3d8   :  { %v8316_v31 = vpop.permute.xlu1 %1283  ;;  %v2261_v6 = vpack.c.bf16 %v2249_v28, %v2248_v47  ;;  %11183 = vst [vmem:[#allocation247_spill] sm:$0xff] %v8370_v46  ;;  %v8378_v28 = vrot.slane %v8341_v9, %v7870_v49  ;;  %v8449_v17 = vmul.f32 %v8363_v16, %v11199_v63  ;;  %v8465_v26 = vmul.f32 %v8370_v46, %v11203_v7  ;;  %v8467_v63 = vld [vmem:[#allocation3 + $0x78] sm:$0xff]  ;;  %v11208_v7 = vld [vmem:[#allocation75_spill] sm:$0xff] }
 0x3d9   :  { %11177 = vst [vmem:[#allocation241_spill] sm:$0xff] %v8316_v31  ;;  %11204 = vst [vmem:[#allocation258_spill] sm:$0xff] %v8467_v63  ;;  %v11207_v31 = vld [vmem:[#allocation73_spill] sm:$0xff]  ;;  %v8513_v46 = vrot.slane %v8457_v51, %v7841_v37 }
 0x3da   :  { %6161 = vmatmul.mubr.msk.bf16.gmra.mrb[4].mxu0 %vm2314_vm1, %v2261_v6  ;;  %v8385_v6 = vrot.slane %v8350_v22, %v7870_v49  ;;  %11200 = vst [vmem:[#allocation256_spill] sm:$0xff] %v8449_v17  ;;  %v8481_v19 = vmul.f32 %v8374_v13, %v11207_v31  ;;  %v553_v31 = vrot.slane %v8341_v9, %v7841_v37  ;;  %v11217_v17 = vld [vmem:[#allocation91_spill] sm:$0xff] }
 0x3db   :  { %6465 = vset.pattern.permute.xlu1 %v11081_v52  ;;  %v8339_v52 = vrot.slane %v8331_v59, %v7836_v24 }
 0x3dc   :  { %2183 = vperm.xlu1 %6465, %v11167_v53   ;;  %v8345_v53 = vrot.slane %v8341_v9, %v7833_v40  ;;  %11185 = vst [vmem:[#allocation249_spill] sm:$0xff] %v8385_v6 }
 0x3dd   :  { %v8324_v48 = vpop.permute.xlu1 %1779  ;;  %v8400_v45 = vmul.f32 %v8339_v52, %v11188_v61  ;;  %v8421_v61 = vrot.slane %v8331_v59, %v7881_v41 }
 0x3de   :  { %11178 = vst [vmem:[#allocation242_spill] sm:$0xff] %v8324_v48  ;;  %v8404_v39 = vmul.f32 %v8345_v53, %v11189_v20  ;;  %v8425_v20 = vrot.slane %v8341_v9, %v7881_v41  ;;  %v11211_v48 = vld [vmem:[#allocation80_spill] sm:$0xff] }
 0x3df   :  { %11192 = vst [vmem:[#allocation252_spill] sm:$0xff] %v8421_v61  ;;  %v8497_v2 = vmul.f32 %v8385_v6, %v11211_v48  ;;  %v8517_v48 = vrot.slane %v8467_v63, %v7841_v37  ;;  %v677_v6 = vrot.slane %v8331_v59, %v7847_v50 }
 0x3e0   :  { %2187 = vperm.xlu1 %6465, %v7161_v36   ;;  %v6773_v36 = vld [vmem:[#allocation3 + $0x60] sm:$0xff]  ;;  %11193 = vst [vmem:[#allocation253_spill] sm:$0xff] %v8425_v20 }
 0x3e1   :  { %v8327_v10 = vpop.permute.xlu1 %1783  ;;  %v429_v25 = vrot.slane %v6773_v36, %v7836_v24  ;;  %v557_v23 = vrot.slane %v6773_v36, %v7841_v37  ;;  %v8366_v5 = vrot.slane %v6773_v36, %v7863_v14  ;;  %v8381_v47 = vrot.slane %v6773_v36, %v7870_v49  ;;  %11212 = vst [vmem:[#allocation262_spill] sm:$0xff] %v8497_v2 }
 0x3e2   :  { %11179 = vst [vmem:[#allocation243_spill] sm:$0xff] %v8327_v10  ;;  %v8392_v30 = vrot.slane %v6773_v36, %v7876_v57  ;;  %v8428_v15 = vrot.slane %v6773_v36, %v7881_v41  ;;  %v8493_v10 = vrot.slane %v8467_v63, %v7836_v24  ;;  %v8502_v54 = vrot.slane %v6773_v36, %v7833_v40 }
 0x3e3   :  { %11182 = vst [vmem:[#allocation246_spill] sm:$0xff] %v8366_v5  ;;  %11184 = vst [vmem:[#allocation248_spill] sm:$0xff] %v8381_v47  ;;  %v8417_v34 = vmul.f32 %v429_v25, %v11191_v8  ;;  %v8437_v8 = vmul.f32 %v557_v23, %v11196_v33  ;;  %v8453_v42 = vmul.f32 %v8366_v5, %v11201_v62 }
 0x3e4   :  { %11186 = vst [vmem:[#allocation250_spill] sm:$0xff] %v8392_v30  ;;  %v425_v33 = vrot.slane %v8341_v9, %v7836_v24  ;;  %v8471_v62 = vrot.slane %v8467_v63, %v7833_v40  ;;  %v8489_v35 = vmul.f32 %v8381_v47, %v11210_v56  ;;  %v11215_v56 = vld [vmem:[#allocation89_spill] sm:$0xff]  ;;  %v8529_v5 = vrot.slane %v6773_v36, %v7847_v50 }
 0x3e5   :  { %11197 = vst [vmem:[#allocation255_spill] sm:$0xff] %v8437_v8  ;;  %v8509_v47 = vmul.f32 %v8389_v38, %v11215_v56  ;;  %v11221_v8 = vld [vmem:[#allocation93_spill] sm:$0xff]  ;;  %v681_v36 = vrot.slane %v8341_v9, %v7847_v50 }
 0x3e6   :  { %v8329_v60 = vpop.permute.xlu1 %1295  ;;  %11205 = vst [vmem:[#allocation259_spill] sm:$0xff] %v8471_v62  ;;  %11220 = vst [vmem:[#allocation265_spill] sm:$0xff] %v8529_v5 }
 0x3e7   :  { %11180 = vst [vmem:[#allocation244_spill] sm:$0xff] %v8329_v60  ;;  %v8477_v60 = vrot.slane %v8457_v51, %v7836_v24  ;;  %11216 = vst [vmem:[#allocation264_spill] sm:$0xff] %v8509_v47  ;;  %v442_v47 = vmul.f32 %v8339_v52, %v11224_v4  ;;  %v11228_v4 = vld [vmem:[#allocation107_spill] sm:$0xff] }
 0x3e9   :  { %11206 = vst [vmem:[#allocation260_spill] sm:$0xff] %v8477_v60 }
 0x3eb   :  { %v8348_v29 = vpop.permute.xlu1 %1791 }
 0x3ec   :  { %11181 = vst [vmem:[#allocation245_spill] sm:$0xff] %v8348_v29  ;;  %v8485_v29 = vmul.f32 %v8378_v28, %v11208_v7  ;;  %v11213_v7 = vld [vmem:[#allocation154_spill] sm:$0xff] }
 0x3ed   :  { %v447_v58 = vmul.f32 %v429_v25, %v11213_v7  ;;  %v8523_v25 = vmul.f32 %v8392_v30, %v11217_v17  ;;  %v11218_v7 = vld [vmem:[#allocation152_spill] sm:$0xff]  ;;  %v8541_v17 = vrot.slane %v8457_v51, %v7847_v50 }
 0x3ee   :  { %11209 = vst [vmem:[#allocation261_spill] sm:$0xff] %v8485_v29  ;;  %v335_v56 = vmul.f32 %v8502_v54, %v11218_v7  ;;  %v11223_v29 = vld [vmem:[#allocation85_spill] sm:$0xff]  ;;  %v8561_v30 = vld [vmem:[#allocation3 + $0x58] sm:$0xff] }
 0x3ef   :  { %v331_v40 = vmul.f32 %v8335_v0, %v11223_v29  ;;  %v11226_v0 = vld [vmem:[#allocation105_spill] sm:$0xff]  ;;  %v8559_v29 = vmul.f32 %v8425_v20, %v11228_v4 }
 0x3f0   :  { %v8430_v44 = vpop.permute.xlu1 %1411  ;;  %v8555_v52 = vmul.f32 %v8421_v61, %v11226_v0  ;;  %v8573_v0 = vrot.slane %v8457_v51, %v7863_v14  ;;  %v11234_v61 = vld [vmem:[#allocation111_spill] sm:$0xff] }
 0x3f1   :  { %11194 = vst [vmem:[#allocation254_spill] sm:$0xff] %v8430_v44  ;;  %v549_v44 = vrot.slane %v8331_v59, %v7841_v37  ;;  %v8533_v37 = vmul.f32 %v8408_v1, %v11221_v8  ;;  %v703_v8 = vmul.f32 %v8529_v5, %v7911_v55  ;;  %11229 = vst [vmem:[#allocation269_spill] sm:$0xff] %v8559_v29 }
 0x3f2   :  { %11227 = vst [vmem:[#allocation268_spill] sm:$0xff] %v8555_v52  ;;  %v8565_v1 = vrot.slane %v8561_v30, %v7863_v14  ;;  %11232 = vst [vmem:[#allocation270_spill] sm:$0xff] %v8573_v0  ;;  %v459_v4 = vadd.f32 %v8400_v45, %v331_v40  ;;  %v458_v29 = vadd.f32 %v442_v47, %v8396_v18  ;;  %v11233_v52 = vld [vmem:[#allocation109_spill] sm:$0xff]  ;;  %v11239_v45 = vld [vmem:[#allocation104_spill] sm:$0xff] }
 0x3f3   :  { %11222 = vst [vmem:[#allocation266_spill] sm:$0xff] %v8533_v37  ;;  %v8579_v20 = vmul.f32 %v8428_v15, %v11233_v52  ;;  %v571_v18 = vmul.f32 %v549_v44, %v11239_v45  ;;  %v8597_v47 = vrot.slane %v8457_v51, %v7870_v49 }
 0x3f5   :  { %v8505_v12 = vpop.permute.xlu1 %1907  ;;  %11240 = vst [vmem:[#allocation273_spill] sm:$0xff] %v8597_v47  ;;  %v11246_v47 = vld [vmem:[#allocation110_spill] sm:$0xff] }
 0x3f6   :  { %11214 = vst [vmem:[#allocation263_spill] sm:$0xff] %v8505_v12  ;;  %v11219_v12 = vld [vmem:[#allocation176_spill] sm:$0xff]  ;;  %v572_v0 = vmul.f32 %v553_v31, %v11246_v47 }
 0x3f7   :  { %v575_v2 = vmul.f32 %v557_v23, %v11219_v12  ;;  %v8545_v23 = vrot.slane %v8467_v63, %v7847_v50  ;;  %v463_v12 = vadd.f32 %v447_v58, %v335_v56  ;;  %v805_v58 = vrot.slane %v8331_v59, %v7863_v14  ;;  %v11230_v56 = vld [vmem:[#allocation96_spill] sm:$0xff] }
 0x3f8   :  { %v444_v55 = vmul.f32 %v425_v33, %v11230_v56  ;;  %v8583_v59 = vmul.f32 %v8445_v32, %v11234_v61  ;;  %v11236_v56 = vld [vmem:[#allocation94_spill] sm:$0xff]  ;;  %v433_v61 = vrot.slane %v8350_v22, %v7836_v24  ;;  %v8619_v22 = vrot.slane %v8561_v30, %v7876_v57  ;;  %v11252_v47 = vld [vmem:[#allocation112_spill] sm:$0xff] }
 0x3f9   :  { %v8551_v7 = vpop.permute.xlu1 %1911  ;;  %v591_v50 = vadd.f32 %v575_v2, %v463_v12  ;;  %v8590_v12 = vrot.slane %v8561_v30, %v7870_v49  ;;  %v809_v2 = vrot.slane %v8341_v9, %v7863_v14 }
 0x3fa   :  { %11225 = vst [vmem:[#allocation267_spill] sm:$0xff] %v8551_v7  ;;  %v11231_v7 = vld [vmem:[#allocation97_spill] sm:$0xff]  ;;  %11235 = vst [vmem:[#allocation271_spill] sm:$0xff] %v8583_v59  ;;  %v573_v59 = vmul.f32 %v553_v31, %v11252_v47  ;;  %v11261_v47 = vld [vmem:[#allocation126_spill] sm:$0xff] }
 0x3fb   :  { %v445_v37 = vmul.f32 %v425_v33, %v11231_v7  ;;  %v332_v33 = vmul.f32 %v8345_v53, %v11236_v56  ;;  %v11237_v7 = vld [vmem:[#allocation103_spill] sm:$0xff]  ;;  %11238 = vst [vmem:[#allocation272_spill] sm:$0xff] %v8590_v12  ;;  %v719_v40 = vadd.f32 %v703_v8, %v591_v50  ;;  %v8610_v8 = vrot.slane %v8467_v63, %v7870_v49  ;;  %v11256_v12 = vld [vmem:[#allocation133_spill] sm:$0xff] }
 0x3fc   :  { %v570_v5 = vmul.f32 %v549_v44, %v11237_v7  ;;  %v11242_v7 = vld [vmem:[#allocation129_spill] sm:$0xff]  ;;  %v11244_v44 = vld [vmem:[#allocation132_spill] sm:$0xff]  ;;  %11247 = vst [vmem:[#allocation277_spill] sm:$0xff] %v8619_v22  ;;  %v8635_v22 = vrot.slane %v8561_v30, %v7881_v41 }
 0x3fd   :  { %v460_v52 = vadd.f32 %v444_v55, %v332_v33  ;;  %v461_v56 = vadd.f32 %v445_v37, %v8404_v39  ;;  %v8606_v50 = vmul.f32 %v8461_v27, %v11242_v7  ;;  %11243 = vst [vmem:[#allocation275_spill] sm:$0xff] %v8610_v8  ;;  %v8614_v45 = vmul.f32 %v8471_v62, %v11244_v44  ;;  %v11248_v55 = vld [vmem:[#allocation167_spill] sm:$0xff]  ;;  %v11251_v44 = vld [vmem:[#allocation141_spill] sm:$0xff] }
 0x3fe   :  { %v8601_v53 = vpop.permute.xlu1 %1423  ;;  %v449_v37 = vmul.f32 %v433_v61, %v11248_v55  ;;  %v586_v39 = vadd.f32 %v570_v5, %v458_v29  ;;  %v11249_v33 = vld [vmem:[#allocation119_spill] sm:$0xff]  ;;  %v847_v8 = vadd.f32 %v8453_v42, %v719_v40  ;;  %v587_v27 = vadd.f32 %v571_v18, %v459_v4  ;;  %11253 = vst [vmem:[#allocation279_spill] sm:$0xff] %v8635_v22  ;;  %v11254_v29 = vld [vmem:[#allocation117_spill] sm:$0xff]  ;;  %v11255_v55 = vld [vmem:[#allocation124_spill] sm:$0xff] }
 0x3ff   :  { %11241 = vst [vmem:[#allocation274_spill] sm:$0xff] %v8601_v53  ;;  %11245 = vst [vmem:[#allocation276_spill] sm:$0xff] %v8614_v45  ;;  %v699_v7 = vmul.f32 %v677_v6, %v11249_v33  ;;  %v8625_v53 = vrot.slane %v8457_v51, %v7876_v57  ;;  %v8630_v62 = vmul.f32 %v8477_v60, %v11251_v44  ;;  %v11259_v40 = vld [vmem:[#allocation144_spill] sm:$0xff]  ;;  %v11263_v22 = vld [vmem:[#allocation157_spill] sm:$0xff] }
 0x400   :  { %v698_v5 = vmul.f32 %v677_v6, %v11254_v29  ;;  %v700_v33 = vmul.f32 %v681_v36, %v11255_v55  ;;  %v827_v45 = vmul.f32 %v805_v58, %v11256_v12  ;;  %v8642_v42 = vrot.slane %v8457_v51, %v7881_v41  ;;  %v11262_v29 = vld [vmem:[#allocation131_spill] sm:$0xff] }
 0x401   :  { %11250 = vst [vmem:[#allocation278_spill] sm:$0xff] %v8625_v53  ;;  %v8648_v18 = vmul.f32 %v8493_v10, %v11259_v40  ;;  %v588_v31 = vadd.f32 %v572_v0, %v460_v52  ;;  %v8652_v44 = vrot.slane %v8467_v63, %v7881_v41  ;;  %v465_v6 = vadd.f32 %v449_v37, %v8434_v21  ;;  %v11264_v40 = vld [vmem:[#allocation159_spill] sm:$0xff]  ;;  %v11265_v52 = vld [vmem:[#allocation142_spill] sm:$0xff] }
 0x402   :  { %11257 = vst [vmem:[#allocation280_spill] sm:$0xff] %v8642_v42  ;;  %v715_v55 = vadd.f32 %v699_v7, %v587_v27  ;;  %v701_v12 = vmul.f32 %v681_v36, %v11261_v47  ;;  %v826_v53 = vmul.f32 %v805_v58, %v11262_v29  ;;  %v975_v51 = vadd.f32 %v8489_v35, %v847_v8  ;;  %v11266_v36 = vld [vmem:[#allocation139_spill] sm:$0xff]  ;;  %v11267_v58 = vld [vmem:[#allocation140_spill] sm:$0xff] }
 0x403   :  { %v8644_v4 = vpop.permute.xlu1 %1919  ;;  %11260 = vst [vmem:[#allocation282_spill] sm:$0xff] %v8652_v44  ;;  %v589_v42 = vadd.f32 %v573_v59, %v461_v56  ;;  %v8660_v60 = vmul.f32 %v8513_v46, %v11263_v22  ;;  %v8664_v0 = vmul.f32 %v8517_v48, %v11264_v40  ;;  %v705_v44 = vmul.f32 %v8363_v16, %v11265_v52  ;;  %v11268_v35 = vld [vmem:[#allocation151_spill] sm:$0xff]  ;;  %v11269_v59 = vld [vmem:[#allocation156_spill] sm:$0xff]  ;;  %v11271_v16 = vld [vmem:[#allocation165_spill] sm:$0xff] }
 0x404   :  { %11258 = vst [vmem:[#allocation281_spill] sm:$0xff] %v8644_v4  ;;  %v714_v21 = vadd.f32 %v698_v5, %v586_v39  ;;  %v716_v7 = vadd.f32 %v700_v33, %v588_v31  ;;  %v843_v27 = vadd.f32 %v827_v45, %v715_v55  ;;  %v828_v37 = vmul.f32 %v809_v2, %v11266_v36  ;;  %v11272_v55 = vld [vmem:[#allocation169_spill] sm:$0xff] }
 0x405   :  { %v829_v47 = vmul.f32 %v809_v2, %v11267_v58  ;;  %v334_v56 = vmul.f32 %v8502_v54, %v11268_v35  ;;  %v954_v8 = vmul.f32 %v8374_v13, %v11269_v59  ;;  %v593_v22 = vadd.f32 %v8441_v3, %v465_v6  ;;  %v11273_v2 = vld [vmem:[#allocation178_spill] sm:$0xff]  ;;  %v11274_v6 = vld [vmem:[#allocation163_spill] sm:$0xff]  ;;  %v11303_v58 = vld [vmem:[#allocation193_spill] sm:$0xff] }
 0x406   :  { %v717_v29 = vadd.f32 %v701_v12, %v589_v42  ;;  %v842_v63 = vadd.f32 %v826_v53, %v714_v21  ;;  %v448_v39 = vmul.f32 %v433_v61, %v11271_v16  ;;  %v1103_v45 = vadd.f32 %v8523_v25, %v975_v51  ;;  %v11275_v53 = vld [vmem:[#allocation185_spill] sm:$0xff]  ;;  %v11276_v51 = vld [vmem:[#allocation191_spill] sm:$0xff]  ;;  %v11297_v35 = vld [vmem:[#allocation214_spill] sm:$0xff] }
 0x407   :  { %v957_v33 = vmul.f32 %v8378_v28, %v11272_v55  ;;  %v1082_v5 = vmul.f32 %v8389_v38, %v11273_v2  ;;  %v1065_v54 = vrot.slane %v8341_v9, %v7876_v57  ;;  %v721_v13 = vadd.f32 %v705_v44, %v593_v22  ;;  %v11277_v38 = vld [vmem:[#allocation168_spill] sm:$0xff]  ;;  %v11278_v9 = vld [vmem:[#allocation171_spill] sm:$0xff] }
 0x408   :  { %v8675_v40 = vpop.permute.xlu1 %1539  ;;  %v971_v3 = vadd.f32 %v8481_v19, %v843_v27  ;;  %v844_v31 = vadd.f32 %v828_v37, %v716_v7  ;;  %v336_v12 = vmul.f32 %v8354_v43, %v11274_v6  ;;  %v576_v61 = vmul.f32 %v8359_v11, %v11275_v53  ;;  %v11280_v11 = vld [vmem:[#allocation182_spill] sm:$0xff]  ;;  %v11281_v27 = vld [vmem:[#allocation188_spill] sm:$0xff]  ;;  %v11285_v16 = vld [vmem:[#allocation255_spill] sm:$0xff] }
 0x409   :  { %11270 = vst [vmem:[#allocation283_spill] sm:$0xff] %v8675_v40  ;;  %v845_v25 = vadd.f32 %v829_v47, %v717_v29  ;;  %v462_v42 = vadd.f32 %v8417_v34, %v334_v56  ;;  %v970_v28 = vadd.f32 %v954_v8, %v842_v63  ;;  %v1085_v21 = vmul.f32 %v1065_v54, %v11276_v51  ;;  %v11282_v56 = vld [vmem:[#allocation264_spill] sm:$0xff] }
 0x40a   :  { %v8694_v52 = vmul.f32 %v8541_v17, %v11277_v38  ;;  %v8698_v19 = vmul.f32 %v8545_v23, %v11278_v9  ;;  %v464_v44 = vadd.f32 %v448_v39, %v336_v12  ;;  %v1231_v43 = vadd.f32 %v8579_v20, %v1103_v45  ;;  %v8710_v9 = vld [vmem:[#allocation3 + $0x48] sm:$0xff]  ;;  %v11283_v39 = vld [vmem:[#allocation189_spill] sm:$0xff]  ;;  %v11286_v38 = vld [vmem:[#allocation199_spill] sm:$0xff] }
 0x40b   :  { %v8705_v47 = vmul.f32 %v8565_v1, %v11280_v11  ;;  %v973_v63 = vadd.f32 %v957_v33, %v845_v25  ;;  %v1098_v34 = vadd.f32 %v1082_v5, %v970_v28  ;;  %v849_v29 = vadd.f32 %v8465_v26, %v721_v13  ;;  %v11284_v45 = vld [vmem:[#allocation261_spill] sm:$0xff]  ;;  %v11288_v25 = vld [vmem:[#allocation202_spill] sm:$0xff]  ;;  %v11289_v26 = vld [vmem:[#allocation252_spill] sm:$0xff] }
 0x40c   :  { %v592_v7 = vadd.f32 %v576_v61, %v464_v44  ;;  %v1084_v37 = vmul.f32 %v1065_v54, %v11281_v27  ;;  %v1099_v8 = vadd.f32 %v11282_v56, %v971_v3  ;;  %v1317_v20 = vrot.slane %v8710_v9, %v11283_v39  ;;  %v11287_v33 = vld [vmem:[#allocation265_spill] sm:$0xff]  ;;  %v11290_v61 = vld [vmem:[#allocation208_spill] sm:$0xff] }
 0x40d   :  { %v8701_v22 = vpop.permute.xlu1 %2035  ;;  %v972_v12 = vadd.f32 %v11284_v45, %v844_v31  ;;  %v1101_v53 = vadd.f32 %v1085_v21, %v973_v63  ;;  %v590_v6 = vadd.f32 %v11285_v16, %v462_v42  ;;  %v702_v5 = vmul.f32 %v11287_v33, %v11286_v38  ;;  %v11291_v54 = vld [vmem:[#allocation253_spill] sm:$0xff]  ;;  %v11294_v21 = vld [vmem:[#allocation246_spill] sm:$0xff]  ;;  %v11295_v16 = vld [vmem:[#allocation268_spill] sm:$0xff] }
 0x40e   :  { %11279 = vst [vmem:[#allocation284_spill] sm:$0xff] %v8701_v22  ;;  %v1211_v13 = vmul.f32 %v11289_v26, %v11288_v25  ;;  %v1212_v28 = vmul.f32 %v11291_v54, %v11290_v61  ;;  %v1321_v3 = vrot.slane %v8561_v30, %v11283_v39  ;;  %v1359_v44 = vadd.f32 %v8606_v50, %v1231_v43  ;;  %v11293_v31 = vld [vmem:[#allocation213_spill] sm:$0xff]  ;;  %v11296_v33 = vld [vmem:[#allocation262_spill] sm:$0xff]  ;;  %v11298_v11 = vld [vmem:[#allocation256_spill] sm:$0xff] }
 0x40f   :  { %v830_v63 = vmul.f32 %v11294_v21, %v11293_v31  ;;  %v1226_v42 = vadd.f32 %v11295_v16, %v1098_v34  ;;  %v1445_v45 = vrot.slane %v8710_v9, %v7836_v24  ;;  %v977_v26 = vadd.f32 %v11296_v33, %v849_v29  ;;  %v8740_v43 = vld [vmem:[%s10407_s5] ss:$0 sm:$0xff]  ;;  %v11300_v34 = vld [vmem:[#allocation215_spill] sm:$0xff]  ;;  %v11302_v27 = vld [vmem:[#allocation192_spill] sm:$0xff] }
 0x410   :  { %v1100_v38 = vadd.f32 %v1084_v37, %v972_v12  ;;  %v1338_v54 = vmul.f32 %v1317_v20, %v11297_v35  ;;  %v720_v61 = vadd.f32 %v11298_v11, %v592_v7  ;;  %v1449_v50 = vrot.slane %v8561_v30, %v7836_v24  ;;  %11299 = vst [vmem:[#allocation261_spill] sm:$0xff] %v8740_v43  ;;  %v11301_v31 = vld [vmem:[#allocation269_spill] sm:$0xff]  ;;  %v11309_v25 = vld [vmem:[#allocation219_spill] sm:$0xff]  ;;  %v11315_v24 = vld [vmem:[#allocation224_spill] sm:$0xff] }
 0x411   :  { %v8725_v56 = vpop.permute.xlu1 %2039  ;;  %v718_v21 = vadd.f32 %v702_v5, %v590_v6  ;;  %v1339_v16 = vmul.f32 %v1317_v20, %v11300_v34  ;;  %v1229_v51 = vadd.f32 %v11301_v31, %v1101_v53  ;;  %v1573_v29 = vrot.slane %v8710_v9, %v11302_v27  ;;  %v11304_v20 = vld [vmem:[#allocation266_spill] sm:$0xff]  ;;  %v11317_v39 = vld [vmem:[#allocation225_spill] sm:$0xff] }
 0x412   :  { %11292 = vst [vmem:[#allocation264_spill] sm:$0xff] %v8725_v56  ;;  %v1227_v37 = vadd.f32 %v1211_v13, %v1099_v8  ;;  %v1228_v12 = vadd.f32 %v1212_v28, %v1100_v38  ;;  %v8748_v11 = vrot.slane %v8561_v30, %v11302_v27  ;;  %v8751_v33 = vadd.f32 %v8630_v62, %v1359_v44  ;;  %v11306_v13 = vld [vmem:[#allocation217_spill] sm:$0xff]  ;;  %v11307_v28 = vld [vmem:[#allocation247_spill] sm:$0xff]  ;;  %v11308_v34 = vld [vmem:[#allocation218_spill] sm:$0xff] }
 0x413   :  { %v846_v55 = vadd.f32 %v830_v63, %v718_v21  ;;  %v1701_v6 = vrot.slane %v8710_v9, %v11303_v58  ;;  %v8756_v5 = vadd.f32 %v11304_v20, %v977_v26  ;;  %v1354_v8 = vadd.f32 %v1338_v54, %v1226_v42  ;;  %v11310_v42 = vld [vmem:[#allocation221_spill] sm:$0xff]  ;;  %v11311_v54 = vld [vmem:[#allocation248_spill] sm:$0xff]  ;;  %v11313_v27 = vld [vmem:[#allocation222_spill] sm:$0xff] }
 0x414   :  { %v832_v36 = vmul.f32 %v11307_v28, %v11306_v13  ;;  %v1340_v35 = vmul.f32 %v1321_v3, %v11308_v34  ;;  %v1355_v63 = vadd.f32 %v1339_v16, %v1227_v37  ;;  %v8767_v21 = vrot.slane %v8561_v30, %v11303_v58  ;;  %v11312_v34 = vld [vmem:[#allocation15_spill] sm:$0xff] }
 0x415   :  { %v6158_v7 = vpop.f32.mrb[0].mxu0  ;;  %v1341_v2 = vmul.f32 %v1321_v3, %v11309_v25  ;;  %v958_v59 = vmul.f32 %v11311_v54, %v11310_v42  ;;  %v1467_v16 = vmul.f32 %v1445_v45, %v11313_v27  ;;  %v11316_v3 = vld [vmem:[#allocation249_spill] sm:$0xff]  ;;  %v1468_v54 = vmul.f32 %v1449_v50, %v11317_v39 }
 0x416   :  { %v2590_v53 = vadd.f32 %v6158_v7, %v8740_v43  ;;  %v8759_v31 = vpop.permute.xlu1 %1551  ;;  %v2518_v38 = vpop.f32.mrb[1].mxu0  ;;  %v848_v30 = vadd.f32 %v832_v36, %v720_v61  ;;  %v1356_v58 = vadd.f32 %v1340_v35, %v1228_v12  ;;  %v960_v25 = vmul.f32 %v11316_v3, %v11315_v24  ;;  %v11320_v12 = vld [vmem:[#allocation229_spill] sm:$0xff]  ;;  %v11323_v3 = vld [vmem:[#allocation148_spill] sm:$0xff] }
 0x417   :  { %11305 = vst [vmem:[#allocation255_spill] sm:$0xff] %v8759_v31  ;;  %v2588_v62 = vadd.f32 %v8740_v43, %v2518_v38  ;;  %v6159_v44 = vpop.f32.mrb[2].mxu0  ;;  %v1466_v38 = vmul.f32 %v1445_v45, %v11312_v34  ;;  %v11319_v34 = vld [vmem:[#allocation145_spill] sm:$0xff]  ;;  %v1829_v45 = vrot.slane %v8710_v9, %v7863_v14  ;;  %v8785_v36 = vadd.f32 %v958_v59, %v846_v55  ;;  %v8795_v24 = vpop.permute.xlu0 %2043 }
 0x418   :  { %v5954_v26 = vmul.f32 -1.442695, %v2590_v53  ;;  %v2591_v7 = vadd.f32 %v6159_v44, %v8740_v43  ;;  %v2521_v20 = vpop.f32.mrb[3].mxu0  ;;  %v1483_v61 = vadd.f32 %v1467_v16, %v1355_v63  ;;  %11325 = vst [vmem:[#allocation252_spill] sm:$0xff] %v8795_v24  ;;  %v1484_v59 = vadd.f32 %v1468_v54, %v1356_v58  ;;  %v11328_v16 = vld [vmem:[#allocation237_spill] sm:$0xff]  ;;  %v11334_v54 = vld [vmem:[#allocation263_spill] sm:$0xff] }
 0x419   :  { %v5952_v28 = vmul.f32 -1.442695, %v2588_v62  ;;  %v2589_v13 = vadd.f32 %v8740_v43, %v2521_v20  ;;  %v11318_v62 = vld [vmem:[#allocation226_spill] sm:$0xff]  ;;  %v1357_v20 = vadd.f32 %v1341_v2, %v1229_v51  ;;  %v1594_v43 = vmul.f32 %v1573_v29, %v11319_v34 }
 0x41a   :  { %6514 = vpow2.f32 %v5954_v26  ;;  %v5955_v37 = vmul.f32 -1.442695, %v2591_v7  ;;  %v1469_v42 = vmul.f32 %v1449_v50, %v11318_v62  ;;  %v1482_v35 = vadd.f32 %v1466_v38, %v1354_v8  ;;  %v11321_v26 = vld [vmem:[#allocation231_spill] sm:$0xff]  ;;  %v11330_v62 = vld [vmem:[#allocation242_spill] sm:$0xff] }
 0x41b   :  { %6516 = vpow2.f32 %v5952_v28  ;;  %v5953_v53 = vmul.f32 -1.442695, %v2589_v13  ;;  %v8776_v44 = vpop.permute.xlu1 %2047  ;;  %v1595_v13 = vmul.f32 %v1573_v29, %v11320_v12  ;;  %v11322_v7 = vld [vmem:[#allocation251_spill] sm:$0xff]  ;;  %v1596_v50 = vmul.f32 %v8748_v11, %v11323_v3  ;;  %v11332_v12 = vld [vmem:[#allocation250_spill] sm:$0xff] }
 0x41c   :  { %11314 = vst [vmem:[#allocation265_spill] sm:$0xff] %v8776_v44  ;;  %6518 = vpow2.f32 %v5955_v37  ;;  %v1088_v28 = vmul.f32 %v11322_v7, %v11321_v26  ;;  %v11324_v37 = vld [vmem:[#allocation149_spill] sm:$0xff]  ;;  %v1957_v51 = vrot.slane %v8710_v9, %v7870_v49  ;;  %v1485_v55 = vadd.f32 %v1469_v42, %v1357_v20  ;;  %v11326_v8 = vld [vmem:[#allocation235_spill] sm:$0xff]  ;;  %v11329_v26 = vld [vmem:[#allocation16_spill] sm:$0xff] }
 0x41d   :  { %6520 = vpow2.f32 %v5953_v53  ;;  %v1722_v2 = vmul.f32 %v1701_v6, %v11324_v37  ;;  %v976_v53 = vadd.f32 %v960_v25, %v848_v30  ;;  %v1723_v63 = vmul.f32 %v1701_v6, %v11326_v8  ;;  %v11331_v37 = vld [vmem:[#allocation228_spill] sm:$0xff]  ;;  %v11333_v25 = vld [vmem:[#allocation243_spill] sm:$0xff] }
 0x41e   :  { %v1610_v29 = vadd.f32 %v1594_v43, %v1482_v35  ;;  %v1216_v7 = vmul.f32 %v8445_v32, %v11328_v16  ;;  %v1724_v3 = vmul.f32 %v8767_v21, %v11329_v26  ;;  %v1850_v39 = vmul.f32 %v1829_v45, %v11330_v62  ;;  %v11335_v35 = vld [vmem:[#allocation146_spill] sm:$0xff]  ;;  %v11336_v62 = vld [vmem:[#allocation267_spill] sm:$0xff] }
 0x41f   :  { %v1086_v34 = vmul.f32 %v11332_v12, %v11331_v37  ;;  %v1611_v27 = vadd.f32 %v1595_v13, %v1483_v61  ;;  %v1851_v58 = vmul.f32 %v1829_v45, %v11333_v25  ;;  %v2085_v6 = vrot.slane %v8710_v9, %v7876_v57 }
 0x420   :  { %v8798_v38 = vpop.permute.xlu1 %1667  ;;  %v1612_v42 = vadd.f32 %v1596_v50, %v1484_v59  ;;  %v1738_v30 = vadd.f32 %v1722_v2, %v1610_v29  ;;  %v1104_v43 = vadd.f32 %v1088_v28, %v976_v53  ;;  %v1978_v20 = vmul.f32 %v1957_v51, %v11334_v54  ;;  %v8818_v2 = vpop.permute.xlu0 %2055 }
 0x421   :  { %11327 = vst [vmem:[#allocation253_spill] sm:$0xff] %v8798_v38  ;;  %v1597_v16 = vmul.f32 %v8748_v11, %v11335_v35  ;;  %v1739_v26 = vadd.f32 %v1723_v63, %v1611_v27  ;;  %v1979_v8 = vmul.f32 %v1957_v51, %v11336_v62  ;;  %v2213_v61 = vrot.slane %v8710_v9, %v7881_v41  ;;  %v11339_v63 = vld [vmem:[#allocation233_spill] sm:$0xff] }
 0x422   :  { %v1232_v45 = vadd.f32 %v1216_v7, %v1104_v43  ;;  %v1740_v13 = vadd.f32 %v1724_v3, %v1612_v42  ;;  %v1866_v37 = vadd.f32 %v1850_v39, %v1738_v30  ;;  %11338 = vst [vmem:[#allocation268_spill] sm:$0xff] %v8818_v2  ;;  %v2106_v59 = vmul.f32 %v2085_v6, %v8701_v22  ;;  %v11340_v30 = vld [vmem:[#allocation276_spill] sm:$0xff] }
 0x423   :  { %v1867_v53 = vadd.f32 %v1851_v58, %v1739_v26  ;;  %v2107_v27 = vmul.f32 %v2085_v6, %v8725_v56  ;;  %v1214_v9 = vmul.f32 %v8428_v15, %v11339_v63  ;;  %v11341_v58 = vld [vmem:[#allocation239_spill] sm:$0xff] }
 0x424   :  { %v6515_v32 = vpop.eup %6514  ;;  %v1994_v29 = vadd.f32 %v1978_v20, %v1866_v37  ;;  %v1360_v43 = vadd.f32 %v11340_v30, %v1232_v45  ;;  %v1868_v26 = vadd.f32 %v8705_v47, %v1740_v13  ;;  %v1725_v6 = vmul.f32 %v8767_v21, %v11341_v58  ;;  %v8838_v13 = vpop.permute.xlu0 %2171 }
 0x425   :  { %v6517_v12 = vpop.eup %6516  ;;  %v2654_v25 = vadd.f32 1.0, %v6515_v32  ;;  %v8816_v50 = vpop.permute.xlu1 %2163  ;;  %v1995_v39 = vadd.f32 %v1979_v8, %v1867_v53  ;;  %v11343_v8 = vld [vmem:[#allocation198_spill] sm:$0xff]  ;;  %v11345_v53 = vld [vmem:[#allocation245_spill] sm:$0xff]  ;;  %v1615_v47 = vadd.f32 %v8660_v60, %v8751_v33  ;;  %11346 = vst [vmem:[#allocation256_spill] sm:$0xff] %v8838_v13  ;;  %v1102_v21 = vadd.f32 %v1086_v34, %v8785_v36 }
 0x426   :  { %11337 = vst [vmem:[#allocation246_spill] sm:$0xff] %v8816_v50  ;;  %v6519_v28 = vpop.eup %6518  ;;  %v2652_v11 = vadd.f32 1.0, %v6517_v12  ;;  %v2234_v42 = vmul.f32 %v2213_v61, %v8816_v50  ;;  %v2122_v12 = vadd.f32 %v2106_v59, %v1994_v29  ;;  %v1853_v45 = vmul.f32 %v8565_v1, %v11345_v53  ;;  %v11347_v59 = vld [vmem:[#allocation271_spill] sm:$0xff]  ;;  %v11348_v29 = vld [vmem:[#allocation241_spill] sm:$0xff]  ;;  %v11407_v50 = vld [vmem:[#allocation20_spill] sm:$0xff] }
 0x427   :  { %v6521_v51 = vpop.eup %6520  ;;  %6522 = vrcp.f32 %v2654_v25  ;;  %v2655_v3 = vadd.f32 1.0, %v6519_v28  ;;  %v2123_v15 = vadd.f32 %v2107_v27, %v1995_v39  ;;  %v11344_v25 = vld [vmem:[#allocation272_spill] sm:$0xff]  ;;  %v1613_v28 = vadd.f32 %v1597_v16, %v1485_v55  ;;  %v11351_v16 = vld [vmem:[#allocation259_spill] sm:$0xff] }
 0x428   :  { %6524 = vrcp.f32 %v2652_v11  ;;  %v2653_v7 = vadd.f32 1.0, %v6521_v51  ;;  %v1980_v20 = vmul.f32 %v11344_v25, %v11343_v8  ;;  %v1233_v27 = vadd.f32 %v11347_v59, %v8756_v5  ;;  %v11350_v55 = vld [vmem:[#allocation244_spill] sm:$0xff]  ;;  %v11383_v8 = vld [vmem:[#allocation55_spill] sm:$0xff] }
 0x429   :  { %6526 = vrcp.f32 %v2655_v3  ;;  %v8829_v32 = vpop.permute.xlu1 %2167  ;;  %v2250_v11 = vadd.f32 %v2234_v42, %v2122_v12  ;;  %v11349_v3 = vld [vmem:[#allocation257_spill] sm:$0xff]  ;;  %v1981_v1 = vmul.f32 %v11344_v25, %v8644_v4  ;;  %v1230_v60 = vadd.f32 %v1214_v9, %v1102_v21  ;;  %v11353_v42 = vld [vmem:[#allocation254_spill] sm:$0xff]  ;;  %v11354_v12 = vld [vmem:[#allocation260_spill] sm:$0xff] }
 0x42a   :  { %11342 = vst [vmem:[#allocation262_spill] sm:$0xff] %v8829_v32  ;;  %6528 = vrcp.f32 %v2653_v7  ;;  %v2235_v37 = vmul.f32 %v2213_v61, %v8829_v32  ;;  %v1741_v61 = vadd.f32 %v1725_v6, %v1613_v28  ;;  %v1342_v39 = vmul.f32 %v11349_v3, %v11348_v29  ;;  %v11356_v28 = vld [vmem:[#allocation277_spill] sm:$0xff]  ;;  %v11357_v3 = vld [vmem:[#allocation184_spill] sm:$0xff] }
 0x42b   :  { %v1345_v7 = vmul.f32 %v11351_v16, %v11350_v55  ;;  %v1488_v33 = vadd.f32 %v8648_v18, %v1360_v43  ;;  %v1996_v30 = vadd.f32 %v1980_v20, %v1868_v26  ;;  %v1470_v6 = vmul.f32 %v11354_v12, %v11353_v42  ;;  %v11358_v16 = vld [vmem:[#allocation270_spill] sm:$0xff]  ;;  %v11359_v9 = vld [vmem:[#allocation201_spill] sm:$0xff]  ;;  %v11361_v43 = vld [vmem:[#allocation203_spill] sm:$0xff] }
 0x42c   :  { %v2251_v51 = vadd.f32 %v2235_v37, %v2123_v15  ;;  %v1869_v5 = vadd.f32 %v1853_v45, %v1741_v61  ;;  %v11355_v15 = vld [vmem:[#allocation274_spill] sm:$0xff]  ;;  %v2109_v59 = vmul.f32 %v11356_v28, %v8776_v44  ;;  %v1855_v25 = vmul.f32 %v11358_v16, %v11357_v3  ;;  %v11360_v21 = vld [vmem:[#allocation273_spill] sm:$0xff]  ;;  %v11362_v26 = vld [vmem:[#allocation275_spill] sm:$0xff]  ;;  %v8874_v3 = vpop.permute.xlu0 %2179 }
 0x42d   :  { %v1473_v37 = vmul.f32 %v8493_v10, %v11355_v15  ;;  %v8862_v18 = vmul.f32 %v11360_v21, %v11359_v9  ;;  %v8866_v20 = vmul.f32 %v11362_v26, %v11361_v43  ;;  %v2108_v45 = vmul.f32 %v11356_v28, %v8795_v24  ;;  %v11363_v55 = vld [vmem:[#allocation279_spill] sm:$0xff]  ;;  %11364 = vst [vmem:[#allocation266_spill] sm:$0xff] %v8874_v3  ;;  %v11382_v24 = vld [vmem:[#allocation48_spill] sm:$0xff] }
 0x42e   :  { %v8850_v34 = vpop.permute.xlu1 %1679  ;;  %v2262_v36 = vpack.c.bf16 %v2251_v51, %v2250_v11  ;;  %v1358_v11 = vadd.f32 %v1342_v39, %v1230_v60  ;;  %v1361_v51 = vadd.f32 %v1345_v7, %v1233_v27  ;;  %v1997_v61 = vadd.f32 %v1981_v1, %v1869_v5 }
 0x42f   :  { %11352 = vst [vmem:[#allocation269_spill] sm:$0xff] %v8850_v34  ;;  %v1743_v12 = vadd.f32 %v8694_v52, %v1615_v47  ;;  %v2236_v9 = vmul.f32 %v11363_v55, %v8838_v13  ;;  %v1598_v43 = vmul.f32 %v8513_v46, %v8675_v40  ;;  %v1601_v28 = vmul.f32 %v8517_v48, %v8759_v31  ;;  %v11381_v40 = vld [vmem:[#allocation35_spill] sm:$0xff] }
 0x430   :  { %6164 = vmatprep.mubr.msk.bf16.mxu0 %vm2314_vm1, %v2262_v36  ;;  %v2124_v42 = vadd.f32 %v2108_v45, %v1996_v30  ;;  %v1486_v29 = vadd.f32 %v1470_v6, %v1358_v11  ;;  %v1489_v39 = vadd.f32 %v1473_v37, %v1361_v51  ;;  %v2125_v27 = vadd.f32 %v2109_v59, %v1997_v61  ;;  %v11366_v30 = vld [vmem:[#allocation278_spill] sm:$0xff]  ;;  %v11367_v6 = vld [vmem:[#allocation280_spill] sm:$0xff] }
 0x431   :  { %v6523_v10 = vpop.eup %6522  ;;  %v1616_v52 = vadd.f32 %v8664_v0, %v1488_v33  ;;  %v1726_v60 = vmul.f32 %v8541_v17, %v8798_v38  ;;  %v1729_v46 = vmul.f32 %v8545_v23, %v8850_v34  ;;  %v8893_v5 = vmul.f32 %v11366_v30, %v8818_v2  ;;  %v11368_v11 = vld [vmem:[#allocation258_spill] sm:$0xff] }
 0x432   :  { %v6525_v15 = vpop.eup %6524  ;;  %v8897_v37 = vmul.f32 %v11367_v6, %v8874_v3  ;;  %v8901_v33 = vadd.f32 %v1855_v25, %v1743_v12  ;;  %v1614_v59 = vadd.f32 %v1598_v43, %v1486_v29  ;;  %v1617_v17 = vadd.f32 %v1601_v28, %v1489_v39  ;;  %v11371_v28 = vld [vmem:[#allocation190_spill] sm:$0xff]  ;;  %v11372_v39 = vld [vmem:[#allocation192_spill] sm:$0xff] }
 0x433   :  { %v6527_v36 = vpop.eup %6526  ;;  %v8880_v7 = vpop.permute.xlu1 %2175  ;;  %v1841_v51 = vrot.slane %v11368_v11, %v7863_v14  ;;  %v8909_v61 = vrot.slane %v11368_v11, %v7876_v57  ;;  %v11376_v11 = vld [vmem:[#allocation24_spill] sm:$0xff]  ;;  %v11378_v3 = vld [vmem:[#allocation26_spill] sm:$0xff] }
 0x434   :  { %11365 = vst [vmem:[#allocation247_spill] sm:$0xff] %v8880_v7  ;;  %v6529_v47 = vpop.eup %6528  ;;  %v8883_v1 = vpack.c.bf16 %v6527_v36, %v6523_v10  ;;  %v2237_v48 = vmul.f32 %v11363_v55, %v8880_v7  ;;  %v2252_v10 = vadd.f32 %v2236_v9, %v2124_v42  ;;  %v1744_v55 = vadd.f32 %v8698_v19, %v1616_v52  ;;  %v11370_v9 = vld [vmem:[#allocation189_spill] sm:$0xff] }
 0x435   :  { %v8899_v0 = vpack.c.bf16 %v6529_v47, %v6525_v15  ;;  %v1742_v25 = vadd.f32 %v1726_v60, %v1614_v59  ;;  %v1745_v12 = vadd.f32 %v1729_v46, %v1617_v17  ;;  %v11373_v60 = vld [vmem:[#allocation193_spill] sm:$0xff] }
 0x436   :  { %v2253_v45 = vadd.f32 %v2237_v48, %v2125_v27  ;;  %v8912_v15 = vunpack.c.l.bf16 %v8883_v1  ;;  %v8922_v52 = vunpack.c.h.bf16 %v8883_v1 }
 0x437   :  { %v2708_v23 = vunpack.c.l.bf16 %v8899_v0  ;;  %v8925_v47 = vunpack.c.h.bf16 %v8899_v0 }
 0x438   :  { %v8914_v29 = vpop.permute.xlu1 %1795  ;;  %v2263_v43 = vpack.c.bf16 %v2253_v45, %v2252_v10  ;;  %v11375_v45 = vld [vmem:[#allocation17_spill] sm:$0xff] }
 0x439   :  { %11369 = vst [vmem:[#allocation248_spill] sm:$0xff] %v8914_v29  ;;  %v1854_v42 = vmul.f32 %v11358_v16, %v8914_v29  ;;  %v2727_v19 = vrot.slane %v2708_v23, %v11370_v9  ;;  %v2775_v36 = vrot.slane %v2708_v23, %v11371_v28  ;;  %v2839_v27 = vrot.slane %v2708_v23, %v11372_v39  ;;  %v11374_v16 = vld [vmem:[#allocation18_spill] sm:$0xff] }
 0x43a   :  { %6165 = vmatmul.mubr.msk.bf16.gmra.mrb[8].mxu0 %vm2314_vm1, %v2263_v43  ;;  %v2903_v46 = vrot.slane %v2708_v23, %v11373_v60  ;;  %v2967_v48 = vrot.slane %v2708_v23, %v7863_v14  ;;  %v8938_v29 = vrot.slane %v8912_v15, %v11370_v9  ;;  %v8942_v43 = vrot.slane %v8912_v15, %v11371_v28 }
 0x43b   :  { %v1870_v59 = vadd.f32 %v1854_v42, %v1742_v25  ;;  %v2756_v17 = vmul.f32 %v2727_v19, %v11374_v16  ;;  %v2757_v10 = vmul.f32 %v2727_v19, %v11375_v45  ;;  %v2804_v34 = vmul.f32 %v2775_v36, %v11376_v11  ;;  %v11379_v45 = vld [vmem:[#allocation21_spill] sm:$0xff] }
 0x43c   :  { %v8933_v31 = vpop.permute.xlu1 %1803  ;;  %v2805_v2 = vmul.f32 %v2775_v36, %v11378_v3  ;;  %v8946_v25 = vrot.slane %v8912_v15, %v11372_v39  ;;  %v2868_v11 = vmul.f32 %v2839_v27, %v11379_v45  ;;  %v3031_v16 = vrot.slane %v2708_v23, %v7870_v49  ;;  %v11380_v3 = vld [vmem:[#allocation31_spill] sm:$0xff]  ;;  %v11385_v45 = vld [vmem:[#allocation40_spill] sm:$0xff] }
 0x43d   :  { %11377 = vst [vmem:[#allocation249_spill] sm:$0xff] %v8933_v31  ;;  %v1856_v42 = vmul.f32 %v1841_v51, %v8933_v31  ;;  %v2820_v19 = vadd.f32 %v2804_v34, %v2756_v17  ;;  %v2869_v38 = vmul.f32 %v2839_v27, %v11380_v3  ;;  %v2932_v63 = vmul.f32 %v2903_v46, %v11381_v40  ;;  %v11388_v40 = vld [vmem:[#allocation82_spill] sm:$0xff] }
 0x43e   :  { %v2821_v36 = vadd.f32 %v2805_v2, %v2757_v10  ;;  %v3095_v7 = vrot.slane %v2708_v23, %v7876_v57  ;;  %v8955_v13 = vadd.f32 %v8862_v18, %v1870_v59  ;;  %v2933_v4 = vmul.f32 %v2903_v46, %v11382_v24  ;;  %v11387_v24 = vld [vmem:[#allocation66_spill] sm:$0xff] }
 0x43f   :  { %v2884_v44 = vadd.f32 %v2868_v11, %v2820_v19  ;;  %v2996_v31 = vmul.f32 %v2967_v48, %v11383_v8  ;;  %v2997_v53 = vmul.f32 %v2967_v48, %v11385_v45  ;;  %v3159_v2 = vrot.slane %v2708_v23, %v7881_v41  ;;  %v11386_v11 = vld [vmem:[#allocation47_spill] sm:$0xff]  ;;  %v11389_v23 = vld [vmem:[#allocation60_spill] sm:$0xff]  ;;  %v11390_v45 = vld [vmem:[#allocation69_spill] sm:$0xff] }
 0x440   :  { %v8959_v34 = vpop.permute.xlu1 %1807  ;;  %v2885_v17 = vadd.f32 %v2869_v38, %v2821_v36  ;;  %v3223_v27 = vrot.slane %v8925_v47, %v11370_v9  ;;  %v8965_v10 = vadd.f32 %v1856_v42, %v1744_v55  ;;  %v3060_v19 = vmul.f32 %v3031_v16, %v11386_v11 }
 0x441   :  { %11384 = vst [vmem:[#allocation251_spill] sm:$0xff] %v8959_v34  ;;  %v1857_v18 = vmul.f32 %v1841_v51, %v8959_v34  ;;  %v2948_v59 = vadd.f32 %v2932_v63, %v2884_v44  ;;  %v3061_v8 = vmul.f32 %v3031_v16, %v11387_v24  ;;  %v3124_v3 = vmul.f32 %v3095_v7, %v11388_v40  ;;  %v11391_v63 = vld [vmem:[#allocation95_spill] sm:$0xff]  ;;  %v11394_v24 = vld [vmem:[#allocation120_spill] sm:$0xff]  ;;  %v11399_v34 = vld [vmem:[#allocation122_spill] sm:$0xff] }
 0x442   :  { %v2949_v46 = vadd.f32 %v2933_v4, %v2885_v17  ;;  %v3287_v38 = vrot.slane %v8925_v47, %v11371_v28  ;;  %v3125_v36 = vmul.f32 %v3095_v7, %v11389_v23  ;;  %v3188_v58 = vmul.f32 %v3159_v2, %v11390_v45  ;;  %v11392_v4 = vld [vmem:[#allocation78_spill] sm:$0xff] }
 0x443   :  { %v3012_v48 = vadd.f32 %v2996_v31, %v2948_v59  ;;  %v3351_v55 = vrot.slane %v8925_v47, %v11372_v39  ;;  %v1873_v51 = vadd.f32 %v1857_v18, %v1745_v12  ;;  %v3189_v42 = vmul.f32 %v3159_v2, %v11391_v63 }
 0x444   :  { %v3013_v44 = vadd.f32 %v2997_v53, %v2949_v46  ;;  %v3252_v17 = vmul.f32 %v3223_v27, %v11392_v4  ;;  %v3253_v11 = vmul.f32 %v3223_v27, %v11394_v24  ;;  %v3415_v31 = vrot.slane %v8925_v47, %v11373_v60  ;;  %v11395_v53 = vld [vmem:[#allocation134_spill] sm:$0xff]  ;;  %v11396_v4 = vld [vmem:[#allocation92_spill] sm:$0xff] }
 0x445   :  { %v8979_v16 = vpop.permute.xlu1 %1927  ;;  %v3076_v40 = vadd.f32 %v3060_v19, %v3012_v48  ;;  %v3479_v7 = vrot.slane %v8925_v47, %v7863_v14  ;;  %v3316_v18 = vmul.f32 %v3287_v38, %v11395_v53  ;;  %v3543_v2 = vrot.slane %v8925_v47, %v7870_v49  ;;  %v11397_v48 = vld [vmem:[#allocation108_spill] sm:$0xff]  ;;  %v11398_v24 = vld [vmem:[#allocation150_spill] sm:$0xff] }
 0x446   :  { %11393 = vst [vmem:[#allocation250_spill] sm:$0xff] %v8979_v16  ;;  %v1983_v59 = vmul.f32 %v11360_v21, %v8979_v16  ;;  %v3077_v12 = vadd.f32 %v3061_v8, %v3013_v44  ;;  %v3317_v19 = vmul.f32 %v3287_v38, %v11396_v4  ;;  %v3380_v27 = vmul.f32 %v3351_v55, %v11397_v48  ;;  %v11402_v4 = vld [vmem:[#allocation137_spill] sm:$0xff]  ;;  %v11406_v16 = vld [vmem:[#allocation19_spill] sm:$0xff] }
 0x447   :  { %v3140_v46 = vadd.f32 %v3124_v3, %v3076_v40  ;;  %v3381_v63 = vmul.f32 %v3351_v55, %v11398_v24  ;;  %v8995_v45 = vadd.f32 %v8866_v20, %v1873_v51  ;;  %v3444_v35 = vmul.f32 %v3415_v31, %v11399_v34  ;;  %v11401_v3 = vld [vmem:[#allocation162_spill] sm:$0xff]  ;;  %v11403_v55 = vld [vmem:[#allocation173_spill] sm:$0xff]  ;;  %v11404_v20 = vld [vmem:[#allocation187_spill] sm:$0xff] }
 0x448   :  { %v3141_v23 = vadd.f32 %v3125_v36, %v3077_v12  ;;  %v3607_v8 = vrot.slane %v8925_v47, %v7876_v57  ;;  %v1999_v21 = vadd.f32 %v1983_v59, %v8901_v33  ;;  %v3445_v38 = vmul.f32 %v3415_v31, %v11401_v3  ;;  %v11405_v36 = vld [vmem:[#allocation161_spill] sm:$0xff]  ;;  %v11408_v59 = vld [vmem:[#allocation28_spill] sm:$0xff] }
 0x449   :  { %v9001_v44 = vpop.permute.xlu1 %1931  ;;  %v3204_v40 = vadd.f32 %v3188_v58, %v3140_v46  ;;  %v3508_v48 = vmul.f32 %v3479_v7, %v11402_v4  ;;  %v3509_v24 = vmul.f32 %v3479_v7, %v11403_v55  ;;  %v3572_v51 = vmul.f32 %v3543_v2, %v11404_v20  ;;  %v11410_v46 = vld [vmem:[#allocation183_spill] sm:$0xff] }
 0x44a   :  { %11400 = vst [vmem:[#allocation276_spill] sm:$0xff] %v9001_v44  ;;  %v3205_v53 = vadd.f32 %v3189_v42, %v3141_v23  ;;  %v3573_v12 = vmul.f32 %v3543_v2, %v11405_v36  ;;  %v2758_v32 = vmul.f32 %v8938_v29, %v11406_v16  ;;  %v2759_v33 = vmul.f32 %v8938_v29, %v11407_v50  ;;  %v11409_v42 = vld [vmem:[#allocation205_spill] sm:$0xff] }
 0x44b   :  { %v3268_v34 = vadd.f32 %v3252_v17, %v3204_v40  ;;  %v2806_v58 = vmul.f32 %v8942_v43, %v11408_v59  ;;  %v1984_v31 = vmul.f32 %v11362_v26, %v9001_v44  ;;  %v3636_v7 = vmul.f32 %v3607_v8, %v11409_v42  ;;  %v11411_v2 = vld [vmem:[#allocation29_spill] sm:$0xff]  ;;  %v11417_v59 = vld [vmem:[#allocation42_spill] sm:$0xff] }
 0x44c   :  { %v3269_v23 = vadd.f32 %v3253_v11, %v3205_v53  ;;  %v3637_v20 = vmul.f32 %v3607_v8, %v11410_v46  ;;  %v2807_v17 = vmul.f32 %v8942_v43, %v11411_v2  ;;  %v11412_v36 = vld [vmem:[#allocation33_spill] sm:$0xff]  ;;  %v3671_v50 = vrot.slane %v8925_v47, %v7881_v41 }
 0x44d   :  { %v3332_v55 = vadd.f32 %v3316_v18, %v3268_v34  ;;  %v2822_v40 = vadd.f32 %v2806_v58, %v2758_v32  ;;  %v2870_v4 = vmul.f32 %v8946_v25, %v11412_v36  ;;  %v2907_v26 = vrot.slane %v8912_v15, %v11373_v60  ;;  %v11414_v18 = vld [vmem:[#allocation23_spill] sm:$0xff]  ;;  %v11416_v36 = vld [vmem:[#allocation38_spill] sm:$0xff] }
 0x44e   :  { %v9022_v29 = vpop.permute.xlu1 %2051  ;;  %v3333_v3 = vadd.f32 %v3317_v19, %v3269_v23  ;;  %v2971_v11 = vrot.slane %v8912_v15, %v7863_v14  ;;  %v2823_v53 = vadd.f32 %v2807_v17, %v2759_v33  ;;  %v2871_v32 = vmul.f32 %v8946_v25, %v11414_v18  ;;  %v11415_v23 = vld [vmem:[#allocation36_spill] sm:$0xff] }
 0x44f   :  { %11413 = vst [vmem:[#allocation272_spill] sm:$0xff] %v9022_v29  ;;  %v3396_v34 = vadd.f32 %v3380_v27, %v3332_v55  ;;  %v2886_v43 = vadd.f32 %v2870_v4, %v2822_v40  ;;  %v9033_v8 = vadd.f32 %v1984_v31, %v8965_v10  ;;  %v2127_v19 = vadd.f32 %v8893_v5, %v1999_v21  ;;  %v11420_v21 = vld [vmem:[#allocation57_spill] sm:$0xff] }
 0x450   :  { %v3397_v58 = vadd.f32 %v3381_v63, %v3333_v3  ;;  %v2934_v47 = vmul.f32 %v2907_v26, %v11415_v23  ;;  %v2887_v42 = vadd.f32 %v2871_v32, %v2823_v53  ;;  %v2935_v2 = vmul.f32 %v2907_v26, %v11416_v36  ;;  %v11419_v63 = vld [vmem:[#allocation206_spill] sm:$0xff]  ;;  %v11422_v53 = vld [vmem:[#allocation207_spill] sm:$0xff] }
 0x451   :  { %v3460_v46 = vadd.f32 %v3444_v35, %v3396_v34  ;;  %v2998_v16 = vmul.f32 %v2971_v11, %v11417_v59  ;;  %v3035_v25 = vrot.slane %v8912_v15, %v7870_v49  ;;  %v3099_v10 = vrot.slane %v8912_v15, %v7876_v57  ;;  %v11480_v23 = vld [vmem:[#allocation194_spill] sm:$0xff] }
 0x452   :  { %v9039_v27 = vpop.permute.xlu1 %2059  ;;  %v3461_v55 = vadd.f32 %v3445_v38, %v3397_v58  ;;  %v2950_v33 = vadd.f32 %v2934_v47, %v2886_v43  ;;  %v3700_v4 = vmul.f32 %v3671_v50, %v11419_v63  ;;  %v2951_v35 = vadd.f32 %v2935_v2, %v2887_v42  ;;  %v11421_v38 = vld [vmem:[#allocation54_spill] sm:$0xff]  ;;  %v11423_v58 = vld [vmem:[#allocation68_spill] sm:$0xff]  ;;  %v11425_v42 = vld [vmem:[#allocation63_spill] sm:$0xff] }
 0x453   :  { %11418 = vst [vmem:[#allocation271_spill] sm:$0xff] %v9039_v27  ;;  %v3524_v5 = vadd.f32 %v3508_v48, %v3460_v46  ;;  %v2999_v3 = vmul.f32 %v2971_v11, %v11420_v21  ;;  %v2110_v31 = vmul.f32 %v11366_v30, %v9022_v29  ;;  %v3062_v26 = vmul.f32 %v3035_v25, %v11421_v38  ;;  %v11472_v38 = vld [vmem:[#allocation49_spill] sm:$0xff]  ;;  %v11475_v21 = vld [vmem:[#allocation52_spill] sm:$0xff] }
 0x454   :  { %v3525_v17 = vadd.f32 %v3509_v24, %v3461_v55  ;;  %v3014_v40 = vadd.f32 %v2998_v16, %v2950_v33  ;;  %v3701_v32 = vmul.f32 %v3671_v50, %v11422_v53  ;;  %v3063_v47 = vmul.f32 %v3035_v25, %v11423_v58  ;;  %v11426_v16 = vld [vmem:[#allocation65_spill] sm:$0xff] }
 0x455   :  { %v3588_v34 = vadd.f32 %v3572_v51, %v3524_v5  ;;  %v3015_v43 = vadd.f32 %v2999_v3, %v2951_v35  ;;  %v3126_v2 = vmul.f32 %v3099_v10, %v11425_v42  ;;  %v3163_v11 = vrot.slane %v8912_v15, %v7881_v41  ;;  %v11427_v5 = vld [vmem:[#allocation98_spill] sm:$0xff] }
 0x456   :  { %v9052_v48 = vpop.permute.xlu1 %2063  ;;  %v3589_v46 = vadd.f32 %v3573_v12, %v3525_v17  ;;  %v3078_v63 = vadd.f32 %v3062_v26, %v3014_v40  ;;  %v3127_v55 = vmul.f32 %v3099_v10, %v11426_v16  ;;  %v3227_v51 = vrot.slane %v8922_v52, %v11370_v9  ;;  %v11428_v40 = vld [vmem:[#allocation74_spill] sm:$0xff] }
 0x457   :  { %11424 = vst [vmem:[#allocation257_spill] sm:$0xff] %v9052_v48  ;;  %v3652_v30 = vadd.f32 %v3636_v7, %v3588_v34  ;;  %v3079_v24 = vadd.f32 %v3063_v47, %v3015_v43  ;;  %v2126_v50 = vadd.f32 %v2110_v31, %v8955_v13  ;;  %v3190_v35 = vmul.f32 %v3163_v11, %v11427_v5  ;;  %v11429_v34 = vld [vmem:[#allocation123_spill] sm:$0xff] }
 0x458   :  { %v3653_v33 = vadd.f32 %v3637_v20, %v3589_v46  ;;  %v3142_v25 = vadd.f32 %v3126_v2, %v3078_v63  ;;  %v2113_v12 = vmul.f32 %v8909_v61, %v9052_v48  ;;  %v3191_v15 = vmul.f32 %v3163_v11, %v11428_v40  ;;  %v11431_v20 = vld [vmem:[#allocation83_spill] sm:$0xff]  ;;  %v11432_v11 = vld [vmem:[#allocation101_spill] sm:$0xff] }
 0x459   :  { %v3716_v3 = vadd.f32 %v3700_v4, %v3652_v30  ;;  %v3143_v17 = vadd.f32 %v3127_v55, %v3079_v24  ;;  %v3254_v10 = vmul.f32 %v3227_v51, %v11429_v34  ;;  %v3291_v43 = vrot.slane %v8922_v52, %v11371_v28  ;;  %v11460_v34 = vld [vmem:[#allocation88_spill] sm:$0xff] }
 0x45a   :  { %v3717_v7 = vadd.f32 %v3701_v32, %v3653_v33  ;;  %v3206_v26 = vadd.f32 %v3190_v35, %v3142_v25  ;;  %v3255_v63 = vmul.f32 %v3227_v51, %v11431_v20  ;;  %v3355_v31 = vrot.slane %v8922_v52, %v11372_v39  ;;  %v11433_v51 = vld [vmem:[#allocation136_spill] sm:$0xff]  ;;  %v9082_v35 = vpop.permute.xlu0 %2191 }
 0x45b   :  { %v9068_v47 = vpop.permute.xlu1 %2183  ;;  %v3207_v13 = vadd.f32 %v3191_v15, %v3143_v17  ;;  %v3419_v4 = vrot.slane %v8922_v52, %v11373_v60  ;;  %v3318_v30 = vmul.f32 %v3291_v43, %v11432_v11  ;;  %v2254_v24 = vadd.f32 %v8897_v37, %v2126_v50  ;;  %11434 = vst [vmem:[#allocation260_spill] sm:$0xff] %v9082_v35  ;;  %v11437_v37 = vld [vmem:[#allocation130_spill] sm:$0xff]  ;;  %v11459_v20 = vld [vmem:[#allocation76_spill] sm:$0xff] }
 0x45c   :  { %11430 = vst [vmem:[#allocation259_spill] sm:$0xff] %v9068_v47  ;;  %v2239_v32 = vmul.f32 %v11367_v6, %v9068_v47  ;;  %v3732_v46 = vpack.c.bf16 %v3717_v7, %v3716_v3  ;;  %v3270_v2 = vadd.f32 %v3254_v10, %v3206_v26  ;;  %v2112_v55 = vmul.f32 %v8909_v61, %v9039_v27  ;;  %v11435_v3 = vld [vmem:[#allocation115_spill] sm:$0xff]  ;;  %v11436_v10 = vld [vmem:[#allocation153_spill] sm:$0xff] }
 0x45d   :  { %v3271_v33 = vadd.f32 %v3255_v63, %v3207_v13  ;;  %v3319_v25 = vmul.f32 %v3291_v43, %v11433_v51  ;;  %v2129_v17 = vadd.f32 %v2113_v12, %v8995_v45  ;;  %v3382_v7 = vmul.f32 %v3355_v31, %v11435_v3  ;;  %v11442_v3 = vld [vmem:[#allocation175_spill] sm:$0xff] }
 0x45e   :  { %v2255_v15 = vadd.f32 %v2239_v32, %v2127_v19  ;;  %6196 = vmatprep.mubr.msk.bf16.mxu1 %vm3760_vm2, %v3732_v46  ;;  %v3334_v6 = vadd.f32 %v3318_v30, %v3270_v2  ;;  %v3383_v53 = vmul.f32 %v3355_v31, %v11436_v10  ;;  %v3446_v50 = vmul.f32 %v3419_v4, %v11437_v37  ;;  %v11439_v19 = vld [vmem:[#allocation282_spill] sm:$0xff]  ;;  %v11440_v2 = vld [vmem:[#allocation164_spill] sm:$0xff] }
 0x45f   :  { %v3335_v26 = vadd.f32 %v3319_v25, %v3271_v33  ;;  %v3483_v61 = vrot.slane %v8922_v52, %v7863_v14  ;;  %v9091_v13 = vpop.permute.xlu1 %2187  ;;  %v3547_v45 = vrot.slane %v8922_v52, %v7870_v49  ;;  %v2241_v32 = vmul.f32 %v11439_v19, %v9082_v35  ;;  %v11441_v25 = vld [vmem:[#allocation147_spill] sm:$0xff] }
 0x460   :  { %11438 = vst [vmem:[#allocation277_spill] sm:$0xff] %v9091_v13  ;;  %v3398_v43 = vadd.f32 %v3382_v7, %v3334_v6  ;;  %v2240_v12 = vmul.f32 %v11439_v19, %v9091_v13  ;;  %v2264_v63 = vpack.c.bf16 %v2255_v15, %v2254_v24  ;;  %v2128_v31 = vadd.f32 %v2112_v55, %v9033_v8  ;;  %v11443_v19 = vld [vmem:[#allocation172_spill] sm:$0xff] }
 0x461   :  { %v3399_v46 = vadd.f32 %v3383_v53, %v3335_v26  ;;  %v3447_v30 = vmul.f32 %v3419_v4, %v11440_v2  ;;  %v3510_v37 = vmul.f32 %v3483_v61, %v11441_v25  ;;  %v3611_v6 = vrot.slane %v8922_v52, %v7876_v57  ;;  %v11444_v4 = vld [vmem:[#allocation174_spill] sm:$0xff] }
 0x462   :  { %v3462_v33 = vadd.f32 %v3446_v50, %v3398_v43  ;;  %6168 = vmatprep.mubr.msk.bf16.mxu0 %vm2314_vm1, %v2264_v63  ;;  %v2257_v7 = vadd.f32 %v2241_v32, %v2129_v17  ;;  %v3511_v24 = vmul.f32 %v3483_v61, %v11442_v3  ;;  %v2256_v15 = vadd.f32 %v2240_v12, %v2128_v31  ;;  %v11445_v43 = vld [vmem:[#allocation197_spill] sm:$0xff]  ;;  %v11446_v63 = vld [vmem:[#allocation211_spill] sm:$0xff]  ;;  %v11447_v12 = vld [vmem:[#allocation114_spill] sm:$0xff] }
 0x463   :  { %v3463_v10 = vadd.f32 %v3447_v30, %v3399_v46  ;;  %v3574_v11 = vmul.f32 %v3547_v45, %v11443_v19  ;;  %v3675_v8 = vrot.slane %v8922_v52, %v7881_v41  ;;  %v3575_v55 = vmul.f32 %v3547_v45, %v11444_v4  ;;  %v11448_v52 = vld [vmem:[#allocation212_spill] sm:$0xff]  ;;  %v11456_v19 = vld [vmem:[#allocation50_spill] sm:$0xff] }
 0x464   :  { %v3526_v51 = vadd.f32 %v3510_v37, %v3462_v33  ;;  %v2265_v26 = vpack.c.bf16 %v2257_v7, %v2256_v15  ;;  %v3638_v25 = vmul.f32 %v3611_v6, %v11445_v43  ;;  %v3639_v17 = vmul.f32 %v3611_v6, %v11446_v63 }
 0x465   :  { %v3527_v53 = vadd.f32 %v3511_v24, %v3463_v10  ;;  %v3702_v37 = vmul.f32 %v3675_v8, %v11447_v12  ;;  %v3703_v10 = vmul.f32 %v3675_v8, %v11448_v52 }
 0x466   :  { %v3590_v50 = vadd.f32 %v3574_v11, %v3526_v51  ;;  %6169 = vmatmul.mubr.msk.bf16.gmra.mrb[12].mxu0 %vm2314_vm1, %v2265_v26  ;;  %v11449_v51 = vld [vmem:[#allocation261_spill] sm:$0xff] }
 0x467   :  { %v3591_v2 = vadd.f32 %v3575_v55, %v3527_v53  ;;  %6176 = vmatprep.mubr.msk.bf16.mxu0 %vm3760_vm2, %v8899_v0 }
 0x468   :  { %v3654_v61 = vadd.f32 %v3638_v25, %v3590_v50 }
 0x469   :  { %v3655_v32 = vadd.f32 %v3639_v17, %v3591_v2 }
 0x46a   :  { %v3718_v31 = vadd.f32 %v3702_v37, %v3654_v61 }
 0x46b   :  { %v3719_v45 = vadd.f32 %v3703_v10, %v3655_v32 }
 0x46d   :  { %v3733_v46 = vpack.c.bf16 %v3719_v45, %v3718_v31 }
 0x46e   :  { %6177 = vmatmul.mubr.msk.bf16.vlgmr.msra.gmra.mrb[16].mxu0 %vm3760_vm2, %v8883_v1 }
 0x46f   :  { %6197 = vmatmul.mubr.msk.bf16.vlgmr.msra.gmra.mrb[0].mxu1 %vm3760_vm2, %v3733_v46 }
 0x4ad   :  { %v6162_v11 = vpop.f32.mrb[4].mxu0 }
 0x4ae   :  { %v2594_v30 = vadd.f32 %v6162_v11, %v11449_v51  ;;  %v2534_v33 = vpop.f32.mrb[5].mxu0 }
 0x4af   :  { %v2592_v25 = vadd.f32 %v11449_v51, %v2534_v33  ;;  %v6163_v6 = vpop.f32.mrb[6].mxu0 }
 0x4b0   :  { %v5958_v7 = vmul.f32 -1.442695, %v2594_v30  ;;  %v2595_v0 = vadd.f32 %v6163_v6, %v11449_v51  ;;  %v2537_v2 = vpop.f32.mrb[7].mxu0 }
 0x4b1   :  { %v5956_v24 = vmul.f32 -1.442695, %v2592_v25  ;;  %v2593_v15 = vadd.f32 %v11449_v51, %v2537_v2 }
 0x4b2   :  { %6530 = vpow2.f32 %v5958_v7  ;;  %v5959_v8 = vmul.f32 -1.442695, %v2595_v0 }
 0x4b3   :  { %6532 = vpow2.f32 %v5956_v24  ;;  %v5957_v53 = vmul.f32 -1.442695, %v2593_v15  ;;  %v11450_v15 = vld [vmem:[#allocation22_spill] sm:$0xff] }
 0x4b4   :  { %6534 = vpow2.f32 %v5959_v8 }
 0x4b5   :  { %6536 = vpow2.f32 %v5957_v53  ;;  %v11451_v53 = vld [vmem:[#allocation43_spill] sm:$0xff] }
 0x4bc   :  { %v6531_v1 = vpop.eup %6530 }
 0x4bd   :  { %v6533_v55 = vpop.eup %6532  ;;  %v2658_v26 = vadd.f32 1.0, %v6531_v1 }
 0x4be   :  { %v6535_v50 = vpop.eup %6534  ;;  %v2656_v17 = vadd.f32 1.0, %v6533_v55  ;;  %v11452_v55 = vld [vmem:[#allocation25_spill] sm:$0xff] }
 0x4bf   :  { %v6537_v61 = vpop.eup %6536  ;;  %6538 = vrcp.f32 %v2658_v26  ;;  %v2659_v37 = vadd.f32 1.0, %v6535_v50  ;;  %v11453_v50 = vld [vmem:[#allocation45_spill] sm:$0xff] }
 0x4c0   :  { %6540 = vrcp.f32 %v2656_v17  ;;  %v2657_v32 = vadd.f32 1.0, %v6537_v61 }
 0x4c1   :  { %6542 = vrcp.f32 %v2659_v37 }
 0x4c2   :  { %6544 = vrcp.f32 %v2657_v32 }
 0x4c9   :  { %v6539_v10 = vpop.eup %6538 }
 0x4ca   :  { %v6541_v31 = vpop.eup %6540 }
 0x4cb   :  { %v6543_v45 = vpop.eup %6542 }
 0x4cc   :  { %v6545_v46 = vpop.eup %6544  ;;  %v2703_v11 = vpack.c.bf16 %v6543_v45, %v6539_v10 }
 0x4cd   :  { %v2702_v51 = vpack.c.bf16 %v6545_v46, %v6541_v31  ;;  %v11454_v46 = vld [vmem:[#allocation56_spill] sm:$0xff] }
 0x4ce   :  { %v9125_v33 = vunpack.c.l.bf16 %v2703_v11  ;;  %v9133_v2 = vunpack.c.h.bf16 %v2703_v11 }
 0x4cf   :  { %v2712_v30 = vunpack.c.l.bf16 %v2702_v51  ;;  %6180 = vmatprep.mubr.msk.bf16.mxu0 %vm3760_vm2, %v2702_v51  ;;  %v9131_v0 = vunpack.c.h.bf16 %v2702_v51  ;;  %v11455_v51 = vld [vmem:[#allocation58_spill] sm:$0xff] }
 0x4d0   :  { %6181 = vmatmul.mubr.msk.bf16.gmra.mrb[20].mxu0 %vm3760_vm2, %v2703_v11  ;;  %v2739_v32 = vrot.slane %v9125_v33, %v11370_v9  ;;  %v2787_v10 = vrot.slane %v9125_v33, %v11371_v28  ;;  %v2851_v12 = vrot.slane %v9125_v33, %v11372_v39  ;;  %v2915_v63 = vrot.slane %v9125_v33, %v11373_v60 }
 0x4d1   :  { %v2735_v25 = vrot.slane %v2712_v30, %v11370_v9  ;;  %v2783_v6 = vrot.slane %v2712_v30, %v11371_v28  ;;  %v2847_v7 = vrot.slane %v2712_v30, %v11372_v39  ;;  %v2911_v24 = vrot.slane %v2712_v30, %v11373_v60 }
 0x4d2   :  { %v2975_v61 = vrot.slane %v2712_v30, %v7863_v14  ;;  %v3039_v37 = vrot.slane %v2712_v30, %v7870_v49  ;;  %v3103_v52 = vrot.slane %v2712_v30, %v7876_v57  ;;  %v2811_v59 = vmul.f32 %v2787_v10, %v11475_v21 }
 0x4d3   :  { %v2760_v8 = vmul.f32 %v2735_v25, %v11450_v15  ;;  %v2761_v1 = vmul.f32 %v2735_v25, %v11451_v53  ;;  %v2808_v26 = vmul.f32 %v2783_v6, %v11452_v55  ;;  %v2809_v17 = vmul.f32 %v2783_v6, %v11453_v50  ;;  %v11473_v50 = vld [vmem:[#allocation51_spill] sm:$0xff] }
 0x4d4   :  { %v2872_v11 = vmul.f32 %v2847_v7, %v11454_v46  ;;  %v2873_v25 = vmul.f32 %v2847_v7, %v11455_v51  ;;  %v3167_v6 = vrot.slane %v2712_v30, %v7881_v41  ;;  %v2936_v3 = vmul.f32 %v2911_v24, %v11456_v19  ;;  %v11461_v51 = vld [vmem:[#allocation90_spill] sm:$0xff]  ;;  %v11465_v19 = vld [vmem:[#allocation121_spill] sm:$0xff]  ;;  %v11474_v53 = vld [vmem:[#allocation27_spill] sm:$0xff] }
 0x4d5   :  { %v2824_v31 = vadd.f32 %v2808_v26, %v2760_v8  ;;  %v2825_v45 = vadd.f32 %v2809_v17, %v2761_v1  ;;  %v11457_v8 = vld [vmem:[#allocation67_spill] sm:$0xff]  ;;  %v3001_v7 = vmul.f32 %v2975_v61, %v11459_v20  ;;  %v3064_v40 = vmul.f32 %v3039_v37, %v11460_v34 }
 0x4d6   :  { %v2937_v1 = vmul.f32 %v2911_v24, %v11457_v8  ;;  %v11458_v26 = vld [vmem:[#allocation59_spill] sm:$0xff]  ;;  %v3231_v30 = vrot.slane %v9131_v0, %v11370_v9  ;;  %v3065_v46 = vmul.f32 %v3039_v37, %v11461_v51  ;;  %v11464_v8 = vld [vmem:[#allocation100_spill] sm:$0xff]  ;;  %v3193_v42 = vmul.f32 %v3167_v6, %v11465_v19  ;;  %v11468_v51 = vld [vmem:[#allocation158_spill] sm:$0xff] }
 0x4d7   :  { %v2888_v43 = vadd.f32 %v2872_v11, %v2824_v31  ;;  %v2889_v4 = vadd.f32 %v2873_v25, %v2825_v45  ;;  %v3000_v17 = vmul.f32 %v2975_v61, %v11458_v26  ;;  %v3295_v31 = vrot.slane %v9131_v0, %v11371_v28  ;;  %v11462_v45 = vld [vmem:[#allocation84_spill] sm:$0xff]  ;;  %v11463_v25 = vld [vmem:[#allocation106_spill] sm:$0xff]  ;;  %v11467_v37 = vld [vmem:[#allocation135_spill] sm:$0xff] }
 0x4d8   :  { %v3128_v11 = vmul.f32 %v3103_v52, %v11462_v45  ;;  %v3129_v24 = vmul.f32 %v3103_v52, %v11463_v25  ;;  %v3192_v26 = vmul.f32 %v3167_v6, %v11464_v8  ;;  %v3359_v61 = vrot.slane %v9131_v0, %v11372_v39  ;;  %v11470_v6 = vld [vmem:[#allocation179_spill] sm:$0xff]  ;;  %v11471_v19 = vld [vmem:[#allocation181_spill] sm:$0xff] }
 0x4d9   :  { %v2952_v5 = vadd.f32 %v2936_v3, %v2888_v43  ;;  %v2953_v16 = vadd.f32 %v2937_v1, %v2889_v4  ;;  %v3423_v3 = vrot.slane %v9131_v0, %v11373_v60  ;;  %v11466_v4 = vld [vmem:[#allocation125_spill] sm:$0xff]  ;;  %v3257_v1 = vmul.f32 %v3231_v30, %v11467_v37 }
 0x4da   :  { %v3256_v43 = vmul.f32 %v3231_v30, %v11466_v4  ;;  %v3487_v45 = vrot.slane %v9131_v0, %v7863_v14  ;;  %v3551_v52 = vrot.slane %v9131_v0, %v7870_v49  ;;  %v3385_v58 = vmul.f32 %v3359_v61, %v11471_v19 }
 0x4db   :  { %v3016_v34 = vadd.f32 %v3000_v17, %v2952_v5  ;;  %v3017_v20 = vadd.f32 %v3001_v7, %v2953_v16  ;;  %v3320_v5 = vmul.f32 %v3295_v31, %v11468_v51  ;;  %v11469_v16 = vld [vmem:[#allocation160_spill] sm:$0xff]  ;;  %v3384_v7 = vmul.f32 %v3359_v61, %v11470_v6  ;;  %v11478_v51 = vld [vmem:[#allocation177_spill] sm:$0xff] }
 0x4dc   :  { %v3321_v17 = vmul.f32 %v3295_v31, %v11469_v16  ;;  %v2762_v4 = vmul.f32 %v2739_v32, %v11472_v38  ;;  %v2763_v30 = vmul.f32 %v2739_v32, %v11473_v50  ;;  %v2810_v15 = vmul.f32 %v2787_v10, %v11474_v53  ;;  %v11479_v16 = vld [vmem:[#allocation216_spill] sm:$0xff]  ;;  %v11483_v50 = vld [vmem:[#allocation30_spill] sm:$0xff] }
 0x4dd   :  { %v3080_v8 = vadd.f32 %v3064_v40, %v3016_v34  ;;  %v3081_v25 = vadd.f32 %v3065_v46, %v3017_v20  ;;  %v11476_v40 = vld [vmem:[#allocation204_spill] sm:$0xff]  ;;  %v11477_v20 = vld [vmem:[#allocation166_spill] sm:$0xff]  ;;  %v3512_v31 = vmul.f32 %v3487_v45, %v11478_v51  ;;  %v3513_v6 = vmul.f32 %v3487_v45, %v11479_v16 }
 0x4de   :  { %v3448_v34 = vmul.f32 %v3423_v3, %v11476_v40  ;;  %v3449_v46 = vmul.f32 %v3423_v3, %v11477_v20  ;;  %v2826_v19 = vadd.f32 %v2810_v15, %v2762_v4  ;;  %v2827_v38 = vadd.f32 %v2811_v59, %v2763_v30  ;;  %v11484_v53 = vld [vmem:[#allocation70_spill] sm:$0xff]  ;;  %v11487_v30 = vld [vmem:[#allocation81_spill] sm:$0xff] }
 0x4df   :  { %v3144_v37 = vadd.f32 %v3128_v11, %v3080_v8  ;;  %v3145_v55 = vadd.f32 %v3129_v24, %v3081_v25  ;;  %v3576_v32 = vmul.f32 %v3551_v52, %v11480_v23  ;;  %v11481_v8 = vld [vmem:[#allocation223_spill] sm:$0xff]  ;;  %v11482_v25 = vld [vmem:[#allocation61_spill] sm:$0xff]  ;;  %v2875_v10 = vmul.f32 %v2851_v12, %v11483_v50  ;;  %v11491_v23 = vld [vmem:[#allocation86_spill] sm:$0xff] }
 0x4e0   :  { %v3577_v11 = vmul.f32 %v3551_v52, %v11481_v8  ;;  %v2874_v24 = vmul.f32 %v2851_v12, %v11482_v25  ;;  %v2938_v3 = vmul.f32 %v2915_v63, %v11484_v53  ;;  %v2979_v51 = vrot.slane %v9125_v33, %v7863_v14 }
 0x4e1   :  { %v3208_v36 = vadd.f32 %v3192_v26, %v3144_v37  ;;  %v3209_v61 = vadd.f32 %v3193_v42, %v3145_v55  ;;  %v2891_v26 = vadd.f32 %v2875_v10, %v2827_v38  ;;  %v11485_v42 = vld [vmem:[#allocation72_spill] sm:$0xff]  ;;  %v3043_v59 = vrot.slane %v9125_v33, %v7870_v49  ;;  %v11489_v10 = vld [vmem:[#allocation99_spill] sm:$0xff] }
 0x4e2   :  { %v2890_v45 = vadd.f32 %v2874_v24, %v2826_v19  ;;  %v2939_v15 = vmul.f32 %v2915_v63, %v11485_v42  ;;  %v3615_v37 = vrot.slane %v9131_v0, %v7876_v57  ;;  %v3003_v19 = vmul.f32 %v2979_v51, %v11487_v30 }
 0x4e3   :  { %v3272_v21 = vadd.f32 %v3256_v43, %v3208_v36  ;;  %v3273_v40 = vadd.f32 %v3257_v1, %v3209_v61  ;;  %v3107_v36 = vrot.slane %v9125_v33, %v7876_v57  ;;  %v11486_v1 = vld [vmem:[#allocation79_spill] sm:$0xff]  ;;  %v3679_v63 = vrot.slane %v9131_v0, %v7881_v41 }
 0x4e4   :  { %v2954_v12 = vadd.f32 %v2938_v3, %v2890_v45  ;;  %v2955_v43 = vadd.f32 %v2939_v15, %v2891_v26  ;;  %v3002_v52 = vmul.f32 %v2979_v51, %v11486_v1  ;;  %v3067_v8 = vmul.f32 %v3043_v59, %v11489_v10  ;;  %v11490_v26 = vld [vmem:[#allocation234_spill] sm:$0xff]  ;;  %v11525_v10 = vld [vmem:[#allocation73_spill] sm:$0xff] }
 0x4e5   :  { %v3336_v55 = vadd.f32 %v3320_v5, %v3272_v21  ;;  %v3337_v4 = vadd.f32 %v3321_v17, %v3273_v40  ;;  %v3171_v21 = vrot.slane %v9125_v33, %v7881_v41  ;;  %v11488_v40 = vld [vmem:[#allocation71_spill] sm:$0xff]  ;;  %v3640_v15 = vmul.f32 %v3615_v37, %v11490_v26 }
 0x4e6   :  { %v3018_v5 = vadd.f32 %v3002_v52, %v2954_v12  ;;  %v3019_v17 = vadd.f32 %v3003_v19, %v2955_v43  ;;  %v3066_v24 = vmul.f32 %v3043_v59, %v11488_v40  ;;  %v3130_v51 = vmul.f32 %v3107_v36, %v11491_v23  ;;  %v11493_v43 = vld [vmem:[#allocation230_spill] sm:$0xff] }
 0x4e7   :  { %v3400_v38 = vadd.f32 %v3384_v7, %v3336_v55  ;;  %v3401_v61 = vadd.f32 %v3385_v58, %v3337_v4  ;;  %v11492_v55 = vld [vmem:[#allocation113_spill] sm:$0xff]  ;;  %v3235_v0 = vrot.slane %v9133_v2, %v11370_v9  ;;  %v3641_v52 = vmul.f32 %v3615_v37, %v11493_v43  ;;  %v11494_v19 = vld [vmem:[#allocation102_spill] sm:$0xff] }
 0x4e8   :  { %v3082_v7 = vadd.f32 %v3066_v24, %v3018_v5  ;;  %v3083_v58 = vadd.f32 %v3067_v8, %v3019_v17  ;;  %v3131_v4 = vmul.f32 %v3107_v36, %v11492_v55  ;;  %v3194_v16 = vmul.f32 %v3171_v21, %v11494_v19  ;;  %v11496_v17 = vld [vmem:[#allocation116_spill] sm:$0xff] }
 0x4e9   :  { %v3464_v3 = vadd.f32 %v3448_v34, %v3400_v38  ;;  %v3465_v45 = vadd.f32 %v3449_v46, %v3401_v61  ;;  %v11495_v46 = vld [vmem:[#allocation128_spill] sm:$0xff]  ;;  %v3299_v61 = vrot.slane %v9133_v2, %v11371_v28  ;;  %v3704_v36 = vmul.f32 %v3679_v63, %v11496_v17  ;;  %v11501_v17 = vld [vmem:[#allocation138_spill] sm:$0xff] }
 0x4ea   :  { %v3146_v59 = vadd.f32 %v3130_v51, %v3082_v7  ;;  %v3147_v34 = vadd.f32 %v3131_v4, %v3083_v58  ;;  %v3195_v38 = vmul.f32 %v3171_v21, %v11495_v46  ;;  %v3363_v24 = vrot.slane %v9133_v2, %v11372_v39  ;;  %v11499_v58 = vld [vmem:[#allocation236_spill] sm:$0xff] }
 0x4eb   :  { %v3528_v33 = vadd.f32 %v3512_v31, %v3464_v3  ;;  %v3529_v12 = vadd.f32 %v3513_v6, %v3465_v45  ;;  %v11497_v3 = vld [vmem:[#allocation127_spill] sm:$0xff]  ;;  %v3705_v21 = vmul.f32 %v3679_v63, %v11499_v58  ;;  %v3427_v4 = vrot.slane %v9133_v2, %v11373_v60  ;;  %v11524_v55 = vld [vmem:[#allocation156_spill] sm:$0xff] }
 0x4ec   :  { %v3210_v31 = vadd.f32 %v3194_v16, %v3146_v59  ;;  %v3211_v6 = vadd.f32 %v3195_v38, %v3147_v34  ;;  %v3258_v37 = vmul.f32 %v3235_v0, %v11497_v3  ;;  %v11498_v45 = vld [vmem:[#allocation143_spill] sm:$0xff]  ;;  %v3323_v26 = vmul.f32 %v3299_v61, %v11501_v17 }
 0x4ed   :  { %v3592_v5 = vadd.f32 %v3576_v32, %v3528_v33  ;;  %v3593_v8 = vadd.f32 %v3577_v11, %v3529_v12  ;;  %v3259_v43 = vmul.f32 %v3235_v0, %v11498_v45  ;;  %v11500_v33 = vld [vmem:[#allocation170_spill] sm:$0xff]  ;;  %v11502_v59 = vld [vmem:[#allocation155_spill] sm:$0xff]  ;;  %v3491_v63 = vrot.slane %v9133_v2, %v7863_v14 }
 0x4ee   :  { %v3274_v32 = vadd.f32 %v3258_v37, %v3210_v31  ;;  %v3322_v12 = vmul.f32 %v3299_v61, %v11500_v33  ;;  %v3386_v34 = vmul.f32 %v3363_v24, %v11502_v59  ;;  %v11503_v0 = vld [vmem:[#allocation195_spill] sm:$0xff]  ;;  %v3555_v61 = vrot.slane %v9133_v2, %v7870_v49  ;;  %v11523_v33 = vld [vmem:[#allocation133_spill] sm:$0xff] }
 0x4ef   :  { %v3656_v51 = vadd.f32 %v3640_v15, %v3592_v5  ;;  %v3657_v7 = vadd.f32 %v3641_v52, %v3593_v8  ;;  %v3275_v11 = vadd.f32 %v3259_v43, %v3211_v6  ;;  %v3387_v15 = vmul.f32 %v3363_v24, %v11503_v0  ;;  %v11504_v5 = vld [vmem:[#allocation209_spill] sm:$0xff]  ;;  %v11505_v6 = vld [vmem:[#allocation210_spill] sm:$0xff]  ;;  %v11522_v17 = vld [vmem:[#allocation131_spill] sm:$0xff] }
 0x4f0   :  { %v3338_v38 = vadd.f32 %v3322_v12, %v3274_v32  ;;  %v3450_v8 = vmul.f32 %v3427_v4, %v11504_v5  ;;  %v3451_v37 = vmul.f32 %v3427_v4, %v11505_v6  ;;  %v3683_v32 = vrot.slane %v9133_v2, %v7881_v41  ;;  %v11508_v4 = vld [vmem:[#allocation196_spill] sm:$0xff]  ;;  %v11520_v0 = vld [vmem:[#allocation117_spill] sm:$0xff] }
 0x4f1   :  { %v3720_v20 = vadd.f32 %v3704_v36, %v3656_v51  ;;  %v3721_v16 = vadd.f32 %v3705_v21, %v3657_v7  ;;  %v3339_v3 = vadd.f32 %v3323_v26, %v3275_v11  ;;  %v3619_v26 = vrot.slane %v9133_v2, %v7876_v57  ;;  %v11506_v51 = vld [vmem:[#allocation180_spill] sm:$0xff] }
 0x4f2   :  { %v3402_v31 = vadd.f32 %v3386_v34, %v3338_v38  ;;  %v3514_v7 = vmul.f32 %v3491_v63, %v11506_v51  ;;  %v11507_v21 = vld [vmem:[#allocation220_spill] sm:$0xff]  ;;  %v3578_v12 = vmul.f32 %v3555_v61, %v11508_v4  ;;  %v11518_v4 = vld [vmem:[#allocation103_spill] sm:$0xff] }
 0x4f3   :  { %v3734_v52 = vpack.c.bf16 %v3721_v16, %v3720_v20  ;;  %v3403_v43 = vadd.f32 %v3387_v15, %v3339_v3  ;;  %v3515_v20 = vmul.f32 %v3491_v63, %v11507_v21  ;;  %v11509_v16 = vld [vmem:[#allocation227_spill] sm:$0xff]  ;;  %v11511_v6 = vld [vmem:[#allocation232_spill] sm:$0xff] }
 0x4f4   :  { %v3466_v36 = vadd.f32 %v3450_v8, %v3402_v31  ;;  %v3579_v34 = vmul.f32 %v3555_v61, %v11509_v16  ;;  %v3643_v8 = vmul.f32 %v3619_v26, %v11511_v6  ;;  %v11513_v63 = vld [vmem:[#allocation240_spill] sm:$0xff]  ;;  %v9257_v61 = vld [vmem:[%s10407_s5] ss:$0 sm:$0xff] }
 0x4f5   :  { %6200 = vmatprep.mubr.msk.bf16.mxu1 %vm3760_vm2, %v3734_v52  ;;  %v3467_v24 = vadd.f32 %v3451_v37, %v3403_v43  ;;  %v11510_v52 = vld [vmem:[#allocation238_spill] sm:$0xff]  ;;  %v3707_v21 = vmul.f32 %v3683_v32, %v11513_v63 }
 0x4f6   :  { %v3530_v3 = vadd.f32 %v3514_v7, %v3466_v36  ;;  %v3642_v58 = vmul.f32 %v3619_v26, %v11510_v52  ;;  %v11512_v37 = vld [vmem:[#allocation118_spill] sm:$0xff] }
 0x4f7   :  { %v3531_v11 = vadd.f32 %v3515_v20, %v3467_v24  ;;  %v3706_v51 = vmul.f32 %v3683_v32, %v11512_v37 }
 0x4f8   :  { %v3594_v38 = vadd.f32 %v3578_v12, %v3530_v3 }
 0x4f9   :  { %v3595_v15 = vadd.f32 %v3579_v34, %v3531_v11  ;;  %v6478_v34 = vld [vmem:[%s10412_s10] sm:$0xff]  }
 0x4fa   :  { %v3658_v31 = vadd.f32 %v3642_v58, %v3594_v38  ;;  %v6479_v38 = vld [vmem:[%s10412_s10 + $0x8] sm:$0xff]   ;;  %6212 = vmatprep.subr.bf16.mxu1 %v6478_v34 }
 0x4fb   :  { %v3659_v43 = vadd.f32 %v3643_v8, %v3595_v15  ;;  %6213 = vmatpush3.bf16.msra.mxu1 %v6478_v34 }
 0x4fc   :  { %v3722_v5 = vadd.f32 %v3706_v51, %v3658_v31  ;;  %6214 = vmatprep.subr.bf16.mxu1 %v6479_v38 }
 0x4fd   :  { %v3723_v2 = vadd.f32 %v3707_v21, %v3659_v43 }
 0x4ff   :  { %v3735_v36 = vpack.c.bf16 %v3723_v2, %v3722_v5  ;;  %6215 = vmatpush3.bf16.msra.mxu1 %v6479_v38 }
 0x501   :  { %6201 = vmatmul.mubr.msk.bf16.gmra.mrb[4].mxu1 %vm3760_vm2, %v3735_v36 }
 0x50d   :  { %v6166_v24 = vpop.f32.mrb[8].mxu0 }
 0x50e   :  { %v2598_v7 = vadd.f32 %v9257_v61, %v6166_v24  ;;  %v2550_v26 = vpop.f32.mrb[9].mxu0 }
 0x50f   :  { %v2596_v58 = vadd.f32 %v9257_v61, %v2550_v26  ;;  %v6167_v20 = vpop.f32.mrb[10].mxu0 }
 0x510   :  { %v5962_v3 = vmul.f32 -1.442695, %v2598_v7  ;;  %v2599_v32 = vadd.f32 %v9257_v61, %v6167_v20  ;;  %v2553_v51 = vpop.f32.mrb[11].mxu0 }
 0x511   :  { %v5960_v21 = vmul.f32 -1.442695, %v2596_v58  ;;  %v2597_v5 = vadd.f32 %v9257_v61, %v2553_v51 }
 0x512   :  { %6546 = vpow2.f32 %v5962_v3  ;;  %v5963_v11 = vmul.f32 -1.442695, %v2599_v32 }
 0x513   :  { %6548 = vpow2.f32 %v5960_v21  ;;  %v5961_v12 = vmul.f32 -1.442695, %v2597_v5 }
 0x514   :  { %6550 = vpow2.f32 %v5963_v11 }
 0x515   :  { %6552 = vpow2.f32 %v5961_v12 }
 0x51c   :  { %v6547_v15 = vpop.eup %6546 }
 0x51d   :  { %v6549_v8 = vpop.eup %6548  ;;  %v2662_v31 = vadd.f32 1.0, %v6547_v15 }
 0x51e   :  { %v6551_v43 = vpop.eup %6550  ;;  %v2660_v2 = vadd.f32 1.0, %v6549_v8 }
 0x51f   :  { %v6553_v36 = vpop.eup %6552  ;;  %6554 = vrcp.f32 %v2662_v31  ;;  %v2663_v24 = vadd.f32 1.0, %v6551_v43 }
 0x520   :  { %6556 = vrcp.f32 %v2660_v2  ;;  %v2661_v7 = vadd.f32 1.0, %v6553_v36 }
 0x521   :  { %6558 = vrcp.f32 %v2663_v24  ;;  %v11514_v24 = vld [vmem:[#allocation32_spill] sm:$0xff] }
 0x522   :  { %6560 = vrcp.f32 %v2661_v7 }
 0x529   :  { %v6555_v26 = vpop.eup %6554 }
 0x52a   :  { %v6557_v58 = vpop.eup %6556 }
 0x52b   :  { %v6559_v20 = vpop.eup %6558 }
 0x52c   :  { %v6561_v3 = vpop.eup %6560  ;;  %v2705_v32 = vpack.c.bf16 %v6559_v20, %v6555_v26  ;;  %v11515_v26 = vld [vmem:[#allocation85_spill] sm:$0xff]  ;;  %v11516_v20 = vld [vmem:[#allocation87_spill] sm:$0xff] }
 0x52d   :  { %v2704_v51 = vpack.c.bf16 %v6561_v3, %v6557_v58 }
 0x52e   :  { %v9269_v21 = vunpack.c.l.bf16 %v2705_v32  ;;  %v9274_v12 = vunpack.c.h.bf16 %v2705_v32 }
 0x52f   :  { %v2716_v5 = vunpack.c.l.bf16 %v2704_v51  ;;  %6184 = vmatprep.mubr.msk.bf16.mxu0 %vm3760_vm2, %v2704_v51  ;;  %v9272_v11 = vunpack.c.h.bf16 %v2704_v51 }
 0x530   :  { %6185 = vmatmul.mubr.msk.bf16.gmra.mrb[24].mxu0 %vm3760_vm2, %v2705_v32  ;;  %v9282_v8 = vrot.slane %v9269_v21, %v11370_v9  ;;  %v9289_v36 = vrot.slane %v9269_v21, %v11371_v28  ;;  %v11517_v32 = vld [vmem:[#allocation34_spill] sm:$0xff]  ;;  %v9299_v6 = vrot.slane %v9269_v21, %v11372_v39  ;;  %v9303_v52 = vrot.slane %v9269_v21, %v11373_v60 }
 0x531   :  { %v2743_v34 = vrot.slane %v2716_v5, %v11370_v9  ;;  %v2791_v38 = vrot.slane %v2716_v5, %v11371_v28  ;;  %v2855_v15 = vrot.slane %v2716_v5, %v11372_v39  ;;  %v2919_v31 = vrot.slane %v2716_v5, %v11373_v60 }
 0x532   :  { %v2983_v43 = vrot.slane %v2716_v5, %v7863_v14  ;;  %v3047_v2 = vrot.slane %v2716_v5, %v7870_v49  ;;  %v3111_v63 = vrot.slane %v2716_v5, %v7876_v57  ;;  %v3175_v37 = vrot.slane %v2716_v5, %v7881_v41 }
 0x533   :  { %v2764_v7 = vmul.f32 %v2743_v34, %v11514_v24  ;;  %v2765_v58 = vmul.f32 %v2743_v34, %v11515_v26  ;;  %v2812_v3 = vmul.f32 %v2791_v38, %v11516_v20  ;;  %v2813_v51 = vmul.f32 %v2791_v38, %v11517_v32  ;;  %v11519_v26 = vld [vmem:[#allocation104_spill] sm:$0xff]  ;;  %v11521_v32 = vld [vmem:[#allocation119_spill] sm:$0xff] }
 0x534   :  { %v2876_v34 = vmul.f32 %v2855_v15, %v11518_v4  ;;  %v2877_v20 = vmul.f32 %v2855_v15, %v11519_v26  ;;  %v2940_v38 = vmul.f32 %v2919_v31, %v11520_v0  ;;  %v2941_v59 = vmul.f32 %v2919_v31, %v11521_v32  ;;  %v11528_v0 = vld [vmem:[#allocation105_spill] sm:$0xff]  ;;  %v11533_v4 = vld [vmem:[#allocation222_spill] sm:$0xff] }
 0x535   :  { %v2828_v16 = vadd.f32 %v2812_v3, %v2764_v7  ;;  %v2829_v24 = vadd.f32 %v2813_v51, %v2765_v58  ;;  %v3004_v5 = vmul.f32 %v2983_v43, %v11522_v17  ;;  %v3005_v45 = vmul.f32 %v2983_v43, %v11523_v33  ;;  %v11526_v7 = vld [vmem:[#allocation178_spill] sm:$0xff]  ;;  %v11527_v3 = vld [vmem:[#allocation89_spill] sm:$0xff]  ;;  %v11532_v33 = vld [vmem:[#allocation15_spill] sm:$0xff] }
 0x536   :  { %v3068_v23 = vmul.f32 %v3047_v2, %v11524_v55  ;;  %v3069_v40 = vmul.f32 %v3047_v2, %v11525_v10  ;;  %v3132_v58 = vmul.f32 %v3111_v63, %v11526_v7  ;;  %v3133_v51 = vmul.f32 %v3111_v63, %v11527_v3  ;;  %v11531_v10 = vld [vmem:[#allocation215_spill] sm:$0xff] }
 0x537   :  { %v2892_v46 = vadd.f32 %v2876_v34, %v2828_v16  ;;  %v2893_v19 = vadd.f32 %v2877_v20, %v2829_v24  ;;  %v3239_v15 = vrot.slane %v9272_v11, %v11370_v9  ;;  %v3303_v31 = vrot.slane %v9272_v11, %v11371_v28  ;;  %v11529_v16 = vld [vmem:[#allocation202_spill] sm:$0xff] }
 0x538   :  { %v3196_v43 = vmul.f32 %v3175_v37, %v11528_v0  ;;  %v3197_v24 = vmul.f32 %v3175_v37, %v11529_v16  ;;  %v3367_v2 = vrot.slane %v9272_v11, %v11372_v39  ;;  %v3431_v34 = vrot.slane %v9272_v11, %v11373_v60  ;;  %v11530_v0 = vld [vmem:[#allocation214_spill] sm:$0xff] }
 0x539   :  { %v2956_v32 = vadd.f32 %v2940_v38, %v2892_v46  ;;  %v2957_v17 = vadd.f32 %v2941_v59, %v2893_v19  ;;  %v6170_v20 = vpop.f32.mrb[12].mxu0  ;;  %v3495_v63 = vrot.slane %v9272_v11, %v7863_v14  ;;  %v3559_v3 = vrot.slane %v9272_v11, %v7870_v49 }
 0x53a   :  { %v2602_v46 = vadd.f32 %v9257_v61, %v6170_v20  ;;  %v2566_v19 = vpop.f32.mrb[13].mxu0  ;;  %v3260_v37 = vmul.f32 %v3239_v15, %v11530_v0  ;;  %v3261_v55 = vmul.f32 %v3239_v15, %v11531_v10  ;;  %v3324_v26 = vmul.f32 %v3303_v31, %v11532_v33 }
 0x53b   :  { %v3020_v59 = vadd.f32 %v3004_v5, %v2956_v32  ;;  %v3021_v38 = vadd.f32 %v3005_v45, %v2957_v17  ;;  %v2600_v16 = vadd.f32 %v9257_v61, %v2566_v19  ;;  %v6171_v7 = vpop.f32.mrb[14].mxu0  ;;  %v3325_v30 = vmul.f32 %v3303_v31, %v11533_v4  ;;  %v11534_v45 = vld [vmem:[#allocation145_spill] sm:$0xff]  ;;  %v11537_v4 = vld [vmem:[#allocation235_spill] sm:$0xff] }
 0x53c   :  { %v5966_v1 = vmul.f32 -1.442695, %v2602_v46  ;;  %v2603_v42 = vadd.f32 %v9257_v61, %v6171_v7  ;;  %v2569_v53 = vpop.f32.mrb[15].mxu0  ;;  %v3388_v32 = vmul.f32 %v3367_v2, %v11534_v45  ;;  %v11535_v5 = vld [vmem:[#allocation229_spill] sm:$0xff]  ;;  %v3453_v7 = vmul.f32 %v3431_v34, %v11537_v4 }
 0x53d   :  { %v3084_v50 = vadd.f32 %v3068_v23, %v3020_v59  ;;  %v3085_v20 = vadd.f32 %v3069_v40, %v3021_v38  ;;  %v5964_v25 = vmul.f32 -1.442695, %v2600_v16  ;;  %v2601_v17 = vadd.f32 %v9257_v61, %v2569_v53  ;;  %v11536_v31 = vld [vmem:[#allocation149_spill] sm:$0xff]  ;;  %v11538_v16 = vld [vmem:[#allocation242_spill] sm:$0xff] }
 0x53e   :  { %v3389_v19 = vmul.f32 %v3367_v2, %v11535_v5  ;;  %6562 = vpow2.f32 %v5966_v1  ;;  %v5967_v0 = vmul.f32 -1.442695, %v2603_v42  ;;  %v3452_v46 = vmul.f32 %v3431_v34, %v11536_v31  ;;  %v9345_v42 = vld [vmem:[%s10410_s8] ss:$0 sm:$0xff] }
 0x53f   :  { %v3148_v15 = vadd.f32 %v3132_v58, %v3084_v50  ;;  %v3149_v10 = vadd.f32 %v3133_v51, %v3085_v20  ;;  %6564 = vpow2.f32 %v5964_v25  ;;  %v5965_v33 = vmul.f32 -1.442695, %v2601_v17  ;;  %v11539_v50 = vld [vmem:[#allocation243_spill] sm:$0xff]  ;;  %v11540_v17 = vld [vmem:[#allocation94_spill] sm:$0xff]  ;;  %v11719_v45 = vld [vmem:[#allocation113_spill] sm:$0xff] }
 0x540   :  { %6566 = vpow2.f32 %v5967_v0  ;;  %v3516_v59 = vmul.f32 %v3495_v63, %v11538_v16  ;;  %v3517_v25 = vmul.f32 %v3495_v63, %v11539_v50  ;;  %v3580_v1 = vmul.f32 %v3559_v3, %v11334_v54 }
 0x541   :  { %v3212_v23 = vadd.f32 %v3196_v43, %v3148_v15  ;;  %v3213_v40 = vadd.f32 %v3197_v24, %v3149_v10  ;;  %6568 = vpow2.f32 %v5965_v33  ;;  %v6178_v61 = vpop.f32.mrb[16].mxu0  ;;  %v3581_v58 = vmul.f32 %v3559_v3, %v11336_v62  ;;  %v11541_v15 = vld [vmem:[#allocation37_spill] sm:$0xff] }
 0x542   :  { %v6198_v53 = vpop.f32.mrb[0].mxu1  ;;  %v3819_v43 = vpop.f32.mrb[17].mxu0  ;;  %v3623_v33 = vrot.slane %v9272_v11, %v7876_v57  ;;  %v3687_v20 = vrot.slane %v9272_v11, %v7881_v41  ;;  %v2766_v63 = vmul.f32 %v9282_v8, %v11540_v17  ;;  %v2767_v3 = vmul.f32 %v9282_v8, %v11541_v15  ;;  %v11543_v11 = vld [vmem:[#allocation97_spill] sm:$0xff] }
 0x543   :  { %v3952_v51 = vpop.f32.mrb[1].mxu1  ;;  %v3961_v0 = vadd.f32 %v6198_v53, %v6178_v61  ;;  %v3276_v10 = vadd.f32 %v3260_v37, %v3212_v23  ;;  %v3277_v24 = vadd.f32 %v3261_v55, %v3213_v40  ;;  %v6179_v38 = vpop.f32.mrb[18].mxu0  ;;  %v2815_v50 = vmul.f32 %v9289_v36, %v11543_v11 }
 0x544   :  { %v6199_v2 = vpop.f32.mrb[2].mxu1  ;;  %v3953_v34 = vadd.f32 %v3952_v51, %v3819_v43  ;;  %v3822_v55 = vpop.f32.mrb[19].mxu0  ;;  %v11542_v43 = vld [vmem:[#allocation96_spill] sm:$0xff] }
 0x545   :  { %v3955_v62 = vpop.f32.mrb[3].mxu1  ;;  %v4024_v53 = vadd.f32 %v9345_v42, %v3961_v0  ;;  %v3964_v37 = vadd.f32 %v6199_v2, %v6179_v38  ;;  %v3340_v23 = vadd.f32 %v3324_v26, %v3276_v10  ;;  %v3341_v40 = vadd.f32 %v3325_v30, %v3277_v24 }
 0x546   :  { %v4022_v61 = vadd.f32 %v9345_v42, %v3953_v34  ;;  %v3956_v51 = vadd.f32 %v3955_v62, %v3822_v55  ;;  %v2814_v54 = vmul.f32 %v9289_v36, %v11542_v43  ;;  %v3644_v0 = vmul.f32 %v3623_v33, %v8701_v22  ;;  %v11544_v34 = vld [vmem:[#allocation246_spill] sm:$0xff]  ;;  %v11579_v22 = vld [vmem:[#allocation176_spill] sm:$0xff] }
 0x547   :  { %v5991_v17 = vmul.f32 -1.442695, %v4024_v53  ;;  %v4025_v16 = vadd.f32 %v9345_v42, %v3964_v37  ;;  %v3404_v8 = vadd.f32 %v3388_v32, %v3340_v23  ;;  %v3405_v15 = vadd.f32 %v3389_v19, %v3341_v40  ;;  %v11545_v53 = vld [vmem:[#allocation262_spill] sm:$0xff] }
 0x548   :  { %v5989_v4 = vmul.f32 -1.442695, %v4022_v61  ;;  %v3645_v26 = vmul.f32 %v3623_v33, %v8725_v56  ;;  %v2830_v30 = vadd.f32 %v2814_v54, %v2766_v63  ;;  %v6563_v10 = vpop.eup %6562  ;;  %v3708_v38 = vmul.f32 %v3687_v20, %v11544_v34  ;;  %v11546_v32 = vld [vmem:[#allocation110_spill] sm:$0xff] }
 0x549   :  { %v5992_v24 = vmul.f32 -1.442695, %v4025_v16  ;;  %v3468_v62 = vadd.f32 %v3452_v46, %v3404_v8  ;;  %v3469_v2 = vadd.f32 %v3453_v7, %v3405_v15  ;;  %v6565_v55 = vpop.eup %6564  ;;  %v4023_v36 = vadd.f32 %v9345_v42, %v3956_v51  ;;  %v11547_v46 = vld [vmem:[#allocation112_spill] sm:$0xff]  ;;  %v11706_v43 = vld [vmem:[#allocation130_spill] sm:$0xff] }
 0x54a   :  { %v3709_v11 = vmul.f32 %v3687_v20, %v11545_v53  ;;  %v2831_v37 = vadd.f32 %v2815_v50, %v2767_v3  ;;  %v2878_v19 = vmul.f32 %v9299_v6, %v11546_v32  ;;  %v6567_v23 = vpop.eup %6566  ;;  %v2664_v40 = vadd.f32 1.0, %v6565_v55  ;;  %v11548_v8 = vld [vmem:[#allocation124_spill] sm:$0xff]  ;;  %v11549_v55 = vld [vmem:[#allocation126_spill] sm:$0xff] }
 0x54b   :  { %6570 = vpow2.f32 %v5991_v17  ;;  %v3532_v33 = vadd.f32 %v3516_v59, %v3468_v62  ;;  %v3533_v54 = vadd.f32 %v3517_v25, %v3469_v2  ;;  %v6569_v63 = vpop.eup %6568  ;;  %v2666_v16 = vadd.f32 1.0, %v6563_v10  ;;  %v11551_v2 = vld [vmem:[#allocation140_spill] sm:$0xff] }
 0x54c   :  { %6572 = vpow2.f32 %v5989_v4  ;;  %v2879_v7 = vmul.f32 %v9299_v6, %v11547_v46  ;;  %v2894_v15 = vadd.f32 %v2878_v19, %v2830_v30  ;;  %v2665_v61 = vadd.f32 1.0, %v6569_v63 }
 0x54d   :  { %6574 = vpow2.f32 %v5992_v24  ;;  %v3596_v51 = vadd.f32 %v3580_v1, %v3532_v33  ;;  %v3597_v20 = vadd.f32 %v3581_v58, %v3533_v54  ;;  %v2667_v50 = vadd.f32 1.0, %v6567_v23  ;;  %v11550_v24 = vld [vmem:[#allocation139_spill] sm:$0xff]  ;;  %v11553_v33 = vld [vmem:[#allocation169_spill] sm:$0xff] }
 0x54e   :  { %v2895_v3 = vadd.f32 %v2879_v7, %v2831_v37  ;;  %v2942_v53 = vmul.f32 %v9303_v52, %v11548_v8  ;;  %v2943_v59 = vmul.f32 %v9303_v52, %v11549_v55  ;;  %6576 = vrcp.f32 %v2664_v40  ;;  %v11552_v52 = vld [vmem:[#allocation75_spill] sm:$0xff]  ;;  %v11608_v8 = vld [vmem:[#allocation53_spill] sm:$0xff] }
 0x54f   :  { %v3660_v25 = vadd.f32 %v3644_v0, %v3596_v51  ;;  %v3661_v17 = vadd.f32 %v3645_v26, %v3597_v20  ;;  %v2987_v4 = vrot.slane %v9269_v21, %v7863_v14  ;;  %6578 = vrcp.f32 %v2665_v61  ;;  %v11555_v51 = vld [vmem:[#allocation191_spill] sm:$0xff] }
 0x550   :  { %v2958_v6 = vadd.f32 %v2942_v53, %v2894_v15  ;;  %v2959_v30 = vadd.f32 %v2943_v59, %v2895_v3  ;;  %v3051_v1 = vrot.slane %v9269_v21, %v7870_v49  ;;  %6580 = vrcp.f32 %v2667_v50  ;;  %v11554_v15 = vld [vmem:[#allocation188_spill] sm:$0xff] }
 0x551   :  { %v3724_v58 = vadd.f32 %v3708_v38, %v3660_v25  ;;  %v3725_v10 = vadd.f32 %v3709_v11, %v3661_v17  ;;  %v3006_v62 = vmul.f32 %v2987_v4, %v11550_v24  ;;  %v3007_v37 = vmul.f32 %v2987_v4, %v11551_v2  ;;  %v11556_v3 = vld [vmem:[#allocation208_spill] sm:$0xff]  ;;  %v11607_v24 = vld [vmem:[#allocation46_spill] sm:$0xff] }
 0x552   :  { %v3070_v19 = vmul.f32 %v3051_v1, %v11552_v52  ;;  %v3115_v0 = vrot.slane %v9269_v21, %v7876_v57  ;;  %v3179_v26 = vrot.slane %v9269_v21, %v7881_v41  ;;  %v3071_v54 = vmul.f32 %v3051_v1, %v11553_v33  ;;  %v11578_v33 = vld [vmem:[#allocation44_spill] sm:$0xff] }
 0x553   :  { %v3736_v53 = vpack.c.bf16 %v3725_v10, %v3724_v58  ;;  %v3022_v23 = vadd.f32 %v3006_v62, %v2958_v6  ;;  %v3023_v40 = vadd.f32 %v3007_v37, %v2959_v30  ;;  %6582 = vrcp.f32 %v2666_v16  ;;  %v11557_v16 = vld [vmem:[#allocation107_spill] sm:$0xff] }
 0x554   :  { %v3243_v11 = vrot.slane %v9274_v12, %v11370_v9  ;;  %v3134_v61 = vmul.f32 %v3115_v0, %v11554_v15  ;;  %v3135_v20 = vmul.f32 %v3115_v0, %v11555_v51  ;;  %v5990_v21 = vmul.f32 -1.442695, %v4023_v36  ;;  %v11559_v36 = vld [vmem:[#allocation219_spill] sm:$0xff] }
 0x555   :  { %v6571_v38 = vpop.eup %6570  ;;  %6204 = vmatprep.mubr.msk.bf16.mxu1 %vm3760_vm2, %v3736_v53  ;;  %v3086_v63 = vadd.f32 %v3070_v19, %v3022_v23  ;;  %v3087_v7 = vadd.f32 %v3071_v54, %v3023_v40  ;;  %v3198_v59 = vmul.f32 %v3179_v26, %v11556_v3  ;;  %v3199_v6 = vmul.f32 %v3179_v26, %v11557_v16  ;;  %v11558_v19 = vld [vmem:[#allocation218_spill] sm:$0xff]  ;;  %v11576_v3 = vld [vmem:[#allocation256_spill] sm:$0xff]  ;;  %v11577_v15 = vld [vmem:[#allocation247_spill] sm:$0xff] }
 0x556   :  { %v6573_v50 = vpop.eup %6572  ;;  %v3307_v30 = vrot.slane %v9274_v12, %v11371_v28  ;;  %v4088_v1 = vadd.f32 1.0, %v6571_v38  ;;  %v3371_v58 = vrot.slane %v9274_v12, %v11372_v39  ;;  %v3262_v0 = vmul.f32 %v3243_v11, %v11558_v19 }
 0x557   :  { %v6575_v25 = vpop.eup %6574  ;;  %v3150_v17 = vadd.f32 %v3134_v61, %v3086_v63  ;;  %v3151_v4 = vadd.f32 %v3135_v20, %v3087_v7  ;;  %v3263_v53 = vmul.f32 %v3243_v11, %v11559_v36  ;;  %v4086_v40 = vadd.f32 1.0, %v6573_v50  ;;  %v11560_v7 = vld [vmem:[#allocation225_spill] sm:$0xff]  ;;  %v11561_v20 = vld [vmem:[#allocation226_spill] sm:$0xff] }
 0x558   :  { %v6577_v10 = vpop.eup %6576  ;;  %6584 = vpow2.f32 %v5990_v21  ;;  %v3435_v26 = vrot.slane %v9274_v12, %v11373_v60  ;;  %v3499_v54 = vrot.slane %v9274_v12, %v7863_v14  ;;  %v3326_v61 = vmul.f32 %v3307_v30, %v11560_v7  ;;  %v11563_v11 = vld [vmem:[#allocation146_spill] sm:$0xff] }
 0x559   :  { %v3214_v62 = vadd.f32 %v3198_v59, %v3150_v17  ;;  %v3215_v37 = vadd.f32 %v3199_v6, %v3151_v4  ;;  %v6579_v23 = vpop.eup %6578  ;;  %v3327_v59 = vmul.f32 %v3307_v30, %v11561_v20  ;;  %6586 = vrcp.f32 %v4088_v1  ;;  %v11562_v4 = vld [vmem:[#allocation148_spill] sm:$0xff]  ;;  %v11565_v20 = vld [vmem:[#allocation239_spill] sm:$0xff]  ;;  %v11566_v7 = vld [vmem:[#allocation182_spill] sm:$0xff] }
 0x55a   :  { %v6581_v17 = vpop.eup %6580  ;;  %v3390_v6 = vmul.f32 %v3371_v58, %v11562_v4  ;;  %v3391_v36 = vmul.f32 %v3371_v58, %v11563_v11  ;;  %v3563_v19 = vrot.slane %v9274_v12, %v7870_v49  ;;  %v2706_v16 = vpack.c.bf16 %v6579_v23, %v6577_v10  ;;  %v11569_v11 = vld [vmem:[#allocation281_spill] sm:$0xff] }
 0x55b   :  { %v3278_v38 = vadd.f32 %v3262_v0, %v3214_v62  ;;  %v3279_v63 = vadd.f32 %v3263_v53, %v3215_v37  ;;  %6588 = vrcp.f32 %v4086_v40  ;;  %v4089_v62 = vadd.f32 1.0, %v6575_v25  ;;  %v11564_v37 = vld [vmem:[#allocation16_spill] sm:$0xff] }
 0x55c   :  { %v3454_v0 = vmul.f32 %v3435_v26, %v11564_v37  ;;  %v3627_v30 = vrot.slane %v9274_v12, %v7876_v57  ;;  %v3455_v4 = vmul.f32 %v3435_v26, %v11565_v20  ;;  %v3518_v58 = vmul.f32 %v3499_v54, %v11566_v7  ;;  %6188 = vmatprep.mubr.msk.bf16.mxu0 %vm3760_vm2, %v2706_v16  ;;  %v11571_v26 = vld [vmem:[#allocation265_spill] sm:$0xff] }
 0x55d   :  { %v3342_v50 = vadd.f32 %v3326_v61, %v3278_v38  ;;  %v3343_v21 = vadd.f32 %v3327_v59, %v3279_v63  ;;  %v6583_v34 = vpop.eup %6582  ;;  %v11567_v38 = vld [vmem:[#allocation245_spill] sm:$0xff]  ;;  %v3691_v10 = vrot.slane %v9274_v12, %v7881_v41  ;;  %v2720_v23 = vunpack.c.l.bf16 %v2706_v16  ;;  %v11568_v59 = vld [vmem:[#allocation198_spill] sm:$0xff] }
 0x55e   :  { %v3519_v63 = vmul.f32 %v3499_v54, %v11567_v38  ;;  %v2707_v25 = vpack.c.bf16 %v6581_v17, %v6583_v34  ;;  %v3582_v37 = vmul.f32 %v3563_v19, %v11568_v59  ;;  %6590 = vrcp.f32 %v4089_v62 }
 0x55f   :  { %v3406_v53 = vadd.f32 %v3390_v6, %v3342_v50  ;;  %v3407_v1 = vadd.f32 %v3391_v36, %v3343_v21  ;;  %v3583_v6 = vmul.f32 %v3563_v19, %v11569_v11  ;;  %v11570_v36 = vld [vmem:[#allocation252_spill] sm:$0xff]  ;;  %v3647_v21 = vmul.f32 %v3627_v30, %v11571_v26 }
 0x560   :  { %v3646_v50 = vmul.f32 %v3627_v30, %v11570_v36  ;;  %6189 = vmatmul.mubr.msk.bf16.gmra.mrb[28].mxu0 %vm3760_vm2, %v2707_v25  ;;  %v2751_v7 = vrot.slane %v2720_v23, %v11370_v9  ;;  %v2799_v54 = vrot.slane %v2720_v23, %v11371_v28  ;;  %v2863_v34 = vrot.slane %v2720_v23, %v11372_v39  ;;  %v11573_v19 = vld [vmem:[#allocation152_spill] sm:$0xff]  ;;  %v11574_v36 = vld [vmem:[#allocation39_spill] sm:$0xff]  ;;  %v11575_v30 = vld [vmem:[#allocation154_spill] sm:$0xff] }
 0x561   :  { %v3470_v40 = vadd.f32 %v3454_v0, %v3406_v53  ;;  %v3471_v61 = vadd.f32 %v3455_v4, %v3407_v1  ;;  %v2927_v17 = vrot.slane %v2720_v23, %v11373_v60  ;;  %v11572_v0 = vld [vmem:[#allocation151_spill] sm:$0xff]  ;;  %v3710_v51 = vmul.f32 %v3691_v10, %v11576_v3 }
 0x562   :  { %v6585_v4 = vpop.eup %6584  ;;  %v2768_v53 = vmul.f32 %v2751_v7, %v11572_v0  ;;  %v2769_v1 = vmul.f32 %v2751_v7, %v11573_v19  ;;  %v2816_v11 = vmul.f32 %v2799_v54, %v11574_v36  ;;  %v2817_v26 = vmul.f32 %v2799_v54, %v11575_v30  ;;  %v11580_v19 = vld [vmem:[#allocation199_spill] sm:$0xff]  ;;  %v11606_v30 = vld [vmem:[#allocation185_spill] sm:$0xff] }
 0x563   :  { %v3534_v38 = vadd.f32 %v3518_v58, %v3470_v40  ;;  %v3535_v12 = vadd.f32 %v3519_v63, %v3471_v61  ;;  %v3711_v58 = vmul.f32 %v3691_v10, %v11577_v15  ;;  %v9437_v63 = vpop.eup %6586  ;;  %v2880_v56 = vmul.f32 %v2863_v34, %v11578_v33 }
 0x564   :  { %v2832_v40 = vadd.f32 %v2816_v11, %v2768_v53  ;;  %v2833_v61 = vadd.f32 %v2817_v26, %v2769_v1  ;;  %v2881_v0 = vmul.f32 %v2863_v34, %v11579_v22  ;;  %v2944_v36 = vmul.f32 %v2927_v17, %v11580_v19 }
 0x565   :  { %v3598_v59 = vadd.f32 %v3582_v37, %v3534_v38  ;;  %v3599_v20 = vadd.f32 %v3583_v6, %v3535_v12  ;;  %v2991_v54 = vrot.slane %v2720_v23, %v7863_v14  ;;  %v9443_v37 = vpop.eup %6588  ;;  %v11581_v12 = vld [vmem:[#allocation200_spill] sm:$0xff]  ;;  %v3055_v15 = vrot.slane %v2720_v23, %v7870_v49 }
 0x566   :  { %v2896_v38 = vadd.f32 %v2880_v56, %v2832_v40  ;;  %v2897_v6 = vadd.f32 %v2881_v0, %v2833_v61  ;;  %v2945_v10 = vmul.f32 %v2927_v17, %v11581_v12  ;;  %v2721_v53 = vunpack.c.h.bf16 %v2706_v16  ;;  %v11584_v40 = vld [vmem:[#allocation221_spill] sm:$0xff]  ;;  %v11605_v12 = vld [vmem:[#allocation250_spill] sm:$0xff] }
 0x567   :  { %v3662_v52 = vadd.f32 %v3646_v50, %v3598_v59  ;;  %v3663_v7 = vadd.f32 %v3647_v21, %v3599_v20  ;;  %v3119_v1 = vrot.slane %v2720_v23, %v7876_v57  ;;  %v11582_v20 = vld [vmem:[#allocation213_spill] sm:$0xff]  ;;  %v11583_v21 = vld [vmem:[#allocation62_spill] sm:$0xff]  ;;  %v4087_v22 = vadd.f32 1.0, %v6585_v4 }
 0x568   :  { %v2960_v34 = vadd.f32 %v2944_v36, %v2896_v38  ;;  %v2961_v59 = vadd.f32 %v2945_v10, %v2897_v6  ;;  %v3008_v50 = vmul.f32 %v2991_v54, %v11582_v20  ;;  %v3009_v19 = vmul.f32 %v2991_v54, %v11583_v21  ;;  %v11586_v36 = vld [vmem:[#allocation228_spill] sm:$0xff]  ;;  %v11587_v38 = vld [vmem:[#allocation91_spill] sm:$0xff] }
 0x569   :  { %v3726_v11 = vadd.f32 %v3710_v51, %v3662_v52  ;;  %v3727_v26 = vadd.f32 %v3711_v58, %v3663_v7  ;;  %v3183_v56 = vrot.slane %v2720_v23, %v7881_v41  ;;  %v3072_v61 = vmul.f32 %v3055_v15, %v11584_v40  ;;  %v11585_v52 = vld [vmem:[#allocation77_spill] sm:$0xff]  ;;  %v11594_v40 = vld [vmem:[#allocation283_spill] sm:$0xff] }
 0x56a   :  { %v3024_v0 = vadd.f32 %v3008_v50, %v2960_v34  ;;  %v3025_v17 = vadd.f32 %v3009_v19, %v2961_v59  ;;  %v3073_v51 = vmul.f32 %v3055_v15, %v11585_v52  ;;  %v9454_v16 = vunpack.c.l.bf16 %v2707_v25  ;;  %v11588_v15 = vld [vmem:[#allocation233_spill] sm:$0xff] }
 0x56b   :  { %v3737_v3 = vpack.c.bf16 %v3727_v26, %v3726_v11  ;;  %v3136_v58 = vmul.f32 %v3119_v1, %v11586_v36  ;;  %v3247_v7 = vrot.slane %v2721_v53, %v11370_v9  ;;  %v3311_v62 = vrot.slane %v2721_v53, %v11371_v28  ;;  %v11589_v34 = vld [vmem:[#allocation109_spill] sm:$0xff] }
 0x56c   :  { %v3088_v4 = vadd.f32 %v3072_v61, %v3024_v0  ;;  %v3089_v54 = vadd.f32 %v3073_v51, %v3025_v17  ;;  %v3137_v23 = vmul.f32 %v3119_v1, %v11587_v38  ;;  %v3375_v19 = vrot.slane %v2721_v53, %v11372_v39  ;;  %v11590_v36 = vld [vmem:[#allocation241_spill] sm:$0xff]  ;;  %v11592_v1 = vld [vmem:[#allocation254_spill] sm:$0xff] }
 0x56d   :  { %6205 = vmatmul.mubr.msk.bf16.gmra.mrb[8].mxu1 %vm3760_vm2, %v3737_v3  ;;  %6592 = vrcp.f32 %v4087_v22  ;;  %v9461_v6 = vunpack.c.h.bf16 %v2707_v25  ;;  %v3200_v10 = vmul.f32 %v3183_v56, %v11588_v15  ;;  %v3439_v3 = vrot.slane %v2721_v53, %v11373_v60  ;;  %v11591_v17 = vld [vmem:[#allocation129_spill] sm:$0xff] }
 0x56e   :  { %v3152_v11 = vadd.f32 %v3136_v58, %v3088_v4  ;;  %v3153_v26 = vadd.f32 %v3137_v23, %v3089_v54  ;;  %v3201_v59 = vmul.f32 %v3183_v56, %v11589_v34  ;;  %v3503_v50 = vrot.slane %v2721_v53, %v7863_v14  ;;  %v11593_v38 = vld [vmem:[#allocation141_spill] sm:$0xff]  ;;  %v11597_v34 = vld [vmem:[#allocation168_spill] sm:$0xff] }
 0x56f   :  { %v3264_v0 = vmul.f32 %v3247_v7, %v11590_v36  ;;  %v3265_v61 = vmul.f32 %v3247_v7, %v11591_v17  ;;  %v3328_v51 = vmul.f32 %v3311_v62, %v11592_v1  ;;  %v3329_v22 = vmul.f32 %v3311_v62, %v11593_v38  ;;  %v11595_v4 = vld [vmem:[#allocation157_spill] sm:$0xff]  ;;  %v11598_v1 = vld [vmem:[#allocation248_spill] sm:$0xff] }
 0x570   :  { %v3216_v25 = vadd.f32 %v3200_v10, %v3152_v11  ;;  %v3217_v52 = vadd.f32 %v3201_v59, %v3153_v26  ;;  %v3392_v15 = vmul.f32 %v3375_v19, %v11594_v40  ;;  %v2755_v58 = vrot.slane %v9454_v16, %v11370_v9  ;;  %v11596_v56 = vld [vmem:[#allocation253_spill] sm:$0xff]  ;;  %v11599_v62 = vld [vmem:[#allocation184_spill] sm:$0xff]  ;;  %v9480_v11 = vpop.eup %6590  ;;  %v11600_v26 = vld [vmem:[#allocation163_spill] sm:$0xff] }
 0x571   :  { %v3393_v54 = vmul.f32 %v3375_v19, %v11595_v4  ;;  %v3456_v23 = vmul.f32 %v3439_v3, %v11596_v56  ;;  %v3457_v21 = vmul.f32 %v3439_v3, %v11597_v34  ;;  %v3567_v36 = vrot.slane %v2721_v53, %v7870_v49  ;;  %v11601_v40 = vld [vmem:[#allocation41_spill] sm:$0xff] }
 0x572   :  { %v3280_v7 = vadd.f32 %v3264_v0, %v3216_v25  ;;  %v3281_v17 = vadd.f32 %v3265_v61, %v3217_v52  ;;  %v3520_v20 = vmul.f32 %v3503_v50, %v11598_v1  ;;  %v3521_v10 = vmul.f32 %v3503_v50, %v11599_v62  ;;  %v11602_v50 = vld [vmem:[#allocation201_spill] sm:$0xff] }
 0x573   :  { %v2770_v59 = vmul.f32 %v2755_v58, %v11600_v26  ;;  %v2771_v38 = vmul.f32 %v2755_v58, %v11601_v40  ;;  %v2803_v19 = vrot.slane %v9454_v16, %v11371_v28  ;;  %v2867_v3 = vrot.slane %v9454_v16, %v11372_v39  ;;  %v11603_v62 = vld [vmem:[#allocation165_spill] sm:$0xff]  ;;  %v11604_v58 = vld [vmem:[#allocation167_spill] sm:$0xff] }
 0x574   :  { %v3344_v34 = vadd.f32 %v3328_v51, %v3280_v7  ;;  %v3345_v56 = vadd.f32 %v3329_v22, %v3281_v17  ;;  %v3631_v52 = vrot.slane %v2721_v53, %v7876_v57  ;;  %v2931_v0 = vrot.slane %v9454_v16, %v11373_v60 }
 0x575   :  { %v3584_v61 = vmul.f32 %v3567_v36, %v11602_v50  ;;  %v3695_v25 = vrot.slane %v2721_v53, %v7881_v41  ;;  %v2818_v1 = vmul.f32 %v2803_v19, %v11603_v62  ;;  %v2819_v40 = vmul.f32 %v2803_v19, %v11604_v58 }
 0x576   :  { %v3408_v26 = vadd.f32 %v3392_v15, %v3344_v34  ;;  %v3409_v4 = vadd.f32 %v3393_v54, %v3345_v56  ;;  %v3585_v33 = vmul.f32 %v3567_v36, %v11605_v12  ;;  %v2995_v17 = vrot.slane %v9454_v16, %v7863_v14  ;;  %v11609_v54 = vld [vmem:[#allocation142_spill] sm:$0xff] }
 0x577   :  { %v6593_v51 = vpop.eup %6592  ;;  %v2834_v22 = vadd.f32 %v2818_v1, %v2770_v59  ;;  %v2835_v7 = vadd.f32 %v2819_v40, %v2771_v38  ;;  %v2882_v2 = vmul.f32 %v2867_v3, %v11606_v30  ;;  %v2883_v50 = vmul.f32 %v2867_v3, %v11607_v24  ;;  %v11610_v40 = vld [vmem:[#allocation268_spill] sm:$0xff]  ;;  %v11611_v59 = vld [vmem:[#allocation217_spill] sm:$0xff] }
 0x578   :  { %v3472_v55 = vadd.f32 %v3456_v23, %v3408_v26  ;;  %v3473_v53 = vadd.f32 %v3457_v21, %v3409_v4  ;;  %v3648_v62 = vmul.f32 %v3631_v52, %v9022_v29  ;;  %v2946_v19 = vmul.f32 %v2931_v0, %v11608_v8  ;;  %v11612_v21 = vld [vmem:[#allocation64_spill] sm:$0xff]  ;;  %v11668_v29 = vld [vmem:[#allocation45_spill] sm:$0xff]  ;;  %v11685_v8 = vld [vmem:[#allocation67_spill] sm:$0xff] }
 0x579   :  { %v2898_v15 = vadd.f32 %v2882_v2, %v2834_v22  ;;  %v2899_v34 = vadd.f32 %v2883_v50, %v2835_v7  ;;  %v2947_v36 = vmul.f32 %v2931_v0, %v11609_v54  ;;  %v3059_v56 = vrot.slane %v9454_v16, %v7870_v49  ;;  %v11613_v22 = vld [vmem:[#allocation266_spill] sm:$0xff] }
 0x57a   :  { %v3536_v12 = vadd.f32 %v3520_v20, %v3472_v55  ;;  %v3537_v1 = vadd.f32 %v3521_v10, %v3473_v53  ;;  %v3649_v38 = vmul.f32 %v3631_v52, %v11610_v40  ;;  %v3010_v30 = vmul.f32 %v2995_v17, %v11611_v59  ;;  %v11614_v10 = vld [vmem:[#allocation224_spill] sm:$0xff] }
 0x57b   :  { %v2962_v3 = vadd.f32 %v2946_v19, %v2898_v15  ;;  %v2963_v23 = vadd.f32 %v2947_v36, %v2899_v34  ;;  %v3011_v4 = vmul.f32 %v2995_v17, %v11612_v21  ;;  %v3123_v26 = vrot.slane %v9454_v16, %v7876_v57  ;;  %v11615_v53 = vld [vmem:[#allocation80_spill] sm:$0xff] }
 0x57c   :  { %v3600_v2 = vadd.f32 %v3584_v61, %v3536_v12  ;;  %v3601_v50 = vadd.f32 %v3585_v33, %v3537_v1  ;;  %v3712_v0 = vmul.f32 %v3695_v25, %v11613_v22  ;;  %v3187_v7 = vrot.slane %v9454_v16, %v7881_v41  ;;  %v11616_v61 = vld [vmem:[#allocation231_spill] sm:$0xff]  ;;  %v11617_v1 = vld [vmem:[#allocation93_spill] sm:$0xff] }
 0x57d   :  { %v3026_v55 = vadd.f32 %v3010_v30, %v2962_v3  ;;  %v3027_v20 = vadd.f32 %v3011_v4, %v2963_v23  ;;  %v3074_v52 = vmul.f32 %v3059_v56, %v11614_v10  ;;  %v3075_v40 = vmul.f32 %v3059_v56, %v11615_v53  ;;  %v11618_v3 = vld [vmem:[#allocation237_spill] sm:$0xff]  ;;  %v11619_v56 = vld [vmem:[#allocation111_spill] sm:$0xff] }
 0x57e   :  { %v3664_v19 = vadd.f32 %v3648_v62, %v3600_v2  ;;  %v3665_v15 = vadd.f32 %v3649_v38, %v3601_v50  ;;  %v3713_v17 = vmul.f32 %v3695_v25, %v9068_v47  ;;  %v3251_v34 = vrot.slane %v9461_v6, %v11370_v9  ;;  %v11620_v2 = vld [vmem:[#allocation132_spill] sm:$0xff]  ;;  %v11666_v53 = vld [vmem:[#allocation43_spill] sm:$0xff] }
 0x57f   :  { %v3090_v12 = vadd.f32 %v3074_v52, %v3026_v55  ;;  %v3091_v33 = vadd.f32 %v3075_v40, %v3027_v20  ;;  %v3138_v36 = vmul.f32 %v3123_v26, %v11616_v61  ;;  %v3139_v22 = vmul.f32 %v3123_v26, %v11617_v1  ;;  %v11621_v20 = vld [vmem:[#allocation244_spill] sm:$0xff]  ;;  %v11665_v1 = vld [vmem:[#allocation22_spill] sm:$0xff] }
 0x580   :  { %v3728_v16 = vadd.f32 %v3712_v0, %v3664_v19  ;;  %v3729_v30 = vadd.f32 %v3713_v17, %v3665_v15  ;;  %v3202_v23 = vmul.f32 %v3187_v7, %v11618_v3  ;;  %v3203_v62 = vmul.f32 %v3187_v7, %v11619_v56 }
 0x581   :  { %v3154_v4 = vadd.f32 %v3138_v36, %v3090_v12  ;;  %v3155_v10 = vadd.f32 %v3139_v22, %v3091_v33  ;;  %v3315_v25 = vrot.slane %v9461_v6, %v11371_v28  ;;  %v3266_v50 = vmul.f32 %v3251_v34, %v11620_v2 }
 0x582   :  { %v3738_v38 = vpack.c.bf16 %v3729_v30, %v3728_v16  ;;  %v3267_v52 = vmul.f32 %v3251_v34, %v11621_v20  ;;  %v3379_v26 = vrot.slane %v9461_v6, %v11372_v39  ;;  %v3443_v22 = vrot.slane %v9461_v6, %v11373_v60  ;;  %v11623_v34 = vld [vmem:[#allocation274_spill] sm:$0xff]  ;;  %v11624_v30 = vld [vmem:[#allocation159_spill] sm:$0xff] }
 0x583   :  { %v3218_v55 = vadd.f32 %v3202_v23, %v3154_v4  ;;  %v3219_v40 = vadd.f32 %v3203_v62, %v3155_v10  ;;  %v9532_v0 = vpack.c.bf16 %v6593_v51, %v9443_v37  ;;  %v9536_v7 = vpack.c.bf16 %v9480_v11, %v9437_v63  ;;  %v11622_v10 = vld [vmem:[#allocation144_spill] sm:$0xff]  ;;  %v11625_v4 = vld [vmem:[#allocation255_spill] sm:$0xff]  ;;  %v11627_v11 = vld [vmem:[#allocation269_spill] sm:$0xff] }
 0x584   :  { %6208 = vmatprep.mubr.msk.bf16.mxu1 %vm3760_vm2, %v3738_v38  ;;  %v3330_v17 = vmul.f32 %v3315_v25, %v11622_v10  ;;  %v3331_v12 = vmul.f32 %v3315_v25, %v11623_v34  ;;  %v3507_v33 = vrot.slane %v9461_v6, %v7863_v14  ;;  %v3394_v23 = vmul.f32 %v3379_v26, %v11624_v30  ;;  %v11626_v51 = vld [vmem:[#allocation171_spill] sm:$0xff] }
 0x585   :  { %v3282_v19 = vadd.f32 %v3266_v50, %v3218_v55  ;;  %v3283_v15 = vadd.f32 %v3267_v52, %v3219_v40  ;;  %v3395_v37 = vmul.f32 %v3379_v26, %v11625_v4  ;;  %v3458_v62 = vmul.f32 %v3443_v22, %v11626_v51  ;;  %v11628_v40 = vld [vmem:[#allocation249_spill] sm:$0xff]  ;;  %v11629_v10 = vld [vmem:[#allocation251_spill] sm:$0xff] }
 0x586   :  { %v3459_v50 = vmul.f32 %v3443_v22, %v11627_v11  ;;  %v3571_v55 = vrot.slane %v9461_v6, %v7870_v49  ;;  %v3522_v25 = vmul.f32 %v3507_v33, %v11628_v40  ;;  %v3699_v26 = vrot.slane %v9461_v6, %v7881_v41  ;;  %v11630_v22 = vld [vmem:[#allocation203_spill] sm:$0xff]  ;;  %v11649_v4 = vld [vmem:[#allocation29_spill] sm:$0xff] }
 0x587   :  { %v3346_v36 = vadd.f32 %v3330_v17, %v3282_v19  ;;  %v3347_v16 = vadd.f32 %v3331_v12, %v3283_v15  ;;  %v3523_v19 = vmul.f32 %v3507_v33, %v11629_v10  ;;  %v3635_v15 = vrot.slane %v9461_v6, %v7876_v57 }
 0x589   :  { %v3410_v38 = vadd.f32 %v3394_v23, %v3346_v36  ;;  %v3411_v63 = vadd.f32 %v3395_v37, %v3347_v16  ;;  %v3586_v36 = vmul.f32 %v3571_v55, %v9001_v44  ;;  %v3587_v16 = vmul.f32 %v3571_v55, %v11630_v22  ;;  %v11641_v44 = vld [vmem:[#allocation47_spill] sm:$0xff] }
 0x58a   :  { %v3650_v40 = vmul.f32 %v3635_v15, %v9039_v27  ;;  %v9608_v27 = vunpack.c.l.bf16 %v9536_v7 }
 0x58b   :  { %v3474_v52 = vadd.f32 %v3458_v62, %v3410_v38  ;;  %v3475_v34 = vadd.f32 %v3459_v50, %v3411_v63  ;;  %v3651_v62 = vmul.f32 %v3635_v15, %v9052_v48  ;;  %v3714_v63 = vmul.f32 %v3699_v26, %v9091_v13  ;;  %v11638_v48 = vld [vmem:[#allocation48_spill] sm:$0xff] }
 0x58c   :  { %v3715_v50 = vmul.f32 %v3699_v26, %v9082_v35  ;;  %v4341_v20 = vrot.slane %v9608_v27, %v11373_v60 }
 0x58d   :  { %v3538_v17 = vadd.f32 %v3522_v25, %v3474_v52  ;;  %v3539_v12 = vadd.f32 %v3523_v19, %v3475_v34 }
 0x58f   :  { %v3602_v23 = vadd.f32 %v3586_v36, %v3538_v17  ;;  %v3603_v37 = vadd.f32 %v3587_v16, %v3539_v12 }
 0x591   :  { %v3666_v38 = vadd.f32 %v3650_v40, %v3602_v23  ;;  %v3667_v33 = vadd.f32 %v3651_v62, %v3603_v37 }
 0x593   :  { %v3730_v10 = vadd.f32 %v3714_v63, %v3666_v38  ;;  %v3731_v6 = vadd.f32 %v3715_v50, %v3667_v33 }
 0x595   :  { %v3739_v25 = vpack.c.bf16 %v3731_v6, %v3730_v10 }
 0x597   :  { %6209 = vmatmul.mubr.msk.bf16.gmra.mrb[12].mxu1 %vm3760_vm2, %v3739_v25 }
 0x598   :  { %6216 = vmatprep.mubr.msk.bf16.mxu1 %vm3760_vm2, %v9532_v0 }
 0x59f   :  { %6217 = vmatmul.mubr.msk.bf16.vlgmr.msra.gmra.mrb[16].mxu1 %vm3760_vm2, %v9536_v7 }
 0x5a3   :  { %v6182_v34 = vpop.f32.mrb[20].mxu0 }
 0x5a4   :  { %v3835_v55 = vpop.f32.mrb[21].mxu0 }
 0x5a5   :  { %v6183_v52 = vpop.f32.mrb[22].mxu0 }
 0x5a6   :  { %v3838_v40 = vpop.f32.mrb[23].mxu0 }
 0x5d4   :  { %v6202_v19 = vpop.f32.mrb[4].mxu1 }
 0x5d5   :  { %v3977_v15 = vadd.f32 %v6202_v19, %v6182_v34  ;;  %v3968_v17 = vpop.f32.mrb[5].mxu1 }
 0x5d6   :  { %v3969_v12 = vadd.f32 %v3968_v17, %v3835_v55  ;;  %v6203_v26 = vpop.f32.mrb[6].mxu1 }
 0x5d7   :  { %v4028_v36 = vadd.f32 %v9345_v42, %v3977_v15  ;;  %v3980_v10 = vadd.f32 %v6203_v26, %v6183_v52  ;;  %v3971_v16 = vpop.f32.mrb[7].mxu1 }
 0x5d8   :  { %v4026_v23 = vadd.f32 %v9345_v42, %v3969_v12  ;;  %v3972_v37 = vadd.f32 %v3971_v16, %v3838_v40 }
 0x5d9   :  { %v5995_v62 = vmul.f32 -1.442695, %v4028_v36  ;;  %v4029_v38 = vadd.f32 %v9345_v42, %v3980_v10 }
 0x5da   :  { %v5993_v33 = vmul.f32 -1.442695, %v4026_v23  ;;  %v4027_v63 = vadd.f32 %v9345_v42, %v3972_v37  ;;  %v4142_v42 = vunpack.c.l.bf16 %v9532_v0 }
 0x5db   :  { %6594 = vpow2.f32 %v5995_v62  ;;  %v5996_v50 = vmul.f32 -1.442695, %v4029_v38  ;;  %v11631_v38 = vld [vmem:[#allocation18_spill] sm:$0xff] }
 0x5dc   :  { %6596 = vpow2.f32 %v5993_v33  ;;  %v5994_v6 = vmul.f32 -1.442695, %v4027_v63  ;;  %v4161_v37 = vrot.slane %v4142_v42, %v11370_v9  ;;  %v4209_v62 = vrot.slane %v4142_v42, %v11371_v28  ;;  %v11632_v63 = vld [vmem:[#allocation24_spill] sm:$0xff] }
 0x5dd   :  { %6598 = vpow2.f32 %v5996_v50 }
 0x5de   :  { %6600 = vpow2.f32 %v5994_v6  ;;  %v4190_v33 = vmul.f32 %v4161_v37, %v11631_v38  ;;  %v4238_v50 = vmul.f32 %v4209_v62, %v11632_v63  ;;  %v4273_v6 = vrot.slane %v4142_v42, %v11372_v39 }
 0x5e5   :  { %v6595_v25 = vpop.eup %6594 }
 0x5e6   :  { %v6597_v34 = vpop.eup %6596  ;;  %v4092_v55 = vadd.f32 1.0, %v6595_v25  ;;  %v11633_v25 = vld [vmem:[#allocation17_spill] sm:$0xff] }
 0x5e7   :  { %v6599_v52 = vpop.eup %6598  ;;  %v4090_v19 = vadd.f32 1.0, %v6597_v34  ;;  %v4191_v34 = vmul.f32 %v4161_v37, %v11633_v25 }
 0x5e8   :  { %v6601_v15 = vpop.eup %6600  ;;  %6602 = vrcp.f32 %v4092_v55  ;;  %v4093_v40 = vadd.f32 1.0, %v6599_v52  ;;  %v11634_v55 = vld [vmem:[#allocation26_spill] sm:$0xff] }
 0x5e9   :  { %6604 = vrcp.f32 %v4090_v19  ;;  %v4091_v17 = vadd.f32 1.0, %v6601_v15  ;;  %v4239_v52 = vmul.f32 %v4209_v62, %v11634_v55  ;;  %v4254_v19 = vadd.f32 %v4238_v50, %v4190_v33  ;;  %v11635_v15 = vld [vmem:[#allocation21_spill] sm:$0xff]  ;;  %v11636_v33 = vld [vmem:[#allocation31_spill] sm:$0xff] }
 0x5ea   :  { %6606 = vrcp.f32 %v4093_v40  ;;  %v4302_v40 = vmul.f32 %v4273_v6, %v11635_v15  ;;  %v4303_v63 = vmul.f32 %v4273_v6, %v11636_v33  ;;  %v11637_v50 = vld [vmem:[#allocation35_spill] sm:$0xff]  ;;  %v4401_v55 = vrot.slane %v4142_v42, %v7863_v14 }
 0x5eb   :  { %6608 = vrcp.f32 %v4091_v17  ;;  %v4337_v17 = vrot.slane %v4142_v42, %v11373_v60 }
 0x5ec   :  { %v4318_v38 = vadd.f32 %v4302_v40, %v4254_v19  ;;  %v4465_v40 = vrot.slane %v4142_v42, %v7870_v49 }
 0x5ed   :  { %v4366_v25 = vmul.f32 %v4337_v17, %v11637_v50  ;;  %v11640_v50 = vld [vmem:[#allocation40_spill] sm:$0xff] }
 0x5ee   :  { %v4431_v22 = vmul.f32 %v4401_v55, %v11640_v50  ;;  %v4494_v11 = vmul.f32 %v4465_v40, %v11641_v44  ;;  %v11647_v50 = vld [vmem:[#allocation69_spill] sm:$0xff] }
 0x5ef   :  { %v4382_v13 = vadd.f32 %v4366_v25, %v4318_v38 }
 0x5f2   :  { %v6603_v12 = vpop.eup %6602 }
 0x5f3   :  { %v6605_v26 = vpop.eup %6604 }
 0x5f4   :  { %v6607_v36 = vpop.eup %6606 }
 0x5f5   :  { %v6609_v10 = vpop.eup %6608  ;;  %v9570_v16 = vpack.c.bf16 %v6607_v36, %v6603_v12  ;;  %v6481_v36 = vld [vmem:[%s10411_s9 + $0x8] sm:$0xff]  }
 0x5f6   :  { %v9572_v23 = vpack.c.bf16 %v6609_v10, %v6605_v26  ;;  %v6480_v26 = vld [vmem:[%s10411_s9] sm:$0xff]   ;;  %v4255_v10 = vadd.f32 %v4239_v52, %v4191_v34  ;;  %v4367_v34 = vmul.f32 %v4337_v17, %v11638_v48  ;;  %v11639_v52 = vld [vmem:[#allocation55_spill] sm:$0xff]  ;;  %v4165_v48 = vrot.slane %v9608_v27, %v11370_v9 }
 0x5f7   :  { %6232 = vmatprep.subr.bf16.mxu1 %v6480_v26  ;;  %v4430_v19 = vmul.f32 %v4401_v55, %v11639_v52  ;;  %v4213_v17 = vrot.slane %v9608_v27, %v11371_v28  ;;  %v4593_v55 = vrot.slane %v4142_v42, %v7881_v41  ;;  %v11644_v52 = vld [vmem:[#allocation19_spill] sm:$0xff] }
 0x5f8   :  { %6220 = vmatprep.mubr.msk.bf16.mxu1 %vm3760_vm2, %v9572_v23  ;;  %6233 = vmatpush3.bf16.msra.mxu1 %v6480_v26  ;;  %v4319_v35 = vadd.f32 %v4303_v63, %v4255_v10  ;;  %v4529_v26 = vrot.slane %v4142_v42, %v7876_v57  ;;  %v11642_v63 = vld [vmem:[#allocation66_spill] sm:$0xff] }
 0x5f9   :  { %6221 = vmatmul.mubr.msk.bf16.gmra.mrb[20].mxu1 %vm3760_vm2, %v9570_v16  ;;  %6234 = vmatprep.subr.bf16.mxu1 %v6481_v36  ;;  %v4446_v33 = vadd.f32 %v4430_v19, %v4382_v13  ;;  %v11643_v13 = vld [vmem:[#allocation82_spill] sm:$0xff]  ;;  %v4622_v51 = vmul.f32 %v4593_v55, %v11647_v50  ;;  %v4241_v42 = vmul.f32 %v4213_v17, %v11649_v4  ;;  %v11652_v50 = vld [vmem:[#allocation33_spill] sm:$0xff] }
 0x5fa   :  { %v4383_v6 = vadd.f32 %v4367_v34, %v4319_v35  ;;  %v4495_v35 = vmul.f32 %v4465_v40, %v11642_v63  ;;  %v4558_v25 = vmul.f32 %v4529_v26, %v11643_v13  ;;  %v4277_v40 = vrot.slane %v9608_v27, %v11372_v39  ;;  %v11648_v63 = vld [vmem:[#allocation20_spill] sm:$0xff] }
 0x5fb   :  { %v4510_v38 = vadd.f32 %v4494_v11, %v4446_v33  ;;  %v11645_v11 = vld [vmem:[#allocation28_spill] sm:$0xff]  ;;  %v4193_v13 = vmul.f32 %v4165_v48, %v11648_v63 }
 0x5fc   :  { %6235 = vmatpush3.bf16.msra.mxu1 %v6481_v36  ;;  %v4447_v10 = vadd.f32 %v4431_v22, %v4383_v6  ;;  %v9618_v36 = vunpack.c.h.bf16 %v9532_v0  ;;  %v4192_v22 = vmul.f32 %v4165_v48, %v11644_v52  ;;  %v4240_v19 = vmul.f32 %v4213_v17, %v11645_v11  ;;  %v11646_v6 = vld [vmem:[#allocation60_spill] sm:$0xff]  ;;  %v11650_v52 = vld [vmem:[#allocation95_spill] sm:$0xff]  ;;  %v11651_v11 = vld [vmem:[#allocation78_spill] sm:$0xff] }
 0x5fd   :  { %v4574_v34 = vadd.f32 %v4558_v25, %v4510_v38  ;;  %v4559_v33 = vmul.f32 %v4529_v26, %v11646_v6  ;;  %v4623_v26 = vmul.f32 %v4593_v55, %v11650_v52  ;;  %v4304_v30 = vmul.f32 %v4277_v40, %v11652_v50  ;;  %v11655_v63 = vld [vmem:[#allocation36_spill] sm:$0xff]  ;;  %v11659_v50 = vld [vmem:[#allocation38_spill] sm:$0xff] }
 0x5fe   :  { %v4511_v44 = vadd.f32 %v4495_v35, %v4447_v10  ;;  %v4657_v0 = vrot.slane %v9618_v36, %v11370_v9  ;;  %v4256_v35 = vadd.f32 %v4240_v19, %v4192_v22  ;;  %v4721_v25 = vrot.slane %v9618_v36, %v11371_v28  ;;  %v11654_v19 = vld [vmem:[#allocation134_spill] sm:$0xff] }
 0x5ff   :  { %v4638_v38 = vadd.f32 %v4622_v51, %v4574_v34  ;;  %v4257_v2 = vadd.f32 %v4241_v42, %v4193_v13  ;;  %v4785_v4 = vrot.slane %v9618_v36, %v11372_v39  ;;  %v9643_v17 = vunpack.c.h.bf16 %v9536_v7  ;;  %v11653_v34 = vld [vmem:[#allocation120_spill] sm:$0xff] }
 0x600   :  { %v4575_v10 = vadd.f32 %v4559_v33, %v4511_v44  ;;  %v4686_v6 = vmul.f32 %v4657_v0, %v11651_v11  ;;  %v4320_v51 = vadd.f32 %v4304_v30, %v4256_v35  ;;  %v9646_v44 = vunpack.c.l.bf16 %v9572_v23  ;;  %v11658_v11 = vld [vmem:[#allocation150_spill] sm:$0xff] }
 0x601   :  { %v4305_v55 = vmul.f32 %v4277_v40, %v11414_v18  ;;  %v4687_v22 = vmul.f32 %v4657_v0, %v11653_v34  ;;  %v4750_v33 = vmul.f32 %v4721_v25, %v11654_v19  ;;  %v4368_v13 = vmul.f32 %v4341_v20, %v11655_v63  ;;  %v11657_v40 = vld [vmem:[#allocation108_spill] sm:$0xff] }
 0x602   :  { %v4639_v56 = vadd.f32 %v4623_v26, %v4575_v10  ;;  %v4702_v48 = vadd.f32 %v4686_v6, %v4638_v38  ;;  %v4405_v42 = vrot.slane %v9608_v27, %v7863_v14  ;;  %v11656_v10 = vld [vmem:[#allocation92_spill] sm:$0xff]  ;;  %v4849_v7 = vrot.slane %v9618_v36, %v11373_v60 }
 0x603   :  { %v9587_v12 = vpop.f32.mrb[24].mxu0  ;;  %v4751_v38 = vmul.f32 %v4721_v25, %v11656_v10  ;;  %v4913_v30 = vrot.slane %v9618_v36, %v7863_v14  ;;  %v4321_v35 = vadd.f32 %v4305_v55, %v4257_v2  ;;  %v4814_v0 = vmul.f32 %v4785_v4, %v11657_v40  ;;  %v11660_v2 = vld [vmem:[#allocation42_spill] sm:$0xff] }
 0x604   :  { %v9595_v37 = vpop.f32.mrb[25].mxu0  ;;  %v4703_v52 = vadd.f32 %v4687_v22, %v4639_v56  ;;  %v4766_v18 = vadd.f32 %v4750_v33, %v4702_v48  ;;  %v4384_v26 = vadd.f32 %v4368_v13, %v4320_v51  ;;  %v4815_v6 = vmul.f32 %v4785_v4, %v11658_v11  ;;  %v11661_v4 = vld [vmem:[#allocation122_spill] sm:$0xff]  ;;  %v11663_v33 = vld [vmem:[#allocation137_spill] sm:$0xff] }
 0x605   :  { %v9597_v62 = vpop.f32.mrb[26].mxu0  ;;  %v4369_v34 = vmul.f32 %v4341_v20, %v11659_v50  ;;  %v4169_v19 = vrot.slane %v9646_v44, %v11370_v9  ;;  %v4217_v25 = vrot.slane %v9646_v44, %v11371_v28  ;;  %v4977_v63 = vrot.slane %v9618_v36, %v7870_v49  ;;  %v11662_v20 = vld [vmem:[#allocation162_spill] sm:$0xff]  ;;  %v11664_v50 = vld [vmem:[#allocation57_spill] sm:$0xff] }
 0x606   :  { %v9602_v15 = vpop.f32.mrb[27].mxu0  ;;  %v5041_v56 = vrot.slane %v9618_v36, %v7876_v57  ;;  %v4432_v48 = vmul.f32 %v4405_v42, %v11660_v2  ;;  %v4469_v51 = vrot.slane %v9608_v27, %v7870_v49  ;;  %v4878_v55 = vmul.f32 %v4849_v7, %v11661_v4  ;;  %v11667_v2 = vld [vmem:[#allocation25_spill] sm:$0xff] }
 0x607   :  { %v4879_v22 = vmul.f32 %v4849_v7, %v11662_v20  ;;  %v4942_v13 = vmul.f32 %v4913_v30, %v11663_v33  ;;  %v4385_v10 = vadd.f32 %v4369_v34, %v4321_v35  ;;  %v4767_v40 = vadd.f32 %v4751_v38, %v4703_v52  ;;  %v11669_v7 = vld [vmem:[#allocation173_spill] sm:$0xff]  ;;  %v11670_v33 = vld [vmem:[#allocation54_spill] sm:$0xff] }
 0x608   :  { %v4830_v11 = vadd.f32 %v4814_v0, %v4766_v18  ;;  %v4433_v3 = vmul.f32 %v4405_v42, %v11664_v50  ;;  %v4448_v47 = vadd.f32 %v4432_v48, %v4384_v26  ;;  %v4194_v61 = vmul.f32 %v4169_v19, %v11665_v1  ;;  %v11671_v42 = vld [vmem:[#allocation187_spill] sm:$0xff]  ;;  %v11672_v1 = vld [vmem:[#allocation161_spill] sm:$0xff]  ;;  %v11674_v48 = vld [vmem:[#allocation68_spill] sm:$0xff] }
 0x609   :  { %v4195_v21 = vmul.f32 %v4169_v19, %v11666_v53  ;;  %v4242_v59 = vmul.f32 %v4217_v25, %v11667_v2  ;;  %v4243_v54 = vmul.f32 %v4217_v25, %v11668_v29  ;;  %v9682_v4 = vunpack.c.l.bf16 %v9570_v16  ;;  %v11673_v26 = vld [vmem:[#allocation205_spill] sm:$0xff] }
 0x60a   :  { %v4943_v20 = vmul.f32 %v4913_v30, %v11669_v7  ;;  %v4496_v35 = vmul.f32 %v4469_v51, %v11670_v33  ;;  %v4533_v38 = vrot.slane %v9608_v27, %v7876_v57  ;;  %v9689_v52 = vmul.f32 %v4977_v63, %v11671_v42 }
 0x60b   :  { %v9692_v18 = vmul.f32 %v4977_v63, %v11672_v1  ;;  %v4449_v53 = vadd.f32 %v4433_v3, %v4385_v10  ;;  %v4281_v29 = vrot.slane %v9646_v44, %v11372_v39  ;;  %v4831_v0 = vadd.f32 %v4815_v6, %v4767_v40  ;;  %v11675_v63 = vld [vmem:[#allocation63_spill] sm:$0xff]  ;;  %v11680_v1 = vld [vmem:[#allocation65_spill] sm:$0xff] }
 0x60c   :  { %v9697_v34 = vmul.f32 %v5041_v56, %v11673_v26  ;;  %v9701_v30 = vrot.slane %v9618_v36, %v7881_v41  ;;  %v4512_v19 = vadd.f32 %v4496_v35, %v4448_v47  ;;  %v4894_v25 = vadd.f32 %v4878_v55, %v4830_v11  ;;  %v11676_v36 = vld [vmem:[#allocation56_spill] sm:$0xff]  ;;  %v11677_v47 = vld [vmem:[#allocation58_spill] sm:$0xff] }
 0x60d   :  { %v4497_v50 = vmul.f32 %v4469_v51, %v11674_v48  ;;  %v4258_v2 = vadd.f32 %v4242_v59, %v4194_v61  ;;  %v4259_v7 = vadd.f32 %v4243_v54, %v4195_v21  ;;  %v4560_v33 = vmul.f32 %v4533_v38, %v11675_v63  ;;  %v11678_v21 = vld [vmem:[#allocation183_spill] sm:$0xff]  ;;  %v11679_v51 = vld [vmem:[#allocation206_spill] sm:$0xff] }
 0x60e   :  { %v4597_v3 = vrot.slane %v9608_v27, %v7881_v41  ;;  %v4173_v6 = vrot.slane %v9682_v4, %v11370_v9  ;;  %v4221_v10 = vrot.slane %v9682_v4, %v11371_v28  ;;  %v4306_v42 = vmul.f32 %v4281_v29, %v11676_v36 }
 0x60f   :  { %v4513_v40 = vadd.f32 %v4497_v50, %v4449_v53  ;;  %v4307_v55 = vmul.f32 %v4281_v29, %v11677_v47  ;;  %v4345_v59 = vrot.slane %v9646_v44, %v11373_v60  ;;  %v4895_v54 = vadd.f32 %v4879_v22, %v4831_v0  ;;  %v11681_v50 = vld [vmem:[#allocation98_spill] sm:$0xff]  ;;  %v11682_v22 = vld [vmem:[#allocation49_spill] sm:$0xff] }
 0x610   :  { %v9716_v61 = vmul.f32 %v5041_v56, %v11678_v21  ;;  %v9720_v27 = vmul.f32 %v9701_v30, %v11679_v51  ;;  %v4576_v11 = vadd.f32 %v4560_v33, %v4512_v19  ;;  %v9722_v35 = vadd.f32 %v4942_v13, %v4894_v25  ;;  %v11683_v56 = vld [vmem:[#allocation27_spill] sm:$0xff]  ;;  %v11684_v21 = vld [vmem:[#allocation50_spill] sm:$0xff] }
 0x611   :  { %v4561_v53 = vmul.f32 %v4533_v38, %v11680_v1  ;;  %v4322_v26 = vadd.f32 %v4306_v42, %v4258_v2  ;;  %v4323_v48 = vadd.f32 %v4307_v55, %v4259_v7  ;;  %v4624_v29 = vmul.f32 %v4597_v3, %v11681_v50  ;;  %v11686_v33 = vld [vmem:[#allocation74_spill] sm:$0xff] }
 0x612   :  { %v4661_v63 = vrot.slane %v9643_v17, %v11370_v9  ;;  %v4196_v0 = vmul.f32 %v4173_v6, %v11682_v22  ;;  %v4244_v36 = vmul.f32 %v4221_v10, %v11683_v56  ;;  %v4370_v51 = vmul.f32 %v4345_v59, %v11684_v21  ;;  %v11690_v22 = vld [vmem:[#allocation59_spill] sm:$0xff]  ;;  %v11691_v21 = vld [vmem:[#allocation76_spill] sm:$0xff] }
 0x613   :  { %v4577_v47 = vadd.f32 %v4561_v53, %v4513_v40  ;;  %v4371_v19 = vmul.f32 %v4345_v59, %v11685_v8  ;;  %v4409_v13 = vrot.slane %v9646_v44, %v7863_v14  ;;  %v9734_v38 = vadd.f32 %v4943_v20, %v4895_v54  ;;  %v11687_v8 = vld [vmem:[#allocation123_spill] sm:$0xff]  ;;  %v11689_v20 = vld [vmem:[#allocation52_spill] sm:$0xff] }
 0x614   :  { %v4640_v25 = vadd.f32 %v4624_v29, %v4576_v11  ;;  %v4725_v2 = vrot.slane %v9643_v17, %v11371_v28  ;;  %v4285_v7 = vrot.slane %v9682_v4, %v11372_v39  ;;  %v4625_v42 = vmul.f32 %v4597_v3, %v11686_v33  ;;  %v11688_v53 = vld [vmem:[#allocation51_spill] sm:$0xff] }
 0x615   :  { %v4789_v40 = vrot.slane %v9643_v17, %v11372_v39  ;;  %v4386_v55 = vadd.f32 %v4370_v51, %v4322_v26  ;;  %v4387_v1 = vadd.f32 %v4371_v19, %v4323_v48  ;;  %v4688_v59 = vmul.f32 %v4661_v63, %v11687_v8  ;;  %v11692_v33 = vld [vmem:[#allocation83_spill] sm:$0xff]  ;;  %v11693_v26 = vld [vmem:[#allocation61_spill] sm:$0xff] }
 0x616   :  { %v4197_v50 = vmul.f32 %v4173_v6, %v11688_v53  ;;  %v4245_v54 = vmul.f32 %v4221_v10, %v11689_v20  ;;  %v4260_v11 = vadd.f32 %v4244_v36, %v4196_v0  ;;  %v4641_v29 = vadd.f32 %v4625_v42, %v4577_v47  ;;  %v11694_v6 = vld [vmem:[#allocation101_spill] sm:$0xff]  ;;  %v11695_v10 = vld [vmem:[#allocation136_spill] sm:$0xff] }
 0x617   :  { %v4434_v56 = vmul.f32 %v4409_v13, %v11690_v22  ;;  %v4435_v24 = vmul.f32 %v4409_v13, %v11691_v21  ;;  %v4473_v3 = vrot.slane %v9646_v44, %v7870_v49  ;;  %v4689_v58 = vmul.f32 %v4661_v63, %v11692_v33  ;;  %v11696_v13 = vld [vmem:[#allocation115_spill] sm:$0xff]  ;;  %v11697_v53 = vld [vmem:[#allocation153_spill] sm:$0xff]  ;;  %v11698_v21 = vld [vmem:[#allocation88_spill] sm:$0xff] }
 0x618   :  { %v4704_v46 = vadd.f32 %v4688_v59, %v4640_v25  ;;  %v4308_v48 = vmul.f32 %v4285_v7, %v11693_v26  ;;  %v4349_v51 = vrot.slane %v9682_v4, %v11373_v60  ;;  %v4752_v19 = vmul.f32 %v4725_v2, %v11694_v6  ;;  %v11699_v26 = vld [vmem:[#allocation90_spill] sm:$0xff] }
 0x619   :  { %v4753_v0 = vmul.f32 %v4725_v2, %v11695_v10  ;;  %v4450_v36 = vadd.f32 %v4434_v56, %v4386_v55  ;;  %v4451_v47 = vadd.f32 %v4435_v24, %v4387_v1  ;;  %v4816_v8 = vmul.f32 %v4789_v40, %v11696_v13  ;;  %v11700_v1 = vld [vmem:[#allocation30_spill] sm:$0xff]  ;;  %v11702_v13 = vld [vmem:[#allocation84_spill] sm:$0xff] }
 0x61a   :  { %v4817_v20 = vmul.f32 %v4789_v40, %v11697_v53  ;;  %v4261_v22 = vadd.f32 %v4245_v54, %v4197_v50  ;;  %v4324_v63 = vadd.f32 %v4308_v48, %v4260_v11  ;;  %v4705_v59 = vadd.f32 %v4689_v58, %v4641_v29  ;;  %v11701_v6 = vld [vmem:[#allocation70_spill] sm:$0xff] }
 0x61b   :  { %v4498_v33 = vmul.f32 %v4473_v3, %v11698_v21  ;;  %v4499_v32 = vmul.f32 %v4473_v3, %v11699_v26  ;;  %v4537_v2 = vrot.slane %v9646_v44, %v7876_v57  ;;  %v4768_v24 = vadd.f32 %v4752_v19, %v4704_v46  ;;  %v11703_v21 = vld [vmem:[#allocation106_spill] sm:$0xff] }
 0x61c   :  { %v4309_v56 = vmul.f32 %v4285_v7, %v11700_v1  ;;  %v4372_v10 = vmul.f32 %v4349_v51, %v11701_v6  ;;  %v4413_v40 = vrot.slane %v9682_v4, %v7863_v14  ;;  %v4853_v58 = vrot.slane %v9643_v17, %v11373_v60 }
 0x61d   :  { %v9778_v54 = vrot.slane %v9643_v17, %v7863_v14  ;;  %v4514_v11 = vadd.f32 %v4498_v33, %v4450_v36  ;;  %v4515_v29 = vadd.f32 %v4499_v32, %v4451_v47  ;;  %v9781_v46 = vunpack.c.h.bf16 %v9572_v23  ;;  %v11704_v36 = vld [vmem:[#allocation72_spill] sm:$0xff]  ;;  %v11705_v47 = vld [vmem:[#allocation79_spill] sm:$0xff] }
 0x61e   :  { %v9785_v7 = vrot.slane %v9643_v17, %v7870_v49  ;;  %v4325_v3 = vadd.f32 %v4309_v56, %v4261_v22  ;;  %v4388_v48 = vadd.f32 %v4372_v10, %v4324_v63  ;;  %v4769_v19 = vadd.f32 %v4753_v0, %v4705_v59  ;;  %v11707_v22 = vld [vmem:[#allocation164_spill] sm:$0xff]  ;;  %v11708_v56 = vld [vmem:[#allocation147_spill] sm:$0xff] }
 0x61f   :  { %v4562_v53 = vmul.f32 %v4537_v2, %v11702_v13  ;;  %v4563_v26 = vmul.f32 %v4537_v2, %v11703_v21  ;;  %v4601_v1 = vrot.slane %v9646_v44, %v7881_v41  ;;  %v4832_v6 = vadd.f32 %v4816_v8, %v4768_v24  ;;  %v11709_v10 = vld [vmem:[#allocation100_spill] sm:$0xff]  ;;  %v11710_v21 = vld [vmem:[#allocation121_spill] sm:$0xff] }
 0x620   :  { %v4373_v32 = vmul.f32 %v4349_v51, %v11704_v36  ;;  %v4436_v23 = vmul.f32 %v4413_v40, %v11705_v47  ;;  %v4477_v33 = vrot.slane %v9682_v4, %v7870_v49  ;;  %v4880_v31 = vmul.f32 %v4853_v58, %v11706_v43 }
 0x621   :  { %v4881_v63 = vmul.f32 %v4853_v58, %v11707_v22  ;;  %v4578_v0 = vadd.f32 %v4562_v53, %v4514_v11  ;;  %v4579_v59 = vadd.f32 %v4563_v26, %v4515_v29  ;;  %v9799_v2 = vmul.f32 %v9778_v54, %v11708_v56  ;;  %v11711_v11 = vld [vmem:[#allocation81_spill] sm:$0xff]  ;;  %v11712_v53 = vld [vmem:[#allocation71_spill] sm:$0xff] }
 0x622   :  { %v4665_v44 = vrot.slane %v9781_v46, %v11370_v9  ;;  %v4389_v8 = vadd.f32 %v4373_v32, %v4325_v3  ;;  %v4452_v51 = vadd.f32 %v4436_v23, %v4388_v48  ;;  %v4833_v24 = vadd.f32 %v4817_v20, %v4769_v19 }
 0x623   :  { %v4626_v13 = vmul.f32 %v4601_v1, %v11709_v10  ;;  %v4627_v36 = vmul.f32 %v4601_v1, %v11710_v21  ;;  %v4729_v43 = vrot.slane %v9781_v46, %v11371_v28  ;;  %v4896_v58 = vadd.f32 %v4880_v31, %v4832_v6  ;;  %v11713_v31 = vld [vmem:[#allocation125_spill] sm:$0xff]  ;;  %v11714_v21 = vld [vmem:[#allocation135_spill] sm:$0xff] }
 0x624   :  { %v4437_v29 = vmul.f32 %v4413_v40, %v11711_v11  ;;  %v4500_v26 = vmul.f32 %v4477_v33, %v11712_v53  ;;  %v4541_v47 = vrot.slane %v9682_v4, %v7876_v57  ;;  %v9812_v22 = vunpack.c.h.bf16 %v9570_v16  ;;  %v11715_v16 = vld [vmem:[#allocation158_spill] sm:$0xff] }
 0x625   :  { %v4642_v20 = vadd.f32 %v4626_v13, %v4578_v0  ;;  %v4643_v48 = vadd.f32 %v4627_v36, %v4579_v59  ;;  %v4793_v19 = vrot.slane %v9781_v46, %v11372_v39  ;;  %v4690_v6 = vmul.f32 %v4665_v44, %v11713_v31  ;;  %v9826_v59 = vld [vmem:[%s10410_s8] ss:$0 sm:$0xff]  ;;  %v11716_v13 = vld [vmem:[#allocation99_spill] sm:$0xff]  ;;  %v11717_v36 = vld [vmem:[#allocation86_spill] sm:$0xff] }
 0x626   :  { %v4453_v40 = vadd.f32 %v4437_v29, %v4389_v8  ;;  %v4516_v23 = vadd.f32 %v4500_v26, %v4452_v51  ;;  %v4691_v11 = vmul.f32 %v4665_v44, %v11714_v21  ;;  %v4754_v53 = vmul.f32 %v4729_v43, %v11715_v16 }
 0x627   :  { %v4605_v0 = vrot.slane %v9682_v4, %v7881_v41  ;;  %v4564_v29 = vmul.f32 %v4541_v47, %v11717_v36  ;;  %v11720_v36 = vld [vmem:[#allocation102_spill] sm:$0xff] }
 0x628   :  { %v4707_v4 = vadd.f32 %v4691_v11, %v4643_v48 }
 0x629   :  { %v4580_v16 = vadd.f32 %v4564_v29, %v4516_v23  ;;  %v11724_v29 = vld [vmem:[#allocation128_spill] sm:$0xff] }
 0x633   :  { %v9756_v42 = vpop.f32.mrb[28].mxu0 }
 0x634   :  { %v9760_v25 = vpop.f32.mrb[29].mxu0 }
 0x635   :  { %v9766_v55 = vpop.f32.mrb[30].mxu0 }
 0x636   :  { %v9772_v50 = vpop.f32.mrb[31].mxu0 }
 0x640   :  { %v6206_v3 = vpop.f32.mrb[8].mxu1 }
 0x641   :  { %v3993_v1 = vadd.f32 %v6206_v3, %v9587_v12  ;;  %v3984_v32 = vpop.f32.mrb[9].mxu1  ;;  %v4706_v3 = vadd.f32 %v4690_v6, %v4642_v20 }
 0x642   :  { %v3985_v56 = vadd.f32 %v3984_v32, %v9595_v37  ;;  %v6207_v10 = vpop.f32.mrb[10].mxu1  ;;  %v4501_v37 = vmul.f32 %v4477_v33, %v11716_v13  ;;  %v4565_v33 = vmul.f32 %v4541_v47, %v11719_v45  ;;  %v4857_v47 = vrot.slane %v9781_v46, %v11373_v60 }
 0x643   :  { %v4032_v12 = vadd.f32 %v9826_v59, %v3993_v1  ;;  %v3996_v8 = vadd.f32 %v6207_v10, %v9597_v62  ;;  %v3987_v51 = vpop.f32.mrb[11].mxu1  ;;  %v11718_v62 = vld [vmem:[#allocation160_spill] sm:$0xff]  ;;  %v4770_v48 = vadd.f32 %v4754_v53, %v4706_v3 }
 0x644   :  { %v4030_v44 = vadd.f32 %v9826_v59, %v3985_v56  ;;  %v3988_v26 = vadd.f32 %v3987_v51, %v9602_v15  ;;  %v4517_v21 = vadd.f32 %v4501_v37, %v4453_v40  ;;  %v4755_v10 = vmul.f32 %v4729_v43, %v11718_v62  ;;  %v11723_v51 = vld [vmem:[#allocation175_spill] sm:$0xff]  ;;  %v11728_v62 = vld [vmem:[#allocation166_spill] sm:$0xff] }
 0x645   :  { %v5999_v32 = vmul.f32 -1.442695, %v4032_v12  ;;  %v4033_v31 = vadd.f32 %v9826_v59, %v3996_v8  ;;  %v4628_v56 = vmul.f32 %v4605_v0, %v11720_v36  ;;  %v4669_v15 = vrot.slane %v9812_v22, %v11370_v9  ;;  %v11721_v12 = vld [vmem:[#allocation179_spill] sm:$0xff]  ;;  %v11722_v8 = vld [vmem:[#allocation181_spill] sm:$0xff] }
 0x646   :  { %v5997_v5 = vmul.f32 -1.442695, %v4030_v44  ;;  %v4031_v1 = vadd.f32 %v9826_v59, %v3988_v26  ;;  %v4771_v6 = vadd.f32 %v4755_v10, %v4707_v4  ;;  %v4897_v40 = vadd.f32 %v4881_v63, %v4833_v24  ;;  %v11725_v44 = vld [vmem:[#allocation127_spill] sm:$0xff] }
 0x647   :  { %6610 = vpow2.f32 %v5999_v32  ;;  %v6000_v13 = vmul.f32 -1.442695, %v4033_v31  ;;  %v4581_v23 = vadd.f32 %v4565_v33, %v4517_v21  ;;  %v4644_v11 = vadd.f32 %v4628_v56, %v4580_v16  ;;  %v11726_v21 = vld [vmem:[#allocation172_spill] sm:$0xff] }
 0x648   :  { %6612 = vpow2.f32 %v5997_v5  ;;  %v5998_v20 = vmul.f32 -1.442695, %v4031_v1  ;;  %v4818_v43 = vmul.f32 %v4793_v19, %v11721_v12  ;;  %v4819_v45 = vmul.f32 %v4793_v19, %v11722_v8  ;;  %v11727_v16 = vld [vmem:[#allocation204_spill] sm:$0xff] }
 0x649   :  { %6614 = vpow2.f32 %v6000_v13  ;;  %v4945_v37 = vmul.f32 %v9778_v54, %v11723_v51  ;;  %v4629_v5 = vmul.f32 %v4605_v0, %v11724_v29  ;;  %v4692_v53 = vmul.f32 %v4669_v15, %v11725_v44  ;;  %v11731_v13 = vld [vmem:[#allocation170_spill] sm:$0xff]  ;;  %v11735_v44 = vld [vmem:[#allocation155_spill] sm:$0xff] }
 0x64a   :  { %6616 = vpow2.f32 %v5998_v20  ;;  %v4733_v63 = vrot.slane %v9812_v22, %v11371_v28  ;;  %v5022_v24 = vadd.f32 %v9689_v52, %v9722_v35  ;;  %v5023_v26 = vadd.f32 %v9692_v18, %v9734_v38  ;;  %v11729_v35 = vld [vmem:[#allocation174_spill] sm:$0xff]  ;;  %v11730_v38 = vld [vmem:[#allocation143_spill] sm:$0xff] }
 0x64b   :  { %v4834_v19 = vadd.f32 %v4818_v43, %v4770_v48  ;;  %v4835_v3 = vadd.f32 %v4819_v45, %v4771_v6  ;;  %v4960_v4 = vadd.f32 %v9799_v2, %v4896_v58  ;;  %v4961_v32 = vadd.f32 %v4945_v37, %v4897_v40  ;;  %v11733_v45 = vld [vmem:[#allocation216_spill] sm:$0xff]  ;;  %v11734_v29 = vld [vmem:[#allocation138_spill] sm:$0xff] }
 0x64c   :  { %v4645_v31 = vadd.f32 %v4629_v5, %v4581_v23  ;;  %v4708_v54 = vadd.f32 %v4692_v53, %v4644_v11  ;;  %v5008_v0 = vmul.f32 %v9785_v7, %v11726_v21  ;;  %v4882_v1 = vmul.f32 %v4857_v47, %v11727_v16 }
 0x64d   :  { %v4883_v10 = vmul.f32 %v4857_v47, %v11728_v62  ;;  %v4921_v52 = vrot.slane %v9781_v46, %v7863_v14  ;;  %v5009_v18 = vmul.f32 %v9785_v7, %v11729_v35  ;;  %v4693_v33 = vmul.f32 %v4669_v15, %v11730_v38  ;;  %v11732_v15 = vld [vmem:[#allocation177_spill] sm:$0xff] }
 0x64e   :  { %v4756_v2 = vmul.f32 %v4733_v63, %v11731_v13  ;;  %v4797_v58 = vrot.slane %v9812_v22, %v11372_v39  ;;  %v5086_v36 = vadd.f32 %v9697_v34, %v5022_v24  ;;  %v5045_v56 = vrot.slane %v9643_v17, %v7876_v57  ;;  %v11739_v35 = vld [vmem:[#allocation209_spill] sm:$0xff] }
 0x64f   :  { %v4898_v20 = vadd.f32 %v4882_v1, %v4834_v19  ;;  %v4899_v48 = vadd.f32 %v4883_v10, %v4835_v3  ;;  %v5024_v40 = vadd.f32 %v5008_v0, %v4960_v4  ;;  %v5025_v23 = vadd.f32 %v5009_v18, %v4961_v32  ;;  %v11736_v0 = vld [vmem:[#allocation194_spill] sm:$0xff]  ;;  %v11737_v1 = vld [vmem:[#allocation223_spill] sm:$0xff] }
 0x650   :  { %v4709_v11 = vadd.f32 %v4693_v33, %v4645_v31  ;;  %v4772_v12 = vadd.f32 %v4756_v2, %v4708_v54  ;;  %v4946_v8 = vmul.f32 %v4921_v52, %v11732_v15  ;;  %v4947_v47 = vmul.f32 %v4921_v52, %v11733_v45  ;;  %v11738_v10 = vld [vmem:[#allocation195_spill] sm:$0xff]  ;;  %v11740_v33 = vld [vmem:[#allocation197_spill] sm:$0xff]  ;;  %v11743_v45 = vld [vmem:[#allocation230_spill] sm:$0xff] }
 0x651   :  { %v6611_v6 = vpop.eup %6610  ;;  %v4985_v51 = vrot.slane %v9781_v46, %v7870_v49  ;;  %v4757_v5 = vmul.f32 %v4733_v63, %v11734_v29  ;;  %v4820_v53 = vmul.f32 %v4797_v58, %v11735_v44  ;;  %v4861_v24 = vrot.slane %v9812_v22, %v11373_v60  ;;  %v11747_v44 = vld [vmem:[#allocation114_spill] sm:$0xff] }
 0x652   :  { %v6613_v7 = vpop.eup %6612  ;;  %v4096_v43 = vadd.f32 1.0, %v6611_v6  ;;  %v4962_v4 = vadd.f32 %v4946_v8, %v4898_v20  ;;  %v4963_v32 = vadd.f32 %v4947_v47, %v4899_v48  ;;  %v5049_v63 = vrot.slane %v9781_v46, %v7876_v57 }
 0x653   :  { %v6615_v34 = vpop.eup %6614  ;;  %v4094_v37 = vadd.f32 1.0, %v6613_v7  ;;  %v4773_v54 = vadd.f32 %v4757_v5, %v4709_v11  ;;  %v4836_v21 = vadd.f32 %v4820_v53, %v4772_v12  ;;  %v5010_v16 = vmul.f32 %v4985_v51, %v11736_v0  ;;  %v11741_v11 = vld [vmem:[#allocation211_spill] sm:$0xff] }
 0x654   :  { %v6617_v19 = vpop.eup %6616  ;;  %6618 = vrcp.f32 %v4096_v43  ;;  %v4097_v3 = vadd.f32 1.0, %v6615_v34  ;;  %v5011_v62 = vmul.f32 %v4985_v51, %v11737_v1  ;;  %v4821_v52 = vmul.f32 %v4797_v58, %v11738_v10  ;;  %v11742_v58 = vld [vmem:[#allocation234_spill] sm:$0xff] }
 0x655   :  { %6620 = vrcp.f32 %v4094_v37  ;;  %v4095_v31 = vadd.f32 1.0, %v6617_v19  ;;  %v4884_v18 = vmul.f32 %v4861_v24, %v11739_v35  ;;  %v4925_v38 = vrot.slane %v9812_v22, %v7863_v14  ;;  %v11744_v37 = vld [vmem:[#allocation210_spill] sm:$0xff] }
 0x656   :  { %6622 = vrcp.f32 %v4097_v3  ;;  %v5072_v13 = vmul.f32 %v5045_v56, %v11740_v33  ;;  %v5109_v2 = vrot.slane %v9643_v17, %v7881_v41  ;;  %v5026_v20 = vadd.f32 %v5010_v16, %v4962_v4  ;;  %v11745_v17 = vld [vmem:[#allocation180_spill] sm:$0xff] }
 0x657   :  { %6624 = vrcp.f32 %v4095_v31  ;;  %v5027_v48 = vadd.f32 %v5011_v62, %v4963_v32  ;;  %v5087_v6 = vadd.f32 %v9716_v61, %v5023_v26  ;;  %v5073_v12 = vmul.f32 %v5045_v56, %v11741_v11  ;;  %v11746_v26 = vld [vmem:[#allocation207_spill] sm:$0xff]  ;;  %v11748_v4 = vld [vmem:[#allocation212_spill] sm:$0xff] }
 0x658   :  { %v4837_v7 = vadd.f32 %v4821_v52, %v4773_v54  ;;  %v4900_v43 = vadd.f32 %v4884_v18, %v4836_v21  ;;  %v5088_v15 = vadd.f32 %v5072_v13, %v5024_v40  ;;  %v5074_v8 = vmul.f32 %v5049_v63, %v11742_v58  ;;  %v11749_v21 = vld [vmem:[#allocation116_spill] sm:$0xff]  ;;  %v11754_v58 = vld [vmem:[#allocation238_spill] sm:$0xff] }
 0x659   :  { %v5075_v47 = vmul.f32 %v5049_v63, %v11743_v45  ;;  %v5113_v51 = vrot.slane %v9781_v46, %v7881_v41  ;;  %v5089_v34 = vadd.f32 %v5073_v12, %v5025_v23  ;;  %v4885_v29 = vmul.f32 %v4861_v24, %v11744_v37  ;;  %v11750_v16 = vld [vmem:[#allocation236_spill] sm:$0xff] }
 0x65a   :  { %v4948_v5 = vmul.f32 %v4925_v38, %v11745_v17  ;;  %v4989_v61 = vrot.slane %v9812_v22, %v7870_v49  ;;  %v5135_v56 = vmul.f32 %v9701_v30, %v11746_v26  ;;  %v5136_v40 = vmul.f32 %v5109_v2, %v11747_v44  ;;  %v11751_v63 = vld [vmem:[#allocation220_spill] sm:$0xff] }
 0x65b   :  { %v5090_v53 = vadd.f32 %v5074_v8, %v5026_v20  ;;  %v5091_v19 = vadd.f32 %v5075_v47, %v5027_v48  ;;  %v9904_v3 = vadd.f32 %v9720_v27, %v5086_v36  ;;  %v5137_v46 = vmul.f32 %v5109_v2, %v11748_v4  ;;  %v11752_v27 = vld [vmem:[#allocation196_spill] sm:$0xff] }
 0x65c   :  { %v4901_v23 = vadd.f32 %v4885_v29, %v4837_v7  ;;  %v4964_v32 = vadd.f32 %v4948_v5, %v4900_v43  ;;  %v9907_v31 = vadd.f32 %v5135_v56, %v5087_v6  ;;  %v9909_v54 = vadd.f32 %v5136_v40, %v5088_v15  ;;  %v11753_v43 = vld [vmem:[#allocation227_spill] sm:$0xff]  ;;  %v11755_v47 = vld [vmem:[#allocation232_spill] sm:$0xff] }
 0x65d   :  { %v5138_v0 = vmul.f32 %v5113_v51, %v11749_v21  ;;  %v5139_v30 = vmul.f32 %v5113_v51, %v11750_v16  ;;  %v9913_v62 = vadd.f32 %v5137_v46, %v5089_v34  ;;  %v4949_v10 = vmul.f32 %v4925_v38, %v11751_v63  ;;  %v11756_v34 = vld [vmem:[#allocation118_spill] sm:$0xff]  ;;  %v11759_v21 = vld [vmem:[#allocation85_spill] sm:$0xff]  ;;  %v11760_v16 = vld [vmem:[#allocation87_spill] sm:$0xff] }
 0x65e   :  { %v6619_v24 = vpop.eup %6618  ;;  %v5012_v36 = vmul.f32 %v4989_v61, %v11752_v27  ;;  %v5053_v52 = vrot.slane %v9812_v22, %v7876_v57  ;;  %v5117_v13 = vrot.slane %v9812_v22, %v7881_v41  ;;  %v5166_v38 = vpack.c.bf16 %v9907_v31, %v9904_v3  ;;  %v11821_v31 = vld [vmem:[#allocation152_spill] sm:$0xff] }
 0x65f   :  { %v6621_v1 = vpop.eup %6620  ;;  %v9919_v18 = vadd.f32 %v5138_v0, %v5090_v53  ;;  %v9921_v33 = vadd.f32 %v5139_v30, %v5091_v19  ;;  %v4965_v48 = vadd.f32 %v4949_v10, %v4901_v23  ;;  %v5167_v7 = vpack.c.bf16 %v9913_v62, %v9909_v54 }
 0x660   :  { %v6623_v35 = vpop.eup %6622  ;;  %v5028_v6 = vadd.f32 %v5012_v36, %v4964_v32  ;;  %v5013_v15 = vmul.f32 %v4989_v61, %v11753_v43  ;;  %v5076_v8 = vmul.f32 %v5053_v52, %v11754_v58  ;;  %v9937_v51 = vmul.f32 %v5053_v52, %v11755_v47  ;;  %v11757_v61 = vld [vmem:[#allocation240_spill] sm:$0xff] }
 0x661   :  { %v6625_v2 = vpop.eup %6624  ;;  %v4139_v20 = vpack.c.bf16 %v6623_v35, %v6619_v24  ;;  %v5168_v22 = vpack.c.bf16 %v9921_v33, %v9919_v18  ;;  %v9940_v37 = vmul.f32 %v5117_v13, %v11756_v34  ;;  %v9950_v26 = vmul.f32 %v5117_v13, %v11757_v61  ;;  %v11758_v32 = vld [vmem:[#allocation32_spill] sm:$0xff]  ;;  %v11833_v33 = vld [vmem:[#allocation77_spill] sm:$0xff] }
 0x662   :  { %v4138_v11 = vpack.c.bf16 %v6625_v2, %v6621_v1  ;;  %v9945_v17 = vadd.f32 %v5013_v15, %v4965_v48  ;;  %v9947_v5 = vadd.f32 %v5076_v8, %v5028_v6  ;;  %v11761_v1 = vld [vmem:[#allocation34_spill] sm:$0xff]  ;;  %v11762_v2 = vld [vmem:[#allocation103_spill] sm:$0xff]  ;;  %v11763_v48 = vld [vmem:[#allocation104_spill] sm:$0xff] }
 0x663   :  { %v9927_v12 = vunpack.c.l.bf16 %v4139_v20  ;;  %v9942_v29 = vunpack.c.h.bf16 %v4139_v20  ;;  %v11765_v15 = vld [vmem:[#allocation119_spill] sm:$0xff] }
 0x664   :  { %v4150_v45 = vunpack.c.l.bf16 %v4138_v11  ;;  %6224 = vmatprep.mubr.msk.bf16.mxu1 %vm3760_vm2, %v4138_v11  ;;  %v9952_v56 = vunpack.c.h.bf16 %v4138_v11  ;;  %v11764_v11 = vld [vmem:[#allocation117_spill] sm:$0xff]  ;;  %v11766_v8 = vld [vmem:[#allocation131_spill] sm:$0xff] }
 0x665   :  { %6225 = vmatmul.mubr.msk.bf16.gmra.mrb[24].mxu1 %vm3760_vm2, %v4139_v20  ;;  %v9962_v23 = vrot.slane %v9927_v12, %v11370_v9  ;;  %v9972_v36 = vrot.slane %v9927_v12, %v11371_v28  ;;  %v9976_v52 = vrot.slane %v9927_v12, %v11372_v39  ;;  %v9985_v47 = vrot.slane %v9927_v12, %v11373_v60 }
 0x666   :  { %v4177_v44 = vrot.slane %v4150_v45, %v11370_v9  ;;  %v4225_v40 = vrot.slane %v4150_v45, %v11371_v28  ;;  %v4289_v53 = vrot.slane %v4150_v45, %v11372_v39  ;;  %v4353_v19 = vrot.slane %v4150_v45, %v11373_v60 }
 0x667   :  { %v4417_v4 = vrot.slane %v4150_v45, %v7863_v14  ;;  %v4481_v46 = vrot.slane %v4150_v45, %v7870_v49  ;;  %v4545_v10 = vrot.slane %v4150_v45, %v7876_v57  ;;  %v4609_v27 = vrot.slane %v4150_v45, %v7881_v41 }
 0x668   :  { %v4198_v24 = vmul.f32 %v4177_v44, %v11758_v32  ;;  %v4199_v0 = vmul.f32 %v4177_v44, %v11759_v21  ;;  %v4246_v30 = vmul.f32 %v4225_v40, %v11760_v16  ;;  %v4247_v63 = vmul.f32 %v4225_v40, %v11761_v1  ;;  %v11767_v40 = vld [vmem:[#allocation133_spill] sm:$0xff]  ;;  %v11770_v1 = vld [vmem:[#allocation178_spill] sm:$0xff] }
 0x669   :  { %v4310_v20 = vmul.f32 %v4289_v53, %v11762_v2  ;;  %v4311_v6 = vmul.f32 %v4289_v53, %v11763_v48  ;;  %v4374_v43 = vmul.f32 %v4353_v19, %v11764_v11  ;;  %v4375_v58 = vmul.f32 %v4353_v19, %v11765_v15  ;;  %v11769_v16 = vld [vmem:[#allocation73_spill] sm:$0xff] }
 0x66a   :  { %v4262_v35 = vadd.f32 %v4246_v30, %v4198_v24  ;;  %v4263_v13 = vadd.f32 %v4247_v63, %v4199_v0  ;;  %v4438_v45 = vmul.f32 %v4417_v4, %v11766_v8  ;;  %v6210_v34 = vpop.f32.mrb[12].mxu1  ;;  %v4439_v32 = vmul.f32 %v4417_v4, %v11767_v40  ;;  %v11768_v24 = vld [vmem:[#allocation156_spill] sm:$0xff]  ;;  %v11771_v63 = vld [vmem:[#allocation89_spill] sm:$0xff] }
 0x66b   :  { %v4502_v21 = vmul.f32 %v4481_v46, %v11768_v24  ;;  %v4009_v0 = vadd.f32 %v6210_v34, %v9756_v42  ;;  %v4000_v53 = vpop.f32.mrb[13].mxu1  ;;  %v4503_v30 = vmul.f32 %v4481_v46, %v11769_v16  ;;  %v4566_v19 = vmul.f32 %v4545_v10, %v11770_v1  ;;  %v11773_v42 = vld [vmem:[#allocation202_spill] sm:$0xff] }
 0x66c   :  { %v4326_v61 = vadd.f32 %v4310_v20, %v4262_v35  ;;  %v4327_v44 = vadd.f32 %v4311_v6, %v4263_v13  ;;  %v4567_v2 = vmul.f32 %v4545_v10, %v11771_v63  ;;  %v4001_v48 = vadd.f32 %v4000_v53, %v9760_v25  ;;  %v6211_v11 = vpop.f32.mrb[14].mxu1  ;;  %v11772_v35 = vld [vmem:[#allocation105_spill] sm:$0xff]  ;;  %v11774_v1 = vld [vmem:[#allocation214_spill] sm:$0xff] }
 0x66d   :  { %v4630_v13 = vmul.f32 %v4609_v27, %v11772_v35  ;;  %v4036_v4 = vadd.f32 %v9826_v59, %v4009_v0  ;;  %v4012_v20 = vadd.f32 %v6211_v11, %v9766_v55  ;;  %v4003_v6 = vpop.f32.mrb[15].mxu1  ;;  %v4631_v34 = vmul.f32 %v4609_v27, %v11773_v42  ;;  %v11775_v11 = vld [vmem:[#allocation215_spill] sm:$0xff]  ;;  %v11778_v42 = vld [vmem:[#allocation145_spill] sm:$0xff] }
 0x66e   :  { %v4390_v15 = vadd.f32 %v4374_v43, %v4326_v61  ;;  %v4391_v8 = vadd.f32 %v4375_v58, %v4327_v44  ;;  %v4673_v46 = vrot.slane %v9952_v56, %v11370_v9  ;;  %v4034_v40 = vadd.f32 %v9826_v59, %v4001_v48 }
 0x66f   :  { %v4004_v10 = vadd.f32 %v4003_v6, %v9772_v50  ;;  %v6003_v43 = vmul.f32 -1.442695, %v4036_v4  ;;  %v4037_v58 = vadd.f32 %v9826_v59, %v4012_v20  ;;  %v4737_v61 = vrot.slane %v9952_v56, %v11371_v28  ;;  %v11777_v20 = vld [vmem:[#allocation222_spill] sm:$0xff] }
 0x670   :  { %v4454_v25 = vadd.f32 %v4438_v45, %v4390_v15  ;;  %v4455_v24 = vadd.f32 %v4439_v32, %v4391_v8  ;;  %v4801_v55 = vrot.slane %v9952_v56, %v11372_v39  ;;  %v6001_v44 = vmul.f32 -1.442695, %v4034_v40  ;;  %v11776_v8 = vld [vmem:[#allocation15_spill] sm:$0xff] }
 0x671   :  { %v4035_v27 = vadd.f32 %v9826_v59, %v4004_v10  ;;  %6626 = vpow2.f32 %v6003_v43  ;;  %v6004_v16 = vmul.f32 -1.442695, %v4037_v58  ;;  %v4694_v50 = vmul.f32 %v4673_v46, %v11774_v1  ;;  %v11780_v10 = vld [vmem:[#allocation149_spill] sm:$0xff]  ;;  %v11781_v43 = vld [vmem:[#allocation235_spill] sm:$0xff] }
 0x672   :  { %v4518_v0 = vadd.f32 %v4502_v21, %v4454_v25  ;;  %v4519_v53 = vadd.f32 %v4503_v30, %v4455_v24  ;;  %v4865_v45 = vrot.slane %v9952_v56, %v11373_v60  ;;  %6628 = vpow2.f32 %v6001_v44  ;;  %v11782_v44 = vld [vmem:[#allocation242_spill] sm:$0xff] }
 0x673   :  { %v6002_v32 = vmul.f32 -1.442695, %v4035_v27  ;;  %6630 = vpow2.f32 %v6004_v16  ;;  %v4695_v15 = vmul.f32 %v4673_v46, %v11775_v11  ;;  %v4758_v35 = vmul.f32 %v4737_v61, %v11776_v8  ;;  %v11785_v16 = vld [vmem:[#allocation267_spill] sm:$0xff]  ;;  %v11789_v8 = vld [vmem:[#allocation97_spill] sm:$0xff] }
 0x674   :  { %v4582_v63 = vadd.f32 %v4566_v19, %v4518_v0  ;;  %v4583_v48 = vadd.f32 %v4567_v2, %v4519_v53  ;;  %v4929_v59 = vrot.slane %v9952_v56, %v7863_v14  ;;  %v4993_v4 = vrot.slane %v9952_v56, %v7870_v49  ;;  %v11779_v19 = vld [vmem:[#allocation229_spill] sm:$0xff]  ;;  %v11783_v0 = vld [vmem:[#allocation243_spill] sm:$0xff] }
 0x675   :  { %6632 = vpow2.f32 %v6002_v32  ;;  %v4759_v6 = vmul.f32 %v4737_v61, %v11777_v20  ;;  %v4822_v40 = vmul.f32 %v4801_v55, %v11778_v42  ;;  %v4823_v2 = vmul.f32 %v4801_v55, %v11779_v19  ;;  %v11786_v55 = vld [vmem:[#allocation94_spill] sm:$0xff]  ;;  %v11792_v42 = vld [vmem:[#allocation124_spill] sm:$0xff] }
 0x676   :  { %v4646_v21 = vadd.f32 %v4630_v13, %v4582_v63  ;;  %v4647_v30 = vadd.f32 %v4631_v34, %v4583_v48  ;;  %v4886_v25 = vmul.f32 %v4865_v45, %v11780_v10  ;;  %v4887_v58 = vmul.f32 %v4865_v45, %v11781_v43  ;;  %v11784_v34 = vld [vmem:[#allocation263_spill] sm:$0xff]  ;;  %v11788_v45 = vld [vmem:[#allocation96_spill] sm:$0xff]  ;;  %v11793_v10 = vld [vmem:[#allocation126_spill] sm:$0xff] }
 0x677   :  { %v4950_v27 = vmul.f32 %v4929_v59, %v11782_v44  ;;  %v4951_v13 = vmul.f32 %v4929_v59, %v11783_v0  ;;  %v5014_v53 = vmul.f32 %v4993_v4, %v11784_v34  ;;  %v5015_v1 = vmul.f32 %v4993_v4, %v11785_v16  ;;  %v11791_v4 = vld [vmem:[#allocation112_spill] sm:$0xff] }
 0x678   :  { %v4710_v46 = vadd.f32 %v4694_v50, %v4646_v21  ;;  %v4711_v24 = vadd.f32 %v4695_v15, %v4647_v30  ;;  %v5057_v61 = vrot.slane %v9952_v56, %v7876_v57  ;;  %v4200_v48 = vmul.f32 %v9962_v23, %v11786_v55  ;;  %v11787_v50 = vld [vmem:[#allocation37_spill] sm:$0xff]  ;;  %v11790_v21 = vld [vmem:[#allocation110_spill] sm:$0xff]  ;;  %v11794_v55 = vld [vmem:[#allocation139_spill] sm:$0xff] }
 0x679   :  { %v4201_v11 = vmul.f32 %v9962_v23, %v11787_v50  ;;  %v4248_v15 = vmul.f32 %v9972_v36, %v11788_v45  ;;  %v4249_v59 = vmul.f32 %v9972_v36, %v11789_v8  ;;  %v4312_v30 = vmul.f32 %v9976_v52, %v11790_v21 }
 0x67a   :  { %v4774_v32 = vadd.f32 %v4758_v35, %v4710_v46  ;;  %v4775_v63 = vadd.f32 %v4759_v6, %v4711_v24  ;;  %v4313_v20 = vmul.f32 %v9976_v52, %v11791_v4  ;;  %v4376_v19 = vmul.f32 %v9985_v47, %v11792_v42  ;;  %v11795_v4 = vld [vmem:[#allocation140_spill] sm:$0xff] }
 0x67b   :  { %v4377_v23 = vmul.f32 %v9985_v47, %v11793_v10  ;;  %v6627_v46 = vpop.eup %6626  ;;  %v4264_v24 = vadd.f32 %v4248_v15, %v4200_v48  ;;  %v4265_v43 = vadd.f32 %v4249_v59, %v4201_v11  ;;  %v4421_v36 = vrot.slane %v9927_v12, %v7863_v14  ;;  %v11797_v10 = vld [vmem:[#allocation284_spill] sm:$0xff] }
 0x67c   :  { %v4838_v35 = vadd.f32 %v4822_v40, %v4774_v32  ;;  %v4839_v6 = vadd.f32 %v4823_v2, %v4775_v63  ;;  %v4485_v44 = vrot.slane %v9927_v12, %v7870_v49  ;;  %v6629_v0 = vpop.eup %6628  ;;  %v4100_v34 = vadd.f32 1.0, %v6627_v46 }
 0x67d   :  { %v4549_v2 = vrot.slane %v9927_v12, %v7876_v57  ;;  %v6631_v16 = vpop.eup %6630  ;;  %v4098_v32 = vadd.f32 1.0, %v6629_v0  ;;  %v4328_v63 = vadd.f32 %v4312_v30, %v4264_v24  ;;  %v4329_v47 = vadd.f32 %v4313_v20, %v4265_v43  ;;  %v11799_v43 = vld [vmem:[#allocation169_spill] sm:$0xff]  ;;  %v11800_v0 = vld [vmem:[#allocation188_spill] sm:$0xff] }
 0x67e   :  { %v4902_v52 = vadd.f32 %v4886_v25, %v4838_v35  ;;  %v4903_v40 = vadd.f32 %v4887_v58, %v4839_v6  ;;  %v4440_v48 = vmul.f32 %v4421_v36, %v11794_v55  ;;  %6634 = vrcp.f32 %v4100_v34  ;;  %v11796_v6 = vld [vmem:[#allocation75_spill] sm:$0xff]  ;;  %v11803_v55 = vld [vmem:[#allocation246_spill] sm:$0xff] }
 0x67f   :  { %v6633_v50 = vpop.eup %6632  ;;  %v4101_v11 = vadd.f32 1.0, %v6631_v16  ;;  %6636 = vrcp.f32 %v4098_v32  ;;  %v4392_v59 = vadd.f32 %v4376_v19, %v4328_v63  ;;  %v4393_v21 = vadd.f32 %v4377_v23, %v4329_v47  ;;  %v11802_v63 = vld [vmem:[#allocation208_spill] sm:$0xff] }
 0x680   :  { %v4966_v45 = vadd.f32 %v4950_v27, %v4902_v52  ;;  %v4967_v15 = vadd.f32 %v4951_v13, %v4903_v40  ;;  %v4099_v8 = vadd.f32 1.0, %v6633_v50  ;;  %v5121_v58 = vrot.slane %v9952_v56, %v7881_v41  ;;  %v11798_v27 = vld [vmem:[#allocation264_spill] sm:$0xff]  ;;  %v11801_v40 = vld [vmem:[#allocation191_spill] sm:$0xff] }
 0x681   :  { %6638 = vrcp.f32 %v4101_v11  ;;  %v4441_v35 = vmul.f32 %v4421_v36, %v11795_v4  ;;  %v4456_v20 = vadd.f32 %v4440_v48, %v4392_v59  ;;  %v4504_v42 = vmul.f32 %v4485_v44, %v11796_v6  ;;  %v11804_v11 = vld [vmem:[#allocation107_spill] sm:$0xff] }
 0x682   :  { %v5030_v25 = vadd.f32 %v5014_v53, %v4966_v45  ;;  %6640 = vrcp.f32 %v4099_v8  ;;  %v5031_v30 = vadd.f32 %v5015_v1, %v4967_v15  ;;  %v5078_v46 = vmul.f32 %v5057_v61, %v11797_v10 }
 0x683   :  { %v5079_v13 = vmul.f32 %v5057_v61, %v11798_v27  ;;  %v4457_v24 = vadd.f32 %v4441_v35, %v4393_v21  ;;  %v4505_v19 = vmul.f32 %v4485_v44, %v11799_v43  ;;  %v4520_v23 = vadd.f32 %v4504_v42, %v4456_v20 }
 0x684   :  { %v4568_v53 = vmul.f32 %v4549_v2, %v11800_v0  ;;  %v4613_v56 = vrot.slane %v9927_v12, %v7881_v41  ;;  %v4677_v36 = vrot.slane %v9942_v29, %v11370_v9  ;;  %v5093_v1 = vadd.f32 %v9937_v51, %v9945_v17  ;;  %v11805_v17 = vld [vmem:[#allocation262_spill] sm:$0xff] }
 0x685   :  { %v5094_v34 = vadd.f32 %v5078_v46, %v5030_v25  ;;  %v4521_v52 = vadd.f32 %v4505_v19, %v4457_v24  ;;  %v4569_v16 = vmul.f32 %v4549_v2, %v11801_v40  ;;  %v5095_v61 = vadd.f32 %v5079_v13, %v5031_v30  ;;  %v11806_v2 = vld [vmem:[#allocation218_spill] sm:$0xff] }
 0x686   :  { %v4584_v32 = vadd.f32 %v4568_v53, %v4520_v23  ;;  %v4632_v44 = vmul.f32 %v4613_v56, %v11802_v63  ;;  %v4741_v47 = vrot.slane %v9942_v29, %v11371_v28  ;;  %v10071_v12 = vadd.f32 %v9940_v37, %v9947_v5  ;;  %v11807_v5 = vld [vmem:[#allocation219_spill] sm:$0xff]  ;;  %v11809_v13 = vld [vmem:[#allocation226_spill] sm:$0xff]  ;;  %v11810_v53 = vld [vmem:[#allocation148_spill] sm:$0xff] }
 0x687   :  { %v5142_v48 = vmul.f32 %v5121_v58, %v11803_v55  ;;  %v4585_v50 = vadd.f32 %v4569_v16, %v4521_v52  ;;  %v4633_v51 = vmul.f32 %v4613_v56, %v11804_v11  ;;  %v5143_v45 = vmul.f32 %v5121_v58, %v11805_v17  ;;  %v11808_v58 = vld [vmem:[#allocation225_spill] sm:$0xff]  ;;  %v11811_v40 = vld [vmem:[#allocation146_spill] sm:$0xff]  ;;  %v11812_v63 = vld [vmem:[#allocation16_spill] sm:$0xff] }
 0x688   :  { %v4648_v15 = vadd.f32 %v4632_v44, %v4584_v32  ;;  %v4696_v8 = vmul.f32 %v4677_v36, %v11806_v2  ;;  %v4805_v59 = vrot.slane %v9942_v29, %v11372_v39  ;;  %v6635_v21 = vpop.eup %6634  ;;  %v10080_v25 = vadd.f32 %v9950_v26, %v5093_v1  ;;  %v11814_v11 = vld [vmem:[#allocation182_spill] sm:$0xff]  ;;  %v11815_v17 = vld [vmem:[#allocation245_spill] sm:$0xff] }
 0x689   :  { %v10082_v4 = vadd.f32 %v5142_v48, %v5094_v34  ;;  %v4649_v37 = vadd.f32 %v4633_v51, %v4585_v50  ;;  %v4697_v35 = vmul.f32 %v4677_v36, %v11807_v5  ;;  %v6637_v30 = vpop.eup %6636  ;;  %v10085_v20 = vadd.f32 %v5143_v45, %v5095_v61  ;;  %v11816_v2 = vld [vmem:[#allocation198_spill] sm:$0xff] }
 0x68a   :  { %v4712_v6 = vadd.f32 %v4696_v8, %v4648_v15  ;;  %v4760_v42 = vmul.f32 %v4741_v47, %v11808_v58  ;;  %v4869_v10 = vrot.slane %v9942_v29, %v11373_v60  ;;  %v4761_v24 = vmul.f32 %v4741_v47, %v11809_v13  ;;  %v11813_v47 = vld [vmem:[#allocation239_spill] sm:$0xff] }
 0x68b   :  { %v6639_v46 = vpop.eup %6638  ;;  %v4713_v27 = vadd.f32 %v4697_v35, %v4649_v37  ;;  %v4933_v26 = vrot.slane %v9942_v29, %v7863_v14  ;;  %v4997_v43 = vrot.slane %v9942_v29, %v7870_v49  ;;  %v4824_v56 = vmul.f32 %v4805_v59, %v11810_v53  ;;  %v11818_v37 = vld [vmem:[#allocation252_spill] sm:$0xff] }
 0x68c   :  { %v6641_v19 = vpop.eup %6640  ;;  %v4141_v23 = vpack.c.bf16 %v6639_v46, %v6635_v21  ;;  %v4776_v0 = vadd.f32 %v4760_v42, %v4712_v6  ;;  %v5061_v36 = vrot.slane %v9942_v29, %v7876_v57  ;;  %v5169_v34 = vpack.c.bf16 %v10080_v25, %v10071_v12 }
 0x68d   :  { %v4140_v1 = vpack.c.bf16 %v6641_v19, %v6637_v30  ;;  %v4777_v52 = vadd.f32 %v4761_v24, %v4713_v27  ;;  %v4825_v16 = vmul.f32 %v4805_v59, %v11811_v40  ;;  %v5170_v61 = vpack.c.bf16 %v10085_v20, %v10082_v4  ;;  %v11817_v59 = vld [vmem:[#allocation281_spill] sm:$0xff] }
 0x68e   :  { %v4840_v32 = vadd.f32 %v4824_v56, %v4776_v0  ;;  %v4888_v44 = vmul.f32 %v4869_v10, %v11812_v63  ;;  %v4889_v55 = vmul.f32 %v4869_v10, %v11813_v47  ;;  %v4952_v51 = vmul.f32 %v4933_v26, %v11814_v11  ;;  %v11819_v10 = vld [vmem:[#allocation265_spill] sm:$0xff]  ;;  %v11825_v47 = vld [vmem:[#allocation256_spill] sm:$0xff] }
 0x68f   :  { %v4154_v48 = vunpack.c.l.bf16 %v4140_v1  ;;  %6228 = vmatprep.mubr.msk.bf16.mxu1 %vm3760_vm2, %v4140_v1  ;;  %v4841_v50 = vadd.f32 %v4825_v16, %v4777_v52  ;;  %v4953_v45 = vmul.f32 %v4933_v26, %v11815_v17  ;;  %v5016_v8 = vmul.f32 %v4997_v43, %v11816_v2  ;;  %v11820_v26 = vld [vmem:[#allocation151_spill] sm:$0xff]  ;;  %v11823_v52 = vld [vmem:[#allocation154_spill] sm:$0xff]  ;;  %v11826_v11 = vld [vmem:[#allocation176_spill] sm:$0xff] }
 0x690   :  { %6229 = vmatmul.mubr.msk.bf16.gmra.mrb[28].mxu1 %vm3760_vm2, %v4141_v23  ;;  %v4904_v15 = vadd.f32 %v4888_v44, %v4840_v32  ;;  %v5017_v21 = vmul.f32 %v4997_v43, %v11817_v59  ;;  %v5080_v5 = vmul.f32 %v5061_v36, %v11818_v37  ;;  %v5081_v46 = vmul.f32 %v5061_v36, %v11819_v10  ;;  %v11822_v43 = vld [vmem:[#allocation39_spill] sm:$0xff]  ;;  %v11824_v32 = vld [vmem:[#allocation44_spill] sm:$0xff]  ;;  %v11847_v4 = vld [vmem:[#allocation41_spill] sm:$0xff] }
 0x691   :  { %6236 = vmatprep.mubr.msk.bf16.mxu1 %vm3760_vm2, %v5166_v38  ;;  %v4905_v35 = vadd.f32 %v4889_v55, %v4841_v50  ;;  %v4185_v30 = vrot.slane %v4154_v48, %v11370_v9  ;;  %v4233_v6 = vrot.slane %v4154_v48, %v11371_v28  ;;  %v4297_v58 = vrot.slane %v4154_v48, %v11372_v39  ;;  %v11829_v37 = vld [vmem:[#allocation200_spill] sm:$0xff] }
 0x692   :  { %v4968_v42 = vadd.f32 %v4952_v51, %v4904_v15  ;;  %v5125_v27 = vrot.slane %v9942_v29, %v7881_v41  ;;  %v4361_v13 = vrot.slane %v4154_v48, %v11373_v60  ;;  %v4155_v0 = vunpack.c.h.bf16 %v4140_v1  ;;  %v11827_v1 = vld [vmem:[#allocation199_spill] sm:$0xff] }
 0x693   :  { %v4969_v24 = vadd.f32 %v4953_v45, %v4905_v35  ;;  %v4202_v3 = vmul.f32 %v4185_v30, %v11820_v26  ;;  %v4203_v38 = vmul.f32 %v4185_v30, %v11821_v31  ;;  %v4250_v19 = vmul.f32 %v4233_v6, %v11822_v43  ;;  %v11834_v31 = vld [vmem:[#allocation228_spill] sm:$0xff] }
 0x694   :  { %v10126_v53 = vunpack.c.l.bf16 %v4141_v23  ;;  %v5032_v56 = vadd.f32 %v5016_v8, %v4968_v42  ;;  %v4251_v40 = vmul.f32 %v4233_v6, %v11823_v52  ;;  %v4314_v63 = vmul.f32 %v4297_v58, %v11824_v32  ;;  %v11828_v8 = vld [vmem:[#allocation247_spill] sm:$0xff]  ;;  %v11836_v52 = vld [vmem:[#allocation233_spill] sm:$0xff] }
 0x695   :  { %v5033_v16 = vadd.f32 %v5017_v21, %v4969_v24  ;;  %v4266_v36 = vadd.f32 %v4250_v19, %v4202_v3  ;;  %v4425_v29 = vrot.slane %v4154_v48, %v7863_v14  ;;  %v5144_v55 = vmul.f32 %v5125_v27, %v11825_v47  ;;  %v11832_v24 = vld [vmem:[#allocation221_spill] sm:$0xff]  ;;  %v11835_v19 = vld [vmem:[#allocation91_spill] sm:$0xff] }
 0x696   :  { %v5096_v44 = vadd.f32 %v5080_v5, %v5032_v56  ;;  %v4267_v50 = vadd.f32 %v4251_v40, %v4203_v38  ;;  %v4315_v51 = vmul.f32 %v4297_v58, %v11826_v11  ;;  %v4378_v15 = vmul.f32 %v4361_v13, %v11827_v1  ;;  %v11830_v58 = vld [vmem:[#allocation213_spill] sm:$0xff] }
 0x697   :  { %v5097_v17 = vadd.f32 %v5081_v46, %v5033_v16  ;;  %v4330_v45 = vadd.f32 %v4314_v63, %v4266_v36  ;;  %v4489_v2 = vrot.slane %v4154_v48, %v7870_v49  ;;  %v5145_v59 = vmul.f32 %v5125_v27, %v11828_v8  ;;  %v11831_v46 = vld [vmem:[#allocation62_spill] sm:$0xff]  ;;  %v11837_v63 = vld [vmem:[#allocation109_spill] sm:$0xff] }
 0x698   :  { %6237 = vmatmul.mubr.msk.bf16.vlgmr.msra.gmra.mrb[16].mxu1 %vm3760_vm2, %v5167_v7  ;;  %v4331_v21 = vadd.f32 %v4315_v51, %v4267_v50  ;;  %v4379_v5 = vmul.f32 %v4361_v13, %v11829_v37  ;;  %v4553_v35 = vrot.slane %v4154_v48, %v7876_v57  ;;  %v10142_v30 = vunpack.c.h.bf16 %v4141_v23  ;;  %v11839_v11 = vld [vmem:[#allocation129_spill] sm:$0xff]  ;;  %v11842_v37 = vld [vmem:[#allocation283_spill] sm:$0xff] }
 0x699   :  { %6240 = vmatprep.mubr.msk.bf16.mxu1 %vm3760_vm2, %v5168_v22  ;;  %v4394_v6 = vadd.f32 %v4378_v15, %v4330_v45  ;;  %v4442_v42 = vmul.f32 %v4425_v29, %v11830_v58  ;;  %v4617_v54 = vrot.slane %v4154_v48, %v7881_v41  ;;  %v5160_v62 = vadd.f32 %v5144_v55, %v5096_v44  ;;  %v11838_v55 = vld [vmem:[#allocation241_spill] sm:$0xff] }
 0x69a   :  { %v5161_v7 = vadd.f32 %v5145_v59, %v5097_v17  ;;  %v4395_v10 = vadd.f32 %v4379_v5, %v4331_v21  ;;  %v4443_v27 = vmul.f32 %v4425_v29, %v11831_v46  ;;  %v4506_v26 = vmul.f32 %v4489_v2, %v11832_v24  ;;  %v11840_v17 = vld [vmem:[#allocation254_spill] sm:$0xff]  ;;  %v11841_v15 = vld [vmem:[#allocation141_spill] sm:$0xff] }
 0x69b   :  { %v4458_v13 = vadd.f32 %v4442_v42, %v4394_v6  ;;  %v4681_v23 = vrot.slane %v4155_v0, %v11370_v9  ;;  %v4745_v3 = vrot.slane %v4155_v0, %v11371_v28  ;;  %v4507_v22 = vmul.f32 %v4489_v2, %v11833_v33  ;;  %v11844_v58 = vld [vmem:[#allocation253_spill] sm:$0xff] }
 0x69c   :  { %v4459_v18 = vadd.f32 %v4443_v27, %v4395_v10  ;;  %v4570_v38 = vmul.f32 %v4553_v35, %v11834_v31  ;;  %v4189_v48 = vrot.slane %v10126_v53, %v11370_v9  ;;  %v4571_v56 = vmul.f32 %v4553_v35, %v11835_v19  ;;  %v11846_v10 = vld [vmem:[#allocation163_spill] sm:$0xff]  ;;  %v11850_v33 = vld [vmem:[#allocation165_spill] sm:$0xff] }
 0x69d   :  { %v4522_v43 = vadd.f32 %v4506_v26, %v4458_v13  ;;  %v4634_v40 = vmul.f32 %v4617_v54, %v11836_v52  ;;  %v4809_v16 = vrot.slane %v4155_v0, %v11372_v39  ;;  %v5171_v36 = vpack.c.bf16 %v5161_v7, %v5160_v62  ;;  %v11848_v13 = vld [vmem:[#allocation248_spill] sm:$0xff]  ;;  %v11851_v31 = vld [vmem:[#allocation167_spill] sm:$0xff] }
 0x69e   :  { %v4523_v32 = vadd.f32 %v4507_v22, %v4459_v18  ;;  %v4635_v29 = vmul.f32 %v4617_v54, %v11837_v63  ;;  %v4873_v44 = vrot.slane %v4155_v0, %v11373_v60  ;;  %v4698_v50 = vmul.f32 %v4681_v23, %v11838_v55  ;;  %v11845_v54 = vld [vmem:[#allocation168_spill] sm:$0xff]  ;;  %v11855_v55 = vld [vmem:[#allocation250_spill] sm:$0xff] }
 0x69f   :  { %v4586_v47 = vadd.f32 %v4570_v38, %v4522_v43  ;;  %v4699_v51 = vmul.f32 %v4681_v23, %v11839_v11  ;;  %v4762_v45 = vmul.f32 %v4745_v3, %v11840_v17  ;;  %v4763_v2 = vmul.f32 %v4745_v3, %v11841_v15  ;;  %v11849_v3 = vld [vmem:[#allocation184_spill] sm:$0xff]  ;;  %v11852_v43 = vld [vmem:[#allocation201_spill] sm:$0xff] }
 0x6a0   :  { %6241 = vmatmul.mubr.msk.bf16.gmra.mrb[20].mxu1 %vm3760_vm2, %v5169_v34  ;;  %v4587_v1 = vadd.f32 %v4571_v56, %v4523_v32  ;;  %v4937_v8 = vrot.slane %v4155_v0, %v7863_v14  ;;  %v5001_v59 = vrot.slane %v4155_v0, %v7870_v49  ;;  %v4826_v5 = vmul.f32 %v4809_v16, %v11842_v37  ;;  %v11843_v34 = vld [vmem:[#allocation157_spill] sm:$0xff]  ;;  %v11858_v37 = vld [vmem:[#allocation272_spill] sm:$0xff] }
 0x6a1   :  { %6244 = vmatprep.mubr.msk.bf16.mxu1 %vm3760_vm2, %v5170_v61  ;;  %v4650_v21 = vadd.f32 %v4634_v40, %v4586_v47  ;;  %v5065_v35 = vrot.slane %v4155_v0, %v7876_v57  ;;  %v5129_v12 = vrot.slane %v4155_v0, %v7881_v41  ;;  %v4827_v6 = vmul.f32 %v4809_v16, %v11843_v34  ;;  %v11853_v56 = vld [vmem:[#allocation185_spill] sm:$0xff] }
 0x6a2   :  { %v4651_v25 = vadd.f32 %v4635_v29, %v4587_v1  ;;  %v4890_v42 = vmul.f32 %v4873_v44, %v11844_v58  ;;  %v4891_v62 = vmul.f32 %v4873_v44, %v11845_v54  ;;  %v4204_v46 = vmul.f32 %v4189_v48, %v11846_v10  ;;  %v11854_v29 = vld [vmem:[#allocation46_spill] sm:$0xff]  ;;  %v11856_v11 = vld [vmem:[#allocation53_spill] sm:$0xff]  ;;  %v11860_v54 = vld [vmem:[#allocation64_spill] sm:$0xff] }
 0x6a3   :  { %v4714_v7 = vadd.f32 %v4698_v50, %v4650_v21  ;;  %v4205_v20 = vmul.f32 %v4189_v48, %v11847_v4  ;;  %v4237_v61 = vrot.slane %v10126_v53, %v11371_v28  ;;  %v4954_v24 = vmul.f32 %v4937_v8, %v11848_v13  ;;  %v11862_v4 = vld [vmem:[#allocation224_spill] sm:$0xff] }
 0x6a4   :  { %v4715_v27 = vadd.f32 %v4699_v51, %v4651_v25  ;;  %v4301_v0 = vrot.slane %v10126_v53, %v11372_v39  ;;  %v4365_v26 = vrot.slane %v10126_v53, %v11373_v60  ;;  %v4955_v18 = vmul.f32 %v4937_v8, %v11849_v3  ;;  %v11859_v25 = vld [vmem:[#allocation217_spill] sm:$0xff]  ;;  %v11864_v3 = vld [vmem:[#allocation266_spill] sm:$0xff] }
 0x6a5   :  { %v4778_v23 = vadd.f32 %v4762_v45, %v4714_v7  ;;  %v4252_v22 = vmul.f32 %v4237_v61, %v11850_v33  ;;  %v4253_v38 = vmul.f32 %v4237_v61, %v11851_v31  ;;  %v5018_v19 = vmul.f32 %v5001_v59, %v11852_v43  ;;  %v11865_v33 = vld [vmem:[#allocation231_spill] sm:$0xff] }
 0x6a6   :  { %v4779_v48 = vadd.f32 %v4763_v2, %v4715_v27  ;;  %v4316_v52 = vmul.f32 %v4301_v0, %v11853_v56  ;;  %v4429_v40 = vrot.slane %v10126_v53, %v7863_v14  ;;  %v4317_v44 = vmul.f32 %v4301_v0, %v11854_v29  ;;  %v11857_v2 = vld [vmem:[#allocation142_spill] sm:$0xff]  ;;  %v11863_v0 = vld [vmem:[#allocation80_spill] sm:$0xff] }
 0x6a7   :  { %v4842_v16 = vadd.f32 %v4826_v5, %v4778_v23  ;;  %v4268_v32 = vadd.f32 %v4252_v22, %v4204_v46  ;;  %v4269_v63 = vadd.f32 %v4253_v38, %v4205_v20  ;;  %v5019_v50 = vmul.f32 %v5001_v59, %v11855_v55  ;;  %v11861_v46 = vld [vmem:[#allocation268_spill] sm:$0xff] }
 0x6a8   :  { %6245 = vmatmul.mubr.msk.bf16.gmra.mrb[24].mxu1 %vm3760_vm2, %v5171_v36  ;;  %v4843_v47 = vadd.f32 %v4827_v6, %v4779_v48  ;;  %v4380_v51 = vmul.f32 %v4365_v26, %v11856_v11  ;;  %v4493_v17 = vrot.slane %v10126_v53, %v7870_v49  ;;  %v4381_v8 = vmul.f32 %v4365_v26, %v11857_v2  ;;  %v11866_v48 = vld [vmem:[#allocation93_spill] sm:$0xff] }
 0x6a9   :  { %v4906_v45 = vadd.f32 %v4890_v42, %v4842_v16  ;;  %v4332_v1 = vadd.f32 %v4316_v52, %v4268_v32  ;;  %v4333_v15 = vadd.f32 %v4317_v44, %v4269_v63  ;;  %v5082_v5 = vmul.f32 %v5065_v35, %v11858_v37  ;;  %v11868_v52 = vld [vmem:[#allocation237_spill] sm:$0xff]  ;;  %v11869_v44 = vld [vmem:[#allocation111_spill] sm:$0xff] }
 0x6aa   :  { %v4907_v21 = vadd.f32 %v4891_v62, %v4843_v47  ;;  %v4444_v34 = vmul.f32 %v4429_v40, %v11859_v25  ;;  %v4557_v36 = vrot.slane %v10126_v53, %v7876_v57  ;;  %v4445_v7 = vmul.f32 %v4429_v40, %v11860_v54 }
 0x6ab   :  { %v4970_v6 = vadd.f32 %v4954_v24, %v4906_v45  ;;  %v4396_v59 = vadd.f32 %v4380_v51, %v4332_v1  ;;  %v4397_v58 = vadd.f32 %v4381_v8, %v4333_v15  ;;  %v5083_v42 = vmul.f32 %v5065_v35, %v11861_v46  ;;  %v11872_v15 = vld [vmem:[#allocation144_spill] sm:$0xff]  ;;  %v11876_v46 = vld [vmem:[#allocation171_spill] sm:$0xff] }
 0x6ac   :  { %v4971_v10 = vadd.f32 %v4955_v18, %v4907_v21  ;;  %v4508_v20 = vmul.f32 %v4493_v17, %v11862_v4  ;;  %v4621_v62 = vrot.slane %v10126_v53, %v7881_v41  ;;  %v4509_v26 = vmul.f32 %v4493_v17, %v11863_v0  ;;  %v11867_v53 = vld [vmem:[#allocation259_spill] sm:$0xff]  ;;  %v11871_v17 = vld [vmem:[#allocation244_spill] sm:$0xff]  ;;  %v11873_v21 = vld [vmem:[#allocation274_spill] sm:$0xff] }
 0x6ad   :  { %v5034_v61 = vadd.f32 %v5018_v19, %v4970_v6  ;;  %v4460_v27 = vadd.f32 %v4444_v34, %v4396_v59  ;;  %v4461_v13 = vadd.f32 %v4445_v7, %v4397_v58  ;;  %v5146_v24 = vmul.f32 %v5129_v12, %v11864_v3  ;;  %v11874_v6 = vld [vmem:[#allocation159_spill] sm:$0xff]  ;;  %v11877_v4 = vld [vmem:[#allocation269_spill] sm:$0xff] }
 0x6ae   :  { %v5035_v23 = vadd.f32 %v5019_v50, %v4971_v10  ;;  %v4572_v22 = vmul.f32 %v4557_v36, %v11865_v33  ;;  %v4685_v18 = vrot.slane %v10142_v30, %v11370_v9  ;;  %v4573_v43 = vmul.f32 %v4557_v36, %v11866_v48  ;;  %v11870_v9 = vld [vmem:[#allocation132_spill] sm:$0xff]  ;;  %v11883_v48 = vld [vmem:[#allocation257_spill] sm:$0xff] }
 0x6af   :  { %v5098_v31 = vadd.f32 %v5082_v5, %v5034_v61  ;;  %v4524_v35 = vadd.f32 %v4508_v20, %v4460_v27  ;;  %v4525_v38 = vadd.f32 %v4509_v26, %v4461_v13  ;;  %v5147_v19 = vmul.f32 %v5129_v12, %v11867_v53  ;;  %v11878_v20 = vld [vmem:[#allocation249_spill] sm:$0xff]  ;;  %v11880_v26 = vld [vmem:[#allocation276_spill] sm:$0xff] }
 0x6b0   :  { %v5099_v56 = vadd.f32 %v5083_v42, %v5035_v23  ;;  %v4636_v40 = vmul.f32 %v4621_v62, %v11868_v52  ;;  %v4749_v16 = vrot.slane %v10142_v30, %v11371_v28  ;;  %v4637_v47 = vmul.f32 %v4621_v62, %v11869_v44 }
 0x6b1   :  { %v5162_v32 = vadd.f32 %v5146_v24, %v5098_v31  ;;  %v4588_v63 = vadd.f32 %v4572_v22, %v4524_v35  ;;  %v4589_v29 = vadd.f32 %v4573_v43, %v4525_v38  ;;  %v4700_v50 = vmul.f32 %v4685_v18, %v11870_v9  ;;  %v11882_v35 = vld [vmem:[#allocation271_spill] sm:$0xff] }
 0x6b2   :  { %v5163_v55 = vadd.f32 %v5147_v19, %v5099_v56  ;;  %v4701_v45 = vmul.f32 %v4685_v18, %v11871_v17  ;;  %v4813_v12 = vrot.slane %v10142_v30, %v11372_v39  ;;  %v4764_v2 = vmul.f32 %v4749_v16, %v11872_v15  ;;  %v11875_v39 = vld [vmem:[#allocation255_spill] sm:$0xff]  ;;  %v11884_v19 = vld [vmem:[#allocation277_spill] sm:$0xff] }
 0x6b3   :  { %v4652_v11 = vadd.f32 %v4636_v40, %v4588_v63  ;;  %v4653_v51 = vadd.f32 %v4637_v47, %v4589_v29  ;;  %v4765_v37 = vmul.f32 %v4749_v16, %v11873_v21  ;;  %v4877_v5 = vrot.slane %v10142_v30, %v11373_v60 }
 0x6b4   :  { %v5172_v1 = vpack.c.bf16 %v5163_v55, %v5162_v32  ;;  %v4941_v25 = vrot.slane %v10142_v30, %v7863_v14  ;;  %v4828_v59 = vmul.f32 %v4813_v12, %v11874_v6  ;;  %v4829_v58 = vmul.f32 %v4813_v12, %v11875_v39  ;;  %v11879_v14 = vld [vmem:[#allocation251_spill] sm:$0xff] }
 0x6b5   :  { %v4716_v8 = vadd.f32 %v4700_v50, %v4652_v11  ;;  %v4717_v28 = vadd.f32 %v4701_v45, %v4653_v51  ;;  %v5005_v54 = vrot.slane %v10142_v30, %v7870_v49  ;;  %v4892_v42 = vmul.f32 %v4877_v5, %v11876_v46  ;;  %v11881_v49 = vld [vmem:[#allocation203_spill] sm:$0xff] }
 0x6b6   :  { %6248 = vmatprep.mubr.msk.bf16.mxu1 %vm3760_vm2, %v5172_v1  ;;  %v4893_v60 = vmul.f32 %v4877_v5, %v11877_v4  ;;  %v4956_v62 = vmul.f32 %v4941_v25, %v11878_v20  ;;  %v4957_v13 = vmul.f32 %v4941_v25, %v11879_v14  ;;  %v5069_v0 = vrot.slane %v10142_v30, %v7876_v57  ;;  %v11885_v57 = vld [vmem:[#allocation260_spill] sm:$0xff] }
 0x6b7   :  { %v4780_v34 = vadd.f32 %v4764_v2, %v4716_v8  ;;  %v4781_v36 = vadd.f32 %v4765_v37, %v4717_v28  ;;  %v5020_v23 = vmul.f32 %v5005_v54, %v11880_v26  ;;  %v5021_v33 = vmul.f32 %v5005_v54, %v11881_v49 }
 0x6b8   :  { %v5133_v22 = vrot.slane %v10142_v30, %v7881_v41  ;;  %v5084_v38 = vmul.f32 %v5069_v0, %v11882_v35  ;;  %v5085_v43 = vmul.f32 %v5069_v0, %v11883_v48  ;;  %v10259_v41 = vld [vmem:[%s10413_s11] ss:$0 sm:$0xff] }
 0x6b9   :  { %v4844_v7 = vadd.f32 %v4828_v59, %v4780_v34  ;;  %v4845_v10 = vadd.f32 %v4829_v58, %v4781_v36 }
 0x6ba   :  { %v5148_v52 = vmul.f32 %v5133_v22, %v11884_v19  ;;  %v5149_v40 = vmul.f32 %v5133_v22, %v11885_v57 }
 0x6bb   :  { %v4908_v61 = vadd.f32 %v4892_v42, %v4844_v7  ;;  %v4909_v27 = vadd.f32 %v4893_v60, %v4845_v10 }
 0x6bd   :  { %v4972_v3 = vadd.f32 %v4956_v62, %v4908_v61  ;;  %v4973_v24 = vadd.f32 %v4957_v13, %v4909_v27 }
 0x6bf   :  { %v5036_v18 = vadd.f32 %v5020_v23, %v4972_v3  ;;  %v5037_v31 = vadd.f32 %v5021_v33, %v4973_v24 }
 0x6c1   :  { %v5100_v56 = vadd.f32 %v5084_v38, %v5036_v18  ;;  %v5101_v53 = vadd.f32 %v5085_v43, %v5037_v31  ;;  %v10276_v38 = vld [vmem:[%s10414_s12] ss:$0 sm:$0xff] }
 0x6c3   :  { %v5164_v16 = vadd.f32 %v5148_v52, %v5100_v56  ;;  %v5165_v32 = vadd.f32 %v5149_v40, %v5101_v53 }
 0x6c5   :  { %v5173_v63 = vpack.c.bf16 %v5165_v32, %v5164_v16 }
 0x6c7   :  { %6249 = vmatmul.mubr.msk.bf16.gmra.mrb[28].mxu1 %vm3760_vm2, %v5173_v63 }
 0x76b   :  { %v6238_v30 = vpop.f32.mrb[16].mxu1 }
 0x76c   :  { %v5457_v29 = vadd.f32 %v6238_v30, %v10259_v41  ;;  %v5385_v44 = vpop.f32.mrb[17].mxu1 }
 0x76d   :  { %v5455_v47 = vadd.f32 %v10259_v41, %v5385_v44  ;;  %v6239_v55 = vpop.f32.mrb[18].mxu1 }
 0x76e   :  { %v6028_v9 = vmul.f32 -1.442695, %v5457_v29  ;;  %v5458_v50 = vadd.f32 %v6239_v55, %v10259_v41  ;;  %v5388_v11 = vpop.f32.mrb[19].mxu1 }
 0x76f   :  { %v6026_v51 = vmul.f32 -1.442695, %v5455_v47  ;;  %v5456_v17 = vadd.f32 %v10259_v41, %v5388_v11 }
 0x770   :  { %6642 = vpow2.f32 %v6028_v9  ;;  %v6029_v45 = vmul.f32 -1.442695, %v5458_v50 }
 0x771   :  { %6644 = vpow2.f32 %v6026_v51  ;;  %v6027_v12 = vmul.f32 -1.442695, %v5456_v17 }
 0x772   :  { %6646 = vpow2.f32 %v6029_v45 }
 0x773   :  { %6648 = vpow2.f32 %v6027_v12  ;;  %v6242_v1 = vpop.f32.mrb[20].mxu1 }
 0x774   :  { %v5461_v15 = vadd.f32 %v6242_v1, %v10259_v41  ;;  %v5401_v2 = vpop.f32.mrb[21].mxu1 }
 0x775   :  { %v5459_v8 = vadd.f32 %v10259_v41, %v5401_v2  ;;  %v6243_v28 = vpop.f32.mrb[22].mxu1 }
 0x776   :  { %v6032_v21 = vmul.f32 -1.442695, %v5461_v15  ;;  %v5462_v37 = vadd.f32 %v6243_v28, %v10259_v41  ;;  %v5404_v5 = vpop.f32.mrb[23].mxu1 }
 0x777   :  { %v6030_v25 = vmul.f32 -1.442695, %v5459_v8  ;;  %v5460_v34 = vadd.f32 %v10259_v41, %v5404_v5 }
 0x778   :  { %6650 = vpow2.f32 %v6032_v21  ;;  %v6033_v36 = vmul.f32 -1.442695, %v5462_v37 }
 0x779   :  { %6652 = vpow2.f32 %v6030_v25  ;;  %v6031_v6 = vmul.f32 -1.442695, %v5460_v34 }
 0x77a   :  { %v6643_v59 = vpop.eup %6642  ;;  %6654 = vpow2.f32 %v6033_v36 }
 0x77b   :  { %v6645_v39 = vpop.eup %6644  ;;  %v5521_v58 = vadd.f32 1.0, %v6643_v59  ;;  %6656 = vpow2.f32 %v6031_v6  ;;  %v6246_v54 = vpop.f32.mrb[24].mxu1 }
 0x77c   :  { %v6647_v7 = vpop.eup %6646  ;;  %v5519_v10 = vadd.f32 1.0, %v6645_v39  ;;  %v5465_v46 = vadd.f32 %v6246_v54, %v10259_v41  ;;  %v5417_v42 = vpop.f32.mrb[25].mxu1 }
 0x77d   :  { %v6649_v4 = vpop.eup %6648  ;;  %6658 = vrcp.f32 %v5521_v58  ;;  %v5522_v60 = vadd.f32 1.0, %v6647_v7  ;;  %v5463_v20 = vadd.f32 %v10259_v41, %v5417_v42  ;;  %v6247_v62 = vpop.f32.mrb[26].mxu1 }
 0x77e   :  { %6660 = vrcp.f32 %v5519_v10  ;;  %v5520_v61 = vadd.f32 1.0, %v6649_v4  ;;  %v6036_v27 = vmul.f32 -1.442695, %v5465_v46  ;;  %v5466_v14 = vadd.f32 %v6247_v62, %v10259_v41  ;;  %v5420_v13 = vpop.f32.mrb[27].mxu1 }
 0x77f   :  { %6662 = vrcp.f32 %v5522_v60  ;;  %v6034_v0 = vmul.f32 -1.442695, %v5463_v20  ;;  %v5464_v26 = vadd.f32 %v10259_v41, %v5420_v13 }
 0x780   :  { %6664 = vrcp.f32 %v5520_v61  ;;  %v6037_v23 = vmul.f32 -1.442695, %v5466_v14 }
 0x781   :  { %6666 = vpow2.f32 %v6036_v27  ;;  %v6035_v3 = vmul.f32 -1.442695, %v5464_v26 }
 0x782   :  { %v6651_v24 = vpop.eup %6650  ;;  %6668 = vpow2.f32 %v6034_v0 }
 0x783   :  { %v6653_v49 = vpop.eup %6652  ;;  %v5525_v33 = vadd.f32 1.0, %v6651_v24  ;;  %6670 = vpow2.f32 %v6037_v23 }
 0x784   :  { %v6655_v22 = vpop.eup %6654  ;;  %v5523_v18 = vadd.f32 1.0, %v6653_v49  ;;  %6672 = vpow2.f32 %v6035_v3 }
 0x785   :  { %v6657_v31 = vpop.eup %6656  ;;  %6674 = vrcp.f32 %v5525_v33  ;;  %v5526_v35 = vadd.f32 1.0, %v6655_v22 }
 0x786   :  { %6676 = vrcp.f32 %v5523_v18  ;;  %v5524_v48 = vadd.f32 1.0, %v6657_v31 }
 0x787   :  { %v6659_v43 = vpop.eup %6658  ;;  %6678 = vrcp.f32 %v5526_v35 }
 0x788   :  { %v6661_v56 = vpop.eup %6660  ;;  %6680 = vrcp.f32 %v5524_v48  ;;  %v5576_v53 = vmul.f32 %v6659_v43, %v10276_v38 }
 0x789   :  { %v6663_v19 = vpop.eup %6662  ;;  %v5574_v52 = vmul.f32 %v6661_v56, %v10276_v38 }
 0x78a   :  { %v6665_v57 = vpop.eup %6664  ;;  %v5596_v40 = vsel %vm3760_vm2, %v5576_v53, 0.0  ;;  %v5577_v30 = vmul.f32 %v6663_v19, %v10276_v38 }
 0x78b   :  { %v6667_v16 = vpop.eup %6666  ;;  %5597 = vadd.xlane.f32.xlu0 %v5596_v40  ;;  %v5590_v32 = vsel %vm3760_vm2, %v5574_v52, 0.0  ;;  %v5575_v63 = vmul.f32 %v6665_v57, %v10276_v38 }
 0x78c   :  { %v6669_v29 = vpop.eup %6668  ;;  %v5529_v44 = vadd.f32 1.0, %v6667_v16  ;;  %5591 = vadd.xlane.f32.xlu1 %v5590_v32  ;;  %v5599_v45 = vsel %vm3760_vm2, %v5577_v30, 0.0 }
 0x78d   :  { %v6671_v47 = vpop.eup %6670  ;;  %v5527_v55 = vadd.f32 1.0, %v6669_v29  ;;  %v5593_v9 = vsel %vm3760_vm2, %v5575_v63, 0.0 }
 0x78e   :  { %v6673_v50 = vpop.eup %6672  ;;  %6682 = vrcp.f32 %v5529_v44  ;;  %v5530_v11 = vadd.f32 1.0, %v6671_v47 }
 0x78f   :  { %v6675_v51 = vpop.eup %6674  ;;  %6684 = vrcp.f32 %v5527_v55  ;;  %v5528_v17 = vadd.f32 1.0, %v6673_v50  ;;  %5594 = vadd.xlane.f32.xlu0 %v5593_v9 }
 0x790   :  { %v6677_v12 = vpop.eup %6676  ;;  %6686 = vrcp.f32 %v5530_v11  ;;  %5600 = vadd.xlane.f32.xlu1 %v5599_v45  ;;  %v5580_v1 = vmul.f32 %v6675_v51, %v10276_v38 }
 0x791   :  { %v6679_v15 = vpop.eup %6678  ;;  %6688 = vrcp.f32 %v5528_v17  ;;  %v5578_v21 = vmul.f32 %v6677_v12, %v10276_v38  ;;  %v10317_v12 = vstv %s10415_s13  ;;  %s6897_s13 = smov [#allocation9]  }
 0x792   :  { %v6681_v2 = vpop.eup %6680  ;;  %v5608_v8 = vsel %vm3760_vm2, %v5580_v1, 0.0  ;;  %v5581_v28 = vmul.f32 %v6679_v15, %v10276_v38  ;;  %s5913_s1 = sshll.u32 %s6897_s13, 4  ;;  %s5914_s1 = int_to_ptr.vmem [resolvable:$true] %s5913_s1 }
 0x793   :  { %5609 = vadd.xlane.f32.xlu0 %v5608_v8  ;;  %v5579_v5 = vmul.f32 %v6681_v2, %v10276_v38  ;;  %v5602_v25 = vsel %vm3760_vm2, %v5578_v21, 0.0  ;;  %s6825_s7 = scalar_lea.vmem %s5914_s1, 128  ;;  %p6830_p3 = scmp.lt.s32.totalorder %s5914_s1, %s5914_s1 }
 0x794   :  { %v5611_v37 = vsel %vm3760_vm2, %v5581_v28, 0.0  ;;  %p6826_p2 = scmp.ne.s32.totalorder %s5914_s1, %s6825_s7  ;;  %p6831_p4 = scmp.lt.s32.totalorder %s6825_s7, %s6825_s7 }
 0x795   :  { %5612 = vadd.xlane.f32.xlu1 %v5611_v37  ;;  %v5605_v36 = vsel %vm3760_vm2, %v5579_v5, 0.0 }
 0x796   :  { %p6832_p5 = por %p6831_p4, %p6830_p3 }
 0x797   :  { %5603 = vadd.xlane.f32.xlu0 %v5602_v25 }
 0x798   :  { %v6683_v34 = vpop.eup %6682  ;;  %p6833_p6 = pnand %p6832_p5, %p6826_p2 }
 0x799   :  { %v6685_v6 = vpop.eup %6684  ;;  %5606 = vadd.xlane.f32.xlu1 %v5605_v36  ;;  %v5584_v59 = vmul.f32 %v6683_v34, %v10276_v38 }
 0x79a   :  { %v6687_v39 = vpop.eup %6686  ;;  %v6250_v58 = vpop.f32.mrb[28].mxu1  ;;  %v5582_v4 = vmul.f32 %v6685_v6, %v10276_v38 }
 0x79b   :  { %v6689_v54 = vpop.eup %6688  ;;  %v5469_v7 = vadd.f32 %v6250_v58, %v10259_v41  ;;  %v5433_v10 = vpop.f32.mrb[29].mxu1  ;;  %v5620_v46 = vsel %vm3760_vm2, %v5584_v59, 0.0  ;;  %v5585_v42 = vmul.f32 %v6687_v39, %v10276_v38 }
 0x79c   :  { %v5467_v60 = vadd.f32 %v10259_v41, %v5433_v10  ;;  %v6251_v20 = vpop.f32.mrb[30].mxu1  ;;  %5621 = vadd.xlane.f32.xlu0 %v5620_v46  ;;  %v5583_v13 = vmul.f32 %v6689_v54, %v10276_v38  ;;  %v5614_v3 = vsel %vm3760_vm2, %v5582_v4, 0.0 }
 0x79d   :  { %v6040_v62 = vmul.f32 -1.442695, %v5469_v7  ;;  %v5470_v61 = vadd.f32 %v6251_v20, %v10259_v41  ;;  %v5436_v27 = vpop.f32.mrb[31].mxu1  ;;  %v5623_v14 = vsel %vm3760_vm2, %v5585_v42, 0.0 }
 0x79e   :  { %v6038_v0 = vmul.f32 -1.442695, %v5467_v60  ;;  %v5468_v26 = vadd.f32 %v10259_v41, %v5436_v27  ;;  %5624 = vadd.xlane.f32.xlu1 %v5623_v14  ;;  %v5617_v49 = vsel %vm3760_vm2, %v5583_v13, 0.0 }
 0x79f   :  { %6690 = vpow2.f32 %v6040_v62  ;;  %v6041_v23 = vmul.f32 -1.442695, %v5470_v61 }
 0x7a0   :  { %6692 = vpow2.f32 %v6038_v0  ;;  %v6039_v24 = vmul.f32 -1.442695, %v5468_v26  ;;  %5615 = vadd.xlane.f32.xlu0 %v5614_v3 }
 0x7a1   :  { %6694 = vpow2.f32 %v6041_v23 }
 0x7a2   :  { %6696 = vpow2.f32 %v6039_v24  ;;  %5618 = vadd.xlane.f32.xlu1 %v5617_v49 }
 0x7a9   :  { %v6691_v33 = vpop.eup %6690 }
 0x7aa   :  { %v6693_v22 = vpop.eup %6692  ;;  %v5533_v18 = vadd.f32 1.0, %v6691_v33 }
 0x7ab   :  { %v6695_v31 = vpop.eup %6694  ;;  %v5531_v35 = vadd.f32 1.0, %v6693_v22 }
 0x7ac   :  { %v6697_v48 = vpop.eup %6696  ;;  %6698 = vrcp.f32 %v5533_v18  ;;  %v5534_v41 = vadd.f32 1.0, %v6695_v31 }
 0x7ad   :  { %6700 = vrcp.f32 %v5531_v35  ;;  %v5532_v43 = vadd.f32 1.0, %v6697_v48 }
 0x7ae   :  { %6702 = vrcp.f32 %v5534_v41 }
 0x7af   :  { %6704 = vrcp.f32 %v5532_v43 }
 0x7b6   :  { %v6699_v56 = vpop.eup %6698 }
 0x7b7   :  { %v6701_v53 = vpop.eup %6700  ;;  %v5588_v32 = vmul.f32 %v6699_v56, %v10276_v38 }
 0x7b8   :  { %v6703_v19 = vpop.eup %6702  ;;  %v5586_v52 = vmul.f32 %v6701_v53, %v10276_v38 }
 0x7b9   :  { %v6705_v57 = vpop.eup %6704  ;;  %v5589_v30 = vmul.f32 %v6703_v19, %v10276_v38  ;;  %v5632_v29 = vsel %vm3760_vm2, %v5588_v32, 0.0 }
 0x7ba   :  { %v5626_v40 = vsel %vm3760_vm2, %v5586_v52, 0.0  ;;  %v5587_v16 = vmul.f32 %v6705_v57, %v10276_v38 }
 0x7bb   :  { %5627 = vadd.xlane.f32.xlu0 %v5626_v40  ;;  %v5635_v44 = vsel %vm3760_vm2, %v5589_v30, 0.0 }
 0x7bc   :  { %v5629_v63 = vsel %vm3760_vm2, %v5587_v16, 0.0 }
 0x7bd   :  { %5630 = vadd.xlane.f32.xlu1 %v5629_v63 }
 0x7bf   :  { %5633 = vadd.xlane.f32.xlu0 %v5632_v29 }
 0x7c1   :  { %5636 = vadd.xlane.f32.xlu1 %v5635_v44 }
 0x818   :  { %v5598_v47 = vpop.xlane.xlu0 %5597 }
 0x819   :  { %v5592_v55 = vpop.xlane.xlu1 %5591  ;;  %v5642_v38 = vadd.f32 %v10317_v12, %v5598_v47 }
 0x81a   :  { %v5640_v15 = vadd.f32 %v10317_v12, %v5592_v55 }
 0x81b   :  { %v6045_v28 = vmul.f32 -1.442695, %v5642_v38 }
 0x81c   :  { %v5595_v9 = vpop.xlane.xlu0 %5594  ;;  %v6043_v5 = vmul.f32 -1.442695, %v5640_v15 }
 0x81d   :  { %v5601_v50 = vpop.xlane.xlu1 %5600  ;;  %v5641_v8 = vadd.f32 %v10317_v12, %v5595_v9  ;;  %6706 = vpow2.f32 %v6045_v28 }
 0x81e   :  { %v5643_v21 = vadd.f32 %v10317_v12, %v5601_v50  ;;  %6708 = vpow2.f32 %v6043_v5 }
 0x81f   :  { %v6044_v36 = vmul.f32 -1.442695, %v5641_v8 }
 0x820   :  { %v5610_v11 = vpop.xlane.xlu0 %5609  ;;  %v6046_v6 = vmul.f32 -1.442695, %v5643_v21 }
 0x821   :  { %6710 = vpow2.f32 %v6044_v36  ;;  %v5646_v4 = vadd.f32 %v10317_v12, %v5610_v11 }
 0x822   :  { %v5613_v51 = vpop.xlane.xlu1 %5612  ;;  %6712 = vpow2.f32 %v6046_v6 }
 0x823   :  { %v5647_v37 = vadd.f32 %v10317_v12, %v5613_v51  ;;  %v6049_v61 = vmul.f32 -1.442695, %v5646_v4 }
 0x824   :  { %v5604_v17 = vpop.xlane.xlu0 %5603 }
 0x825   :  { %v5644_v59 = vadd.f32 %v10317_v12, %v5604_v17  ;;  %v6050_v58 = vmul.f32 -1.442695, %v5647_v37  ;;  %v11886_v37 = vlaneseq }
 0x826   :  { %v5607_v45 = vpop.xlane.xlu1 %5606 }
 0x827   :  { %v5645_v25 = vadd.f32 %v10317_v12, %v5607_v45  ;;  %v6047_v46 = vmul.f32 -1.442695, %v5644_v59  ;;  %6714 = vpow2.f32 %v6050_v58  ;;  %v6707_v62 = vpop.eup %6706  ;;  %v5802_v5 = vand.u32 127, %v11886_v37 }
 0x828   :  { %v6709_v14 = vpop.eup %6708  ;;  %v5706_v26 = vadd.f32 1.0, %v6707_v62 }
 0x829   :  { %v5622_v1 = vpop.xlane.xlu0 %5621  ;;  %v6048_v7 = vmul.f32 -1.442695, %v5645_v25  ;;  %v5704_v49 = vadd.f32 1.0, %v6709_v14 }
 0x82a   :  { %v5650_v27 = vadd.f32 %v10317_v12, %v5622_v1 }
 0x82b   :  { %v5625_v2 = vpop.xlane.xlu1 %5624  ;;  %6716 = vpow2.f32 %v6048_v7  ;;  %v6711_v0 = vpop.eup %6710 }
 0x82c   :  { %6718 = vpow2.f32 %v6047_v46  ;;  %v5651_v20 = vadd.f32 %v10317_v12, %v5625_v2  ;;  %v6713_v23 = vpop.eup %6712  ;;  %v6053_v3 = vmul.f32 -1.442695, %v5650_v27  ;;  %v5705_v22 = vadd.f32 1.0, %v6711_v0 }
 0x82d   :  { %v5616_v34 = vpop.xlane.xlu0 %5615  ;;  %v5707_v18 = vadd.f32 1.0, %v6713_v23 }
 0x82e   :  { %v5648_v54 = vadd.f32 %v10317_v12, %v5616_v34  ;;  %v6054_v13 = vmul.f32 -1.442695, %v5651_v20  ;;  %v5807_v34 = vadd.s32 4294967288, %v5802_v5 }
 0x82f   :  { %v5619_v39 = vpop.xlane.xlu1 %5618 }
 0x830   :  { %v5649_v10 = vadd.f32 %v10317_v12, %v5619_v39  ;;  %v6051_v42 = vmul.f32 -1.442695, %v5648_v54 }
 0x831   :  { %v6715_v24 = vpop.eup %6714 }
 0x832   :  { %v6052_v60 = vmul.f32 -1.442695, %v5649_v10  ;;  %6720 = vpow2.f32 %v6051_v42  ;;  %v5711_v35 = vadd.f32 1.0, %v6715_v24 }
 0x834   :  { %6722 = vpow2.f32 %v6052_v60  ;;  %v11887_v60 = vld [vmem:[#allocation186_spill] sm:$0xff] }
 0x835   :  { %6724 = vpow2.f32 %v6049_v61  ;;  %v6717_v33 = vpop.eup %6716  ;;  %v10337_v20 = vsub.s32 %v5807_v34, %v11887_v60  ;;  %v10340_v23 = vsub.s32 %v5802_v5, %v11887_v60 }
 0x836   :  { %6726 = vpow2.f32 %v6054_v13  ;;  %v6719_v31 = vpop.eup %6718  ;;  %v5709_v41 = vadd.f32 1.0, %v6717_v33 }
 0x837   :  { %6728 = vrcp.f32 %v5706_v26  ;;  %v5708_v19 = vadd.f32 1.0, %v6719_v31 }
 0x838   :  { %6730 = vpow2.f32 %v6053_v3 }
 0x839   :  { %6732 = vrcp.f32 %v5704_v49 }
 0x83a   :  { %6734 = vrcp.f32 %v5705_v22 }
 0x83b   :  { %6736 = vrcp.f32 %v5707_v18 }
 0x83c   :  { %v6721_v48 = vpop.eup %6720  ;;  %6738 = vrcp.f32 %v5711_v35 }
 0x83d   :  { %v5712_v57 = vadd.f32 1.0, %v6721_v48  ;;  %6740 = vrcp.f32 %v5709_v41 }
 0x83e   :  { %v6723_v53 = vpop.eup %6722 }
 0x83f   :  { %v6725_v63 = vpop.eup %6724  ;;  %v5713_v30 = vadd.f32 1.0, %v6723_v53 }
 0x840   :  { %v6727_v55 = vpop.eup %6726  ;;  %v5710_v11 = vadd.f32 1.0, %v6725_v63 }
 0x841   :  { %v6729_v50 = vpop.eup %6728  ;;  %v5715_v1 = vadd.f32 1.0, %v6727_v55 }
 0x842   :  { %v6731_v17 = vpop.eup %6730  ;;  %v5754_v46 = vmul.f32 0.8, %v6729_v50 }
 0x843   :  { %v6733_v38 = vpop.eup %6732  ;;  %v5714_v8 = vadd.f32 1.0, %v6731_v17 }
 0x844   :  { %v6735_v15 = vpop.eup %6734  ;;  %v5752_v39 = vmul.f32 0.8, %v6733_v38  ;;  %v5770_v33 = vadd.f32 0.1, %v5754_v46 }
 0x845   :  { %v6737_v2 = vpop.eup %6736  ;;  %v5753_v36 = vmul.f32 0.8, %v6735_v15 }
 0x846   :  { %v6739_v28 = vpop.eup %6738  ;;  %v5755_v58 = vmul.f32 0.8, %v6737_v2  ;;  %v5768_v14 = vadd.f32 0.1, %v5752_v39 }
 0x847   :  { %v6741_v21 = vpop.eup %6740  ;;  %v5769_v62 = vadd.f32 0.1, %v5753_v36  ;;  %v5759_v22 = vmul.f32 0.8, %v6739_v28 }
 0x848   :  { %v5628_v43 = vpop.xlane.xlu0 %5627  ;;  %v5757_v7 = vmul.f32 0.8, %v6741_v21  ;;  %v5771_v13 = vadd.f32 0.1, %v5755_v58  ;;  %v5806_v53 = vrot.slane %v5768_v14, %v10340_v23 }
 0x849   :  { %v5652_v56 = vadd.f32 %v10317_v12, %v5628_v43  ;;  %v5811_v31 = vrot.slane %v5769_v62, %v10337_v20 }
 0x84a   :  { %v5631_v52 = vpop.xlane.xlu1 %5630  ;;  %v5773_v3 = vadd.f32 0.1, %v5757_v7  ;;  %v5821_v41 = vrot.slane %v5771_v13, %v10337_v20 }
 0x84b   :  { %v6055_v40 = vmul.f32 -1.442695, %v5652_v56  ;;  %v5653_v16 = vadd.f32 %v10317_v12, %v5631_v52  ;;  %v5813_v63 = vsel %vm5812_vm3, %v5811_v31, %v5806_v53 }
 0x84c   :  { %v5634_v32 = vpop.xlane.xlu0 %5633 }
 0x84d   :  { %6742 = vpow2.f32 %v6055_v40  ;;  %v6056_v29 = vmul.f32 -1.442695, %v5653_v16  ;;  %v5654_v44 = vadd.f32 %v10317_v12, %v5634_v32  ;;  %v5775_v40 = vadd.f32 0.1, %v5759_v22 }
 0x84e   :  { %6744 = vrcp.f32 %v5708_v19  ;;  %v5637_v47 = vpop.xlane.xlu1 %5636  ;;  %v5830_v19 = vrot.slane %v5773_v3, %v10337_v20 }
 0x84f   :  { %6746 = vrcp.f32 %v5712_v57  ;;  %v5655_v9 = vadd.f32 %v10317_v12, %v5637_v47  ;;  %v6057_v51 = vmul.f32 -1.442695, %v5654_v44  ;;  %v5817_v57 = vrot.slane %v5770_v33, %v10340_v23 }
 0x850   :  { %6748 = vpow2.f32 %v6056_v29  ;;  %v5839_v17 = vrot.slane %v5775_v40, %v10337_v20 }
 0x851   :  { %6750 = vrcp.f32 %v5713_v30  ;;  %v6058_v45 = vmul.f32 -1.442695, %v5655_v9  ;;  %v5822_v44 = vsel %vm5812_vm3, %v5821_v41, %v5817_v57 }
 0x852   :  { %6752 = vpow2.f32 %v6057_v51  ;;  %v5878_v38 = vsel %vm5877_vm4, %v5822_v44, %v5813_v63 }
 0x853   :  { %6754 = vpow2.f32 %v6058_v45 }
 0x854   :  { %6756 = vrcp.f32 %v5710_v11 }
 0x855   :  { %6758 = vrcp.f32 %v5715_v1 }
 0x856   :  { %6760 = vrcp.f32 %v5714_v8 }
 0x857   :  { %v6743_v12 = vpop.eup %6742 }
 0x858   :  { %v6745_v25 = vpop.eup %6744  ;;  %v5716_v6 = vadd.f32 1.0, %v6743_v12 }
 0x859   :  { %v6747_v59 = vpop.eup %6746  ;;  %v5756_v61 = vmul.f32 0.8, %v6745_v25 }
 0x85a   :  { %v6749_v54 = vpop.eup %6748  ;;  %6762 = vrcp.f32 %v5716_v6  ;;  %v5760_v48 = vmul.f32 0.8, %v6747_v59 }
 0x85b   :  { %v6751_v10 = vpop.eup %6750  ;;  %v5717_v42 = vadd.f32 1.0, %v6749_v54  ;;  %v5772_v35 = vadd.f32 0.1, %v5756_v61 }
 0x85c   :  { %v6753_v4 = vpop.eup %6752  ;;  %v5761_v24 = vmul.f32 0.8, %v6751_v10  ;;  %v5776_v29 = vadd.f32 0.1, %v5760_v48 }
 0x85d   :  { %v6755_v27 = vpop.eup %6754  ;;  %6764 = vrcp.f32 %v5717_v42  ;;  %v5718_v0 = vadd.f32 1.0, %v6753_v4  ;;  %v5826_v30 = vrot.slane %v5772_v35, %v10340_v23 }
 0x85e   :  { %v6757_v26 = vpop.eup %6756  ;;  %v5719_v49 = vadd.f32 1.0, %v6755_v27  ;;  %v5777_v52 = vadd.f32 0.1, %v5761_v24  ;;  %v5844_v1 = vrot.slane %v5776_v29, %v10340_v23  ;;  %v5784_v27 = vld [vmem:[%s10404_s2] sm:$0xff] }
 0x85f   :  { %6766 = vrcp.f32 %v5718_v0  ;;  %v6759_v18 = vpop.eup %6758  ;;  %v5758_v43 = vmul.f32 0.8, %v6757_v26  ;;  %v5831_v50 = vsel %vm5812_vm3, %v5830_v19, %v5826_v30 }
 0x860   :  { %6768 = vrcp.f32 %v5719_v49  ;;  %v6761_v56 = vpop.eup %6760  ;;  %v5763_v16 = vmul.f32 0.8, %v6759_v18  ;;  %v5848_v11 = vrot.slane %v5777_v52, %v10337_v20  ;;  %v5880_v21 = vsel %vm5879_vm5, %v5831_v50, %v5878_v38 }
 0x861   :  { %v5774_v47 = vadd.f32 0.1, %v5758_v43  ;;  %v5762_v55 = vmul.f32 0.8, %v6761_v56 }
 0x862   :  { %v5779_v45 = vadd.f32 0.1, %v5763_v16  ;;  %v5849_v12 = vsel %vm5812_vm3, %v5848_v11, %v5844_v1 }
 0x863   :  { %v5835_v28 = vrot.slane %v5774_v47, %v10340_v23  ;;  %v5778_v37 = vadd.f32 0.1, %v5762_v55 }
 0x864   :  { %v6763_v32 = vpop.eup %6762  ;;  %v5857_v6 = vrot.slane %v5779_v45, %v10337_v20 }
 0x865   :  { %v5764_v9 = vmul.f32 0.8, %v6763_v32  ;;  %v5840_v36 = vsel %vm5812_vm3, %v5839_v17, %v5835_v28  ;;  %v5853_v10 = vrot.slane %v5778_v37, %v10340_v23 }
 0x866   :  { %v5882_v7 = vsel %vm5881_vm6, %v5840_v36, %v5880_v21 }
 0x867   :  { %v6765_v51 = vpop.eup %6764  ;;  %v5780_v15 = vadd.f32 0.1, %v5764_v9  ;;  %v5884_v42 = vsel %vm5883_vm7, %v5849_v12, %v5882_v7  ;;  %v5858_v61 = vsel %vm5812_vm3, %v5857_v6, %v5853_v10 }
 0x868   :  { %v5765_v2 = vmul.f32 0.8, %v6765_v51  ;;  %v5886_v14 = vsel %vm5885_vm8, %v5858_v61, %v5884_v42 }
 0x869   :  { %v6767_v8 = vpop.eup %6766  ;;  %v5862_v39 = vrot.slane %v5780_v15, %v10340_v23 }
 0x86a   :  { %v6769_v5 = vpop.eup %6768  ;;  %v5781_v25 = vadd.f32 0.1, %v5765_v2  ;;  %v5766_v34 = vmul.f32 0.8, %v6767_v8 }
 0x86b   :  { %v5767_v59 = vmul.f32 0.8, %v6769_v5 }
 0x86c   :  { %v5866_v58 = vrot.slane %v5781_v25, %v10337_v20  ;;  %v5782_v54 = vadd.f32 0.1, %v5766_v34 }
 0x86d   :  { %v5783_v46 = vadd.f32 0.1, %v5767_v59 }
 0x86e   :  { %v5867_v4 = vsel %vm5812_vm3, %v5866_v58, %v5862_v39  ;;  %v5871_v60 = vrot.slane %v5782_v54, %v10340_v23 }
 0x86f   :  { %v5875_v62 = vrot.slane %v5783_v46, %v10337_v20  ;;  %v5888_v0 = vsel %vm5887_vm9, %v5867_v4, %v5886_v14  ;;  %v6899_v20 = vmov 0.0  }
 0x871   :  { %v5876_v13 = vsel %vm5812_vm3, %v5875_v62, %v5871_v60 }
 0x872   :  { %v5890_v26 = vsel %vm5889_vm10, %v5876_v13, %v5888_v0 }
 0x873   :  { %vm5892_vm11 = vcmp.lt.f32.partialorder %v5784_v27, %v5890_v26  ;;  %5895 = vst.msk [vmem:[#allocation9] sm:$0xff] %vm113_vm0, %v5890_v26 }
 0x874   :  { %v6059_v23 = vsel %vm5892_vm11, 1.0, %v6899_v20 }
 0x875   :  { %6836 = shalt.err (!%p6833_p6)
}
 0x876   :  { %s6837_s17 = scalar_lea.hbm %s10417_s15, 128 }
 0x877   :  { %p6838_p7 = scmp.ne.s32.totalorder %s10417_s15, %s6837_s17  ;;  %p6841_p8 = scmp.lt.u32.totalorder %s6837_s17, %s10417_s15 }
 0x879   :  { %p6843_p9 = pnand %p6841_p8, %p6838_p7 }
 0x87b   :  { %6846 = shalt.err (!%p6843_p9)
}
 0x87c   :  { %5916 = dma.vmem_to_hbm [thread:$0]  %s5914_s1, 128, %s10417_s15, [#allocation10]   ;;  %5896 = vst.msk [vmem:[#allocation8] sm:$0xff] %vm113_vm0, %v6059_v23 }
 0x87d   :  { %s6847_s22 = scalar_lea.vmem %s10369_s30, 128  ;;  %p6852_p11 = scmp.lt.s32.totalorder %s10369_s30, %s10369_s30 }
 0x87e   :  { %p6848_p10 = scmp.ne.s32.totalorder %s10369_s30, %s6847_s22  ;;  %p6853_p12 = scmp.lt.s32.totalorder %s6847_s22, %s6847_s22 }
 0x880   :  { %p6854_p13 = por %p6853_p12, %p6852_p11 }
 0x882   :  { %p6855_p0 = pnand %p6854_p13, %p6848_p10 }
 0x884   :  { %6858 = shalt.err (!%p6855_p0)
}
 0x885   :  { %s6859_s25 = scalar_lea.hbm %s10416_s14, 128 }
 0x886   :  { %p6860_p1 = scmp.ne.s32.totalorder %s10416_s14, %s6859_s25  ;;  %p6863_p2 = scmp.lt.u32.totalorder %s6859_s25, %s10416_s14 }
 0x888   :  { %p6865_p3 = pnand %p6863_p2, %p6860_p1 }
 0x88a   :  { %6868 = shalt.err (!%p6865_p3)
}
 0x88b   :  { %5906 = dma.vmem_to_hbm [thread:$0]  %s10369_s30, 128, %s10416_s14, [#allocation5]  }
 0x88c   :  { %6873 = dma.done.wait [#allocation5], 128  }
 0x88d   :  { %6874 = vsyncadd [#allocation5], 4294967168 }
 0x88e   :  { %6875 = dma.done.wait [#allocation10], 128  }
 0x88f   :  { %6876 = vsyncadd [#allocation10], 4294967168 }
 0x890   :  { %5923 = vsyncpa [#allocation4], 1 }
 0x891   :  { %5924 = vsyncpa [#allocation7], 1 }
 0x892   :  { %5925 = vsyncpa [#allocation5], 1 }
 0x893   :  { %5926 = vsyncpa [#allocation10], 1 }

</bundles_post_ra>
